<compile_context>
chip_gen: v5e
topology: v5e:2x2
jax: 0.10.0
libtpu: 0.0.40
codegen_flags: <defaults>
</compile_context>

<pallas_src>
import math

import jax
import jax.numpy as jnp
from jax.experimental import pallas as pl
from jax.experimental.pallas import tpu as pltpu

NUM_FEATURES = 1792          # efficientnet_b4 classifier.in_features
NUM_OUTPUTS = 5
CARB_IDX = 3
LN_EPS = 1e-5
BN_EPS = 1e-5

MAX_TB = 256                 # batch tile cap; sweep 256-512 on v6e, keep <=256 on v5e/v7x

PARAM_ORDER = ("ln_g", "ln_b",
               "w1", "b1", "w2", "b2",
               "w37", "b37",
               "w4", "b4", "w5", "b5", "w6p",
               "w8p", "b_out")


def _nutrition_head_kernel(x_ref, ln_g_ref, ln_b_ref,
                           w1, b1, w2, b2,
                           w37, b37,
                           w4, b4, w5, b5, w6p,
                           w8p, b_out,
                           out_ref):
    # Features arrive as bf16 (halves the per-row HBM read); LN math runs in f32.
    x = x_ref[...].astype(jnp.float32)

    # ---- nn.LayerNorm(num_features) ----
    mu = jnp.mean(x, axis=-1, keepdims=True)
    var = jnp.mean(jnp.square(x - mu), axis=-1, keepdims=True)
    h = ((x - mu) * jax.lax.rsqrt(var + LN_EPS) * ln_g_ref[...] + ln_b_ref[...])
    h = h.astype(jnp.bfloat16)            # single downcast; activations stay bf16

    def lin(a, w, b):
        # bf16 x bf16 MXU matmul with f32 accumulation; bias (folded BN) in f32.
        return jnp.dot(a, w[...], preferred_element_type=jnp.float32) + b[...]

    def lin_relu(a, w, b):
        # Linear (+folded BatchNorm1d eval) -> ReLU -> bf16  (Dropout = id in eval)
        return jnp.maximum(lin(a, w, b), 0.0).astype(jnp.bfloat16)

    # ---- shared_layers ----
    h = lin_relu(h, w1, b1)               # 1792 -> 1024
    h = lin_relu(h, w2, b2)               # 1024 -> 512

    # ---- fused first layers of both branches: 512 -> 768 (carb 512 | other 256) ----
    co = lin_relu(h, w37, b37)            # one MXU pass over h
    c = co[:, :512]                       # lane-aligned split (512 = 4*128)
    o = co[:, 512:]                       # (TB, 256)

    # ---- remaining carb_branch ----
    c = lin_relu(c, w4, b4)               # 512 -> 256
    c = lin_relu(c, w5, b5)               # 256 -> 128

    # ---- final heads, pre-padded to the 5-wide output layout (carb_idx = 3) ----
    out = (jnp.dot(o, w8p[...], preferred_element_type=jnp.float32)
           + jnp.dot(c, w6p[...], preferred_element_type=jnp.float32)
           + b_out[...])
    out_ref[...] = out


def init_params(key):
    """Deterministic init matching NutritionModel._initialize_weights (eval mode),
    with BatchNorm folded into the preceding Linear, w3/w7 fused, and weights bf16."""
    layer_dims = [
        (NUM_FEATURES, 1024, True),      # shared
        (1024, 512, True),               # shared
        (512, 512, True),                # carb (fused with 'other' first layer)
        (512, 256, True),                # carb
        (256, 128, True),                # carb
        (128, 1, False),                 # carb head
        (512, 256, True),                # other (fused with carb first layer)
        (256, NUM_OUTPUTS - 1, False),   # other head
    ]
    # BN eval with running_mean=0, running_var=1, weight=1, bias=0:
    #   scale = 1/sqrt(1+eps), shift = 0  -> folded: W' = W*scale, b' = b*scale.
    # NOTE: a trained checkpoint needs the general fold
    #   W' = W*gamma/sqrt(var+eps), b' = gamma*(b-mean)/sqrt(var+eps) + beta.
    bn_scale = 1.0 / math.sqrt(1.0 + BN_EPS)

    keys = jax.random.split(key, len(layer_dims))
    wts, bss = [], []
    for k, (fin, fout, has_bn) in zip(keys, layer_dims):
        # kaiming_normal_(mode='fan_out', nonlinearity='relu'): std = sqrt(2 / fan_out)
        std = math.sqrt(2.0 / fout)
        w = jax.random.normal(k, (fout, fin), jnp.float32) * std   # torch layout (out,in)
        wt = jnp.asarray(w.T)                                      # (in, out)
        b = jnp.zeros((fout,), jnp.float32)
        if has_bn:
            wt = wt * bn_scale
            b = b * bn_scale
        wts.append(wt)
        bss.append(b)

    # Fuse carb-branch layer 0 (512->512) with other-branch layer 0 (512->256).
    w37 = jnp.concatenate([wts[2], wts[6]], axis=1)    # (512, 768)
    b37 = jnp.concatenate([bss[2], bss[6]], axis=0)    # (768,)

    # Pad the two head weights into a shared 5-wide output space (carb_idx = 3),
    # so the kernel emits the final slab without any lane-dim concatenate.
    w6, b6 = wts[5], bss[5]        # (128, 1)
    w8, b8 = wts[7], bss[7]        # (256, 4)
    w6p = jnp.zeros((128, NUM_OUTPUTS), jnp.float32).at[:, CARB_IDX].set(w6[:, 0])
    w8p = jnp.zeros((256, NUM_OUTPUTS), jnp.float32)
    w8p = w8p.at[:, :CARB_IDX].set(w8[:, :CARB_IDX])
    w8p = w8p.at[:, CARB_IDX + 1:].set(w8[:, CARB_IDX:])
    b_out = jnp.zeros((NUM_OUTPUTS,), jnp.float32)
    b_out = b_out.at[:CARB_IDX].set(b8[:CARB_IDX])
    b_out = b_out.at[CARB_IDX].set(b6[0])
    b_out = b_out.at[CARB_IDX + 1:].set(b8[CARB_IDX:])

    bf16 = jnp.bfloat16
    params = {
        "ln_g": jnp.ones((1, NUM_FEATURES), jnp.float32),
        "ln_b": jnp.zeros((1, NUM_FEATURES), jnp.float32),
        "w1": wts[0].astype(bf16), "b1": bss[0].reshape(1, -1),
        "w2": wts[1].astype(bf16), "b2": bss[1].reshape(1, -1),
        "w37": w37.astype(bf16), "b37": b37.reshape(1, -1),
        "w4": wts[3].astype(bf16), "b4": bss[3].reshape(1, -1),
        "w5": wts[4].astype(bf16), "b5": bss[4].reshape(1, -1),
        "w6p": w6p.astype(bf16),
        "w8p": w8p.astype(bf16),
        "b_out": b_out.reshape(1, -1),
    }
    return params


def _round_up(x, m):
    return (x + m - 1) // m * m


@jax.jit
def nutrition_model_forward(features, params):
    B = features.shape[0]
    # Round to 16 rows (native bf16 sublane packing); cap at MAX_TB.
    TB = min(MAX_TB, _round_up(B, 16))
    padded_b = _round_up(B, TB)
    x = features.astype(jnp.bfloat16)        # stream features as bf16
    if padded_b != B:
        x = jnp.pad(x, ((0, padded_b - B), (0, 0)))

    weight_args = [params[name] for name in PARAM_ORDER]

    def resident_spec(p):
        # Same block index for every grid step -> weight stays resident in VMEM.
        nd = p.ndim
        return pl.BlockSpec(p.shape, lambda i, _nd=nd: (0,) * _nd)

    out = pl.pallas_call(
        _nutrition_head_kernel,
        out_shape=jax.ShapeDtypeStruct((padded_b, NUM_OUTPUTS), jnp.float32),
        grid=(padded_b // TB,),
        in_specs=[pl.BlockSpec((TB, NUM_FEATURES), lambda i: (i, 0))]
                 + [resident_spec(p) for p in weight_args],
        out_specs=pl.BlockSpec((TB, NUM_OUTPUTS), lambda i: (i, 0)),
        compiler_params=pltpu.CompilerParams(
            dimension_semantics=("parallel",),
            vmem_limit_bytes=32 << 20,
        ),
    )(x, *weight_args)
    return out[:B]


if __name__ == "__main__":
    key = jax.random.PRNGKey(0)
    pkey, xkey = jax.random.split(key)

    params = init_params(pkey)

    batch = 8
    features = jax.random.normal(xkey, (batch, NUM_FEATURES), jnp.float32)

    out = nutrition_model_forward(features, params)
    jax.block_until_ready(out)

    assert out.shape == (batch, NUM_OUTPUTS), out.shape
    assert out.dtype == jnp.float32
    assert bool(jnp.all(jnp.isfinite(out)))
    print("KERNEL_OK")
</pallas_src>

<mosaic_0001>
module attributes {stable_mosaic.version = 11 : i64} {
  func.func @_nutrition_head_kernel(%arg0: i32, %arg1: memref<16x1792xbf16, #tpu.memory_space<vmem>>, %arg2: memref<1x1792xf32, #tpu.memory_space<vmem>>, %arg3: memref<1x1792xf32, #tpu.memory_space<vmem>>, %arg4: memref<1792x1024xbf16, #tpu.memory_space<vmem>>, %arg5: memref<1x1024xf32, #tpu.memory_space<vmem>>, %arg6: memref<1024x512xbf16, #tpu.memory_space<vmem>>, %arg7: memref<1x512xf32, #tpu.memory_space<vmem>>, %arg8: memref<512x768xbf16, #tpu.memory_space<vmem>>, %arg9: memref<1x768xf32, #tpu.memory_space<vmem>>, %arg10: memref<512x256xbf16, #tpu.memory_space<vmem>>, %arg11: memref<1x256xf32, #tpu.memory_space<vmem>>, %arg12: memref<256x128xbf16, #tpu.memory_space<vmem>>, %arg13: memref<1x128xf32, #tpu.memory_space<vmem>>, %arg14: memref<128x5xbf16, #tpu.memory_space<vmem>>, %arg15: memref<256x5xbf16, #tpu.memory_space<vmem>>, %arg16: memref<1x5xf32, #tpu.memory_space<vmem>>, %arg17: memref<16x5xf32, #tpu.memory_space<vmem>>) attributes {dimension_semantics = [#tpu.dimension_semantics<parallel>], iteration_bounds = array<i64: 1>, scalar_prefetch = 0 : i64, scratch_operands = 0 : i64, tpu.core_type = #tpu.core_type<tc>, window_params = [{transform_indices = @transform_0, window_bounds = array<i64: 16, 1792>}, {pipeline_mode = #tpu.pipeline_mode<synchronous>, transform_indices = @transform_1, window_bounds = array<i64: 1, 1792>}, {pipeline_mode = #tpu.pipeline_mode<synchronous>, transform_indices = @transform_2, window_bounds = array<i64: 1, 1792>}, {pipeline_mode = #tpu.pipeline_mode<synchronous>, transform_indices = @transform_3, window_bounds = array<i64: 1792, 1024>}, {pipeline_mode = #tpu.pipeline_mode<synchronous>, transform_indices = @transform_4, window_bounds = array<i64: 1, 1024>}, {pipeline_mode = #tpu.pipeline_mode<synchronous>, transform_indices = @transform_5, window_bounds = array<i64: 1024, 512>}, {pipeline_mode = #tpu.pipeline_mode<synchronous>, transform_indices = @transform_6, window_bounds = array<i64: 1, 512>}, {pipeline_mode = #tpu.pipeline_mode<synchronous>, transform_indices = @transform_7, window_bounds = array<i64: 512, 768>}, {pipeline_mode = #tpu.pipeline_mode<synchronous>, transform_indices = @transform_8, window_bounds = array<i64: 1, 768>}, {pipeline_mode = #tpu.pipeline_mode<synchronous>, transform_indices = @transform_9, window_bounds = array<i64: 512, 256>}, {pipeline_mode = #tpu.pipeline_mode<synchronous>, transform_indices = @transform_10, window_bounds = array<i64: 1, 256>}, {pipeline_mode = #tpu.pipeline_mode<synchronous>, transform_indices = @transform_11, window_bounds = array<i64: 256, 128>}, {pipeline_mode = #tpu.pipeline_mode<synchronous>, transform_indices = @transform_12, window_bounds = array<i64: 1, 128>}, {pipeline_mode = #tpu.pipeline_mode<synchronous>, transform_indices = @transform_13, window_bounds = array<i64: 128, 5>}, {pipeline_mode = #tpu.pipeline_mode<synchronous>, transform_indices = @transform_14, window_bounds = array<i64: 256, 5>}, {pipeline_mode = #tpu.pipeline_mode<synchronous>, transform_indices = @transform_15, window_bounds = array<i64: 1, 5>}, {transform_indices = @transform_16, window_bounds = array<i64: 16, 5>}]} {
    %c0 = arith.constant 0 : index
    %c0_0 = arith.constant 0 : index
    %0 = vector.load %arg1[%c0, %c0_0] : memref<16x1792xbf16, #tpu.memory_space<vmem>>, vector<16x1792xbf16>
    %1 = arith.extf %0 : vector<16x1792xbf16> to vector<16x1792xf32>
    %cst = arith.constant dense<0.000000e+00> : vector<16xf32>
    %2 = vector.multi_reduction <add>, %1, %cst [1] : vector<16x1792xf32> to vector<16xf32>
    %3 = vector.shape_cast %2 : vector<16xf32> to vector<16x1xf32>
    %cst_1 = arith.constant 1.792000e+03 : f32
    %4 = vector.broadcast %cst_1 : f32 to vector<16x1xf32>
    %5 = arith.divf %3, %4 : vector<16x1xf32>
    %6 = vector.broadcast %5 : vector<16x1xf32> to vector<16x1792xf32>
    %7 = arith.subf %1, %6 : vector<16x1792xf32>
    %8 = arith.mulf %7, %7 : vector<16x1792xf32>
    %cst_2 = arith.constant dense<0.000000e+00> : vector<16xf32>
    %9 = vector.multi_reduction <add>, %8, %cst_2 [1] : vector<16x1792xf32> to vector<16xf32>
    %10 = vector.shape_cast %9 : vector<16xf32> to vector<16x1xf32>
    %cst_3 = arith.constant 1.792000e+03 : f32
    %11 = vector.broadcast %cst_3 : f32 to vector<16x1xf32>
    %12 = arith.divf %10, %11 : vector<16x1xf32>
    %13 = vector.broadcast %5 : vector<16x1xf32> to vector<16x1792xf32>
    %14 = arith.subf %1, %13 : vector<16x1792xf32>
    %cst_4 = arith.constant 9.99999974E-6 : f32
    %15 = vector.broadcast %cst_4 : f32 to vector<16x1xf32>
    %16 = arith.addf %12, %15 : vector<16x1xf32>
    %17 = math.rsqrt %16 : vector<16x1xf32>
    %18 = vector.broadcast %17 : vector<16x1xf32> to vector<16x1792xf32>
    %19 = arith.mulf %14, %18 : vector<16x1792xf32>
    %c0_5 = arith.constant 0 : index
    %c0_6 = arith.constant 0 : index
    %20 = vector.load %arg2[%c0_5, %c0_6] : memref<1x1792xf32, #tpu.memory_space<vmem>>, vector<1x1792xf32>
    %21 = vector.broadcast %20 : vector<1x1792xf32> to vector<16x1792xf32>
    %22 = arith.mulf %19, %21 : vector<16x1792xf32>
    %c0_7 = arith.constant 0 : index
    %c0_8 = arith.constant 0 : index
    %23 = vector.load %arg3[%c0_7, %c0_8] : memref<1x1792xf32, #tpu.memory_space<vmem>>, vector<1x1792xf32>
    %24 = vector.broadcast %23 : vector<1x1792xf32> to vector<16x1792xf32>
    %25 = arith.addf %22, %24 : vector<16x1792xf32>
    %26 = arith.truncf %25 : vector<16x1792xf32> to vector<16x1792xbf16>
    %c0_9 = arith.constant 0 : index
    %c0_10 = arith.constant 0 : index
    %27 = vector.load %arg4[%c0_9, %c0_10] : memref<1792x1024xbf16, #tpu.memory_space<vmem>>, vector<1792x1024xbf16>
    %cst_11 = arith.constant dense<0.000000e+00> : vector<16x1024xf32>
    %28 = tpu.matmul %26, %27, %cst_11 {dimension_numbers = #tpu.dot_dimension_numbers<[1], [0], [0], [1], [0, 0, 1, 1], [], []>} : vector<16x1792xbf16>, vector<1792x1024xbf16>, vector<16x1024xf32> -> vector<16x1024xf32>
    %c0_12 = arith.constant 0 : index
    %c0_13 = arith.constant 0 : index
    %29 = vector.load %arg5[%c0_12, %c0_13] : memref<1x1024xf32, #tpu.memory_space<vmem>>, vector<1x1024xf32>
    %30 = vector.broadcast %29 : vector<1x1024xf32> to vector<16x1024xf32>
    %31 = arith.addf %28, %30 : vector<16x1024xf32>
    %cst_14 = arith.constant 0.000000e+00 : f32
    %32 = vector.broadcast %cst_14 : f32 to vector<16x1024xf32>
    %33 = arith.maximumf %31, %32 : vector<16x1024xf32>
    %34 = arith.truncf %33 : vector<16x1024xf32> to vector<16x1024xbf16>
    %c0_15 = arith.constant 0 : index
    %c0_16 = arith.constant 0 : index
    %35 = vector.load %arg6[%c0_15, %c0_16] : memref<1024x512xbf16, #tpu.memory_space<vmem>>, vector<1024x512xbf16>
    %cst_17 = arith.constant dense<0.000000e+00> : vector<16x512xf32>
    %36 = tpu.matmul %34, %35, %cst_17 {dimension_numbers = #tpu.dot_dimension_numbers<[1], [0], [0], [1], [0, 0, 1, 1], [], []>} : vector<16x1024xbf16>, vector<1024x512xbf16>, vector<16x512xf32> -> vector<16x512xf32>
    %c0_18 = arith.constant 0 : index
    %c0_19 = arith.constant 0 : index
    %37 = vector.load %arg7[%c0_18, %c0_19] : memref<1x512xf32, #tpu.memory_space<vmem>>, vector<1x512xf32>
    %38 = vector.broadcast %37 : vector<1x512xf32> to vector<16x512xf32>
    %39 = arith.addf %36, %38 : vector<16x512xf32>
    %cst_20 = arith.constant 0.000000e+00 : f32
    %40 = vector.broadcast %cst_20 : f32 to vector<16x512xf32>
    %41 = arith.maximumf %39, %40 : vector<16x512xf32>
    %42 = arith.truncf %41 : vector<16x512xf32> to vector<16x512xbf16>
    %c0_21 = arith.constant 0 : index
    %c0_22 = arith.constant 0 : index
    %43 = vector.load %arg8[%c0_21, %c0_22] : memref<512x768xbf16, #tpu.memory_space<vmem>>, vector<512x768xbf16>
    %cst_23 = arith.constant dense<0.000000e+00> : vector<16x768xf32>
    %44 = tpu.matmul %42, %43, %cst_23 {dimension_numbers = #tpu.dot_dimension_numbers<[1], [0], [0], [1], [0, 0, 1, 1], [], []>} : vector<16x512xbf16>, vector<512x768xbf16>, vector<16x768xf32> -> vector<16x768xf32>
    %c0_24 = arith.constant 0 : index
    %c0_25 = arith.constant 0 : index
    %45 = vector.load %arg9[%c0_24, %c0_25] : memref<1x768xf32, #tpu.memory_space<vmem>>, vector<1x768xf32>
    %46 = vector.broadcast %45 : vector<1x768xf32> to vector<16x768xf32>
    %47 = arith.addf %44, %46 : vector<16x768xf32>
    %cst_26 = arith.constant 0.000000e+00 : f32
    %48 = vector.broadcast %cst_26 : f32 to vector<16x768xf32>
    %49 = arith.maximumf %47, %48 : vector<16x768xf32>
    %50 = arith.truncf %49 : vector<16x768xf32> to vector<16x768xbf16>
    %51 = vector.extract_strided_slice %50 {offsets = [0, 0], sizes = [16, 512], strides = [1, 1]} : vector<16x768xbf16> to vector<16x512xbf16>
    %52 = vector.extract_strided_slice %50 {offsets = [0, 512], sizes = [16, 256], strides = [1, 1]} : vector<16x768xbf16> to vector<16x256xbf16>
    %c0_27 = arith.constant 0 : index
    %c0_28 = arith.constant 0 : index
    %53 = vector.load %arg10[%c0_27, %c0_28] : memref<512x256xbf16, #tpu.memory_space<vmem>>, vector<512x256xbf16>
    %cst_29 = arith.constant dense<0.000000e+00> : vector<16x256xf32>
    %54 = tpu.matmul %51, %53, %cst_29 {dimension_numbers = #tpu.dot_dimension_numbers<[1], [0], [0], [1], [0, 0, 1, 1], [], []>} : vector<16x512xbf16>, vector<512x256xbf16>, vector<16x256xf32> -> vector<16x256xf32>
    %c0_30 = arith.constant 0 : index
    %c0_31 = arith.constant 0 : index
    %55 = vector.load %arg11[%c0_30, %c0_31] : memref<1x256xf32, #tpu.memory_space<vmem>>, vector<1x256xf32>
    %56 = vector.broadcast %55 : vector<1x256xf32> to vector<16x256xf32>
    %57 = arith.addf %54, %56 : vector<16x256xf32>
    %cst_32 = arith.constant 0.000000e+00 : f32
    %58 = vector.broadcast %cst_32 : f32 to vector<16x256xf32>
    %59 = arith.maximumf %57, %58 : vector<16x256xf32>
    %60 = arith.truncf %59 : vector<16x256xf32> to vector<16x256xbf16>
    %c0_33 = arith.constant 0 : index
    %c0_34 = arith.constant 0 : index
    %61 = vector.load %arg12[%c0_33, %c0_34] : memref<256x128xbf16, #tpu.memory_space<vmem>>, vector<256x128xbf16>
    %cst_35 = arith.constant dense<0.000000e+00> : vector<16x128xf32>
    %62 = tpu.matmul %60, %61, %cst_35 {dimension_numbers = #tpu.dot_dimension_numbers<[1], [0], [0], [1], [0, 0, 1, 1], [], []>} : vector<16x256xbf16>, vector<256x128xbf16>, vector<16x128xf32> -> vector<16x128xf32>
    %c0_36 = arith.constant 0 : index
    %c0_37 = arith.constant 0 : index
    %63 = vector.load %arg13[%c0_36, %c0_37] : memref<1x128xf32, #tpu.memory_space<vmem>>, vector<1x128xf32>
    %64 = vector.broadcast %63 : vector<1x128xf32> to vector<16x128xf32>
    %65 = arith.addf %62, %64 : vector<16x128xf32>
    %cst_38 = arith.constant 0.000000e+00 : f32
    %66 = vector.broadcast %cst_38 : f32 to vector<16x128xf32>
    %67 = arith.maximumf %65, %66 : vector<16x128xf32>
    %68 = arith.truncf %67 : vector<16x128xf32> to vector<16x128xbf16>
    %c0_39 = arith.constant 0 : index
    %c0_40 = arith.constant 0 : index
    %69 = vector.load %arg15[%c0_39, %c0_40] : memref<256x5xbf16, #tpu.memory_space<vmem>>, vector<256x5xbf16>
    %cst_41 = arith.constant dense<0.000000e+00> : vector<16x5xf32>
    %70 = tpu.matmul %52, %69, %cst_41 {dimension_numbers = #tpu.dot_dimension_numbers<[1], [0], [0], [1], [0, 0, 1, 1], [], []>} : vector<16x256xbf16>, vector<256x5xbf16>, vector<16x5xf32> -> vector<16x5xf32>
    %c0_42 = arith.constant 0 : index
    %c0_43 = arith.constant 0 : index
    %71 = vector.load %arg14[%c0_42, %c0_43] : memref<128x5xbf16, #tpu.memory_space<vmem>>, vector<128x5xbf16>
    %cst_44 = arith.constant dense<0.000000e+00> : vector<16x5xf32>
    %72 = tpu.matmul %68, %71, %cst_44 {dimension_numbers = #tpu.dot_dimension_numbers<[1], [0], [0], [1], [0, 0, 1, 1], [], []>} : vector<16x128xbf16>, vector<128x5xbf16>, vector<16x5xf32> -> vector<16x5xf32>
    %73 = arith.addf %70, %72 : vector<16x5xf32>
    %c0_45 = arith.constant 0 : index
    %c0_46 = arith.constant 0 : index
    %74 = vector.load %arg16[%c0_45, %c0_46] : memref<1x5xf32, #tpu.memory_space<vmem>>, vector<1x5xf32>
    %75 = vector.broadcast %74 : vector<1x5xf32> to vector<16x5xf32>
    %76 = arith.addf %73, %75 : vector<16x5xf32>
    %c0_47 = arith.constant 0 : index
    %c0_48 = arith.constant 0 : index
    %77 = vector.load %arg17[%c0_47, %c0_48] : memref<16x5xf32, #tpu.memory_space<vmem>>, vector<16x5xf32>
    tpu.vector_store %arg17[%c0_47, %c0_48], %76 {strides = array<i32>} : memref<16x5xf32, #tpu.memory_space<vmem>>, vector<16x5xf32>,
    return
  }
  func.func @transform_0(%arg0: i32) -> (i32, i32) {
    %c0_i32 = arith.constant 0 : i32
    %c0_i32_0 = arith.constant 0 : i32
    return %arg0, %c0_i32 : i32, i32
  }
  func.func @transform_1(%arg0: i32) -> (i32, i32) {
    %c0_i32 = arith.constant 0 : i32
    %c0_i32_0 = arith.constant 0 : i32
    %c0_i32_1 = arith.constant 0 : i32
    return %c0_i32, %c0_i32_0 : i32, i32
  }
  func.func @transform_2(%arg0: i32) -> (i32, i32) {
    %c0_i32 = arith.constant 0 : i32
    %c0_i32_0 = arith.constant 0 : i32
    %c0_i32_1 = arith.constant 0 : i32
    return %c0_i32, %c0_i32_0 : i32, i32
  }
  func.func @transform_3(%arg0: i32) -> (i32, i32) {
    %c0_i32 = arith.constant 0 : i32
    %c0_i32_0 = arith.constant 0 : i32
    %c0_i32_1 = arith.constant 0 : i32
    return %c0_i32, %c0_i32_0 : i32, i32
  }
  func.func @transform_4(%arg0: i32) -> (i32, i32) {
    %c0_i32 = arith.constant 0 : i32
    %c0_i32_0 = arith.constant 0 : i32
    %c0_i32_1 = arith.constant 0 : i32
    return %c0_i32, %c0_i32_0 : i32, i32
  }
  func.func @transform_5(%arg0: i32) -> (i32, i32) {
    %c0_i32 = arith.constant 0 : i32
    %c0_i32_0 = arith.constant 0 : i32
    %c0_i32_1 = arith.constant 0 : i32
    return %c0_i32, %c0_i32_0 : i32, i32
  }
  func.func @transform_6(%arg0: i32) -> (i32, i32) {
    %c0_i32 = arith.constant 0 : i32
    %c0_i32_0 = arith.constant 0 : i32
    %c0_i32_1 = arith.constant 0 : i32
    return %c0_i32, %c0_i32_0 : i32, i32
  }
  func.func @transform_7(%arg0: i32) -> (i32, i32) {
    %c0_i32 = arith.constant 0 : i32
    %c0_i32_0 = arith.constant 0 : i32
    %c0_i32_1 = arith.constant 0 : i32
    return %c0_i32, %c0_i32_0 : i32, i32
  }
  func.func @transform_8(%arg0: i32) -> (i32, i32) {
    %c0_i32 = arith.constant 0 : i32
    %c0_i32_0 = arith.constant 0 : i32
    %c0_i32_1 = arith.constant 0 : i32
    return %c0_i32, %c0_i32_0 : i32, i32
  }
  func.func @transform_9(%arg0: i32) -> (i32, i32) {
    %c0_i32 = arith.constant 0 : i32
    %c0_i32_0 = arith.constant 0 : i32
    %c0_i32_1 = arith.constant 0 : i32
    return %c0_i32, %c0_i32_0 : i32, i32
  }
  func.func @transform_10(%arg0: i32) -> (i32, i32) {
    %c0_i32 = arith.constant 0 : i32
    %c0_i32_0 = arith.constant 0 : i32
    %c0_i32_1 = arith.constant 0 : i32
    return %c0_i32, %c0_i32_0 : i32, i32
  }
  func.func @transform_11(%arg0: i32) -> (i32, i32) {
    %c0_i32 = arith.constant 0 : i32
    %c0_i32_0 = arith.constant 0 : i32
    %c0_i32_1 = arith.constant 0 : i32
    return %c0_i32, %c0_i32_0 : i32, i32
  }
  func.func @transform_12(%arg0: i32) -> (i32, i32) {
    %c0_i32 = arith.constant 0 : i32
    %c0_i32_0 = arith.constant 0 : i32
    %c0_i32_1 = arith.constant 0 : i32
    return %c0_i32, %c0_i32_0 : i32, i32
  }
  func.func @transform_13(%arg0: i32) -> (i32, i32) {
    %c0_i32 = arith.constant 0 : i32
    %c0_i32_0 = arith.constant 0 : i32
    %c0_i32_1 = arith.constant 0 : i32
    return %c0_i32, %c0_i32_0 : i32, i32
  }
  func.func @transform_14(%arg0: i32) -> (i32, i32) {
    %c0_i32 = arith.constant 0 : i32
    %c0_i32_0 = arith.constant 0 : i32
    %c0_i32_1 = arith.constant 0 : i32
    return %c0_i32, %c0_i32_0 : i32, i32
  }
  func.func @transform_15(%arg0: i32) -> (i32, i32) {
    %c0_i32 = arith.constant 0 : i32
    %c0_i32_0 = arith.constant 0 : i32
    %c0_i32_1 = arith.constant 0 : i32
    return %c0_i32, %c0_i32_0 : i32, i32
  }
  func.func @transform_16(%arg0: i32) -> (i32, i32) {
    %c0_i32 = arith.constant 0 : i32
    %c0_i32_0 = arith.constant 0 : i32
    return %arg0, %c0_i32 : i32, i32
  }
}

</mosaic_0001>

<bundles_post_ra>
// kernel: nutrition_model_forward.1
= control target key start
LH: loop header
LB: loop body
LE: loop exit
PB: predicated region body
PF: predicated region fallthrough
CT: control target
= control target key end

     0   :  { %s21183_s0 = inlined_call_operand.vmem [shape: bf16[16,1792], index: 0, kind: input, shape index: {}]   ;;  %s21184_s1 = inlined_call_operand.hbm [shape: f32[1,1792], index: 1, kind: input, shape index: {}]   ;;  %s21185_s2 = inlined_call_operand.hbm [shape: f32[1,1792], index: 2, kind: input, shape index: {}]   ;;  %s21186_s3 = inlined_call_operand.hbm [shape: bf16[1792,1024], index: 3, kind: input, shape index: {}]   ;;  %s21187_s4 = inlined_call_operand.hbm [shape: f32[1,1024], index: 4, kind: input, shape index: {}]   ;;  %s21188_s5 = inlined_call_operand.hbm [shape: bf16[1024,512], index: 5, kind: input, shape index: {}]   ;;  %s21189_s6 = inlined_call_operand.hbm [shape: f32[1,512], index: 6, kind: input, shape index: {}]   ;;  %s21190_s7 = inlined_call_operand.hbm [shape: bf16[512,768], index: 7, kind: input, shape index: {}]   ;;  %s21191_s8 = inlined_call_operand.hbm [shape: f32[1,768], index: 8, kind: input, shape index: {}]   ;;  %s21192_s9 = inlined_call_operand.hbm [shape: bf16[512,256], index: 9, kind: input, shape index: {}]   ;;  %s21193_s10 = inlined_call_operand.hbm [shape: f32[1,256], index: 10, kind: input, shape index: {}]   ;;  %s21194_s11 = inlined_call_operand.hbm [shape: bf16[256,128], index: 11, kind: input, shape index: {}]   ;;  %s21195_s12 = inlined_call_operand.hbm [shape: f32[1,128], index: 12, kind: input, shape index: {}]   ;;  %s21196_s13 = inlined_call_operand.vmem [shape: bf16[128,5], index: 13, kind: input, shape index: {}]   ;;  %s21197_s14 = inlined_call_operand.vmem [shape: bf16[256,5], index: 14, kind: input, shape index: {}]   ;;  %s21198_s15 = inlined_call_operand.hbm [shape: f32[1,5], index: 15, kind: input, shape index: {}]   ;;  %s21199_s16 = inlined_call_operand.vmem [shape: f32[16,5], index: 16, kind: output, shape index: {}]  }
   0x1   :  { %21211 = sst [smem:[#allocation97_spill]] %s21183_s0 }
   0x2   :  { %21 = vsyncpa [#allocation3], 0 }
   0x3   :  { %22 = vsyncpa [#allocation5], 0 }
   0x4   :  { %23 = vsyncpa [#allocation8], 0 }
   0x5   :  { %24 = vsyncpa [#allocation11], 0 }
   0x6   :  { %25 = vsyncpa [#allocation14], 0 }
   0x7   :  { %26 = vsyncpa [#allocation17], 0  ;;  %s46_s23 = sshll.u32 %s21185_s2, 4  ;;  %s47_s23 = int_to_ptr.hbm [resolvable:$true] %s46_s23 }
   0x8   :  { %27 = vsyncpa [#allocation20], 0  ;;  %s19661_s24 = smov [#allocation4]   ;;  %s70_s28 = sshll.u32 %s21187_s4, 4  ;;  %s71_s28 = int_to_ptr.hbm [resolvable:$true] %s70_s28 }
   0x9   :  { %s48_s25 = sshll.u32 %s19661_s24, 4  ;;  %s19662_s29 = smov [#allocation7]   ;;  %s49_s25 = int_to_ptr.vmem [resolvable:$true] %s48_s25 }
   0xa   :  { %51 = dma.hbm_to_vmem [thread:$0]  %s47_s23, 224, %s49_s25, [#allocation5]  }
   0xb   :  { %s72_s30 = sshll.u32 %s19662_s29, 4  ;;  %s94_s18 = sshll.u32 %s21189_s6, 4  ;;  %s73_s30 = int_to_ptr.vmem [resolvable:$true] %s72_s30  ;;  %s95_s18 = int_to_ptr.hbm [resolvable:$true] %s94_s18 }
   0xc   :  { %75 = dma.hbm_to_vmem [thread:$0]  %s71_s28, 128, %s73_s30, [#allocation8]  }
   0xd   :  { %s118_s20 = sshll.u32 %s21191_s8, 4  ;;  %s19663_s21 = smov [#allocation10]   ;;  %s119_s20 = int_to_ptr.hbm [resolvable:$true] %s118_s20 }
   0xe   :  { %s96_s22 = sshll.u32 %s19663_s21, 4  ;;  %s19664_s4 = smov [#allocation13]   ;;  %s97_s22 = int_to_ptr.vmem [resolvable:$true] %s96_s22 }
   0xf   :  { %99 = dma.hbm_to_vmem [thread:$0]  %s95_s18, 64, %s97_s22, [#allocation11]  }
  0x10   :  { %s120_s23 = sshll.u32 %s19664_s4, 4  ;;  %s142_s26 = sshll.u32 %s21193_s10, 4  ;;  %s121_s23 = int_to_ptr.vmem [resolvable:$true] %s120_s23  ;;  %s143_s26 = int_to_ptr.hbm [resolvable:$true] %s142_s26 }
  0x11   :  { %123 = dma.hbm_to_vmem [thread:$0]  %s119_s20, 96, %s121_s23, [#allocation14]  }
  0x12   :  { %s166_s28 = sshll.u32 %s21195_s12, 4  ;;  %s19665_s29 = smov [#allocation16]   ;;  %s167_s28 = int_to_ptr.hbm [resolvable:$true] %s166_s28 }
  0x13   :  { %s144_s8 = sshll.u32 %s19665_s29, 4  ;;  %s19666_s30 = smov [#allocation19]   ;;  %s145_s8 = int_to_ptr.vmem [resolvable:$true] %s144_s8 }
  0x14   :  { %147 = dma.hbm_to_vmem [thread:$0]  %s143_s26, 32, %s145_s8, [#allocation17]  }
  0x15   :  { %s168_s0 = sshll.u32 %s19666_s30, 4  ;;  %s35_s2 = sshll.u32 %s21184_s1, 4  ;;  %s169_s0 = int_to_ptr.vmem [resolvable:$true] %s168_s0  ;;  %s36_s2 = int_to_ptr.hbm [resolvable:$true] %s35_s2 }
  0x16   :  { %171 = dma.hbm_to_vmem [thread:$0]  %s167_s28, 16, %s169_s0, [#allocation20]  }
  0x17   :  { %s56_s20 = sshll.u32 %s21186_s3, 4  ;;  %s19667_s21 = smov [#allocation2]   ;;  %s57_s20 = int_to_ptr.hbm [resolvable:$true] %s56_s20 }
  0x18   :  { %s37_s12 = sshll.u32 %s19667_s21, 4  ;;  %s19668_s22 = smov [#allocation6]   ;;  %s38_s12 = int_to_ptr.vmem [resolvable:$true] %s37_s12 }
  0x19   :  { %40 = dma.hbm_to_vmem [thread:$0]  %s36_s2, 224, %s38_s12, [#allocation3]  }
  0x1a   :  { %s58_s4 = sshll.u32 %s19668_s22, 4  ;;  %s19669_s23 = smov 512   ;;  %s59_s4 = int_to_ptr.vmem [resolvable:$true] %s58_s4 }
  0x1b   :  { %s19670_s24 = smov 32   ;;  %s80_s26 = sshll.u32 %s21188_s5, 4  ;;  %s81_s26 = int_to_ptr.hbm [resolvable:$true] %s80_s26 }
  0x1c   :  { %64 = dma.hbm_to_vmem [thread:$0]  %s57_s20, 114688, %s59_s4, [#allocation5], %s19669_s23, %s19669_s23, %s19670_s24  }
  0x1d   :  { %s19671_s6 = smov [#allocation9]   ;;  %s104_s29 = sshll.u32 %s21190_s7, 4  ;;  %s105_s29 = int_to_ptr.hbm [resolvable:$true] %s104_s29 }
  0x1e   :  { %s82_s27 = sshll.u32 %s19671_s6, 4  ;;  %s19672_s8 = smov 256   ;;  %s83_s27 = int_to_ptr.vmem [resolvable:$true] %s82_s27 }
  0x1f   :  { %s19673_s30 = smov 16   ;;  %s19674_s0 = smov [#allocation12]  }
  0x20   :  { %88 = dma.hbm_to_vmem [thread:$0]  %s81_s26, 32768, %s83_s27, [#allocation8], %s19672_s8, %s19672_s8, %s19673_s30  }
  0x21   :  { %s106_s17 = sshll.u32 %s19674_s0, 4  ;;  %s19675_s18 = smov 384   ;;  %s107_s17 = int_to_ptr.vmem [resolvable:$true] %s106_s17 }
  0x22   :  { %s19676_s2 = smov 24   ;;  %s128_s19 = sshll.u32 %s21192_s9, 4  ;;  %s129_s19 = int_to_ptr.hbm [resolvable:$true] %s128_s19 }
  0x23   :  { %112 = dma.hbm_to_vmem [thread:$0]  %s105_s29, 24576, %s107_s17, [#allocation11], %s19675_s18, %s19675_s18, %s19676_s2  }
  0x24   :  { %s19677_s20 = smov [#allocation15]   ;;  %s152_s22 = sshll.u32 %s21194_s11, 4  ;;  %s153_s22 = int_to_ptr.hbm [resolvable:$true] %s152_s22 }
  0x25   :  { %s130_s21 = sshll.u32 %s19677_s20, 4  ;;  %s19678_s4 = smov 128   ;;  %s131_s21 = int_to_ptr.vmem [resolvable:$true] %s130_s21 }
  0x26   :  { %s19679_s23 = smov 8   ;;  %s19680_s24 = smov [#allocation18]  }
  0x27   :  { %136 = dma.hbm_to_vmem [thread:$0]  %s129_s19, 8192, %s131_s21, [#allocation14], %s19678_s4, %s19678_s4, %s19679_s23  }
  0x28   :  { %s154_s25 = sshll.u32 %s19680_s24, 4  ;;  %s19681_s1 = smov 64   ;;  %s155_s25 = int_to_ptr.vmem [resolvable:$true] %s154_s25 }
  0x29   :  { %s19682_s26 = smov 4   ;;  %s181_s27 = sshll.u32 %s21198_s15, 4  ;;  %s182_s27 = int_to_ptr.hbm [resolvable:$true] %s181_s27 }
  0x2a   :  { %160 = dma.hbm_to_vmem [thread:$0]  %s153_s22, 2048, %s155_s25, [#allocation17], %s19681_s1, %s19681_s1, %s19682_s26  }
  0x2b   :  { %s19683_s3 = smov [#allocation21]  }
  0x2c   :  { %s183_s28 = sshll.u32 %s19683_s3, 4  ;;  %s184_s28 = int_to_ptr.vmem [resolvable:$true] %s183_s28 }
  0x2d   :  { %186 = dma.hbm_to_vmem [thread:$0]  %s182_s27, 16, %s184_s28, [#allocation20]  }
  0x2e   :  { %19647 = dma.done.wait [#allocation3], 224  }
  0x2f   :  { %19648 = vsyncadd [#allocation3], 4294967072 }
  0x30   :  { %19649 = dma.done.wait [#allocation5], 114912  }
  0x31   :  { %19650 = vsyncadd [#allocation5], 4294852384 }
  0x32   :  { %19651 = dma.done.wait [#allocation8], 32896  }
  0x33   :  { %19652 = vsyncadd [#allocation8], 4294934400 }
  0x34   :  { %19653 = dma.done.wait [#allocation11], 24640  }
  0x35   :  { %19654 = vsyncadd [#allocation11], 4294942656 }
  0x36   :  { %19655 = dma.done.wait [#allocation14], 8288  }
  0x37   :  { %19656 = vsyncadd [#allocation14], 4294959008 }
  0x38   :  { %19657 = dma.done.wait [#allocation17], 2080  }
  0x39   :  { %19658 = vsyncadd [#allocation17], 4294965216 }
  0x3a   :  { %19659 = dma.done.wait [#allocation20], 32  }
  0x3b   :  { %19660 = vsyncadd [#allocation20], 4294967264  ;;  %s21212_s29 = sld [smem:[#allocation97_spill]]  ;;  %vm12045_vm7 = vcmask 39936  }
  0x41   :  { %v19812_v0 = vld [vmem:[%s21212_s29] sm:$0xff]  ;;  %v19817_v1 = vld [vmem:[%s21212_s29 + $0x8] sm:$0xff]  ;;  %v19825_v5 = vld [vmem:[%s21212_s29 + $0x38] sm:$0xff] }
  0x42   :  { %v253_v2 = vunpack.c.l.bf16 %v19812_v0  ;;  %v254_v3 = vunpack.c.h.bf16 %v19812_v0  ;;  %v255_v4 = vunpack.c.l.bf16 %v19817_v1  ;;  %v19830_v6 = vld [vmem:[%s21212_s29 + $0x10] sm:$0xff]  ;;  %v19835_v7 = vld [vmem:[%s21212_s29 + $0x40] sm:$0xff]  ;;  %v256_v8 = vunpack.c.h.bf16 %v19817_v1  ;;  %v19851_v15 = vld [vmem:[%s21212_s29 + $0x18] sm:$0xff] }
  0x43   :  { %v267_v10 = vunpack.c.l.bf16 %v19825_v5  ;;  %v268_v11 = vunpack.c.h.bf16 %v19825_v5  ;;  %v257_v12 = vunpack.c.l.bf16 %v19830_v6  ;;  %v269_v14 = vunpack.c.l.bf16 %v19835_v7  ;;  %v19856_v16 = vld [vmem:[%s21212_s29 + $0x48] sm:$0xff]  ;;  %v19875_v25 = vld [vmem:[%s21212_s29 + $0x20] sm:$0xff]  ;;  %v19880_v26 = vld [vmem:[%s21212_s29 + $0x50] sm:$0xff] }
  0x44   :  { %v281_v9 = vadd.f32 %v254_v3, %v253_v2  ;;  %v258_v17 = vunpack.c.h.bf16 %v19830_v6  ;;  %v270_v19 = vunpack.c.h.bf16 %v19835_v7  ;;  %v259_v21 = vunpack.c.l.bf16 %v19851_v15  ;;  %v19897_v35 = vld [vmem:[%s21212_s29 + $0x28] sm:$0xff]  ;;  %v19902_v36 = vld [vmem:[%s21212_s29 + $0x58] sm:$0xff]  ;;  %v19919_v45 = vld [vmem:[%s21212_s29 + $0x30] sm:$0xff] }
  0x45   :  { %v296_v20 = vadd.f32 %v268_v11, %v267_v10  ;;  %v271_v23 = vunpack.c.l.bf16 %v19856_v16  ;;  %v260_v27 = vunpack.c.h.bf16 %v19851_v15  ;;  %v272_v29 = vunpack.c.h.bf16 %v19856_v16  ;;  %v19924_v46 = vld [vmem:[%s21212_s29 + $0x60] sm:$0xff]  ;;  %v19941_v55 = vld [vmem:[%s21212_s29 + $0x68] sm:$0xff]  ;;  %v18103_v7 = vld [vmem:[#allocation6 + $0x7dc] sm:$0xf0] }
  0x46   :  { %v282_v13 = vadd.f32 %v281_v9, %v255_v4  ;;  %v261_v31 = vunpack.c.l.bf16 %v19875_v25  ;;  %v273_v33 = vunpack.c.l.bf16 %v19880_v26  ;;  %v262_v37 = vunpack.c.h.bf16 %v19875_v25  ;;  %v17959_v16 = vld [vmem:[#allocation6 + $0x35c] sm:$0xf0] }
  0x47   :  { %v297_v24 = vadd.f32 %v296_v20, %v269_v14  ;;  %v274_v39 = vunpack.c.h.bf16 %v19880_v26  ;;  %v263_v41 = vunpack.c.l.bf16 %v19897_v35  ;;  %v275_v43 = vunpack.c.l.bf16 %v19902_v36  ;;  %v12701_v26 = vld [vmem:[#allocation6 + $0x500] sm:$0xf] }
  0x48   :  { %v283_v18 = vadd.f32 %v282_v13, %v256_v8  ;;  %v264_v47 = vunpack.c.h.bf16 %v19897_v35  ;;  %v276_v49 = vunpack.c.h.bf16 %v19902_v36  ;;  %v265_v51 = vunpack.c.l.bf16 %v19919_v45  ;;  %v12669_v36 = vld [vmem:[#allocation6 + $0x4c0] sm:$0xf] }
  0x49   :  { %v298_v30 = vadd.f32 %v297_v24, %v270_v19  ;;  %v277_v53 = vunpack.c.l.bf16 %v19924_v46  ;;  %v266_v56 = vunpack.c.h.bf16 %v19919_v45  ;;  %v21203_v58 = vunpack.c.h.bf16 %v19924_v46 }
  0x4a   :  { %v284_v22 = vadd.f32 %v283_v18, %v257_v12  ;;  %v21202_v61 = vunpack.c.l.bf16 %v19941_v55  ;;  %v21201_v13 = vunpack.c.h.bf16 %v19941_v55 }
  0x4b   :  { %v299_v34 = vadd.f32 %v298_v30, %v271_v23 }
  0x4c   :  { %v285_v28 = vadd.f32 %v284_v22, %v258_v17  ;;  %v19684_v22 = vmov 1792.0  }
  0x4d   :  { %v300_v40 = vadd.f32 %v299_v34, %v272_v29  ;;  %19325 = vrcp.f32 %v19684_v22  ;;  %v17975_v22 = vld [vmem:[#allocation6 + $0x3dc] sm:$0xf0] }
  0x4e   :  { %v286_v32 = vadd.f32 %v285_v28, %v259_v21 }
  0x4f   :  { %v301_v44 = vadd.f32 %v300_v40, %v273_v33 }
  0x50   :  { %v287_v38 = vadd.f32 %v286_v32, %v260_v27 }
  0x51   :  { %v302_v50 = vadd.f32 %v301_v44, %v274_v39 }
  0x52   :  { %v288_v42 = vadd.f32 %v287_v38, %v261_v31 }
  0x53   :  { %v303_v54 = vadd.f32 %v302_v50, %v275_v43  ;;  %v19326_v24 = vpop.eup %19325 }
  0x54   :  { %v289_v48 = vadd.f32 %v288_v42, %v262_v37  ;;  %v312_v28 = vmul.f32 1792.0, %v19326_v24  ;;  %vm316_vm0 = vweird.f32 %v19326_v24 }
  0x55   :  { %v304_v59 = vadd.f32 %v303_v54, %v276_v49 }
  0x56   :  { %v290_v52 = vadd.f32 %v289_v48, %v263_v41  ;;  %v313_v30 = vsub.f32 1.0, %v312_v28  ;;  %v18039_v28 = vld [vmem:[#allocation6 + $0x5dc] sm:$0xf0] }
  0x57   :  { %v305_v62 = vadd.f32 %v304_v59, %v277_v53 }
  0x58   :  { %v291_v57 = vadd.f32 %v290_v52, %v264_v47  ;;  %v314_v32 = vmul.f32 %v19326_v24, %v313_v30  ;;  %v13053_v30 = vld [vmem:[#allocation6 + $0x7c0] sm:$0xf] }
  0x59   :  { %v306_v9 = vadd.f32 %v305_v62, %v21203_v58 }
  0x5a   :  { %v292_v60 = vadd.f32 %v291_v57, %v265_v51  ;;  %v315_v34 = vadd.f32 %v19326_v24, %v314_v32 }
  0x5b   :  { %v307_v18 = vadd.f32 %v306_v9, %v21202_v61  ;;  %v12285_v9 = vld [vmem:[#allocation6 + $0x1c0] sm:$0xf] }
  0x5c   :  { %v293_v63 = vadd.f32 %v292_v60, %v266_v56  ;;  %v19963_v38 = vsel %vm316_vm0, %v19326_v24, %v315_v34  ;;  %v12797_v24 = vld [vmem:[#allocation6 + $0x5c0] sm:$0xf] }
  0x5d   :  { %v308_v20 = vadd.f32 %v307_v18, %v21201_v13  ;;  %v17911_v18 = vld [vmem:[#allocation6 + $0x1dc] sm:$0xf0] }
  0x5e   :  { %294 = vadd.xlane.f32.xlu0 %v293_v63  ;;  %v18095_v13 = vld [vmem:[#allocation6 + $0x79c] sm:$0xf0] }
  0x66   :  { %309 = vadd.xlane.f32.xlu0 %v308_v20  ;;  %v12541_v20 = vld [vmem:[#allocation6 + $0x3c0] sm:$0xf] }
  0xd1   :  { %v295_v40 = vpop.xlane.xlu0 %294 }
  0xd2   :  { %v318_v42 = vmul.f32 %v19963_v38, %v295_v40  ;;  %v17903_v40 = vld [vmem:[#allocation6 + $0x19c] sm:$0xf0] }
  0xd4   :  { %v19968_v44 = vsub.f32 %v253_v2, %v318_v42  ;;  %v19972_v48 = vsub.f32 %v254_v3, %v318_v42  ;;  %v19976_v50 = vsub.f32 %v255_v4, %v318_v42  ;;  %v19984_v59 = vsub.f32 %v256_v8, %v318_v42 }
  0xd5   :  { %v19991_v0 = vsub.f32 %v257_v12, %v318_v42  ;;  %v20007_v8 = vsub.f32 %v258_v17, %v318_v42  ;;  %v20013_v63 = vsub.f32 %v259_v21, %v318_v42  ;;  %v20021_v5 = vsub.f32 %v261_v31, %v318_v42 }
  0xd6   :  { %v348_v52 = vmul.f32 %v19968_v44, %v19968_v44  ;;  %v349_v54 = vmul.f32 %v19972_v48, %v19972_v48  ;;  %v350_v3 = vmul.f32 %v19976_v50, %v19976_v50  ;;  %v351_v12 = vmul.f32 %v19984_v59, %v19984_v59 }
  0xd7   :  { %v352_v6 = vmul.f32 %v19991_v0, %v19991_v0  ;;  %v20032_v21 = vsub.f32 %v262_v37, %v318_v42  ;;  %v20036_v15 = vsub.f32 %v263_v41, %v318_v42  ;;  %v353_v25 = vmul.f32 %v20007_v8, %v20007_v8 }
  0xd8   :  { %v376_v4 = vadd.f32 %v349_v54, %v348_v52  ;;  %v20055_v32 = vsub.f32 %v265_v51, %v318_v42  ;;  %v20059_v35 = vsub.f32 %v266_v56, %v318_v42  ;;  %v356_v52 = vmul.f32 %v20021_v5, %v20021_v5  ;;  %v12509_v56 = vld [vmem:[#allocation6 + $0x380] sm:$0xf] }
  0xd9   :  { %v310_v57 = vpop.xlane.xlu0 %309 }
  0xda   :  { %v19987_v2 = vmul.f32 %v19963_v38, %v310_v57  ;;  %v377_v62 = vadd.f32 %v376_v4, %v350_v3  ;;  %v12765_v57 = vld [vmem:[#allocation6 + $0x580] sm:$0xf]  ;;  %v12286_v4 = vor.u32 %v17911_v18, %v12285_v9 }
  0xdb   :  { %v17895_v18 = vld [vmem:[#allocation6 + $0x15c] sm:$0xf0] }
  0xdc   :  { %v19998_v60 = vsub.f32 %v267_v10, %v19987_v2  ;;  %v20003_v1 = vsub.f32 %v268_v11, %v19987_v2  ;;  %v20017_v10 = vsub.f32 %v260_v27, %v318_v42  ;;  %v378_v11 = vadd.f32 %v377_v62, %v351_v12  ;;  %5986 = vmatpush.bf16.msra.mxu0 %v12286_v4 }
  0xdd   :  { %v20028_v17 = vsub.f32 %v269_v14, %v19987_v2  ;;  %v20044_v14 = vsub.f32 %v264_v47, %v318_v42  ;;  %v20051_v41 = vsub.f32 %v270_v19, %v19987_v2  ;;  %v354_v47 = vmul.f32 %v20013_v63, %v20013_v63  ;;  %v12253_v19 = vld [vmem:[#allocation6 + $0x180] sm:$0xf] }
  0xde   :  { %v362_v27 = vmul.f32 %v19998_v60, %v19998_v60  ;;  %v363_v31 = vmul.f32 %v20003_v1, %v20003_v1  ;;  %v379_v37 = vadd.f32 %v378_v11, %v352_v6  ;;  %v355_v34 = vmul.f32 %v20017_v10, %v20017_v10  ;;  %v17967_v42 = vld [vmem:[#allocation6 + $0x39c] sm:$0xf0] }
  0xdf   :  { %v20070_v51 = vsub.f32 %v271_v23, %v19987_v2  ;;  %v364_v45 = vmul.f32 %v20028_v17, %v20028_v17  ;;  %v12542_v12 = vor.u32 %v17975_v22, %v12541_v20  ;;  %v12798_v62 = vor.u32 %v18039_v28, %v12797_v24  ;;  %v18031_v6 = vld [vmem:[#allocation6 + $0x59c] sm:$0xf0] }
  0xe0   :  { %v380_v54 = vadd.f32 %v379_v37, %v353_v25  ;;  %v391_v3 = vadd.f32 %v363_v31, %v362_v27  ;;  %v13021_v11 = vld [vmem:[#allocation6 + $0x780] sm:$0xf]  ;;  %v20077_v25 = vsub.f32 %v272_v29, %v19987_v2  ;;  %v365_v23 = vmul.f32 %v20051_v41, %v20051_v41 }
  0xe1   :  { %v13054_v37 = vor.u32 %v18103_v7, %v13053_v30  ;;  %6000 = vmatpush.bf16.msra.mxu1 %v12542_v12  ;;  %v12254_v27 = vor.u32 %v17903_v40, %v12253_v19  ;;  %v12510_v9 = vor.u32 %v17967_v42, %v12509_v56  ;;  %v12221_v31 = vld [vmem:[#allocation6 + $0x140] sm:$0xf]  ;;  %6014 = vmatpush.bf16.msra.mxu2 %v12798_v62 }
  0xe2   :  { %v381_v61 = vadd.f32 %v380_v54, %v354_v47  ;;  %v392_v58 = vadd.f32 %v391_v3, %v364_v45  ;;  %v12766_v22 = vor.u32 %v18031_v6, %v12765_v57  ;;  %v13022_v24 = vor.u32 %v18095_v13, %v13021_v11  ;;  %v12477_v28 = vld [vmem:[#allocation6 + $0x340] sm:$0xf] }
  0xe3   :  { %6028 = vmatpush.bf16.msra.mxu3 %v13054_v37  ;;  %v12733_v29 = vld [vmem:[#allocation6 + $0x540] sm:$0xf]  ;;  %v357_v47 = vmul.f32 %v20032_v21, %v20032_v21  ;;  %v20086_v30 = vsub.f32 %v273_v33, %v19987_v2  ;;  %v366_v7 = vmul.f32 %v20070_v51, %v20070_v51  ;;  %v358_v13 = vmul.f32 %v20036_v15, %v20036_v15 }
  0xe4   :  { %v382_v20 = vadd.f32 %v381_v61, %v355_v34  ;;  %v393_v19 = vadd.f32 %v392_v58, %v365_v23  ;;  %v18023_v61 = vld [vmem:[#allocation6 + $0x55c] sm:$0xf0]  ;;  %v20095_v45 = vsub.f32 %v274_v39, %v19987_v2  ;;  %v367_v33 = vmul.f32 %v20077_v25, %v20077_v25  ;;  %5987 = vmatpush.bf16.msra.mxu0 %v12254_v27 }
  0xe5   :  { %v12989_v34 = vld [vmem:[#allocation6 + $0x740] sm:$0xf]  ;;  %6001 = vmatpush.bf16.msra.mxu1 %v12510_v9  ;;  %v12222_v42 = vor.u32 %v17895_v18, %v12221_v31  ;;  %v12478_v58 = vor.u32 %v17959_v16, %v12477_v28  ;;  %6015 = vmatpush.bf16.msra.mxu2 %v12766_v22  ;;  %v12734_v12 = vor.u32 %v18023_v61, %v12733_v29 }
  0xe6   :  { %v18087_v40 = vld [vmem:[#allocation6 + $0x75c] sm:$0xf0]  ;;  %v383_v54 = vadd.f32 %v382_v20, %v356_v52  ;;  %v394_v56 = vadd.f32 %v393_v19, %v366_v7  ;;  %v359_v39 = vmul.f32 %v20044_v14, %v20044_v14  ;;  %v20104_v11 = vsub.f32 %v275_v43, %v19987_v2 }
  0xe7   :  { %v12189_v57 = vld [vmem:[#allocation6 + $0x100] sm:$0xf]  ;;  %6029 = vmatpush.bf16.msra.mxu3 %v13022_v24  ;;  %v12990_v52 = vor.u32 %v18087_v40, %v12989_v34  ;;  %v368_v23 = vmul.f32 %v20086_v30, %v20086_v30  ;;  %v360_v18 = vmul.f32 %v20055_v32, %v20055_v32  ;;  %v20113_v22 = vsub.f32 %v276_v49, %v19987_v2 }
  0xe8   :  { %v17887_v3 = vld [vmem:[#allocation6 + $0x11c] sm:$0xf0]  ;;  %v384_v4 = vadd.f32 %v383_v54, %v357_v47  ;;  %v395_v37 = vadd.f32 %v394_v56, %v367_v33  ;;  %v369_v43 = vmul.f32 %v20095_v45, %v20095_v45  ;;  %5988 = vmatpush.bf16.msra.mxu0 %v12222_v42  ;;  %v20120_v49 = vsub.f32 %v277_v53, %v19987_v2 }
  0xe9   :  { %v12445_v62 = vld [vmem:[#allocation6 + $0x300] sm:$0xf]  ;;  %6002 = vmatpush.bf16.msra.mxu1 %v12478_v58  ;;  %v12190_v28 = vor.u32 %v17887_v3, %v12189_v57  ;;  %6016 = vmatpush.bf16.msra.mxu2 %v12734_v12  ;;  %v361_v58 = vmul.f32 %v20059_v35, %v20059_v35  ;;  %v21213_v3 = vunpack.c.h.bf16 %v19924_v46  ;;  %v371_v53 = vmul.f32 %v20113_v22, %v20113_v22 }
  0xea   :  { %v17951_v6 = vld [vmem:[#allocation6 + $0x31c] sm:$0xf0]  ;;  %v385_v20 = vadd.f32 %v384_v4, %v358_v13  ;;  %v396_v24 = vadd.f32 %v395_v37, %v368_v23  ;;  %v370_v13 = vmul.f32 %v20104_v11, %v20104_v11  ;;  %v21214_v23 = vunpack.c.l.bf16 %v19941_v55 }
  0xeb   :  { %v18015_v27 = vld [vmem:[#allocation6 + $0x51c] sm:$0xf0]  ;;  %v12446_v16 = vor.u32 %v17951_v6, %v12445_v62  ;;  %6030 = vmatpush.bf16.msra.mxu3 %v12990_v52  ;;  %v20129_v4 = vsub.f32 %v21213_v3, %v19987_v2  ;;  %v372_v46 = vmul.f32 %v20120_v49, %v20120_v49 }
  0xec   :  { %v12957_v9 = vld [vmem:[#allocation6 + $0x700] sm:$0xf]  ;;  %v386_v7 = vadd.f32 %v385_v20, %v359_v39  ;;  %v12702_v19 = vor.u32 %v18015_v27, %v12701_v26  ;;  %v397_v54 = vadd.f32 %v396_v24, %v369_v43  ;;  %5989 = vmatpush.bf16.msra.mxu0 %v12190_v28  ;;  %v20136_v37 = vsub.f32 %v21214_v23, %v19987_v2 }
  0xed   :  { %v18079_v31 = vld [vmem:[#allocation6 + $0x71c] sm:$0xf0]  ;;  %6003 = vmatpush.bf16.msra.mxu1 %v12446_v16 }
  0xee   :  { %v12157_v29 = vld [vmem:[#allocation6 + $0xc0] sm:$0xf]  ;;  %v12958_v61 = vor.u32 %v18079_v31, %v12957_v9  ;;  %v387_v57 = vadd.f32 %v386_v7, %v360_v18  ;;  %v398_v12 = vadd.f32 %v397_v54, %v370_v13  ;;  %6017 = vmatpush.bf16.msra.mxu2 %v12702_v19  ;;  %v21215_v9 = vunpack.c.h.bf16 %v19941_v55 }
  0xef   :  { %v17879_v47 = vld [vmem:[#allocation6 + $0xdc] sm:$0xf0]  ;;  %v373_v18 = vmul.f32 %v20129_v4, %v20129_v4  ;;  %v374_v43 = vmul.f32 %v20136_v37, %v20136_v37 }
  0xf0   :  { %v12413_v34 = vld [vmem:[#allocation6 + $0x2c0] sm:$0xf]  ;;  %v12158_v52 = vor.u32 %v17879_v47, %v12157_v29  ;;  %v388_v6 = vadd.f32 %v387_v57, %v361_v58  ;;  %6031 = vmatpush.bf16.msra.mxu3 %v12958_v61  ;;  %v399_v27 = vadd.f32 %v398_v12, %v371_v53  ;;  %v20143_v31 = vsub.f32 %v21215_v9, %v19987_v2 }
  0xf1   :  { %v17943_v40 = vld [vmem:[#allocation6 + $0x2dc] sm:$0xf0] }
  0xf2   :  { %v18007_v33 = vld [vmem:[#allocation6 + $0x4dc] sm:$0xf0]  ;;  %v12414_v62 = vor.u32 %v17943_v40, %v12413_v34  ;;  %389 = vadd.xlane.f32.xlu1 %v388_v6  ;;  %v400_v20 = vadd.f32 %v399_v27, %v372_v46  ;;  %5990 = vmatpush.bf16.msra.mxu0 %v12158_v52  ;;  %v375_v28 = vmul.f32 %v20143_v31, %v20143_v31 }
  0xf3   :  { %v12925_v56 = vld [vmem:[#allocation6 + $0x6c0] sm:$0xf]  ;;  %v12670_v26 = vor.u32 %v18007_v33, %v12669_v36 }
  0xf4   :  { %v18071_v42 = vld [vmem:[#allocation6 + $0x6dc] sm:$0xf0]  ;;  %6004 = vmatpush.bf16.msra.mxu1 %v12414_v62  ;;  %v401_v24 = vadd.f32 %v400_v20, %v373_v18 }
  0xf5   :  { %v12926_v39 = vor.u32 %v18071_v42, %v12925_v56  ;;  %6018 = vmatpush.bf16.msra.mxu2 %v12670_v26  ;;  %v12125_v55 = vld [vmem:[#allocation6 + $0x80] sm:$0xf] }
  0xf6   :  { %v402_v16 = vadd.f32 %v401_v24, %v374_v43  ;;  %v17871_v2 = vld [vmem:[#allocation6 + $0x9c] sm:$0xf0] }
  0xf7   :  { %6032 = vmatpush.bf16.msra.mxu3 %v12926_v39  ;;  %v12381_v47 = vld [vmem:[#allocation6 + $0x280] sm:$0xf]  ;;  %v12126_v7 = vor.u32 %v17871_v2, %v12125_v55 }
  0xf8   :  { %v403_v29 = vadd.f32 %v402_v16, %v375_v28  ;;  %v17935_v19 = vld [vmem:[#allocation6 + $0x29c] sm:$0xf0] }
  0xf9   :  { %v12637_v61 = vld [vmem:[#allocation6 + $0x480] sm:$0xf]  ;;  %v12382_v40 = vor.u32 %v17935_v19, %v12381_v47  ;;  %5991 = vmatpush.bf16.msra.mxu0 %v12126_v7 }
  0xfa   :  { %404 = vadd.xlane.f32.xlu1 %v403_v29  ;;  %v17999_v34 = vld [vmem:[#allocation6 + $0x49c] sm:$0xf0] }
  0xfb   :  { %v12638_v36 = vor.u32 %v17999_v34, %v12637_v61  ;;  %v12893_v13 = vld [vmem:[#allocation6 + $0x680] sm:$0xf]  ;;  %6005 = vmatpush.bf16.msra.mxu1 %v12382_v40 }
  0xfc   :  { %v18063_v54 = vld [vmem:[#allocation6 + $0x69c] sm:$0xf0] }
  0xfd   :  { %v12894_v33 = vor.u32 %v18063_v54, %v12893_v13  ;;  %6019 = vmatpush.bf16.msra.mxu2 %v12638_v36  ;;  %v12093_v56 = vld [vmem:[#allocation6 + $0x40] sm:$0xf] }
  0xfe   :  { %v17863_v42 = vld [vmem:[#allocation6 + $0x5c] sm:$0xf0] }
  0xff   :  { %v12349_v58 = vld [vmem:[#allocation6 + $0x240] sm:$0xf]  ;;  %6033 = vmatpush.bf16.msra.mxu3 %v12894_v33  ;;  %v12094_v57 = vor.u32 %v17863_v42, %v12093_v56 }
 0x100   :  { %v17927_v3 = vld [vmem:[#allocation6 + $0x25c] sm:$0xf0] }
 0x101   :  { %v12605_v53 = vld [vmem:[#allocation6 + $0x440] sm:$0xf]  ;;  %v12350_v52 = vor.u32 %v17927_v3, %v12349_v58  ;;  %5992 = vmatpush.bf16.msra.mxu0 %v12094_v57 }
 0x102   :  { %v17991_v12 = vld [vmem:[#allocation6 + $0x45c] sm:$0xf0] }
 0x103   :  { %v12606_v62 = vor.u32 %v17991_v12, %v12605_v53  ;;  %v12861_v6 = vld [vmem:[#allocation6 + $0x640] sm:$0xf]  ;;  %6006 = vmatpush.bf16.msra.mxu1 %v12350_v52 }
 0x104   :  { %v18055_v26 = vld [vmem:[#allocation6 + $0x65c] sm:$0xf0] }
 0x105   :  { %v12862_v39 = vor.u32 %v18055_v26, %v12861_v6  ;;  %6020 = vmatpush.bf16.msra.mxu2 %v12606_v62  ;;  %v12061_v23 = vld [vmem:[#allocation6] sm:$0xf] }
 0x106   :  { %v17855_v46 = vld [vmem:[#allocation6 + $0x1c] sm:$0xf0] }
 0x107   :  { %v12317_v27 = vld [vmem:[#allocation6 + $0x200] sm:$0xf]  ;;  %6034 = vmatpush.bf16.msra.mxu3 %v12862_v39  ;;  %v12062_v9 = vor.u32 %v17855_v46, %v12061_v23 }
 0x108   :  { %v17919_v18 = vld [vmem:[#allocation6 + $0x21c] sm:$0xf0] }
 0x109   :  { %v12573_v20 = vld [vmem:[#allocation6 + $0x400] sm:$0xf]  ;;  %v12318_v24 = vor.u32 %v17919_v18, %v12317_v27  ;;  %5993 = vmatpush.bf16.msra.mxu0 %v12062_v9 }
 0x10a   :  { %v17983_v43 = vld [vmem:[#allocation6 + $0x41c] sm:$0xf0] }
 0x10b   :  { %v12574_v28 = vor.u32 %v17983_v43, %v12573_v20  ;;  %v12829_v16 = vld [vmem:[#allocation6 + $0x600] sm:$0xf]  ;;  %6007 = vmatpush.bf16.msra.mxu1 %v12318_v24 }
 0x10c   :  { %v18047_v29 = vld [vmem:[#allocation6 + $0x61c] sm:$0xf0] }
 0x10d   :  { %v13309_v55 = vld [vmem:[#allocation6 + $0x9c0] sm:$0xf]  ;;  %v12830_v2 = vor.u32 %v18047_v29, %v12829_v16  ;;  %6021 = vmatpush.bf16.msra.mxu2 %v12574_v28 }
 0x10e   :  { %v18167_v47 = vld [vmem:[#allocation6 + $0x9dc] sm:$0xf0] }
 0x10f   :  { %v13565_v7 = vld [vmem:[#allocation6 + $0xbc0] sm:$0xf]  ;;  %v13310_v61 = vor.u32 %v18167_v47, %v13309_v55  ;;  %6035 = vmatpush.bf16.msra.mxu3 %v12830_v2 }
 0x110   :  { %v18231_v19 = vld [vmem:[#allocation6 + $0xbdc] sm:$0xf0] }
 0x111   :  { %v13566_v34 = vor.u32 %v18231_v19, %v13565_v7  ;;  %v13821_v40 = vld [vmem:[#allocation6 + $0xdc0] sm:$0xf]  ;;  %6042 = vmatpush.bf16.msrb.mxu0 %v13310_v61 }
 0x112   :  { %v18295_v36 = vld [vmem:[#allocation6 + $0xddc] sm:$0xf0] }
 0x113   :  { %v14077_v13 = vld [vmem:[#allocation6 + $0xfc0] sm:$0xf]  ;;  %v13822_v54 = vor.u32 %v18295_v36, %v13821_v40  ;;  %6056 = vmatpush.bf16.msrb.mxu1 %v13566_v34 }
 0x114   :  { %v18359_v33 = vld [vmem:[#allocation6 + $0xfdc] sm:$0xf0] }
 0x115   :  { %v13277_v56 = vld [vmem:[#allocation6 + $0x980] sm:$0xf]  ;;  %v14078_v58 = vor.u32 %v18359_v33, %v14077_v13  ;;  %6070 = vmatpush.bf16.msrb.mxu2 %v13822_v54 }
 0x116   :  { %v18159_v42 = vld [vmem:[#allocation6 + $0x99c] sm:$0xf0] }
 0x117   :  { %v13278_v57 = vor.u32 %v18159_v42, %v13277_v56  ;;  %v13533_v3 = vld [vmem:[#allocation6 + $0xb80] sm:$0xf]  ;;  %6084 = vmatpush.bf16.msrb.mxu3 %v14078_v58 }
 0x118   :  { %v18223_v53 = vld [vmem:[#allocation6 + $0xb9c] sm:$0xf0] }
 0x119   :  { %v13789_v12 = vld [vmem:[#allocation6 + $0xd80] sm:$0xf]  ;;  %v13534_v52 = vor.u32 %v18223_v53, %v13533_v3  ;;  %6043 = vmatpush.bf16.msrb.mxu0 %v13278_v57 }
 0x11a   :  { %v18287_v62 = vld [vmem:[#allocation6 + $0xd9c] sm:$0xf0] }
 0x11b   :  { %v14045_v6 = vld [vmem:[#allocation6 + $0xf80] sm:$0xf]  ;;  %v13790_v39 = vor.u32 %v18287_v62, %v13789_v12  ;;  %6057 = vmatpush.bf16.msrb.mxu1 %v13534_v52 }
 0x11c   :  { %v18351_v26 = vld [vmem:[#allocation6 + $0xf9c] sm:$0xf0] }
 0x11d   :  { %v14046_v23 = vor.u32 %v18351_v26, %v14045_v6  ;;  %v13245_v46 = vld [vmem:[#allocation6 + $0x940] sm:$0xf]  ;;  %6071 = vmatpush.bf16.msrb.mxu2 %v13790_v39 }
 0x11e   :  { %v18151_v27 = vld [vmem:[#allocation6 + $0x95c] sm:$0xf0] }
 0x11f   :  { %v13501_v9 = vld [vmem:[#allocation6 + $0xb40] sm:$0xf]  ;;  %v13246_v18 = vor.u32 %v18151_v27, %v13245_v46  ;;  %6085 = vmatpush.bf16.msrb.mxu3 %v14046_v23 }
 0x120   :  { %v18215_v20 = vld [vmem:[#allocation6 + $0xb5c] sm:$0xf0] }
 0x121   :  { %v13757_v43 = vld [vmem:[#allocation6 + $0xd40] sm:$0xf]  ;;  %v13502_v28 = vor.u32 %v18215_v20, %v13501_v9  ;;  %6044 = vmatpush.bf16.msrb.mxu0 %v13246_v18 }
 0x122   :  { %v18279_v24 = vld [vmem:[#allocation6 + $0xd5c] sm:$0xf0] }
 0x123   :  { %v13758_v16 = vor.u32 %v18279_v24, %v13757_v43  ;;  %v14013_v29 = vld [vmem:[#allocation6 + $0xf40] sm:$0xf]  ;;  %6058 = vmatpush.bf16.msrb.mxu1 %v13502_v28 }
 0x124   :  { %v18343_v55 = vld [vmem:[#allocation6 + $0xf5c] sm:$0xf0] }
 0x125   :  { %v14014_v2 = vor.u32 %v18343_v55, %v14013_v29  ;;  %v13213_v47 = vld [vmem:[#allocation6 + $0x900] sm:$0xf]  ;;  %6072 = vmatpush.bf16.msrb.mxu2 %v13758_v16 }
 0x126   :  { %v18143_v7 = vld [vmem:[#allocation6 + $0x91c] sm:$0xf0] }
 0x127   :  { %v13469_v19 = vld [vmem:[#allocation6 + $0xb00] sm:$0xf]  ;;  %v13214_v61 = vor.u32 %v18143_v7, %v13213_v47  ;;  %6086 = vmatpush.bf16.msrb.mxu3 %v14014_v2 }
 0x128   :  { %v18207_v34 = vld [vmem:[#allocation6 + $0xb1c] sm:$0xf0] }
 0x129   :  { %v13725_v40 = vld [vmem:[#allocation6 + $0xd00] sm:$0xf]  ;;  %v13470_v13 = vor.u32 %v18207_v34, %v13469_v19  ;;  %6045 = vmatpush.bf16.msrb.mxu0 %v13214_v61 }
 0x12a   :  { %v18271_v36 = vld [vmem:[#allocation6 + $0xd1c] sm:$0xf0] }
 0x12b   :  { %v13726_v54 = vor.u32 %v18271_v36, %v13725_v40  ;;  %v13981_v33 = vld [vmem:[#allocation6 + $0xf00] sm:$0xf]  ;;  %6059 = vmatpush.bf16.msrb.mxu1 %v13470_v13 }
 0x12c   :  { %v18335_v56 = vld [vmem:[#allocation6 + $0xf1c] sm:$0xf0] }
 0x12d   :  { %v13982_v42 = vor.u32 %v18335_v56, %v13981_v33  ;;  %v13181_v58 = vld [vmem:[#allocation6 + $0x8c0] sm:$0xf]  ;;  %6073 = vmatpush.bf16.msrb.mxu2 %v13726_v54 }
 0x12e   :  { %v18135_v57 = vld [vmem:[#allocation6 + $0x8dc] sm:$0xf0] }
 0x12f   :  { %v13437_v3 = vld [vmem:[#allocation6 + $0xac0] sm:$0xf]  ;;  %v13182_v53 = vor.u32 %v18135_v57, %v13181_v58  ;;  %6087 = vmatpush.bf16.msrb.mxu3 %v13982_v42 }
 0x130   :  { %v18199_v12 = vld [vmem:[#allocation6 + $0xadc] sm:$0xf0] }
 0x131   :  { %v13693_v52 = vld [vmem:[#allocation6 + $0xcc0] sm:$0xf]  ;;  %v13438_v6 = vor.u32 %v18199_v12, %v13437_v3  ;;  %6046 = vmatpush.bf16.msrb.mxu0 %v13182_v53 }
 0x132   :  { %v18263_v62 = vld [vmem:[#allocation6 + $0xcdc] sm:$0xf0] }
 0x133   :  { %v13694_v26 = vor.u32 %v18263_v62, %v13693_v52  ;;  %v13949_v39 = vld [vmem:[#allocation6 + $0xec0] sm:$0xf]  ;;  %6060 = vmatpush.bf16.msrb.mxu1 %v13438_v6 }
 0x134   :  { %v18327_v23 = vld [vmem:[#allocation6 + $0xedc] sm:$0xf0] }
 0x135   :  { %v13950_v46 = vor.u32 %v18327_v23, %v13949_v39  ;;  %v13149_v27 = vld [vmem:[#allocation6 + $0x880] sm:$0xf]  ;;  %6074 = vmatpush.bf16.msrb.mxu2 %v13694_v26 }
 0x136   :  { %v18127_v9 = vld [vmem:[#allocation6 + $0x89c] sm:$0xf0] }
 0x137   :  { %v13405_v18 = vld [vmem:[#allocation6 + $0xa80] sm:$0xf]  ;;  %v13150_v20 = vor.u32 %v18127_v9, %v13149_v27  ;;  %6088 = vmatpush.bf16.msrb.mxu3 %v13950_v46 }
 0x138   :  { %v18191_v43 = vld [vmem:[#allocation6 + $0xa9c] sm:$0xf0] }
 0x139   :  { %v13661_v24 = vld [vmem:[#allocation6 + $0xc80] sm:$0xf]  ;;  %v13406_v16 = vor.u32 %v18191_v43, %v13405_v18  ;;  %6047 = vmatpush.bf16.msrb.mxu0 %v13150_v20 }
 0x13a   :  { %v18255_v28 = vld [vmem:[#allocation6 + $0xc9c] sm:$0xf0] }
 0x13b   :  { %v13662_v29 = vor.u32 %v18255_v28, %v13661_v24  ;;  %v13917_v55 = vld [vmem:[#allocation6 + $0xe80] sm:$0xf]  ;;  %6061 = vmatpush.bf16.msrb.mxu1 %v13406_v16 }
 0x13c   :  { %v18319_v2 = vld [vmem:[#allocation6 + $0xe9c] sm:$0xf0] }
 0x13d   :  { %v13117_v47 = vld [vmem:[#allocation6 + $0x840] sm:$0xf]  ;;  %v13918_v19 = vor.u32 %v18319_v2, %v13917_v55  ;;  %6075 = vmatpush.bf16.msrb.mxu2 %v13662_v29 }
 0x13e   :  { %v18119_v61 = vld [vmem:[#allocation6 + $0x85c] sm:$0xf0] }
 0x13f   :  { %v13373_v34 = vld [vmem:[#allocation6 + $0xa40] sm:$0xf]  ;;  %v13118_v56 = vor.u32 %v18119_v61, %v13117_v47  ;;  %6089 = vmatpush.bf16.msrb.mxu3 %v13918_v19 }
 0x140   :  { %v18183_v40 = vld [vmem:[#allocation6 + $0xa5c] sm:$0xf0] }
 0x141   :  { %v13629_v13 = vld [vmem:[#allocation6 + $0xc40] sm:$0xf]  ;;  %v13374_v42 = vor.u32 %v18183_v40, %v13373_v34  ;;  %6048 = vmatpush.bf16.msrb.mxu0 %v13118_v56  ;;  %v20153_v34 = vld [vmem:[#allocation2] sm:$0xff]  ;;  %v20161_v56 = vld [vmem:[#allocation4] sm:$0xff] }
 0x142   :  { %v18247_v54 = vld [vmem:[#allocation6 + $0xc5c] sm:$0xf0] }
 0x143   :  { %v13885_v33 = vld [vmem:[#allocation6 + $0xe40] sm:$0xf]  ;;  %v13630_v12 = vor.u32 %v18247_v54, %v13629_v13  ;;  %6062 = vmatpush.bf16.msrb.mxu1 %v13374_v42  ;;  %v462_v13 = vperm.slane %v20153_v34, 0  ;;  %v463_v54 = vperm.slane %v20153_v34, 1  ;;  %v464_v42 = vperm.slane %v20153_v34, 2 }
 0x144   :  { %v18311_v58 = vld [vmem:[#allocation6 + $0xe5c] sm:$0xf0] }
 0x145   :  { %v13085_v57 = vld [vmem:[#allocation6 + $0x800] sm:$0xf]  ;;  %v13886_v6 = vor.u32 %v18311_v58, %v13885_v33  ;;  %6076 = vmatpush.bf16.msrb.mxu2 %v13630_v12  ;;  %v465_v58 = vperm.slane %v20153_v34, 3 }
 0x146   :  { %v18111_v3 = vld [vmem:[#allocation6 + $0x81c] sm:$0xf0] }
 0x147   :  { %v13341_v52 = vld [vmem:[#allocation6 + $0xa00] sm:$0xf]  ;;  %v13086_v27 = vor.u32 %v18111_v3, %v13085_v57  ;;  %6090 = vmatpush.bf16.msrb.mxu3 %v13886_v6  ;;  %v523_v6 = vperm.slane %v20161_v56, 1 }
 0x148   :  { %v18175_v62 = vld [vmem:[#allocation6 + $0xa1c] sm:$0xf0] }
 0x149   :  { %v13597_v26 = vld [vmem:[#allocation6 + $0xc00] sm:$0xf]  ;;  %v13342_v9 = vor.u32 %v18175_v62, %v13341_v52  ;;  %6049 = vmatpush.bf16.msrb.mxu0 %v13086_v27 }
 0x14a   :  { %v18239_v39 = vld [vmem:[#allocation6 + $0xc1c] sm:$0xf0] }
 0x14b   :  { %v13853_v23 = vld [vmem:[#allocation6 + $0xe00] sm:$0xf]  ;;  %v13598_v18 = vor.u32 %v18239_v39, %v13597_v26  ;;  %6063 = vmatpush.bf16.msrb.mxu1 %v13342_v9  ;;  %v524_v26 = vperm.slane %v20161_v56, 2  ;;  %v525_v39 = vperm.slane %v20161_v56, 3 }
 0x14c   :  { %v18303_v46 = vld [vmem:[#allocation6 + $0xe1c] sm:$0xf0] }
 0x14d   :  { %v13854_v20 = vor.u32 %v18303_v46, %v13853_v23  ;;  %6077 = vmatpush.bf16.msrb.mxu2 %v13598_v18 }
 0x14f   :  { %6091 = vmatpush.bf16.msrb.mxu3 %v13854_v20  ;;  %v14333_v20 = vld [vmem:[#allocation6 + $0x11c0] sm:$0xf] }
 0x165   :  { %v390_v7 = vpop.xlane.xlu1 %389 }
 0x166   :  { %v406_v36 = vmul.f32 %v390_v7, %v19963_v38 }
 0x168   :  { %v408_v53 = vadd.f32 1e-05, %v406_v36 }
 0x16a   :  { %19327 = vrsqrt.f32 %v408_v53  ;;  %vm416_vm2 = vweird.f32 %v408_v53 }
 0x16d   :  { %v405_v43 = vpop.xlane.xlu1 %404 }
 0x16e   :  { %v407_v24 = vmul.f32 %v405_v43, %v19963_v38  ;;  %v466_v43 = vperm.slane %v20153_v34, 4 }
 0x170   :  { %v19328_v28 = vpop.eup %19327  ;;  %v409_v29 = vadd.f32 1e-05, %v407_v24  ;;  %v526_v24 = vperm.slane %v20161_v56, 4 }
 0x171   :  { %v411_v16 = vmul.f32 %v19328_v28, %v408_v53  ;;  %vm417_vm1 = vweird.f32 %v19328_v28 }
 0x172   :  { %19329 = vrsqrt.f32 %v409_v29  ;;  %vm418_vm3 = vmor %vm416_vm2, %vm417_vm1  ;;  %vm426_vm5 = vweird.f32 %v409_v29 }
 0x173   :  { %v412_v55 = vmul.f32 %v19328_v28, %v411_v16 }
 0x175   :  { %v413_v2 = vmul.f32 0.5, %v412_v55 }
 0x177   :  { %v414_v47 = vsub.f32 1.5, %v413_v2  ;;  %v18423_v2 = vld [vmem:[#allocation6 + $0x11dc] sm:$0xf0] }
 0x178   :  { %v19330_v7 = vpop.eup %19329 }
 0x179   :  { %v415_v19 = vmul.f32 %v19328_v28, %v414_v47  ;;  %v421_v61 = vmul.f32 %v19330_v7, %v409_v29  ;;  %vm427_vm4 = vweird.f32 %v19330_v7  ;;  %v18487_v47 = vld [vmem:[#allocation6 + $0x13dc] sm:$0xf0] }
 0x17a   :  { %vm428_vm6 = vmor %vm426_vm5, %vm427_vm4 }
 0x17b   :  { %v20155_v38 = vsel %vm418_vm3, %v19328_v28, %v415_v19  ;;  %v422_v40 = vmul.f32 %v19330_v7, %v421_v61 }
 0x17c   :  { %v430_v33 = vmul.f32 %v20155_v38, %v19968_v44  ;;  %v431_v3 = vmul.f32 %v20155_v38, %v19972_v48  ;;  %v432_v53 = vmul.f32 %v20155_v38, %v19976_v50  ;;  %v433_v12 = vmul.f32 %v20155_v38, %v19984_v59 }
 0x17d   :  { %v423_v36 = vmul.f32 0.5, %v422_v40  ;;  %v522_v44 = vperm.slane %v20161_v56, 0 }
 0x17e   :  { %v490_v62 = vmul.f32 %v462_v13, %v430_v33  ;;  %v491_v48 = vmul.f32 %v463_v54, %v431_v3  ;;  %v492_v46 = vmul.f32 %v464_v42, %v432_v53  ;;  %v493_v50 = vmul.f32 %v465_v58, %v433_v12  ;;  %v15101_v3 = vld [vmem:[#allocation6 + $0x17c0] sm:$0xf] }
 0x17f   :  { %v424_v57 = vsub.f32 1.5, %v423_v36  ;;  %v18615_v53 = vld [vmem:[#allocation6 + $0x17dc] sm:$0xf0]  ;;  %v14334_v12 = vor.u32 %v18423_v2, %v14333_v20  ;;  %v527_v20 = vperm.slane %v20161_v56, 5  ;;  %v20205_v2 = vld [vmem:[#allocation4 + $0x8] sm:$0x3f] }
 0x180   :  { %v552_v19 = vadd.f32 %v524_v26, %v492_v46  ;;  %v553_v61 = vadd.f32 %v525_v39, %v493_v50  ;;  %v15102_v50 = vor.u32 %v18615_v53, %v15101_v3  ;;  %v15037_v3 = vld [vmem:[#allocation6 + $0x1740] sm:$0xf] }
 0x181   :  { %v425_v52 = vmul.f32 %v19330_v7, %v424_v57  ;;  %v18551_v57 = vld [vmem:[#allocation6 + $0x15dc] sm:$0xf0] }
 0x182   :  { %v18599_v53 = vld [vmem:[#allocation6 + $0x175c] sm:$0xf0] }
 0x183   :  { %v20175_v23 = vsel %vm428_vm6, %v19330_v7, %v425_v52  ;;  %v550_v7 = vadd.f32 %v522_v44, %v490_v62 }
 0x184   :  { %v444_v59 = vmul.f32 %v20175_v23, %v19998_v60  ;;  %v445_v27 = vmul.f32 %v20175_v23, %v20003_v1  ;;  %v446_v9 = vmul.f32 %v20175_v23, %v20028_v17  ;;  %v447_v18 = vmul.f32 %v20175_v23, %v20051_v41  ;;  %v14589_v60 = vld [vmem:[#allocation6 + $0x13c0] sm:$0xf] }
 0x185   :  { %v551_v1 = vadd.f32 %v523_v6, %v491_v48  ;;  %v14845_v17 = vld [vmem:[#allocation6 + $0x15c0] sm:$0xf] }
 0x186   :  { %v504_v28 = vmul.f32 %v462_v13, %v444_v59  ;;  %v505_v16 = vmul.f32 %v463_v54, %v445_v27  ;;  %v506_v29 = vmul.f32 %v464_v42, %v446_v9  ;;  %v507_v55 = vmul.f32 %v465_v58, %v447_v18  ;;  %v14301_v54 = vld [vmem:[#allocation6 + $0x1180] sm:$0xf] }
 0x187   :  { %v14590_v13 = vor.u32 %v18487_v47, %v14589_v60  ;;  %v18415_v42 = vld [vmem:[#allocation6 + $0x119c] sm:$0xf0]  ;;  %v14846_v46 = vor.u32 %v18551_v57, %v14845_v17  ;;  %v467_v18 = vperm.slane %v20153_v34, 5  ;;  %v449_v57 = vmul.f32 %v20175_v23, %v20077_v25 }
 0x188   :  { %v564_v40 = vadd.f32 %v522_v44, %v504_v28  ;;  %v565_v36 = vadd.f32 %v523_v6, %v505_v16  ;;  %v566_v41 = vadd.f32 %v524_v26, %v506_v29  ;;  %v567_v33 = vadd.f32 %v525_v39, %v507_v55  ;;  %v14557_v58 = vld [vmem:[#allocation6 + $0x1380] sm:$0xf]  ;;  %v20195_v39 = vld [vmem:[#allocation2 + $0x8] sm:$0x3f] }
 0x189   :  { %v18479_v44 = vld [vmem:[#allocation6 + $0x139c] sm:$0xf0]  ;;  %v468_v28 = vperm.slane %v20153_v34, 6  ;;  %v528_v16 = vperm.slane %v20161_v56, 6  ;;  %v469_v29 = vperm.slane %v20153_v34, 7  ;;  %v529_v55 = vperm.slane %v20161_v56, 7 }
 0x18a   :  { %v20187_v52 = vpack.c.bf16 %v564_v40, %v550_v7  ;;  %v20189_v59 = vpack.c.bf16 %v565_v36, %v551_v1  ;;  %v20191_v62 = vpack.c.bf16 %v566_v41, %v552_v19  ;;  %v20193_v48 = vpack.c.bf16 %v567_v33, %v553_v61  ;;  %v14813_v6 = vld [vmem:[#allocation6 + $0x1580] sm:$0xf] }
 0x18b   :  { %v18543_v26 = vld [vmem:[#allocation6 + $0x159c] sm:$0xf0]  ;;  %v14302_v60 = vor.u32 %v18415_v42, %v14301_v54  ;;  %v14558_v47 = vor.u32 %v18479_v44, %v14557_v58  ;;  %v448_v33 = vmul.f32 %v20175_v23, %v20070_v51  ;;  %v434_v54 = vmul.f32 %v20155_v38, %v19991_v0 }
 0x18c   :  { %v15069_v27 = vld [vmem:[#allocation6 + $0x1780] sm:$0xf]  ;;  %5994 = vmatmul.bf16.vlgmr.msra.gmra.mxu0 %v20187_v52  ;;  %6008 = vmatmul.bf16.vlgmr.msra.gmra.mxu1 %v20189_v59  ;;  %v14814_v7 = vor.u32 %v18543_v26, %v14813_v6  ;;  %v435_v51 = vmul.f32 %v20155_v38, %v20007_v8  ;;  %v436_v25 = vmul.f32 %v20155_v38, %v20013_v63 }
 0x18d   :  { %v18607_v9 = vld [vmem:[#allocation6 + $0x179c] sm:$0xf0]  ;;  %6022 = vmatmul.bf16.vlgmr.msra.gmra.mxu2 %v20191_v62  ;;  %6036 = vmatmul.bf16.vlgmr.msra.gmra.mxu3 %v20193_v48  ;;  %v508_v63 = vmul.f32 %v466_v43, %v448_v33  ;;  %v509_v58 = vmul.f32 %v467_v18, %v449_v57 }
 0x18e   :  { %v14269_v1 = vld [vmem:[#allocation6 + $0x1140] sm:$0xf]  ;;  %6098 = vmatpush.bf16.msra.mxu0 %v14334_v12  ;;  %6112 = vmatpush.bf16.msra.mxu1 %v14590_v13  ;;  %v15070_v17 = vor.u32 %v18607_v9, %v15069_v27  ;;  %v450_v12 = vmul.f32 %v20175_v23, %v20086_v30  ;;  %v451_v13 = vmul.f32 %v20175_v23, %v20095_v45 }
 0x18f   :  { %v18407_v19 = vld [vmem:[#allocation6 + $0x115c] sm:$0xf0]  ;;  %6126 = vmatpush.bf16.msra.mxu2 %v14846_v46  ;;  %6140 = vmatpush.bf16.msra.mxu3 %v15102_v50  ;;  %v437_v45 = vmul.f32 %v20155_v38, %v20017_v10  ;;  %v15038_v27 = vor.u32 %v18599_v53, %v15037_v3 }
 0x190   :  { %v14525_v61 = vld [vmem:[#allocation6 + $0x1340] sm:$0xf]  ;;  %v14270_v6 = vor.u32 %v18407_v19, %v14269_v1 }
 0x191   :  { %v18471_v40 = vld [vmem:[#allocation6 + $0x135c] sm:$0xf0]  ;;  %v497_v57 = vmul.f32 %v469_v29, %v437_v45 }
 0x192   :  { %v14781_v36 = vld [vmem:[#allocation6 + $0x1540] sm:$0xf]  ;;  %v14526_v0 = vor.u32 %v18471_v40, %v14525_v61  ;;  %6099 = vmatpush.bf16.msra.mxu0 %v14302_v60  ;;  %6113 = vmatpush.bf16.msra.mxu1 %v14558_v47  ;;  %v494_v61 = vmul.f32 %v466_v43, %v434_v54  ;;  %v510_v40 = vmul.f32 %v468_v28, %v450_v12 }
 0x193   :  { %v18535_v41 = vld [vmem:[#allocation6 + $0x155c] sm:$0xf0]  ;;  %6127 = vmatpush.bf16.msra.mxu2 %v14814_v7  ;;  %6141 = vmatpush.bf16.msra.mxu3 %v15070_v17  ;;  %v495_v60 = vmul.f32 %v467_v18, %v435_v51  ;;  %v496_v47 = vmul.f32 %v468_v28, %v436_v25  ;;  %v568_v28 = vadd.f32 %v526_v24, %v508_v63 }
 0x194   :  { %v14782_v26 = vor.u32 %v18535_v41, %v14781_v36  ;;  %v14237_v46 = vld [vmem:[#allocation6 + $0x1100] sm:$0xf]  ;;  %v511_v36 = vmul.f32 %v469_v29, %v451_v13  ;;  %v569_v54 = vadd.f32 %v527_v20, %v509_v58  ;;  %v554_v29 = vadd.f32 %v526_v24, %v494_v61 }
 0x195   :  { %v18399_v30 = vld [vmem:[#allocation6 + $0x111c] sm:$0xf0]  ;;  %v570_v51 = vadd.f32 %v528_v16, %v510_v40  ;;  %v555_v58 = vadd.f32 %v527_v20, %v495_v60  ;;  %v475_v60 = vperm.slane %v20195_v39, 5 }
 0x196   :  { %v14493_v50 = vld [vmem:[#allocation6 + $0x1300] sm:$0xf]  ;;  %v14238_v33 = vor.u32 %v18399_v30, %v14237_v46  ;;  %6100 = vmatpush.bf16.msra.mxu0 %v14270_v6  ;;  %6114 = vmatpush.bf16.msra.mxu1 %v14526_v0  ;;  %v571_v25 = vadd.f32 %v529_v55, %v511_v36  ;;  %v531_v6 = vperm.slane %v20205_v2, 1  ;;  %v556_v0 = vadd.f32 %v528_v16, %v496_v47 }
 0x197   :  { %v18463_v8 = vld [vmem:[#allocation6 + $0x131c] sm:$0xf0]  ;;  %6128 = vmatpush.bf16.msra.mxu2 %v14782_v26  ;;  %6142 = vmatpush.bf16.msra.mxu3 %v15038_v27  ;;  %v20286_v63 = vpack.c.bf16 %v569_v54, %v555_v58  ;;  %v532_v54 = vperm.slane %v20205_v2, 2 }
 0x198   :  { %v14749_v9 = vld [vmem:[#allocation6 + $0x1500] sm:$0xf]  ;;  %v14494_v7 = vor.u32 %v18463_v8, %v14493_v50  ;;  %v557_v50 = vadd.f32 %v529_v55, %v497_v57  ;;  %v534_v57 = vperm.slane %v20205_v2, 4 }
 0x199   :  { %v18527_v42 = vld [vmem:[#allocation6 + $0x151c] sm:$0xf0] }
 0x19a   :  { %v15005_v1 = vld [vmem:[#allocation6 + $0x1700] sm:$0xf]  ;;  %v14750_v17 = vor.u32 %v18527_v42, %v14749_v9  ;;  %6101 = vmatpush.bf16.msra.mxu0 %v14238_v33  ;;  %6115 = vmatpush.bf16.msra.mxu1 %v14494_v7  ;;  %v20284_v9 = vpack.c.bf16 %v568_v28, %v554_v29  ;;  %v20295_v61 = vpack.c.bf16 %v571_v25, %v557_v50  ;;  %v535_v28 = vperm.slane %v20205_v2, 5 }
 0x19b   :  { %v18591_v19 = vld [vmem:[#allocation6 + $0x171c] sm:$0xf0]  ;;  %v443_v33 = vmul.f32 %v20155_v38, %v20059_v35  ;;  %v452_v29 = vmul.f32 %v20175_v23, %v20104_v11  ;;  %v454_v25 = vmul.f32 %v20175_v23, %v20120_v49 }
 0x19c   :  { %v20232_v10 = vld [vmem:[#allocation6 + $0x10c0] sm:$0xf]  ;;  %v15006_v18 = vor.u32 %v18591_v19, %v15005_v1  ;;  %v474_v1 = vperm.slane %v20195_v39, 4  ;;  %6129 = vmatpush.bf16.msra.mxu2 %v14750_v17  ;;  %v20293_v19 = vpack.c.bf16 %v570_v51, %v556_v0  ;;  %6050 = vmatmul.bf16.vlgmr.msrb.gmra.mxu0 %v20284_v9  ;;  %v20323_v17 = vmul.f32 %v20155_v38, %v20032_v21 }
 0x19d   :  { %v20234_v41 = vld [vmem:[#allocation6 + $0x10dc] sm:$0xf0]  ;;  %6064 = vmatmul.bf16.vlgmr.msrb.gmra.mxu1 %v20286_v63  ;;  %6092 = vmatmul.bf16.vlgmr.msrb.gmra.mxu3 %v20295_v61  ;;  %v453_v51 = vmul.f32 %v20175_v23, %v20113_v22  ;;  %v440_v22 = vmul.f32 %v20155_v38, %v20036_v15  ;;  %v21217_v15 = vperm.slane %v20195_v39, 1 }
 0x19e   :  { %v20236_v3 = vld [vmem:[#allocation6 + $0x12c0] sm:$0xf]  ;;  %v14206_v26 = vor.u32 %v20234_v41, %v20232_v10  ;;  %6143 = vmatpush.bf16.msra.mxu3 %v15006_v18  ;;  %v472_v41 = vperm.slane %v20195_v39, 2  ;;  %6078 = vmatmul.bf16.vlgmr.msrb.gmra.mxu2 %v20293_v19 }
 0x19f   :  { %v20238_v53 = vld [vmem:[#allocation6 + $0x12dc] sm:$0xf0] }
 0x1a0   :  { %v20240_v44 = vld [vmem:[#allocation6 + $0x14c0] sm:$0xf]  ;;  %v14462_v24 = vor.u32 %v20238_v53, %v20236_v3  ;;  %v442_v3 = vmul.f32 %v20155_v38, %v20055_v32  ;;  %v456_v53 = vmul.f32 %v20175_v23, %v20136_v37  ;;  %v457_v32 = vmul.f32 %v20175_v23, %v20143_v31  ;;  %6102 = vmatpush.bf16.msra.mxu0 %v14206_v26 }
 0x1a1   :  { %v20242_v34 = vld [vmem:[#allocation6 + $0x14dc] sm:$0xf0]  ;;  %v503_v31 = vmul.f32 %v475_v60, %v443_v33 }
 0x1a2   :  { %v20244_v43 = vld [vmem:[#allocation6 + $0x16c0] sm:$0xf]  ;;  %v14718_v45 = vor.u32 %v20242_v34, %v20240_v44  ;;  %v20290_v44 = vmul.f32 %v20155_v38, %v20021_v5  ;;  %6116 = vmatpush.bf16.msra.mxu1 %v14462_v24  ;;  %v502_v18 = vmul.f32 %v474_v1, %v442_v3  ;;  %v517_v58 = vmul.f32 %v475_v60, %v457_v32 }
 0x1a3   :  { %v18583_v12 = vld [vmem:[#allocation6 + $0x16dc] sm:$0xf0] }
 0x1a4   :  { %v20250_v13 = vld [vmem:[#allocation6 + $0x1080] sm:$0xf]  ;;  %v14974_v20 = vor.u32 %v18583_v12, %v20244_v43  ;;  %6130 = vmatpush.bf16.msra.mxu2 %v14718_v45  ;;  %v516_v12 = vmul.f32 %v474_v1, %v456_v53  ;;  %v562_v50 = vadd.f32 %v534_v57, %v502_v18  ;;  %v577_v49 = vadd.f32 %v535_v28, %v517_v58 }
 0x1a5   :  { %v20252_v42 = vld [vmem:[#allocation6 + $0x109c] sm:$0xf0]  ;;  %v441_v1 = vmul.f32 %v20155_v38, %v20044_v14  ;;  %v21220_v58 = vperm.slane %v20205_v2, 0 }
 0x1a6   :  { %v20269_v46 = vld [vmem:[#allocation6 + $0x1280] sm:$0xf]  ;;  %v14174_v16 = vor.u32 %v20252_v42, %v20250_v13  ;;  %6144 = vmatpush.bf16.msra.mxu3 %v14974_v20  ;;  %v576_v45 = vadd.f32 %v534_v57, %v516_v12  ;;  %v17907_v57 = vld [vmem:[#allocation6 + $0x1c4] sm:$0xf]  ;;  %v21219_v12 = vmov %v21217_v15 }
 0x1a7   :  { %v20271_v30 = vld [vmem:[#allocation6 + $0x129c] sm:$0xf0] }
 0x1a8   :  { %v20280_v27 = vld [vmem:[#allocation6 + $0x1480] sm:$0xf]  ;;  %v14430_v40 = vor.u32 %v20271_v30, %v20269_v46  ;;  %v455_v30 = vmul.f32 %v20175_v23, %v20129_v4  ;;  %6103 = vmatpush.bf16.msra.mxu0 %v14174_v16  ;;  %v473_v4 = vperm.slane %v20195_v39, 3  ;;  %v20347_v23 = vpack.c.bf16 %v576_v45, %v562_v50  ;;  %v17899_v50 = vld [vmem:[#allocation6 + $0x184] sm:$0xf] }
 0x1a9   :  { %v20282_v8 = vld [vmem:[#allocation6 + $0x149c] sm:$0xf0]  ;;  %v21221_v45 = vmov %v21220_v58 }
 0x1aa   :  { %v14941_v56 = vld [vmem:[#allocation6 + $0x1680] sm:$0xf]  ;;  %v14686_v7 = vor.u32 %v20282_v8, %v20280_v27  ;;  %6117 = vmatpush.bf16.msra.mxu1 %v14430_v40  ;;  %v563_v8 = vadd.f32 %v535_v28, %v503_v31  ;;  %v515_v32 = vmul.f32 %v473_v4, %v455_v30  ;;  %v499_v31 = vmul.f32 %v21219_v12, %v20323_v17  ;;  %v17947_v12 = vld [vmem:[#allocation6 + $0x304] sm:$0xf] }
 0x1ab   :  { %v18575_v55 = vld [vmem:[#allocation6 + $0x169c] sm:$0xf0] }
 0x1ac   :  { %v20299_v36 = vld [vmem:[#allocation6 + $0x1040] sm:$0xf]  ;;  %v14942_v37 = vor.u32 %v18575_v55, %v14941_v56  ;;  %6131 = vmatpush.bf16.msra.mxu2 %v14686_v7  ;;  %v20355_v3 = vpack.c.bf16 %v577_v49, %v563_v8  ;;  %v17963_v8 = vld [vmem:[#allocation6 + $0x384] sm:$0xf] }
 0x1ad   :  { %v20301_v10 = vld [vmem:[#allocation6 + $0x105c] sm:$0xf0]  ;;  %v12511_v49 = vld [vmem:[#allocation6 + $0x3a0] sm:$0xf0] }
 0x1ae   :  { %v20306_v5 = vld [vmem:[#allocation6 + $0x1240] sm:$0xf]  ;;  %v14142_v35 = vor.u32 %v20301_v10, %v20299_v36  ;;  %6145 = vmatpush.bf16.msra.mxu3 %v14942_v37  ;;  %v21216_v10 = vperm.slane %v20195_v39, 0  ;;  %v12287_v37 = vld [vmem:[#allocation6 + $0x1e0] sm:$0xf0] }
 0x1af   :  { %v20308_v47 = vld [vmem:[#allocation6 + $0x125c] sm:$0xf0] }
 0x1b0   :  { %v14653_v34 = vld [vmem:[#allocation6 + $0x1440] sm:$0xf]  ;;  %v14398_v21 = vor.u32 %v20308_v47, %v20306_v5  ;;  %v512_v60 = vmul.f32 %v21216_v10, %v452_v29  ;;  %v513_v5 = vmul.f32 %v21217_v15, %v453_v51  ;;  %v514_v47 = vmul.f32 %v472_v41, %v454_v25  ;;  %6104 = vmatpush.bf16.msra.mxu0 %v14142_v35 }
 0x1b1   :  { %v18503_v43 = vld [vmem:[#allocation6 + $0x145c] sm:$0xf0]  ;;  %v21218_v18 = vmov %v21216_v10  ;;  %v501_v35 = vmul.f32 %v473_v4, %v441_v1  ;;  %v12514_v10 = vor.u32 %v17963_v8, %v12511_v49  ;;  %v12383_v8 = vld [vmem:[#allocation6 + $0x2a0] sm:$0xf0] }
 0x1b2   :  { %v14909_v13 = vld [vmem:[#allocation6 + $0x1640] sm:$0xf]  ;;  %v14654_v0 = vor.u32 %v18503_v43, %v14653_v34  ;;  %6118 = vmatpush.bf16.msra.mxu1 %v14398_v21  ;;  %v17971_v34 = vld [vmem:[#allocation6 + $0x3c4] sm:$0xf]  ;;  %v498_v28 = vmul.f32 %v21218_v18, %v20290_v44  ;;  %v533_v21 = vperm.slane %v20205_v2, 3  ;;  %v573_v44 = vadd.f32 %v531_v6, %v513_v5 }
 0x1b3   :  { %v18567_v42 = vld [vmem:[#allocation6 + $0x165c] sm:$0xf0]  ;;  %v12543_v43 = vld [vmem:[#allocation6 + $0x3e0] sm:$0xf0]  ;;  %v574_v17 = vadd.f32 %v532_v54, %v514_v47 }
 0x1b4   :  { %v14109_v26 = vld [vmem:[#allocation6 + $0x1000] sm:$0xf]  ;;  %v14910_v56 = vor.u32 %v18567_v42, %v14909_v13  ;;  %v500_v13 = vmul.f32 %v472_v41, %v440_v22  ;;  %6132 = vmatpush.bf16.msra.mxu2 %v14654_v0  ;;  %v575_v30 = vadd.f32 %v533_v21, %v515_v32  ;;  %v12255_v22 = vld [vmem:[#allocation6 + $0x1a0] sm:$0xf0] }
 0x1b5   :  { %v18367_v24 = vld [vmem:[#allocation6 + $0x101c] sm:$0xf0]  ;;  %v17891_v5 = vld [vmem:[#allocation6 + $0x144] sm:$0xf] }
 0x1b6   :  { %v14365_v46 = vld [vmem:[#allocation6 + $0x1200] sm:$0xf]  ;;  %v14110_v53 = vor.u32 %v18367_v24, %v14109_v26  ;;  %6146 = vmatpush.bf16.msra.mxu3 %v14910_v56  ;;  %v572_v26 = vadd.f32 %v21220_v58, %v512_v60  ;;  %v12290_v24 = vor.u32 %v17907_v57, %v12287_v37  ;;  %v561_v56 = vadd.f32 %v533_v21, %v501_v35  ;;  %v12223_v47 = vld [vmem:[#allocation6 + $0x160] sm:$0xf0] }
 0x1b7   :  { %v18431_v20 = vld [vmem:[#allocation6 + $0x121c] sm:$0xf0]  ;;  %v12226_v32 = vor.u32 %v17891_v5, %v12223_v47  ;;  %v17883_v18 = vld [vmem:[#allocation6 + $0x104] sm:$0xf] }
 0x1b8   :  { %v14621_v11 = vld [vmem:[#allocation6 + $0x1400] sm:$0xf]  ;;  %v14366_v14 = vor.u32 %v18431_v20, %v14365_v46  ;;  %v12546_v46 = vor.u32 %v17971_v34, %v12543_v43  ;;  %6105 = vmatpush.bf16.msra.mxu0 %v14110_v53  ;;  %v558_v20 = vadd.f32 %v21221_v45, %v498_v28  ;;  %v20384_v2 = vpack.c.bf16 %v575_v30, %v561_v56  ;;  %v17955_v53 = vld [vmem:[#allocation6 + $0x344] sm:$0xf] }
 0x1b9   :  { %v18495_v27 = vld [vmem:[#allocation6 + $0x141c] sm:$0xf0]  ;;  %v12191_v28 = vld [vmem:[#allocation6 + $0x120] sm:$0xf0] }
 0x1ba   :  { %v14877_v55 = vld [vmem:[#allocation6 + $0x1600] sm:$0xf]  ;;  %v14622_v38 = vor.u32 %v18495_v27, %v14621_v11  ;;  %6119 = vmatpush.bf16.msra.mxu1 %v14366_v14  ;;  %v559_v11 = vadd.f32 %v531_v6, %v499_v31  ;;  %v560_v27 = vadd.f32 %v532_v54, %v500_v13  ;;  %v20378_v4 = vpack.c.bf16 %v572_v26, %v558_v20  ;;  %v12479_v14 = vld [vmem:[#allocation6 + $0x360] sm:$0xf0] }
 0x1bb   :  { %v18559_v16 = vld [vmem:[#allocation6 + $0x161c] sm:$0xf0]  ;;  %v12258_v54 = vor.u32 %v17899_v50, %v12255_v22  ;;  %v12482_v37 = vor.u32 %v17955_v53, %v12479_v14  ;;  %v12447_v31 = vld [vmem:[#allocation6 + $0x320] sm:$0xf0]  ;;  %v12194_v21 = vor.u32 %v17883_v18, %v12191_v28 }
 0x1bc   :  { %v15357_v40 = vld [vmem:[#allocation6 + $0x19c0] sm:$0xf]  ;;  %v14878_v42 = vor.u32 %v18559_v16, %v14877_v55  ;;  %6133 = vmatpush.bf16.msra.mxu2 %v14622_v38  ;;  %v20380_v16 = vpack.c.bf16 %v573_v44, %v559_v11  ;;  %6106 = vmatmul.bf16.vlgmr.msra.gmra.mxu0 %v20378_v4  ;;  %v17875_v26 = vld [vmem:[#allocation6 + $0xc4] sm:$0xf] }
 0x1bd   :  { %v18679_v36 = vld [vmem:[#allocation6 + $0x19dc] sm:$0xf0]  ;;  %v12159_v44 = vld [vmem:[#allocation6 + $0xe0] sm:$0xf0] }
 0x1be   :  { %v15613_v33 = vld [vmem:[#allocation6 + $0x1bc0] sm:$0xf]  ;;  %v15358_v29 = vor.u32 %v18679_v36, %v15357_v40  ;;  %6147 = vmatpush.bf16.msra.mxu3 %v14878_v42  ;;  %v20382_v40 = vpack.c.bf16 %v574_v17, %v560_v27  ;;  %6120 = vmatmul.bf16.vlgmr.msra.gmra.mxu1 %v20380_v16  ;;  %v17939_v17 = vld [vmem:[#allocation6 + $0x2c4] sm:$0xf]  ;;  %v12162_v30 = vor.u32 %v17875_v26, %v12159_v44 }
 0x1bf   :  { %v18743_v7 = vld [vmem:[#allocation6 + $0x1bdc] sm:$0xf0]  ;;  %v17867_v11 = vld [vmem:[#allocation6 + $0x84] sm:$0xf] }
 0x1c0   :  { %v15325_v51 = vld [vmem:[#allocation6 + $0x1980] sm:$0xf]  ;;  %v15614_v25 = vor.u32 %v18743_v7, %v15613_v33  ;;  %6154 = vmatpush.bf16.msrb.mxu0 %v15358_v29  ;;  %6182 = vmatpush.bf16.msrb.mxu2 %v12290_v24  ;;  %v12127_v27 = vld [vmem:[#allocation6 + $0xa0] sm:$0xf0] }
 0x1c1   :  { %v18671_v39 = vld [vmem:[#allocation6 + $0x199c] sm:$0xf0]  ;;  %6134 = vmatmul.bf16.vlgmr.msra.gmra.mxu2 %v20382_v40  ;;  %6148 = vmatmul.bf16.vlgmr.msra.gmra.mxu3 %v20384_v2  ;;  %v17931_v22 = vld [vmem:[#allocation6 + $0x284] sm:$0xf] }
 0x1c2   :  { %v15581_v41 = vld [vmem:[#allocation6 + $0x1b80] sm:$0xf]  ;;  %v15326_v55 = vor.u32 %v18671_v39, %v15325_v51  ;;  %6168 = vmatpush.bf16.msrb.mxu1 %v15614_v25  ;;  %6196 = vmatpush.bf16.msrb.mxu3 %v12546_v46  ;;  %v12450_v51 = vor.u32 %v17947_v12, %v12447_v31  ;;  %v12415_v39 = vld [vmem:[#allocation6 + $0x2e0] sm:$0xf0] }
 0x1c3   :  { %v18735_v0 = vld [vmem:[#allocation6 + $0x1b9c] sm:$0xf0]  ;;  %v12418_v50 = vor.u32 %v17939_v17, %v12415_v39  ;;  %v17923_v5 = vld [vmem:[#allocation6 + $0x244] sm:$0xf] }
 0x1c4   :  { %v15582_v1 = vor.u32 %v18735_v0, %v15581_v41  ;;  %v15293_v6 = vld [vmem:[#allocation6 + $0x1940] sm:$0xf]  ;;  %6155 = vmatpush.bf16.msrb.mxu0 %v15326_v55  ;;  %6183 = vmatpush.bf16.msrb.mxu2 %v12258_v54  ;;  %v12351_v47 = vld [vmem:[#allocation6 + $0x260] sm:$0xf0] }
 0x1c5   :  { %v18663_v36 = vld [vmem:[#allocation6 + $0x195c] sm:$0xf0]  ;;  %v17915_v18 = vld [vmem:[#allocation6 + $0x204] sm:$0xf] }
 0x1c6   :  { %v15549_v60 = vld [vmem:[#allocation6 + $0x1b40] sm:$0xf]  ;;  %6169 = vmatpush.bf16.msrb.mxu1 %v15582_v1  ;;  %v15294_v38 = vor.u32 %v18663_v36, %v15293_v6  ;;  %6197 = vmatpush.bf16.msrb.mxu3 %v12514_v10  ;;  %v12130_v6 = vor.u32 %v17867_v11, %v12127_v27  ;;  %v12386_v36 = vor.u32 %v17931_v22, %v12383_v8  ;;  %v12319_v28 = vld [vmem:[#allocation6 + $0x220] sm:$0xf0] }
 0x1c7   :  { %v18727_v15 = vld [vmem:[#allocation6 + $0x1b5c] sm:$0xf0]  ;;  %v18035_v12 = vld [vmem:[#allocation6 + $0x5c4] sm:$0xf]  ;;  %v12322_v44 = vor.u32 %v17915_v18, %v12319_v28 }
 0x1c8   :  { %v15550_v33 = vor.u32 %v18727_v15, %v15549_v60  ;;  %v15261_v7 = vld [vmem:[#allocation6 + $0x1900] sm:$0xf]  ;;  %6156 = vmatpush.bf16.msrb.mxu0 %v15294_v38  ;;  %6184 = vmatpush.bf16.msrb.mxu2 %v12226_v32  ;;  %v17859_v60 = vld [vmem:[#allocation6 + $0x44] sm:$0xf] }
 0x1c9   :  { %v18655_v57 = vld [vmem:[#allocation6 + $0x191c] sm:$0xf0]  ;;  %v12095_v15 = vld [vmem:[#allocation6 + $0x60] sm:$0xf0] }
 0x1ca   :  { %v15517_v34 = vld [vmem:[#allocation6 + $0x1b00] sm:$0xf]  ;;  %6170 = vmatpush.bf16.msrb.mxu1 %v15550_v33  ;;  %v15262_v13 = vor.u32 %v18655_v57, %v15261_v7  ;;  %6198 = vmatpush.bf16.msrb.mxu3 %v12482_v37  ;;  %v12098_v32 = vor.u32 %v17859_v60, %v12095_v15  ;;  %v12354_v37 = vor.u32 %v17923_v5, %v12351_v47  ;;  %v12799_v31 = vld [vmem:[#allocation6 + $0x5e0] sm:$0xf0] }
 0x1cb   :  { %v18719_v43 = vld [vmem:[#allocation6 + $0x1b1c] sm:$0xf0]  ;;  %v12802_v17 = vor.u32 %v18035_v12, %v12799_v31  ;;  %v18219_v11 = vld [vmem:[#allocation6 + $0xb84] sm:$0xf] }
 0x1cc   :  { %v15518_v42 = vor.u32 %v18719_v43, %v15517_v34  ;;  %v15229_v29 = vld [vmem:[#allocation6 + $0x18c0] sm:$0xf]  ;;  %6157 = vmatpush.bf16.msrb.mxu0 %v15262_v13  ;;  %6185 = vmatpush.bf16.msrb.mxu2 %v12194_v21  ;;  %v17851_v34 = vld [vmem:[#allocation6 + $0x4] sm:$0xf] }
 0x1cd   :  { %v18647_v35 = vld [vmem:[#allocation6 + $0x18dc] sm:$0xf0]  ;;  %v12063_v43 = vld [vmem:[#allocation6 + $0x20] sm:$0xf0] }
 0x1ce   :  { %v15485_v25 = vld [vmem:[#allocation6 + $0x1ac0] sm:$0xf]  ;;  %6171 = vmatpush.bf16.msrb.mxu1 %v15518_v42  ;;  %v15230_v41 = vor.u32 %v18647_v35, %v15229_v29  ;;  %6199 = vmatpush.bf16.msrb.mxu3 %v12450_v51  ;;  %v18099_v13 = vld [vmem:[#allocation6 + $0x7c4] sm:$0xf]  ;;  %v12066_v26 = vor.u32 %v17851_v34, %v12063_v43 }
 0x1cf   :  { %v18711_v58 = vld [vmem:[#allocation6 + $0x1adc] sm:$0xf0]  ;;  %v13055_v42 = vld [vmem:[#allocation6 + $0x7e0] sm:$0xf0] }
 0x1d0   :  { %v15486_v0 = vor.u32 %v18711_v58, %v15485_v25  ;;  %v15197_v24 = vld [vmem:[#allocation6 + $0x1880] sm:$0xf]  ;;  %6158 = vmatpush.bf16.msrb.mxu0 %v15230_v41  ;;  %6186 = vmatpush.bf16.msrb.mxu2 %v12162_v30  ;;  %v18163_v29 = vld [vmem:[#allocation6 + $0x9c4] sm:$0xf]  ;;  %v13058_v39 = vor.u32 %v18099_v13, %v13055_v42 }
 0x1d1   :  { %v18639_v46 = vld [vmem:[#allocation6 + $0x189c] sm:$0xf0]  ;;  %v13311_v51 = vld [vmem:[#allocation6 + $0x9e0] sm:$0xf0] }
 0x1d2   :  { %v15453_v45 = vld [vmem:[#allocation6 + $0x1a80] sm:$0xf]  ;;  %6172 = vmatpush.bf16.msrb.mxu1 %v15486_v0  ;;  %v15198_v49 = vor.u32 %v18639_v46, %v15197_v24  ;;  %6200 = vmatpush.bf16.msrb.mxu3 %v12418_v50  ;;  %v18227_v25 = vld [vmem:[#allocation6 + $0xbc4] sm:$0xf]  ;;  %v13314_v24 = vor.u32 %v18163_v29, %v13311_v51 }
 0x1d3   :  { %v18703_v20 = vld [vmem:[#allocation6 + $0x1a9c] sm:$0xf0]  ;;  %v13567_v58 = vld [vmem:[#allocation6 + $0xbe0] sm:$0xf0] }
 0x1d4   :  { %v15454_v56 = vor.u32 %v18703_v20, %v15453_v45  ;;  %v15165_v55 = vld [vmem:[#allocation6 + $0x1840] sm:$0xf]  ;;  %6159 = vmatpush.bf16.msrb.mxu0 %v15198_v49  ;;  %6187 = vmatpush.bf16.msrb.mxu2 %v12130_v6  ;;  %v18027_v41 = vld [vmem:[#allocation6 + $0x584] sm:$0xf]  ;;  %v13570_v46 = vor.u32 %v18227_v25, %v13567_v58 }
 0x1d5   :  { %v18631_v1 = vld [vmem:[#allocation6 + $0x185c] sm:$0xf0]  ;;  %v12767_v0 = vld [vmem:[#allocation6 + $0x5a0] sm:$0xf0] }
 0x1d6   :  { %v15421_v54 = vld [vmem:[#allocation6 + $0x1a40] sm:$0xf]  ;;  %6173 = vmatpush.bf16.msrb.mxu1 %v15454_v56  ;;  %v15166_v14 = vor.u32 %v18631_v1, %v15165_v55  ;;  %6201 = vmatpush.bf16.msrb.mxu3 %v12386_v36  ;;  %v18091_v30 = vld [vmem:[#allocation6 + $0x784] sm:$0xf]  ;;  %v12770_v22 = vor.u32 %v18027_v41, %v12767_v0 }
 0x1d7   :  { %v18695_v10 = vld [vmem:[#allocation6 + $0x1a5c] sm:$0xf0]  ;;  %v13023_v50 = vld [vmem:[#allocation6 + $0x7a0] sm:$0xf0] }
 0x1d8   :  { %v15133_v53 = vld [vmem:[#allocation6 + $0x1800] sm:$0xf]  ;;  %v15422_v38 = vor.u32 %v18695_v10, %v15421_v54  ;;  %6160 = vmatpush.bf16.msrb.mxu0 %v15166_v14  ;;  %6188 = vmatpush.bf16.msrb.mxu2 %v12098_v32  ;;  %v18155_v45 = vld [vmem:[#allocation6 + $0x984] sm:$0xf]  ;;  %v13026_v8 = vor.u32 %v18091_v30, %v13023_v50 }
 0x1d9   :  { %v18623_v33 = vld [vmem:[#allocation6 + $0x181c] sm:$0xf0]  ;;  %v13279_v20 = vld [vmem:[#allocation6 + $0x9a0] sm:$0xf0] }
 0x1da   :  { %v15389_v7 = vld [vmem:[#allocation6 + $0x1a00] sm:$0xf]  ;;  %6174 = vmatpush.bf16.msrb.mxu1 %v15422_v38  ;;  %v15134_v35 = vor.u32 %v18623_v33, %v15133_v53  ;;  %6202 = vmatpush.bf16.msrb.mxu3 %v12354_v37  ;;  %v13535_v27 = vld [vmem:[#allocation6 + $0xba0] sm:$0xf0]  ;;  %v13282_v55 = vor.u32 %v18155_v45, %v13279_v20 }
 0x1db   :  { %v18687_v57 = vld [vmem:[#allocation6 + $0x1a1c] sm:$0xf0]  ;;  %v18019_v49 = vld [vmem:[#allocation6 + $0x544] sm:$0xf]  ;;  %v13538_v1 = vor.u32 %v18219_v11, %v13535_v27 }
 0x1dc   :  { %v15390_v21 = vor.u32 %v18687_v57, %v15389_v7  ;;  %6161 = vmatpush.bf16.msrb.mxu0 %v15134_v35  ;;  %6189 = vmatpush.bf16.msrb.mxu2 %v12066_v26  ;;  %v12735_v56 = vld [vmem:[#allocation6 + $0x560] sm:$0xf0] }
 0x1dd   :  { %v18083_v6 = vld [vmem:[#allocation6 + $0x744] sm:$0xf]  ;;  %v12738_v5 = vor.u32 %v18019_v49, %v12735_v56 }
 0x1de   :  { %6175 = vmatpush.bf16.msrb.mxu1 %v15390_v21  ;;  %6203 = vmatpush.bf16.msrb.mxu3 %v12322_v44  ;;  %v12991_v36 = vld [vmem:[#allocation6 + $0x760] sm:$0xf0] }
 0x1df   :  { %v18147_v54 = vld [vmem:[#allocation6 + $0x944] sm:$0xf]  ;;  %6162 = vmatmul.bf16.vlgmr.msrb.gmra.mxu0 %v20347_v23  ;;  %6190 = vmatmul.bf16.vlgmr.msrb.gmra.mxu2 %v20187_v52  ;;  %v12994_v47 = vor.u32 %v18083_v6, %v12991_v36 }
 0x1e0   :  { %6210 = vmatpush.bf16.msra.mxu0 %v12802_v17  ;;  %6238 = vmatpush.bf16.msra.mxu2 %v13314_v24  ;;  %v13247_v10 = vld [vmem:[#allocation6 + $0x960] sm:$0xf0] }
 0x1e1   :  { %6176 = vmatmul.bf16.vlgmr.msrb.gmra.mxu1 %v20355_v3  ;;  %v18211_v60 = vld [vmem:[#allocation6 + $0xb44] sm:$0xf]  ;;  %6204 = vmatmul.bf16.vlgmr.msrb.gmra.mxu3 %v20189_v59  ;;  %v13250_v38 = vor.u32 %v18147_v54, %v13247_v10 }
 0x1e2   :  { %6224 = vmatpush.bf16.msra.mxu1 %v13058_v39  ;;  %6252 = vmatpush.bf16.msra.mxu3 %v13570_v46  ;;  %v13503_v15 = vld [vmem:[#allocation6 + $0xb60] sm:$0xf0] }
 0x1e3   :  { %v18011_v53 = vld [vmem:[#allocation6 + $0x504] sm:$0xf]  ;;  %v13506_v33 = vor.u32 %v18211_v60, %v13503_v15 }
 0x1e4   :  { %6211 = vmatpush.bf16.msra.mxu0 %v12770_v22  ;;  %v12703_v14 = vld [vmem:[#allocation6 + $0x520] sm:$0xf0]  ;;  %6239 = vmatpush.bf16.msra.mxu2 %v13282_v55 }
 0x1e5   :  { %v18075_v7 = vld [vmem:[#allocation6 + $0x704] sm:$0xf]  ;;  %v12706_v18 = vor.u32 %v18011_v53, %v12703_v14 }
 0x1e6   :  { %6225 = vmatpush.bf16.msra.mxu1 %v13026_v8  ;;  %6253 = vmatpush.bf16.msra.mxu3 %v13538_v1  ;;  %v12959_v57 = vld [vmem:[#allocation6 + $0x720] sm:$0xf0] }
 0x1e7   :  { %v18139_v32 = vld [vmem:[#allocation6 + $0x904] sm:$0xf]  ;;  %v12962_v28 = vor.u32 %v18075_v7, %v12959_v57 }
 0x1e8   :  { %v13215_v37 = vld [vmem:[#allocation6 + $0x920] sm:$0xf0]  ;;  %6212 = vmatpush.bf16.msra.mxu0 %v12738_v5  ;;  %6240 = vmatpush.bf16.msra.mxu2 %v13250_v38 }
 0x1e9   :  { %v18203_v34 = vld [vmem:[#allocation6 + $0xb04] sm:$0xf]  ;;  %v13218_v13 = vor.u32 %v18139_v32, %v13215_v37 }
 0x1ea   :  { %v13471_v43 = vld [vmem:[#allocation6 + $0xb20] sm:$0xf0]  ;;  %6226 = vmatpush.bf16.msra.mxu1 %v12994_v47  ;;  %6254 = vmatpush.bf16.msra.mxu3 %v13506_v33 }
 0x1eb   :  { %v18003_v12 = vld [vmem:[#allocation6 + $0x4c4] sm:$0xf]  ;;  %v13474_v42 = vor.u32 %v18203_v34, %v13471_v43 }
 0x1ec   :  { %v12671_v31 = vld [vmem:[#allocation6 + $0x4e0] sm:$0xf0]  ;;  %6213 = vmatpush.bf16.msra.mxu0 %v12706_v18  ;;  %6241 = vmatpush.bf16.msra.mxu2 %v13218_v13 }
 0x1ed   :  { %v18067_v29 = vld [vmem:[#allocation6 + $0x6c4] sm:$0xf]  ;;  %v12674_v26 = vor.u32 %v18003_v12, %v12671_v31 }
 0x1ee   :  { %v12927_v35 = vld [vmem:[#allocation6 + $0x6e0] sm:$0xf0]  ;;  %6227 = vmatpush.bf16.msra.mxu1 %v12962_v28  ;;  %6255 = vmatpush.bf16.msra.mxu3 %v13474_v42 }
 0x1ef   :  { %v18131_v21 = vld [vmem:[#allocation6 + $0x8c4] sm:$0xf]  ;;  %v12930_v44 = vor.u32 %v18067_v29, %v12927_v35 }
 0x1f0   :  { %v13183_v51 = vld [vmem:[#allocation6 + $0x8e0] sm:$0xf0]  ;;  %6214 = vmatpush.bf16.msra.mxu0 %v12674_v26 }
 0x1f1   :  { %v18195_v25 = vld [vmem:[#allocation6 + $0xac4] sm:$0xf]  ;;  %v13186_v41 = vor.u32 %v18131_v21, %v13183_v51 }
 0x1f2   :  { %v13439_v58 = vld [vmem:[#allocation6 + $0xae0] sm:$0xf0]  ;;  %6228 = vmatpush.bf16.msra.mxu1 %v12930_v44 }
 0x1f3   :  { %v17995_v17 = vld [vmem:[#allocation6 + $0x484] sm:$0xf]  ;;  %v13442_v0 = vor.u32 %v18195_v25, %v13439_v58  ;;  %6242 = vmatpush.bf16.msra.mxu2 %v13186_v41 }
 0x1f4   :  { %v12639_v39 = vld [vmem:[#allocation6 + $0x4a0] sm:$0xf0] }
 0x1f5   :  { %v18059_v24 = vld [vmem:[#allocation6 + $0x684] sm:$0xf]  ;;  %v12642_v11 = vor.u32 %v17995_v17, %v12639_v39  ;;  %6256 = vmatpush.bf16.msra.mxu3 %v13442_v0 }
 0x1f6   :  { %v12895_v46 = vld [vmem:[#allocation6 + $0x6a0] sm:$0xf0] }
 0x1f7   :  { %v18123_v30 = vld [vmem:[#allocation6 + $0x884] sm:$0xf]  ;;  %v12898_v27 = vor.u32 %v18059_v24, %v12895_v46  ;;  %6215 = vmatpush.bf16.msra.mxu0 %v12642_v11 }
 0x1f8   :  { %v13151_v50 = vld [vmem:[#allocation6 + $0x8a0] sm:$0xf0] }
 0x1f9   :  { %v18187_v45 = vld [vmem:[#allocation6 + $0xa84] sm:$0xf]  ;;  %v13154_v49 = vor.u32 %v18123_v30, %v13151_v50  ;;  %6229 = vmatpush.bf16.msra.mxu1 %v12898_v27 }
 0x1fa   :  { %v13407_v20 = vld [vmem:[#allocation6 + $0xaa0] sm:$0xf0] }
 0x1fb   :  { %v17987_v22 = vld [vmem:[#allocation6 + $0x444] sm:$0xf]  ;;  %v13410_v56 = vor.u32 %v18187_v45, %v13407_v20  ;;  %6243 = vmatpush.bf16.msra.mxu2 %v13154_v49 }
 0x1fc   :  { %v12607_v8 = vld [vmem:[#allocation6 + $0x460] sm:$0xf0] }
 0x1fd   :  { %v18051_v55 = vld [vmem:[#allocation6 + $0x644] sm:$0xf]  ;;  %v12610_v15 = vor.u32 %v17987_v22, %v12607_v8  ;;  %6257 = vmatpush.bf16.msra.mxu3 %v13410_v56 }
 0x1fe   :  { %v12863_v1 = vld [vmem:[#allocation6 + $0x660] sm:$0xf0] }
 0x1ff   :  { %v18115_v6 = vld [vmem:[#allocation6 + $0x844] sm:$0xf]  ;;  %v12866_v5 = vor.u32 %v18051_v55, %v12863_v1  ;;  %6216 = vmatpush.bf16.msra.mxu0 %v12610_v15 }
 0x200   :  { %v13119_v36 = vld [vmem:[#allocation6 + $0x860] sm:$0xf0] }
 0x201   :  { %v18179_v54 = vld [vmem:[#allocation6 + $0xa44] sm:$0xf]  ;;  %v13122_v38 = vor.u32 %v18115_v6, %v13119_v36  ;;  %6230 = vmatpush.bf16.msra.mxu1 %v12866_v5 }
 0x202   :  { %v13375_v10 = vld [vmem:[#allocation6 + $0xa60] sm:$0xf0] }
 0x203   :  { %v17979_v60 = vld [vmem:[#allocation6 + $0x404] sm:$0xf]  ;;  %v13378_v33 = vor.u32 %v18179_v54, %v13375_v10  ;;  %6244 = vmatpush.bf16.msra.mxu2 %v13122_v38 }
 0x204   :  { %v12575_v47 = vld [vmem:[#allocation6 + $0x420] sm:$0xf0] }
 0x205   :  { %v18043_v53 = vld [vmem:[#allocation6 + $0x604] sm:$0xf]  ;;  %v12578_v31 = vor.u32 %v17979_v60, %v12575_v47  ;;  %6258 = vmatpush.bf16.msra.mxu3 %v13378_v33 }
 0x206   :  { %v12831_v14 = vld [vmem:[#allocation6 + $0x620] sm:$0xf0] }
 0x207   :  { %v18107_v7 = vld [vmem:[#allocation6 + $0x804] sm:$0xf]  ;;  %v12834_v13 = vor.u32 %v18043_v53, %v12831_v14  ;;  %6217 = vmatpush.bf16.msra.mxu0 %v12578_v31 }
 0x208   :  { %v13087_v57 = vld [vmem:[#allocation6 + $0x820] sm:$0xf0] }
 0x209   :  { %v18171_v32 = vld [vmem:[#allocation6 + $0xa04] sm:$0xf]  ;;  %v13090_v21 = vor.u32 %v18107_v7, %v13087_v57  ;;  %6231 = vmatpush.bf16.msra.mxu1 %v12834_v13 }
 0x20a   :  { %v13343_v37 = vld [vmem:[#allocation6 + $0xa20] sm:$0xf0]  ;;  %6218 = vmatmul.bf16.vlgmr.msra.gmra.mxu0 %v20191_v62 }
 0x20b   :  { %v18291_v34 = vld [vmem:[#allocation6 + $0xdc4] sm:$0xf]  ;;  %v13346_v51 = vor.u32 %v18171_v32, %v13343_v37  ;;  %6245 = vmatpush.bf16.msra.mxu2 %v13090_v21 }
 0x20c   :  { %v13823_v43 = vld [vmem:[#allocation6 + $0xde0] sm:$0xf0]  ;;  %6232 = vmatmul.bf16.vlgmr.msra.gmra.mxu1 %v20193_v48 }
 0x20d   :  { %v18355_v18 = vld [vmem:[#allocation6 + $0xfc4] sm:$0xf]  ;;  %v13826_v25 = vor.u32 %v18291_v34, %v13823_v43  ;;  %6259 = vmatpush.bf16.msra.mxu3 %v13346_v51 }
 0x20e   :  { %v14079_v28 = vld [vmem:[#allocation6 + $0xfe0] sm:$0xf0]  ;;  %6246 = vmatmul.bf16.vlgmr.msra.gmra.mxu2 %v20284_v9 }
 0x20f   :  { %v18419_v12 = vld [vmem:[#allocation6 + $0x11c4] sm:$0xf]  ;;  %v14082_v58 = vor.u32 %v18355_v18, %v14079_v28  ;;  %6266 = vmatpush.bf16.msrb.mxu0 %v13826_v25 }
 0x210   :  { %v14335_v42 = vld [vmem:[#allocation6 + $0x11e0] sm:$0xf0]  ;;  %6260 = vmatmul.bf16.vlgmr.msra.gmra.mxu3 %v20286_v63 }
 0x211   :  { %v18483_v29 = vld [vmem:[#allocation6 + $0x13c4] sm:$0xf]  ;;  %v14338_v17 = vor.u32 %v18419_v12, %v14335_v42  ;;  %6280 = vmatpush.bf16.msrb.mxu1 %v14082_v58 }
 0x212   :  { %v14591_v35 = vld [vmem:[#allocation6 + $0x13e0] sm:$0xf0] }
 0x213   :  { %v18283_v26 = vld [vmem:[#allocation6 + $0xd84] sm:$0xf]  ;;  %v14594_v39 = vor.u32 %v18483_v29, %v14591_v35  ;;  %6294 = vmatpush.bf16.msrb.mxu2 %v14338_v17 }
 0x214   :  { %v13791_v44 = vld [vmem:[#allocation6 + $0xda0] sm:$0xf0] }
 0x215   :  { %v18347_v41 = vld [vmem:[#allocation6 + $0xf84] sm:$0xf]  ;;  %v13794_v45 = vor.u32 %v18283_v26, %v13791_v44  ;;  %6308 = vmatpush.bf16.msrb.mxu3 %v14594_v39 }
 0x216   :  { %v14047_v0 = vld [vmem:[#allocation6 + $0xfa0] sm:$0xf0] }
 0x217   :  { %v18411_v24 = vld [vmem:[#allocation6 + $0x1184] sm:$0xf]  ;;  %v14050_v20 = vor.u32 %v18347_v41, %v14047_v0  ;;  %6267 = vmatpush.bf16.msrb.mxu0 %v13794_v45 }
 0x218   :  { %v14303_v46 = vld [vmem:[#allocation6 + $0x11a0] sm:$0xf0] }
 0x219   :  { %v18475_v30 = vld [vmem:[#allocation6 + $0x1384] sm:$0xf]  ;;  %v14306_v22 = vor.u32 %v18411_v24, %v14303_v46  ;;  %6281 = vmatpush.bf16.msrb.mxu1 %v14050_v20 }
 0x21a   :  { %v14559_v50 = vld [vmem:[#allocation6 + $0x13a0] sm:$0xf0] }
 0x21b   :  { %v18275_v11 = vld [vmem:[#allocation6 + $0xd44] sm:$0xf]  ;;  %v14562_v8 = vor.u32 %v18475_v30, %v14559_v50  ;;  %6295 = vmatpush.bf16.msrb.mxu2 %v14306_v22 }
 0x21c   :  { %v13759_v27 = vld [vmem:[#allocation6 + $0xd60] sm:$0xf0] }
 0x21d   :  { %v18339_v49 = vld [vmem:[#allocation6 + $0xf44] sm:$0xf]  ;;  %v13762_v54 = vor.u32 %v18275_v11, %v13759_v27  ;;  %6309 = vmatpush.bf16.msrb.mxu3 %v14562_v8 }
 0x21e   :  { %v14015_v56 = vld [vmem:[#allocation6 + $0xf60] sm:$0xf0] }
 0x21f   :  { %v18403_v55 = vld [vmem:[#allocation6 + $0x1144] sm:$0xf]  ;;  %v14018_v10 = vor.u32 %v18339_v49, %v14015_v56  ;;  %6268 = vmatpush.bf16.msrb.mxu0 %v13762_v54 }
 0x220   :  { %v14271_v1 = vld [vmem:[#allocation6 + $0x1160] sm:$0xf0] }
 0x221   :  { %v18467_v6 = vld [vmem:[#allocation6 + $0x1344] sm:$0xf]  ;;  %v14274_v5 = vor.u32 %v18403_v55, %v14271_v1  ;;  %6282 = vmatpush.bf16.msrb.mxu1 %v14018_v10 }
 0x222   :  { %v14527_v36 = vld [vmem:[#allocation6 + $0x1360] sm:$0xf0] }
 0x223   :  { %v18267_v60 = vld [vmem:[#allocation6 + $0xd04] sm:$0xf]  ;;  %v14530_v47 = vor.u32 %v18467_v6, %v14527_v36  ;;  %6296 = vmatpush.bf16.msrb.mxu2 %v14274_v5 }
 0x224   :  { %v13727_v15 = vld [vmem:[#allocation6 + $0xd20] sm:$0xf0] }
 0x225   :  { %v18331_v53 = vld [vmem:[#allocation6 + $0xf04] sm:$0xf]  ;;  %v13730_v32 = vor.u32 %v18267_v60, %v13727_v15  ;;  %6310 = vmatpush.bf16.msrb.mxu3 %v14530_v47 }
 0x226   :  { %v13983_v14 = vld [vmem:[#allocation6 + $0xf20] sm:$0xf0] }
 0x227   :  { %v18395_v38 = vld [vmem:[#allocation6 + $0x1104] sm:$0xf]  ;;  %v13986_v37 = vor.u32 %v18331_v53, %v13983_v14  ;;  %6269 = vmatpush.bf16.msrb.mxu0 %v13730_v32 }
 0x228   :  { %v14239_v33 = vld [vmem:[#allocation6 + $0x1120] sm:$0xf0] }
 0x229   :  { %v18459_v7 = vld [vmem:[#allocation6 + $0x1304] sm:$0xf]  ;;  %v14242_v18 = vor.u32 %v18395_v38, %v14239_v33  ;;  %6283 = vmatpush.bf16.msrb.mxu1 %v13986_v37 }
 0x22a   :  { %v14495_v57 = vld [vmem:[#allocation6 + $0x1320] sm:$0xf0] }
 0x22b   :  { %v18259_v34 = vld [vmem:[#allocation6 + $0xcc4] sm:$0xf]  ;;  %v14498_v28 = vor.u32 %v18459_v7, %v14495_v57  ;;  %6297 = vmatpush.bf16.msrb.mxu2 %v14242_v18 }
 0x22c   :  { %v13695_v43 = vld [vmem:[#allocation6 + $0xce0] sm:$0xf0] }
 0x22d   :  { %v18323_v12 = vld [vmem:[#allocation6 + $0xec4] sm:$0xf]  ;;  %v13698_v21 = vor.u32 %v18259_v34, %v13695_v43  ;;  %6311 = vmatpush.bf16.msrb.mxu3 %v14498_v28 }
 0x22e   :  { %v13951_v31 = vld [vmem:[#allocation6 + $0xee0] sm:$0xf0] }
 0x22f   :  { %v18387_v13 = vld [vmem:[#allocation6 + $0x10c4] sm:$0xf]  ;;  %v13954_v51 = vor.u32 %v18323_v12, %v13951_v31  ;;  %6270 = vmatpush.bf16.msrb.mxu0 %v13698_v21 }
 0x230   :  { %v14207_v42 = vld [vmem:[#allocation6 + $0x10e0] sm:$0xf0] }
 0x231   :  { %v18451_v29 = vld [vmem:[#allocation6 + $0x12c4] sm:$0xf]  ;;  %v14210_v26 = vor.u32 %v18387_v13, %v14207_v42  ;;  %6284 = vmatpush.bf16.msrb.mxu1 %v13954_v51 }
 0x232   :  { %v14463_v35 = vld [vmem:[#allocation6 + $0x12e0] sm:$0xf0] }
 0x233   :  { %v18251_v25 = vld [vmem:[#allocation6 + $0xc84] sm:$0xf]  ;;  %v14466_v44 = vor.u32 %v18451_v29, %v14463_v35  ;;  %6298 = vmatpush.bf16.msrb.mxu2 %v14210_v26 }
 0x234   :  { %v13663_v58 = vld [vmem:[#allocation6 + $0xca0] sm:$0xf0] }
 0x235   :  { %v18315_v17 = vld [vmem:[#allocation6 + $0xe84] sm:$0xf]  ;;  %v13666_v30 = vor.u32 %v18251_v25, %v13663_v58  ;;  %6312 = vmatpush.bf16.msrb.mxu3 %v14466_v44 }
 0x236   :  { %v13919_v39 = vld [vmem:[#allocation6 + $0xea0] sm:$0xf0] }
 0x237   :  { %v18379_v41 = vld [vmem:[#allocation6 + $0x1084] sm:$0xf]  ;;  %v13922_v50 = vor.u32 %v18315_v17, %v13919_v39  ;;  %6271 = vmatpush.bf16.msrb.mxu0 %v13666_v30 }
 0x238   :  { %v14175_v0 = vld [vmem:[#allocation6 + $0x10a0] sm:$0xf0] }
 0x239   :  { %v18443_v24 = vld [vmem:[#allocation6 + $0x1284] sm:$0xf]  ;;  %v14178_v11 = vor.u32 %v18379_v41, %v14175_v0  ;;  %6285 = vmatpush.bf16.msrb.mxu1 %v13922_v50 }
 0x23a   :  { %v14431_v46 = vld [vmem:[#allocation6 + $0x12a0] sm:$0xf0] }
 0x23b   :  { %v18243_v45 = vld [vmem:[#allocation6 + $0xc44] sm:$0xf]  ;;  %v14434_v27 = vor.u32 %v18443_v24, %v14431_v46  ;;  %6299 = vmatpush.bf16.msrb.mxu2 %v14178_v11 }
 0x23c   :  { %v13631_v20 = vld [vmem:[#allocation6 + $0xc60] sm:$0xf0] }
 0x23d   :  { %v18307_v22 = vld [vmem:[#allocation6 + $0xe44] sm:$0xf]  ;;  %v13634_v36 = vor.u32 %v18243_v45, %v13631_v20  ;;  %6313 = vmatpush.bf16.msrb.mxu3 %v14434_v27 }
 0x23e   :  { %v13887_v8 = vld [vmem:[#allocation6 + $0xe60] sm:$0xf0] }
 0x23f   :  { %v18371_v49 = vld [vmem:[#allocation6 + $0x1044] sm:$0xf]  ;;  %v13890_v54 = vor.u32 %v18307_v22, %v13887_v8  ;;  %6272 = vmatpush.bf16.msrb.mxu0 %v13634_v36  ;;  %v6009_v36 = vpop.f32.mrf.mxu1 }
 0x240   :  { %v14143_v56 = vld [vmem:[#allocation6 + $0x1060] sm:$0xf0] }
 0x241   :  { %v18435_v55 = vld [vmem:[#allocation6 + $0x1244] sm:$0xf]  ;;  %v14146_v5 = vor.u32 %v18371_v49, %v14143_v56  ;;  %6286 = vmatpush.bf16.msrb.mxu1 %v13890_v54 }
 0x242   :  { %v14399_v1 = vld [vmem:[#allocation6 + $0x1260] sm:$0xf0] }
 0x243   :  { %v18235_v6 = vld [vmem:[#allocation6 + $0xc04] sm:$0xf]  ;;  %v14402_v47 = vor.u32 %v18435_v55, %v14399_v1  ;;  %6300 = vmatpush.bf16.msrb.mxu2 %v14146_v5 }
 0x244   :  { %v13599_v10 = vld [vmem:[#allocation6 + $0xc20] sm:$0xf0] }
 0x245   :  { %v18299_v60 = vld [vmem:[#allocation6 + $0xe04] sm:$0xf]  ;;  %v13602_v43 = vor.u32 %v18235_v6, %v13599_v10  ;;  %6314 = vmatpush.bf16.msrb.mxu3 %v14402_v47  ;;  %v5995_v6 = vpop.f32.mrf.mxu0 }
 0x246   :  { %v13855_v15 = vld [vmem:[#allocation6 + $0xe20] sm:$0xf0] }
 0x247   :  { %v18363_v53 = vld [vmem:[#allocation6 + $0x1004] sm:$0xf]  ;;  %v13858_v18 = vor.u32 %v18299_v60, %v13855_v15  ;;  %6273 = vmatpush.bf16.msrb.mxu0 %v13602_v43 }
 0x248   :  { %v14111_v14 = vld [vmem:[#allocation6 + $0x1020] sm:$0xf0] }
 0x249   :  { %v18427_v38 = vld [vmem:[#allocation6 + $0x1204] sm:$0xf]  ;;  %v14114_v13 = vor.u32 %v18363_v53, %v14111_v14  ;;  %6287 = vmatpush.bf16.msrb.mxu1 %v13858_v18 }
 0x24a   :  { %v14367_v33 = vld [vmem:[#allocation6 + $0x1220] sm:$0xf0]  ;;  %6274 = vmatmul.bf16.vlgmr.msrb.gmra.mxu0 %v20293_v19 }
 0x24b   :  { %v18547_v7 = vld [vmem:[#allocation6 + $0x15c4] sm:$0xf]  ;;  %v14370_v42 = vor.u32 %v18427_v38, %v14367_v33  ;;  %6301 = vmatpush.bf16.msrb.mxu2 %v14114_v13 }
 0x24c   :  { %v14847_v57 = vld [vmem:[#allocation6 + $0x15e0] sm:$0xf0]  ;;  %6288 = vmatmul.bf16.vlgmr.msrb.gmra.mxu1 %v20295_v61 }
 0x24d   :  { %v18611_v32 = vld [vmem:[#allocation6 + $0x17c4] sm:$0xf]  ;;  %v14850_v29 = vor.u32 %v18547_v7, %v14847_v57  ;;  %6315 = vmatpush.bf16.msrb.mxu3 %v14370_v42 }
 0x24e   :  { %v15103_v37 = vld [vmem:[#allocation6 + $0x17e0] sm:$0xf0]  ;;  %6302 = vmatmul.bf16.vlgmr.msrb.gmra.mxu2 %v20378_v4 }
 0x24f   :  { %v18675_v34 = vld [vmem:[#allocation6 + $0x19c4] sm:$0xf]  ;;  %v15106_v35 = vor.u32 %v18611_v32, %v15103_v37  ;;  %6322 = vmatpush.bf16.msra.mxu0 %v14850_v29 }
 0x250   :  { %v15359_v28 = vld [vmem:[#allocation6 + $0x19e0] sm:$0xf0]  ;;  %6316 = vmatmul.bf16.vlgmr.msrb.gmra.mxu3 %v20380_v16 }
 0x251   :  { %v18739_v12 = vld [vmem:[#allocation6 + $0x1bc4] sm:$0xf]  ;;  %v15362_v58 = vor.u32 %v18675_v34, %v15359_v28  ;;  %6336 = vmatpush.bf16.msra.mxu1 %v15106_v35  ;;  %v6023_v35 = vpop.f32.mrf.mxu2 }
 0x252   :  { %v15615_v31 = vld [vmem:[#allocation6 + $0x1be0] sm:$0xf0] }
 0x253   :  { %v18539_v21 = vld [vmem:[#allocation6 + $0x1584] sm:$0xf]  ;;  %v15618_v26 = vor.u32 %v18739_v12, %v15615_v31  ;;  %6350 = vmatpush.bf16.msra.mxu2 %v15362_v58 }
 0x254   :  { %v14815_v51 = vld [vmem:[#allocation6 + $0x15a0] sm:$0xf0] }
 0x255   :  { %v18603_v25 = vld [vmem:[#allocation6 + $0x1784] sm:$0xf]  ;;  %v14818_v46 = vor.u32 %v18539_v21, %v14815_v51  ;;  %6364 = vmatpush.bf16.msra.mxu3 %v15618_v26  ;;  %v6037_v21 = vpop.f32.mrf.mxu3 }
 0x256   :  { %v15071_v44 = vld [vmem:[#allocation6 + $0x17a0] sm:$0xf0] }
 0x257   :  { %v18667_v17 = vld [vmem:[#allocation6 + $0x1984] sm:$0xf]  ;;  %v15074_v30 = vor.u32 %v18603_v25, %v15071_v44  ;;  %6323 = vmatpush.bf16.msra.mxu0 %v14818_v46  ;;  %v20407_v44 = vpop.f32.mrf.mxu0 }
 0x258   :  { %v20398_v39 = vld [vmem:[#allocation7] sm:$0xff] }
 0x259   :  { %v15327_v41 = vld [vmem:[#allocation6 + $0x19a0] sm:$0xf0]  ;;  %v21205_v20 = vperm.slane %v20398_v39, 0  ;;  %6337 = vmatpush.bf16.msra.mxu1 %v15074_v30 }
 0x25a   :  { %v18731_v0 = vld [vmem:[#allocation6 + $0x1b84] sm:$0xf]  ;;  %v15330_v11 = vor.u32 %v18667_v17, %v15327_v41  ;;  %v20409_v17 = vpop.f32.mrf.mxu1 }
 0x25b   :  { %v15583_v24 = vld [vmem:[#allocation6 + $0x1ba0] sm:$0xf0]  ;;  %v5996_v60 = vadd.f32 %v5995_v6, %v21205_v20  ;;  %v15589_v20 = vld [vmem:[#allocation6 + $0x1b88] sm:$0xf] }
 0x25c   :  { %v18531_v50 = vld [vmem:[#allocation6 + $0x1544] sm:$0xf]  ;;  %v15586_v27 = vor.u32 %v18731_v0, %v15583_v24  ;;  %6351 = vmatpush.bf16.msra.mxu2 %v15330_v11 }
 0x25d   :  { %v14783_v45 = vld [vmem:[#allocation6 + $0x1560] sm:$0xf0]  ;;  %v6010_v7 = vadd.f32 %v6009_v36, %v5996_v60 }
 0x25e   :  { %v18595_v22 = vld [vmem:[#allocation6 + $0x1744] sm:$0xf]  ;;  %v14786_v54 = vor.u32 %v18531_v50, %v14783_v45  ;;  %6365 = vmatpush.bf16.msra.mxu3 %v15586_v27 }
 0x25f   :  { %v15039_v8 = vld [vmem:[#allocation6 + $0x1760] sm:$0xf0]  ;;  %v6024_v26 = vadd.f32 %v6023_v35, %v6010_v7  ;;  %v6051_v7 = vpop.f32.mrf.mxu0 }
 0x260   :  { %v18659_v49 = vld [vmem:[#allocation6 + $0x1944] sm:$0xf]  ;;  %v15042_v10 = vor.u32 %v18595_v22, %v15039_v8  ;;  %6324 = vmatpush.bf16.msra.mxu0 %v14786_v54 }
 0x261   :  { %v15295_v56 = vld [vmem:[#allocation6 + $0x1960] sm:$0xf0]  ;;  %v6038_v30 = vadd.f32 %v6037_v21, %v6024_v26  ;;  %v12549_v26 = vld [vmem:[#allocation6 + $0x3c8] sm:$0xf] }
 0x262   :  { %v18723_v55 = vld [vmem:[#allocation6 + $0x1b44] sm:$0xf]  ;;  %v15298_v47 = vor.u32 %v18659_v49, %v15295_v56  ;;  %6338 = vmatpush.bf16.msra.mxu1 %v15042_v10 }
 0x263   :  { %v15551_v1 = vld [vmem:[#allocation6 + $0x1b60] sm:$0xf0] }
 0x264   :  { %v18523_v15 = vld [vmem:[#allocation6 + $0x1504] sm:$0xf]  ;;  %v15554_v53 = vor.u32 %v18723_v55, %v15551_v1  ;;  %6352 = vmatpush.bf16.msra.mxu2 %v15298_v47  ;;  %v20411_v47 = vpop.f32.mrf.mxu2 }
 0x265   :  { %v14751_v5 = vld [vmem:[#allocation6 + $0x1520] sm:$0xf0] }
 0x266   :  { %v18587_v14 = vld [vmem:[#allocation6 + $0x1704] sm:$0xf]  ;;  %v14754_v34 = vor.u32 %v18523_v15, %v14751_v5  ;;  %6366 = vmatpush.bf16.msra.mxu3 %v15554_v53  ;;  %v20413_v53 = vpop.f32.mrf.mxu3 }
 0x267   :  { %v15007_v38 = vld [vmem:[#allocation6 + $0x1720] sm:$0xf0] }
 0x268   :  { %v18651_v33 = vld [vmem:[#allocation6 + $0x1904] sm:$0xf]  ;;  %v15010_v43 = vor.u32 %v18587_v14, %v15007_v38  ;;  %6325 = vmatpush.bf16.msra.mxu0 %v14754_v34 }
 0x269   :  { %v15263_v57 = vld [vmem:[#allocation6 + $0x1920] sm:$0xf0] }
 0x26a   :  { %v18715_v32 = vld [vmem:[#allocation6 + $0x1b04] sm:$0xf]  ;;  %v15266_v12 = vor.u32 %v18651_v33, %v15263_v57  ;;  %6339 = vmatpush.bf16.msra.mxu1 %v15010_v43  ;;  %v6065_v57 = vpop.f32.mrf.mxu1  ;;  %v6052_v43 = vadd.f32 %v6051_v7, %v6038_v30  ;;  %v18040_v30 = vld [vmem:[#allocation6 + $0x5e4] sm:$0xf0] }
 0x26b   :  { %v15519_v37 = vld [vmem:[#allocation6 + $0x1b20] sm:$0xf0] }
 0x26c   :  { %v18515_v18 = vld [vmem:[#allocation6 + $0x14c4] sm:$0xf]  ;;  %v15522_v31 = vor.u32 %v18715_v32, %v15519_v37  ;;  %6353 = vmatpush.bf16.msra.mxu2 %v15266_v12  ;;  %v6066_v21 = vadd.f32 %v6065_v57, %v6052_v43  ;;  %v17896_v43 = vld [vmem:[#allocation6 + $0x164] sm:$0xf0] }
 0x26d   :  { %v14719_v28 = vld [vmem:[#allocation6 + $0x14e0] sm:$0xf0] }
 0x26e   :  { %v18579_v13 = vld [vmem:[#allocation6 + $0x16c4] sm:$0xf]  ;;  %v14722_v41 = vor.u32 %v18515_v18, %v14719_v28  ;;  %6367 = vmatpush.bf16.msra.mxu3 %v15522_v31 }
 0x26f   :  { %v14975_v42 = vld [vmem:[#allocation6 + $0x16e0] sm:$0xf0] }
 0x270   :  { %v18643_v29 = vld [vmem:[#allocation6 + $0x18c4] sm:$0xf]  ;;  %v14978_v0 = vor.u32 %v18579_v13, %v14975_v42  ;;  %6326 = vmatpush.bf16.msra.mxu0 %v14722_v41  ;;  %v17976_v41 = vld [vmem:[#allocation6 + $0x3e4] sm:$0xf0] }
 0x271   :  { %v15231_v51 = vld [vmem:[#allocation6 + $0x18e0] sm:$0xf0] }
 0x272   :  { %v18707_v25 = vld [vmem:[#allocation6 + $0x1ac4] sm:$0xf]  ;;  %v15234_v50 = vor.u32 %v18643_v29, %v15231_v51  ;;  %6340 = vmatpush.bf16.msra.mxu1 %v14978_v0  ;;  %v12805_v0 = vld [vmem:[#allocation6 + $0x5c8] sm:$0xf]  ;;  %v20417_v57 = vpop.f32.mrf.mxu1 }
 0x273   :  { %v15487_v58 = vld [vmem:[#allocation6 + $0x1ae0] sm:$0xf0]  ;;  %21222 = vst [vmem:[#allocation29_spill] sm:$0xff] %v20417_v57  ;;  %v18669_v57 = vld [vmem:[#allocation6 + $0x1994] sm:$0xf] }
 0x274   :  { %v18507_v24 = vld [vmem:[#allocation6 + $0x1484] sm:$0xf]  ;;  %v15490_v45 = vor.u32 %v18707_v25, %v15487_v58  ;;  %6354 = vmatpush.bf16.msra.mxu2 %v15234_v50  ;;  %v12293_v25 = vld [vmem:[#allocation6 + $0x1c8] sm:$0xf] }
 0x275   :  { %v14687_v46 = vld [vmem:[#allocation6 + $0x14a0] sm:$0xf0]  ;;  %v17912_v58 = vld [vmem:[#allocation6 + $0x1e4] sm:$0xf0] }
 0x276   :  { %v18571_v11 = vld [vmem:[#allocation6 + $0x1684] sm:$0xf]  ;;  %v14690_v55 = vor.u32 %v18507_v24, %v14687_v46  ;;  %6368 = vmatpush.bf16.msra.mxu3 %v15490_v45  ;;  %v13061_v50 = vld [vmem:[#allocation6 + $0x7c8] sm:$0xf] }
 0x277   :  { %v14943_v27 = vld [vmem:[#allocation6 + $0x16a0] sm:$0xf0]  ;;  %v18104_v45 = vld [vmem:[#allocation6 + $0x7e4] sm:$0xf0] }
 0x278   :  { %v18635_v22 = vld [vmem:[#allocation6 + $0x1884] sm:$0xf]  ;;  %v14946_v1 = vor.u32 %v18571_v11, %v14943_v27  ;;  %6327 = vmatpush.bf16.msra.mxu0 %v14690_v55  ;;  %v12261_v55 = vld [vmem:[#allocation6 + $0x188] sm:$0xf] }
 0x279   :  { %v15199_v8 = vld [vmem:[#allocation6 + $0x18a0] sm:$0xf0] }
 0x27a   :  { %v18699_v49 = vld [vmem:[#allocation6 + $0x1a84] sm:$0xf]  ;;  %v15202_v54 = vor.u32 %v18635_v22, %v15199_v8  ;;  %6341 = vmatpush.bf16.msra.mxu1 %v14946_v1  ;;  %v12294_v22 = vor.u32 %v17912_v58, %v12293_v25  ;;  %v12550_v8 = vor.u32 %v17976_v41, %v12549_v26  ;;  %v17904_v1 = vld [vmem:[#allocation6 + $0x1a4] sm:$0xf0] }
 0x27b   :  { %v15455_v56 = vld [vmem:[#allocation6 + $0x1aa0] sm:$0xf0]  ;;  %v12197_v58 = vld [vmem:[#allocation6 + $0x108] sm:$0xf] }
 0x27c   :  { %v18499_v6 = vld [vmem:[#allocation6 + $0x1444] sm:$0xf]  ;;  %v15458_v10 = vor.u32 %v18699_v49, %v15455_v56  ;;  %6355 = vmatpush.bf16.msra.mxu2 %v15202_v54  ;;  %v6079_v49 = vpop.f32.mrf.mxu2  ;;  %v6093_v56 = vpop.f32.mrf.mxu3  ;;  %v17888_v26 = vld [vmem:[#allocation6 + $0x124] sm:$0xf0] }
 0x27d   :  { %v14655_v36 = vld [vmem:[#allocation6 + $0x1460] sm:$0xf0]  ;;  %v6080_v54 = vadd.f32 %v6079_v49, %v6066_v21  ;;  %v12198_v49 = vor.u32 %v17888_v26, %v12197_v58 }
 0x27e   :  { %v18563_v60 = vld [vmem:[#allocation6 + $0x1644] sm:$0xf]  ;;  %v14658_v37 = vor.u32 %v18499_v6, %v14655_v36  ;;  %6369 = vmatpush.bf16.msra.mxu3 %v15458_v10  ;;  %v12806_v6 = vor.u32 %v18040_v30, %v12805_v0  ;;  %v13062_v36 = vor.u32 %v18104_v45, %v13061_v50  ;;  %v20415_v10 = vpop.f32.mrf.mxu0  ;;  %v12709_v30 = vld [vmem:[#allocation6 + $0x508] sm:$0xf] }
 0x27f   :  { %v14911_v15 = vld [vmem:[#allocation6 + $0x1660] sm:$0xf0]  ;;  %v6094_v7 = vadd.f32 %v6093_v56, %v6080_v54  ;;  %v18016_v45 = vld [vmem:[#allocation6 + $0x524] sm:$0xf0] }
 0x280   :  { %v18627_v5 = vld [vmem:[#allocation6 + $0x1844] sm:$0xf]  ;;  %v14914_v34 = vor.u32 %v18563_v60, %v14911_v15  ;;  %6328 = vmatpush.bf16.msra.mxu0 %v14658_v37  ;;  %v12517_v60 = vld [vmem:[#allocation6 + $0x388] sm:$0xf] }
 0x281   :  { %v15167_v14 = vld [vmem:[#allocation6 + $0x1860] sm:$0xf0]  ;;  %v17968_v15 = vld [vmem:[#allocation6 + $0x3a4] sm:$0xf0] }
 0x282   :  { %v18691_v38 = vld [vmem:[#allocation6 + $0x1a44] sm:$0xf]  ;;  %v15170_v31 = vor.u32 %v18627_v5, %v15167_v14  ;;  %6342 = vmatpush.bf16.msra.mxu1 %v14914_v34  ;;  %v12773_v5 = vld [vmem:[#allocation6 + $0x588] sm:$0xf]  ;;  %v12518_v37 = vor.u32 %v17968_v15, %v12517_v60 }
 0x283   :  { %v15423_v33 = vld [vmem:[#allocation6 + $0x1a60] sm:$0xf0]  ;;  %v18032_v14 = vld [vmem:[#allocation6 + $0x5a4] sm:$0xf0] }
 0x284   :  { %v18491_v32 = vld [vmem:[#allocation6 + $0x1404] sm:$0xf]  ;;  %v15426_v13 = vor.u32 %v18691_v38, %v15423_v33  ;;  %6356 = vmatpush.bf16.msra.mxu2 %v15170_v31  ;;  %v13029_v38 = vld [vmem:[#allocation6 + $0x788] sm:$0xf]  ;;  %v20423_v25 = vpop.f32.mrf.mxu2  ;;  %v20425_v50 = vpop.f32.mrf.mxu3 }
 0x285   :  { %v14623_v18 = vld [vmem:[#allocation6 + $0x1420] sm:$0xf0]  ;;  %v18096_v33 = vld [vmem:[#allocation6 + $0x7a4] sm:$0xf0]  ;;  %21223 = vst [vmem:[#allocation30_spill] sm:$0xff] %v20423_v25 }
 0x286   :  { %v18555_v28 = vld [vmem:[#allocation6 + $0x1604] sm:$0xf]  ;;  %v14626_v24 = vor.u32 %v18491_v32, %v14623_v18  ;;  %6370 = vmatpush.bf16.msra.mxu3 %v15426_v13  ;;  %v12262_v32 = vor.u32 %v17904_v1, %v12261_v55  ;;  %v12229_v34 = vld [vmem:[#allocation6 + $0x148] sm:$0xf]  ;;  %v12774_v18 = vor.u32 %v18032_v14, %v12773_v5  ;;  %21224 = vst [vmem:[#allocation31_spill] sm:$0xff] %v20425_v50 }
 0x287   :  { %v14879_v12 = vld [vmem:[#allocation6 + $0x1620] sm:$0xf0]  ;;  %v17960_v31 = vld [vmem:[#allocation6 + $0x364] sm:$0xf0]  ;;  %v12230_v21 = vor.u32 %v17896_v43, %v12229_v34  ;;  %v12781_v25 = vld [vmem:[#allocation6 + $0x590] sm:$0xf] }
 0x288   :  { %v18619_v42 = vld [vmem:[#allocation6 + $0x1804] sm:$0xf]  ;;  %v14882_v46 = vor.u32 %v18555_v28, %v14879_v12  ;;  %6329 = vmatpush.bf16.msra.mxu0 %v14626_v24  ;;  %v13030_v28 = vor.u32 %v18096_v33, %v13029_v38  ;;  %v12485_v12 = vld [vmem:[#allocation6 + $0x348] sm:$0xf] }
 0x289   :  { %v15135_v29 = vld [vmem:[#allocation6 + $0x1820] sm:$0xf0]  ;;  %v12741_v13 = vld [vmem:[#allocation6 + $0x548] sm:$0xf] }
 0x28a   :  { %v18683_v35 = vld [vmem:[#allocation6 + $0x1a04] sm:$0xf]  ;;  %v15138_v11 = vor.u32 %v18619_v42, %v15135_v29  ;;  %6343 = vmatpush.bf16.msra.mxu1 %v14882_v46  ;;  %v18024_v42 = vld [vmem:[#allocation6 + $0x564] sm:$0xf0] }
 0x28b   :  { %v15391_v51 = vld [vmem:[#allocation6 + $0x1a20] sm:$0xf0]  ;;  %6330 = vmatmul.bf16.vlgmr.msra.gmra.mxu0 %v20382_v40  ;;  %v12997_v29 = vld [vmem:[#allocation6 + $0x748] sm:$0xf]  ;;  %v12742_v41 = vor.u32 %v18024_v42, %v12741_v13 }
 0x28c   :  { %v15394_v27 = vor.u32 %v18683_v35, %v15391_v51  ;;  %6357 = vmatpush.bf16.msra.mxu2 %v15138_v11  ;;  %6378 = vmatpush.bf16.msrb.mxu0 %v12294_v22  ;;  %v18088_v35 = vld [vmem:[#allocation6 + $0x764] sm:$0xf0]  ;;  %v12486_v51 = vor.u32 %v17960_v31, %v12485_v12  ;;  %v6107_v22 = vpop.f32.mrf.mxu0  ;;  %v6135_v42 = vpop.f32.mrf.mxu2 }
 0x28d   :  { %6344 = vmatmul.bf16.vlgmr.msra.gmra.mxu1 %v20384_v2  ;;  %v12998_v0 = vor.u32 %v18088_v35, %v12997_v29  ;;  %v12453_v24 = vld [vmem:[#allocation6 + $0x308] sm:$0xf]  ;;  %v6149_v58 = vpop.f32.mrf.mxu3 }
 0x28e   :  { %6371 = vmatpush.bf16.msra.mxu3 %v15394_v27  ;;  %6392 = vmatpush.bf16.msrb.mxu1 %v12550_v8  ;;  %v17952_v46 = vld [vmem:[#allocation6 + $0x324] sm:$0xf0]  ;;  %v6108_v8 = vadd.f32 %v6107_v22, %v6094_v7 }
 0x28f   :  { %6358 = vmatmul.bf16.vlgmr.msra.gmra.mxu2 %v20347_v23  ;;  %v12965_v11 = vld [vmem:[#allocation6 + $0x708] sm:$0xf]  ;;  %v12454_v56 = vor.u32 %v17952_v46, %v12453_v24 }
 0x290   :  { %6406 = vmatpush.bf16.msrb.mxu2 %v12806_v6  ;;  %6379 = vmatpush.bf16.msrb.mxu0 %v12262_v32  ;;  %v18080_v27 = vld [vmem:[#allocation6 + $0x724] sm:$0xf0]  ;;  %v6121_v6 = vpop.f32.mrf.mxu1 }
 0x291   :  { %6372 = vmatmul.bf16.vlgmr.msra.gmra.mxu3 %v20355_v3  ;;  %v12165_v55 = vld [vmem:[#allocation6 + $0xc8] sm:$0xf]  ;;  %v12966_v54 = vor.u32 %v18080_v27, %v12965_v11  ;;  %v6122_v14 = vadd.f32 %v6121_v6, %v6108_v8 }
 0x292   :  { %6420 = vmatpush.bf16.msrb.mxu3 %v13062_v36  ;;  %6393 = vmatpush.bf16.msrb.mxu1 %v12518_v37  ;;  %v17880_v1 = vld [vmem:[#allocation6 + $0xe4] sm:$0xf0]  ;;  %v12710_v36 = vor.u32 %v18016_v45, %v12709_v30 }
 0x293   :  { %v12421_v60 = vld [vmem:[#allocation6 + $0x2c8] sm:$0xf]  ;;  %v12166_v37 = vor.u32 %v17880_v1, %v12165_v55 }
 0x294   :  { %6407 = vmatpush.bf16.msrb.mxu2 %v12774_v18  ;;  %6380 = vmatpush.bf16.msrb.mxu0 %v12230_v21  ;;  %v17944_v15 = vld [vmem:[#allocation6 + $0x2e4] sm:$0xf0] }
 0x295   :  { %v12677_v5 = vld [vmem:[#allocation6 + $0x4c8] sm:$0xf]  ;;  %v12422_v7 = vor.u32 %v17944_v15, %v12421_v60 }
 0x296   :  { %6421 = vmatpush.bf16.msrb.mxu3 %v13030_v28  ;;  %6394 = vmatpush.bf16.msrb.mxu1 %v12486_v51  ;;  %v18008_v38 = vld [vmem:[#allocation6 + $0x4e4] sm:$0xf0]  ;;  %v6136_v51 = vadd.f32 %v6135_v42, %v6122_v14 }
 0x297   :  { %v12933_v33 = vld [vmem:[#allocation6 + $0x6c8] sm:$0xf]  ;;  %v12678_v18 = vor.u32 %v18008_v38, %v12677_v5 }
 0x298   :  { %6408 = vmatpush.bf16.msrb.mxu2 %v12742_v41  ;;  %v18072_v32 = vld [vmem:[#allocation6 + $0x6e4] sm:$0xf0]  ;;  %6381 = vmatpush.bf16.msrb.mxu0 %v12198_v49  ;;  %v20427_v46 = vadd.f32 %v6149_v58, %v6136_v51 }
 0x299   :  { %v12133_v34 = vld [vmem:[#allocation6 + $0x88] sm:$0xf]  ;;  %v12934_v28 = vor.u32 %v18072_v32, %v12933_v33 }
 0x29a   :  { %6422 = vmatpush.bf16.msrb.mxu3 %v12998_v0  ;;  %6395 = vmatpush.bf16.msrb.mxu1 %v12454_v56  ;;  %v17872_v43 = vld [vmem:[#allocation6 + $0xa4] sm:$0xf0] }
 0x29b   :  { %v12389_v12 = vld [vmem:[#allocation6 + $0x288] sm:$0xf]  ;;  %v12134_v26 = vor.u32 %v17872_v43, %v12133_v34 }
 0x29c   :  { %6409 = vmatpush.bf16.msrb.mxu2 %v12710_v36  ;;  %v17936_v31 = vld [vmem:[#allocation6 + $0x2a4] sm:$0xf0]  ;;  %6382 = vmatpush.bf16.msrb.mxu0 %v12166_v37 }
 0x29d   :  { %v12645_v13 = vld [vmem:[#allocation6 + $0x488] sm:$0xf]  ;;  %v12390_v41 = vor.u32 %v17936_v31, %v12389_v12 }
 0x29e   :  { %6423 = vmatpush.bf16.msrb.mxu3 %v12966_v54  ;;  %v18000_v29 = vld [vmem:[#allocation6 + $0x4a4] sm:$0xf0]  ;;  %6396 = vmatpush.bf16.msrb.mxu1 %v12422_v7 }
 0x29f   :  { %v12901_v35 = vld [vmem:[#allocation6 + $0x688] sm:$0xf]  ;;  %v12646_v30 = vor.u32 %v18000_v29, %v12645_v13 }
 0x2a0   :  { %v18064_v21 = vld [vmem:[#allocation6 + $0x6a4] sm:$0xf0]  ;;  %6410 = vmatpush.bf16.msrb.mxu2 %v12678_v18  ;;  %6383 = vmatpush.bf16.msrb.mxu0 %v12134_v26 }
 0x2a1   :  { %v12101_v0 = vld [vmem:[#allocation6 + $0x48] sm:$0xf]  ;;  %v12902_v45 = vor.u32 %v18064_v21, %v12901_v35 }
 0x2a2   :  { %v17864_v24 = vld [vmem:[#allocation6 + $0x64] sm:$0xf0]  ;;  %6424 = vmatpush.bf16.msrb.mxu3 %v12934_v28  ;;  %6397 = vmatpush.bf16.msrb.mxu1 %v12390_v41 }
 0x2a3   :  { %v12357_v11 = vld [vmem:[#allocation6 + $0x248] sm:$0xf]  ;;  %v12102_v1 = vor.u32 %v17864_v24, %v12101_v0 }
 0x2a4   :  { %v17928_v27 = vld [vmem:[#allocation6 + $0x264] sm:$0xf0]  ;;  %6411 = vmatpush.bf16.msrb.mxu2 %v12646_v30 }
 0x2a5   :  { %v12613_v22 = vld [vmem:[#allocation6 + $0x448] sm:$0xf]  ;;  %v12358_v6 = vor.u32 %v17928_v27, %v12357_v11  ;;  %6384 = vmatpush.bf16.msrb.mxu0 %v12102_v1 }
 0x2a6   :  { %v17992_v8 = vld [vmem:[#allocation6 + $0x464] sm:$0xf0]  ;;  %6425 = vmatpush.bf16.msrb.mxu3 %v12902_v45 }
 0x2a7   :  { %v12869_v49 = vld [vmem:[#allocation6 + $0x648] sm:$0xf]  ;;  %v12614_v15 = vor.u32 %v17992_v8, %v12613_v22  ;;  %6398 = vmatpush.bf16.msrb.mxu1 %v12358_v6  ;;  %v20429_v8 = vpop.f32.mrf.mxu0  ;;  %v20431_v6 = vpop.f32.mrf.mxu1 }
 0x2a8   :  { %v18056_v56 = vld [vmem:[#allocation6 + $0x664] sm:$0xf0]  ;;  %21225 = vst [vmem:[#allocation32_spill] sm:$0xff] %v20429_v8  ;;  %v15079_v8 = vld [vmem:[#allocation6 + $0x17a8] sm:$0xf0] }
 0x2a9   :  { %v12069_v55 = vld [vmem:[#allocation6 + $0x8] sm:$0xf]  ;;  %v12870_v5 = vor.u32 %v18056_v56, %v12869_v49  ;;  %6412 = vmatpush.bf16.msrb.mxu2 %v12614_v15  ;;  %21226 = vst [vmem:[#allocation33_spill] sm:$0xff] %v20431_v6  ;;  %v18156_v6 = vld [vmem:[#allocation6 + $0x98c] sm:$0xf] }
 0x2aa   :  { %v17856_v36 = vld [vmem:[#allocation6 + $0x24] sm:$0xf0] }
 0x2ab   :  { %v12325_v54 = vld [vmem:[#allocation6 + $0x208] sm:$0xf]  ;;  %v12070_v28 = vor.u32 %v17856_v36, %v12069_v55  ;;  %6426 = vmatpush.bf16.msrb.mxu3 %v12870_v5 }
 0x2ac   :  { %v17920_v60 = vld [vmem:[#allocation6 + $0x224] sm:$0xf0] }
 0x2ad   :  { %v12581_v14 = vld [vmem:[#allocation6 + $0x408] sm:$0xf]  ;;  %v12326_v12 = vor.u32 %v17920_v60, %v12325_v54  ;;  %6385 = vmatpush.bf16.msrb.mxu0 %v12070_v28 }
 0x2ae   :  { %v17984_v38 = vld [vmem:[#allocation6 + $0x424] sm:$0xf0] }
 0x2af   :  { %v12837_v33 = vld [vmem:[#allocation6 + $0x608] sm:$0xf]  ;;  %v12582_v29 = vor.u32 %v17984_v38, %v12581_v14  ;;  %6399 = vmatpush.bf16.msrb.mxu1 %v12326_v12 }
 0x2b0   :  { %v18048_v32 = vld [vmem:[#allocation6 + $0x624] sm:$0xf0]  ;;  %6386 = vmatmul.bf16.vlgmr.msrb.gmra.mxu0 %v20187_v52 }
 0x2b1   :  { %v13317_v37 = vld [vmem:[#allocation6 + $0x9c8] sm:$0xf]  ;;  %v12838_v35 = vor.u32 %v18048_v32, %v12837_v33  ;;  %6413 = vmatpush.bf16.msrb.mxu2 %v12582_v29 }
 0x2b2   :  { %v18168_v7 = vld [vmem:[#allocation6 + $0x9e4] sm:$0xf0]  ;;  %6400 = vmatmul.bf16.vlgmr.msrb.gmra.mxu1 %v20189_v59 }
 0x2b3   :  { %v13573_v34 = vld [vmem:[#allocation6 + $0xbc8] sm:$0xf]  ;;  %v13318_v21 = vor.u32 %v18168_v7, %v13317_v37  ;;  %6427 = vmatpush.bf16.msrb.mxu3 %v12838_v35 }
 0x2b4   :  { %v18232_v43 = vld [vmem:[#allocation6 + $0xbe4] sm:$0xf0]  ;;  %6414 = vmatmul.bf16.vlgmr.msrb.gmra.mxu2 %v20191_v62 }
 0x2b5   :  { %v13829_v18 = vld [vmem:[#allocation6 + $0xdc8] sm:$0xf]  ;;  %v13574_v51 = vor.u32 %v18232_v43, %v13573_v34  ;;  %6434 = vmatpush.bf16.msra.mxu0 %v13318_v21  ;;  %v6163_v21 = vpop.f32.mrf.mxu0 }
 0x2b6   :  { %v18296_v31 = vld [vmem:[#allocation6 + $0xde4] sm:$0xf0]  ;;  %6428 = vmatmul.bf16.vlgmr.msrb.gmra.mxu3 %v20193_v48 }
 0x2b7   :  { %v14085_v13 = vld [vmem:[#allocation6 + $0xfc8] sm:$0xf]  ;;  %v13830_v41 = vor.u32 %v18296_v31, %v13829_v18  ;;  %6448 = vmatpush.bf16.msra.mxu1 %v13574_v51  ;;  %v20439_v51 = vpop.f32.mrf.mxu3 }
 0x2b8   :  { %v18360_v42 = vld [vmem:[#allocation6 + $0xfe4] sm:$0xf0]  ;;  %21228 = vst [vmem:[#allocation35_spill] sm:$0xff] %v20439_v51  ;;  %v18092_v51 = vld [vmem:[#allocation6 + $0x78c] sm:$0xf] }
 0x2b9   :  { %v13285_v58 = vld [vmem:[#allocation6 + $0x988] sm:$0xf]  ;;  %v14086_v0 = vor.u32 %v18360_v42, %v14085_v13  ;;  %6462 = vmatpush.bf16.msra.mxu2 %v13830_v41  ;;  %v20437_v13 = vpop.f32.mrf.mxu2 }
 0x2ba   :  { %v18160_v26 = vld [vmem:[#allocation6 + $0x9a4] sm:$0xf0]  ;;  %21227 = vst [vmem:[#allocation34_spill] sm:$0xff] %v20437_v13  ;;  %v13031_v13 = vld [vmem:[#allocation6 + $0x7a8] sm:$0xf0] }
 0x2bb   :  { %v13541_v24 = vld [vmem:[#allocation6 + $0xb88] sm:$0xf]  ;;  %v13286_v49 = vor.u32 %v18160_v26, %v13285_v58  ;;  %6476 = vmatpush.bf16.msra.mxu3 %v14086_v0  ;;  %v6164_v58 = vadd.f32 %v6163_v21, %v20427_v46 }
 0x2bc   :  { %v18224_v30 = vld [vmem:[#allocation6 + $0xba4] sm:$0xf0] }
 0x2bd   :  { %v13797_v45 = vld [vmem:[#allocation6 + $0xd88] sm:$0xf]  ;;  %v13542_v56 = vor.u32 %v18224_v30, %v13541_v24  ;;  %6435 = vmatpush.bf16.msra.mxu0 %v13286_v49  ;;  %v6177_v30 = vpop.f32.mrf.mxu1 }
 0x2be   :  { %v18288_v11 = vld [vmem:[#allocation6 + $0xda4] sm:$0xf0] }
 0x2bf   :  { %v14053_v27 = vld [vmem:[#allocation6 + $0xf88] sm:$0xf]  ;;  %v13798_v36 = vor.u32 %v18288_v11, %v13797_v45  ;;  %6449 = vmatpush.bf16.msra.mxu1 %v13542_v56  ;;  %v20442_v56 = vadd.f32 %v6177_v30, %v6164_v58 }
 0x2c0   :  { %v18352_v22 = vld [vmem:[#allocation6 + $0xfa4] sm:$0xf0] }
 0x2c1   :  { %v13253_v55 = vld [vmem:[#allocation6 + $0x948] sm:$0xf]  ;;  %v14054_v54 = vor.u32 %v18352_v22, %v14053_v27  ;;  %6463 = vmatpush.bf16.msra.mxu2 %v13798_v36  ;;  %21229 = vst [vmem:[#allocation36_spill] sm:$0xff] %v20442_v56 }
 0x2c2   :  { %v18152_v1 = vld [vmem:[#allocation6 + $0x964] sm:$0xf0] }
 0x2c3   :  { %v13509_v60 = vld [vmem:[#allocation6 + $0xb48] sm:$0xf]  ;;  %v13254_v32 = vor.u32 %v18152_v1, %v13253_v55  ;;  %6477 = vmatpush.bf16.msra.mxu3 %v14054_v54  ;;  %v21204_v54 = vperm.slane %v20398_v39, 1 }
 0x2c4   :  { %v18216_v15 = vld [vmem:[#allocation6 + $0xb64] sm:$0xf0] }
 0x2c5   :  { %v13765_v5 = vld [vmem:[#allocation6 + $0xd48] sm:$0xf]  ;;  %v13510_v37 = vor.u32 %v18216_v15, %v13509_v60  ;;  %6436 = vmatpush.bf16.msra.mxu0 %v13254_v32 }
 0x2c6   :  { %v18280_v14 = vld [vmem:[#allocation6 + $0xd64] sm:$0xf0] }
 0x2c7   :  { %v14021_v38 = vld [vmem:[#allocation6 + $0xf48] sm:$0xf]  ;;  %v13766_v43 = vor.u32 %v18280_v14, %v13765_v5  ;;  %6450 = vmatpush.bf16.msra.mxu1 %v13510_v37 }
 0x2c8   :  { %v18344_v33 = vld [vmem:[#allocation6 + $0xf64] sm:$0xf0] }
 0x2c9   :  { %v13221_v7 = vld [vmem:[#allocation6 + $0x908] sm:$0xf]  ;;  %v14022_v18 = vor.u32 %v18344_v33, %v14021_v38  ;;  %6464 = vmatpush.bf16.msra.mxu2 %v13766_v43 }
 0x2ca   :  { %v18144_v34 = vld [vmem:[#allocation6 + $0x924] sm:$0xf0] }
 0x2cb   :  { %v13477_v28 = vld [vmem:[#allocation6 + $0xb08] sm:$0xf]  ;;  %v13222_v26 = vor.u32 %v18144_v34, %v13221_v7  ;;  %6478 = vmatpush.bf16.msra.mxu3 %v14022_v18  ;;  %v6191_v7 = vpop.f32.mrf.mxu2 }
 0x2cc   :  { %v18208_v12 = vld [vmem:[#allocation6 + $0xb24] sm:$0xf0] }
 0x2cd   :  { %v13733_v31 = vld [vmem:[#allocation6 + $0xd08] sm:$0xf]  ;;  %v13478_v41 = vor.u32 %v18208_v12, %v13477_v28  ;;  %6437 = vmatpush.bf16.msra.mxu0 %v13222_v26  ;;  %v6192_v28 = vadd.f32 %v6191_v7, %v21204_v54  ;;  %v6205_v12 = vpop.f32.mrf.mxu3 }
 0x2ce   :  { %v18272_v42 = vld [vmem:[#allocation6 + $0xd24] sm:$0xf0] }
 0x2cf   :  { %v13989_v29 = vld [vmem:[#allocation6 + $0xf08] sm:$0xf]  ;;  %v13734_v45 = vor.u32 %v18272_v42, %v13733_v31  ;;  %6451 = vmatpush.bf16.msra.mxu1 %v13478_v41  ;;  %v20447_v21 = vadd.f32 %v6205_v12, %v6192_v28 }
 0x2d0   :  { %v18336_v35 = vld [vmem:[#allocation6 + $0xf24] sm:$0xf0] }
 0x2d1   :  { %v13189_v0 = vld [vmem:[#allocation6 + $0x8c8] sm:$0xf]  ;;  %v13990_v11 = vor.u32 %v18336_v35, %v13989_v29  ;;  %6465 = vmatpush.bf16.msra.mxu2 %v13734_v45 }
 0x2d2   :  { %v18136_v24 = vld [vmem:[#allocation6 + $0x8e4] sm:$0xf0] }
 0x2d3   :  { %v13445_v27 = vld [vmem:[#allocation6 + $0xac8] sm:$0xf]  ;;  %v13190_v46 = vor.u32 %v18136_v24, %v13189_v0  ;;  %6479 = vmatpush.bf16.msra.mxu3 %v13990_v11 }
 0x2d4   :  { %v18200_v22 = vld [vmem:[#allocation6 + $0xae4] sm:$0xf0] }
 0x2d5   :  { %v13701_v49 = vld [vmem:[#allocation6 + $0xcc8] sm:$0xf]  ;;  %v13446_v60 = vor.u32 %v18200_v22, %v13445_v27  ;;  %6438 = vmatpush.bf16.msra.mxu0 %v13190_v46 }
 0x2d6   :  { %v18264_v55 = vld [vmem:[#allocation6 + $0xce4] sm:$0xf0] }
 0x2d7   :  { %v13957_v1 = vld [vmem:[#allocation6 + $0xec8] sm:$0xf]  ;;  %v13702_v14 = vor.u32 %v18264_v55, %v13701_v49  ;;  %6452 = vmatpush.bf16.msra.mxu1 %v13446_v60 }
 0x2d8   :  { %v18328_v36 = vld [vmem:[#allocation6 + $0xee4] sm:$0xf0] }
 0x2d9   :  { %v13157_v15 = vld [vmem:[#allocation6 + $0x888] sm:$0xf]  ;;  %v13958_v38 = vor.u32 %v18328_v36, %v13957_v1  ;;  %6466 = vmatpush.bf16.msra.mxu2 %v13702_v14 }
 0x2da   :  { %v18128_v5 = vld [vmem:[#allocation6 + $0x8a4] sm:$0xf0] }
 0x2db   :  { %v13413_v33 = vld [vmem:[#allocation6 + $0xa88] sm:$0xf]  ;;  %v13158_v31 = vor.u32 %v18128_v5, %v13157_v15  ;;  %6480 = vmatpush.bf16.msra.mxu3 %v13958_v38 }
 0x2dc   :  { %v18192_v32 = vld [vmem:[#allocation6 + $0xaa4] sm:$0xf0] }
 0x2dd   :  { %v13669_v37 = vld [vmem:[#allocation6 + $0xc88] sm:$0xf]  ;;  %v13414_v42 = vor.u32 %v18192_v32, %v13413_v33  ;;  %6439 = vmatpush.bf16.msra.mxu0 %v13158_v31 }
 0x2de   :  { %v18256_v34 = vld [vmem:[#allocation6 + $0xca4] sm:$0xf0] }
 0x2df   :  { %v13925_v43 = vld [vmem:[#allocation6 + $0xe88] sm:$0xf]  ;;  %v13670_v58 = vor.u32 %v18256_v34, %v13669_v37  ;;  %6453 = vmatpush.bf16.msra.mxu1 %v13414_v42 }
 0x2e0   :  { %v18320_v18 = vld [vmem:[#allocation6 + $0xea4] sm:$0xf0] }
 0x2e1   :  { %v13125_v29 = vld [vmem:[#allocation6 + $0x848] sm:$0xf]  ;;  %v13926_v26 = vor.u32 %v18320_v18, %v13925_v43  ;;  %6467 = vmatpush.bf16.msra.mxu2 %v13670_v58 }
 0x2e2   :  { %v18120_v35 = vld [vmem:[#allocation6 + $0x864] sm:$0xf0] }
 0x2e3   :  { %v13381_v41 = vld [vmem:[#allocation6 + $0xa48] sm:$0xf]  ;;  %v13126_v22 = vor.u32 %v18120_v35, %v13125_v29  ;;  %6481 = vmatpush.bf16.msra.mxu3 %v13926_v26 }
 0x2e4   :  { %v18184_v0 = vld [vmem:[#allocation6 + $0xa64] sm:$0xf0] }
 0x2e5   :  { %v13637_v24 = vld [vmem:[#allocation6 + $0xc48] sm:$0xf]  ;;  %v13382_v49 = vor.u32 %v18184_v0, %v13381_v41  ;;  %6440 = vmatpush.bf16.msra.mxu0 %v13126_v22 }
 0x2e6   :  { %v18248_v30 = vld [vmem:[#allocation6 + $0xc64] sm:$0xf0] }
 0x2e7   :  { %v13893_v45 = vld [vmem:[#allocation6 + $0xe48] sm:$0xf]  ;;  %v13638_v46 = vor.u32 %v18248_v30, %v13637_v24  ;;  %6454 = vmatpush.bf16.msra.mxu1 %v13382_v49 }
 0x2e8   :  { %v18312_v11 = vld [vmem:[#allocation6 + $0xe64] sm:$0xf0] }
 0x2e9   :  { %v13093_v27 = vld [vmem:[#allocation6 + $0x808] sm:$0xf]  ;;  %v13894_v60 = vor.u32 %v18312_v11, %v13893_v45  ;;  %6468 = vmatpush.bf16.msra.mxu2 %v13638_v46 }
 0x2ea   :  { %v18112_v55 = vld [vmem:[#allocation6 + $0x824] sm:$0xf0] }
 0x2eb   :  { %v13349_v1 = vld [vmem:[#allocation6 + $0xa08] sm:$0xf]  ;;  %v13094_v43 = vor.u32 %v18112_v55, %v13093_v27  ;;  %6482 = vmatpush.bf16.msra.mxu3 %v13894_v60  ;;  %v20449_v55 = vpop.f32.mrf.mxu0 }
 0x2ec   :  { %v18176_v36 = vld [vmem:[#allocation6 + $0xa24] sm:$0xf0]  ;;  %21230 = vst [vmem:[#allocation37_spill] sm:$0xff] %v20449_v55 }
 0x2ed   :  { %v13605_v15 = vld [vmem:[#allocation6 + $0xc08] sm:$0xf]  ;;  %v13350_v18 = vor.u32 %v18176_v36, %v13349_v1  ;;  %6441 = vmatpush.bf16.msra.mxu0 %v13094_v43 }
 0x2ee   :  { %v18240_v5 = vld [vmem:[#allocation6 + $0xc24] sm:$0xf0] }
 0x2ef   :  { %v13861_v14 = vld [vmem:[#allocation6 + $0xe08] sm:$0xf]  ;;  %v13606_v42 = vor.u32 %v18240_v5, %v13605_v15  ;;  %6455 = vmatpush.bf16.msra.mxu1 %v13350_v18  ;;  %v20451_v15 = vpop.f32.mrf.mxu1 }
 0x2f0   :  { %v18304_v38 = vld [vmem:[#allocation6 + $0xe24] sm:$0xf0]  ;;  %21231 = vst [vmem:[#allocation38_spill] sm:$0xff] %v20451_v15  ;;  %6442 = vmatmul.bf16.vlgmr.msra.gmra.mxu0 %v20284_v9  ;;  %v17900_v15 = vld [vmem:[#allocation6 + $0x18c] sm:$0xf] }
 0x2f1   :  { %v14341_v33 = vld [vmem:[#allocation6 + $0x11c8] sm:$0xf]  ;;  %v13862_v29 = vor.u32 %v18304_v38, %v13861_v14  ;;  %6469 = vmatpush.bf16.msra.mxu2 %v13606_v42 }
 0x2f2   :  { %v18424_v32 = vld [vmem:[#allocation6 + $0x11e4] sm:$0xf0]  ;;  %6456 = vmatmul.bf16.vlgmr.msra.gmra.mxu1 %v20286_v63 }
 0x2f3   :  { %v14597_v37 = vld [vmem:[#allocation6 + $0x13c8] sm:$0xf]  ;;  %v14342_v35 = vor.u32 %v18424_v32, %v14341_v33  ;;  %6483 = vmatpush.bf16.msra.mxu3 %v13862_v29 }
 0x2f4   :  { %v18488_v7 = vld [vmem:[#allocation6 + $0x13e4] sm:$0xf0]  ;;  %6470 = vmatmul.bf16.vlgmr.msra.gmra.mxu2 %v20293_v19 }
 0x2f5   :  { %v14853_v34 = vld [vmem:[#allocation6 + $0x15c8] sm:$0xf]  ;;  %v14598_v58 = vor.u32 %v18488_v7, %v14597_v37  ;;  %6490 = vmatpush.bf16.msrb.mxu0 %v14342_v35 }
 0x2f6   :  { %v18552_v28 = vld [vmem:[#allocation6 + $0x15e4] sm:$0xf0]  ;;  %6484 = vmatmul.bf16.vlgmr.msra.gmra.mxu3 %v20295_v61 }
 0x2f7   :  { %v15109_v12 = vld [vmem:[#allocation6 + $0x17c8] sm:$0xf]  ;;  %v14854_v0 = vor.u32 %v18552_v28, %v14853_v34  ;;  %6504 = vmatpush.bf16.msrb.mxu1 %v14598_v58 }
 0x2f8   :  { %v18616_v31 = vld [vmem:[#allocation6 + $0x17e4] sm:$0xf0] }
 0x2f9   :  { %v14309_v26 = vld [vmem:[#allocation6 + $0x1188] sm:$0xf]  ;;  %v15110_v24 = vor.u32 %v18616_v31, %v15109_v12  ;;  %6518 = vmatpush.bf16.msrb.mxu2 %v14854_v0 }
 0x2fa   :  { %v18416_v41 = vld [vmem:[#allocation6 + $0x11a4] sm:$0xf0] }
 0x2fb   :  { %v14565_v30 = vld [vmem:[#allocation6 + $0x1388] sm:$0xf]  ;;  %v14310_v1 = vor.u32 %v18416_v41, %v14309_v26  ;;  %6532 = vmatpush.bf16.msrb.mxu3 %v15110_v24  ;;  %v20457_v26 = vpop.f32.mrf.mxu2 }
 0x2fc   :  { %v18480_v45 = vld [vmem:[#allocation6 + $0x13a4] sm:$0xf0] }
 0x2fd   :  { %v14821_v11 = vld [vmem:[#allocation6 + $0x1588] sm:$0xf]  ;;  %v14566_v36 = vor.u32 %v18480_v45, %v14565_v30  ;;  %6491 = vmatpush.bf16.msrb.mxu0 %v14310_v1  ;;  %v6219_v30 = vpop.f32.mrf.mxu0  ;;  %v20459_v45 = vpop.f32.mrf.mxu3 }
 0x2fe   :  { %v18544_v27 = vld [vmem:[#allocation6 + $0x15a4] sm:$0xf0] }
 0x2ff   :  { %v15077_v22 = vld [vmem:[#allocation6 + $0x1788] sm:$0xf]  ;;  %v14822_v5 = vor.u32 %v18544_v27, %v14821_v11  ;;  %6505 = vmatpush.bf16.msrb.mxu1 %v14566_v36  ;;  %v6220_v11 = vadd.f32 %v6219_v30, %v20447_v21  ;;  %v6233_v36 = vpop.f32.mrf.mxu1 }
 0x300   :  { %v18608_v49 = vld [vmem:[#allocation6 + $0x17a4] sm:$0xf0] }
 0x301   :  { %v14277_v46 = vld [vmem:[#allocation6 + $0x1148] sm:$0xf]  ;;  %v15078_v14 = vor.u32 %v18608_v49, %v15077_v22  ;;  %6519 = vmatpush.bf16.msrb.mxu2 %v14822_v5 }
 0x302   :  { %v18408_v60 = vld [vmem:[#allocation6 + $0x1164] sm:$0xf0] }
 0x303   :  { %v14533_v38 = vld [vmem:[#allocation6 + $0x1348] sm:$0xf]  ;;  %v14278_v43 = vor.u32 %v18408_v60, %v14277_v46  ;;  %6533 = vmatpush.bf16.msrb.mxu3 %v15078_v14 }
 0x304   :  { %v18472_v33 = vld [vmem:[#allocation6 + $0x1364] sm:$0xf0] }
 0x305   :  { %v14789_v32 = vld [vmem:[#allocation6 + $0x1548] sm:$0xf]  ;;  %v14534_v18 = vor.u32 %v18472_v33, %v14533_v38  ;;  %6492 = vmatpush.bf16.msrb.mxu0 %v14278_v43  ;;  %v6234_v33 = vadd.f32 %v6233_v36, %v6220_v11  ;;  %v6261_v30 = vpop.f32.mrf.mxu3 }
 0x306   :  { %v18536_v37 = vld [vmem:[#allocation6 + $0x1564] sm:$0xf0] }
 0x307   :  { %v15045_v7 = vld [vmem:[#allocation6 + $0x1748] sm:$0xf]  ;;  %v14790_v31 = vor.u32 %v18536_v37, %v14789_v32  ;;  %6506 = vmatpush.bf16.msrb.mxu1 %v14534_v18 }
 0x308   :  { %v18600_v34 = vld [vmem:[#allocation6 + $0x1764] sm:$0xf0] }
 0x309   :  { %v14245_v28 = vld [vmem:[#allocation6 + $0x1108] sm:$0xf]  ;;  %v15046_v42 = vor.u32 %v18600_v34, %v15045_v7  ;;  %6520 = vmatpush.bf16.msrb.mxu2 %v14790_v31 }
 0x30a   :  { %v18400_v12 = vld [vmem:[#allocation6 + $0x1124] sm:$0xf0] }
 0x30b   :  { %v14501_v29 = vld [vmem:[#allocation6 + $0x1308] sm:$0xf]  ;;  %v14246_v27 = vor.u32 %v18400_v12, %v14245_v28  ;;  %6534 = vmatpush.bf16.msrb.mxu3 %v15046_v42 }
 0x30c   :  { %v18464_v35 = vld [vmem:[#allocation6 + $0x1324] sm:$0xf0] }
 0x30d   :  { %v14757_v58 = vld [vmem:[#allocation6 + $0x1508] sm:$0xf]  ;;  %v14502_v22 = vor.u32 %v18464_v35, %v14501_v29  ;;  %6493 = vmatpush.bf16.msrb.mxu0 %v14246_v27  ;;  %v6247_v35 = vpop.f32.mrf.mxu2 }
 0x30e   :  { %v18528_v41 = vld [vmem:[#allocation6 + $0x1524] sm:$0xf0] }
 0x30f   :  { %v15013_v0 = vld [vmem:[#allocation6 + $0x1708] sm:$0xf]  ;;  %v14758_v46 = vor.u32 %v18528_v41, %v14757_v58  ;;  %6507 = vmatpush.bf16.msrb.mxu1 %v14502_v22 }
 0x310   :  { %v18592_v24 = vld [vmem:[#allocation6 + $0x1724] sm:$0xf0] }
 0x311   :  { %v14213_v49 = vld [vmem:[#allocation6 + $0x10c8] sm:$0xf]  ;;  %v15014_v60 = vor.u32 %v18592_v24, %v15013_v0  ;;  %6521 = vmatpush.bf16.msrb.mxu2 %v14758_v46  ;;  %v6248_v24 = vadd.f32 %v6247_v35, %v6234_v33 }
 0x312   :  { %v18392_v1 = vld [vmem:[#allocation6 + $0x10e4] sm:$0xf0] }
 0x313   :  { %v14469_v5 = vld [vmem:[#allocation6 + $0x12c8] sm:$0xf]  ;;  %v14214_v34 = vor.u32 %v18392_v1, %v14213_v49  ;;  %6535 = vmatpush.bf16.msrb.mxu3 %v15014_v60  ;;  %v20462_v1 = vadd.f32 %v6261_v30, %v6248_v24  ;;  %v17908_v30 = vld [vmem:[#allocation6 + $0x1cc] sm:$0xf] }
 0x314   :  { %v18456_v14 = vld [vmem:[#allocation6 + $0x12e4] sm:$0xf0] }
 0x315   :  { %v14725_v38 = vld [vmem:[#allocation6 + $0x14c8] sm:$0xf]  ;;  %v14470_v21 = vor.u32 %v18456_v14, %v14469_v5  ;;  %6494 = vmatpush.bf16.msrb.mxu0 %v14214_v34 }
 0x316   :  { %v18520_v32 = vld [vmem:[#allocation6 + $0x14e4] sm:$0xf0] }
 0x317   :  { %v14981_v37 = vld [vmem:[#allocation6 + $0x16c8] sm:$0xf]  ;;  %v14726_v28 = vor.u32 %v18520_v32, %v14725_v38  ;;  %6508 = vmatpush.bf16.msrb.mxu1 %v14470_v21 }
 0x318   :  { %v18584_v7 = vld [vmem:[#allocation6 + $0x16e4] sm:$0xf0] }
 0x319   :  { %v14181_v43 = vld [vmem:[#allocation6 + $0x1088] sm:$0xf]  ;;  %v14982_v12 = vor.u32 %v18584_v7, %v14981_v37  ;;  %6522 = vmatpush.bf16.msrb.mxu2 %v14726_v28 }
 0x31a   :  { %v18384_v18 = vld [vmem:[#allocation6 + $0x10a4] sm:$0xf0] }
 0x31b   :  { %v14437_v31 = vld [vmem:[#allocation6 + $0x1288] sm:$0xf]  ;;  %v14182_v11 = vor.u32 %v18384_v18, %v14181_v43  ;;  %6536 = vmatpush.bf16.msrb.mxu3 %v14982_v12 }
 0x31c   :  { %v18448_v42 = vld [vmem:[#allocation6 + $0x12a4] sm:$0xf0] }
 0x31d   :  { %v14693_v29 = vld [vmem:[#allocation6 + $0x1488] sm:$0xf]  ;;  %v14438_v27 = vor.u32 %v18448_v42, %v14437_v31  ;;  %6495 = vmatpush.bf16.msrb.mxu0 %v14182_v11 }
 0x31e   :  { %v18512_v58 = vld [vmem:[#allocation6 + $0x14a4] sm:$0xf0] }
 0x31f   :  { %v14949_v41 = vld [vmem:[#allocation6 + $0x1688] sm:$0xf]  ;;  %v14694_v36 = vor.u32 %v18512_v58, %v14693_v29  ;;  %6509 = vmatpush.bf16.msrb.mxu1 %v14438_v27 }
 0x320   :  { %v18576_v0 = vld [vmem:[#allocation6 + $0x16a4] sm:$0xf0] }
 0x321   :  { %v14149_v22 = vld [vmem:[#allocation6 + $0x1048] sm:$0xf]  ;;  %v14950_v46 = vor.u32 %v18576_v0, %v14949_v41  ;;  %6523 = vmatpush.bf16.msrb.mxu2 %v14694_v36 }
 0x322   :  { %v18376_v49 = vld [vmem:[#allocation6 + $0x1064] sm:$0xf0] }
 0x323   :  { %v14405_v60 = vld [vmem:[#allocation6 + $0x1248] sm:$0xf]  ;;  %v14150_v7 = vor.u32 %v18376_v49, %v14149_v22  ;;  %6537 = vmatpush.bf16.msrb.mxu3 %v14950_v46  ;;  %v12295_v22 = vld [vmem:[#allocation6 + $0x1e8] sm:$0xf0] }
 0x324   :  { %v18440_v5 = vld [vmem:[#allocation6 + $0x1264] sm:$0xf0]  ;;  %v17972_v49 = vld [vmem:[#allocation6 + $0x3cc] sm:$0xf] }
 0x325   :  { %v14661_v14 = vld [vmem:[#allocation6 + $0x1448] sm:$0xf]  ;;  %v14406_v34 = vor.u32 %v18440_v5, %v14405_v60  ;;  %6496 = vmatpush.bf16.msrb.mxu0 %v14150_v7  ;;  %v12551_v60 = vld [vmem:[#allocation6 + $0x3e8] sm:$0xf0] }
 0x326   :  { %v18504_v38 = vld [vmem:[#allocation6 + $0x1464] sm:$0xf0]  ;;  %v12554_v54 = vor.u32 %v17972_v49, %v12551_v60  ;;  %v17964_v7 = vld [vmem:[#allocation6 + $0x38c] sm:$0xf] }
 0x327   :  { %v14917_v32 = vld [vmem:[#allocation6 + $0x1648] sm:$0xf]  ;;  %v14662_v28 = vor.u32 %v18504_v38, %v14661_v14  ;;  %6510 = vmatpush.bf16.msrb.mxu1 %v14406_v34  ;;  %v12519_v34 = vld [vmem:[#allocation6 + $0x3a8] sm:$0xf0] }
 0x328   :  { %v18568_v37 = vld [vmem:[#allocation6 + $0x1664] sm:$0xf0]  ;;  %v17884_v60 = vld [vmem:[#allocation6 + $0x10c] sm:$0xf] }
 0x329   :  { %v14117_v33 = vld [vmem:[#allocation6 + $0x1008] sm:$0xf]  ;;  %v14918_v12 = vor.u32 %v18568_v37, %v14917_v32  ;;  %6524 = vmatpush.bf16.msrb.mxu2 %v14662_v28  ;;  %v12298_v37 = vor.u32 %v17908_v30, %v12295_v22  ;;  %v12487_v30 = vld [vmem:[#allocation6 + $0x368] sm:$0xf0] }
 0x32a   :  { %v18368_v21 = vld [vmem:[#allocation6 + $0x1024] sm:$0xf0] }
 0x32b   :  { %v14373_v43 = vld [vmem:[#allocation6 + $0x1208] sm:$0xf]  ;;  %v14118_v11 = vor.u32 %v18368_v21, %v14117_v33  ;;  %6538 = vmatpush.bf16.msrb.mxu3 %v14918_v12  ;;  %v12263_v33 = vld [vmem:[#allocation6 + $0x1a8] sm:$0xf0]  ;;  %v20464_v21 = vpop.f32.mrf.mxu0 }
 0x32c   :  { %v18432_v18 = vld [vmem:[#allocation6 + $0x1224] sm:$0xf0] }
 0x32d   :  { %v14629_v31 = vld [vmem:[#allocation6 + $0x1408] sm:$0xf]  ;;  %v14374_v27 = vor.u32 %v18432_v18, %v14373_v43  ;;  %6497 = vmatpush.bf16.msrb.mxu0 %v14118_v11 }
 0x32e   :  { %v18496_v42 = vld [vmem:[#allocation6 + $0x1424] sm:$0xf0] }
 0x32f   :  { %v14885_v29 = vld [vmem:[#allocation6 + $0x1608] sm:$0xf]  ;;  %v14630_v36 = vor.u32 %v18496_v42, %v14629_v31  ;;  %6511 = vmatpush.bf16.msrb.mxu1 %v14374_v27  ;;  %v20466_v31 = vpop.f32.mrf.mxu1  ;;  %v12266_v42 = vor.u32 %v17900_v15, %v12263_v33 }
 0x330   :  { %v18560_v35 = vld [vmem:[#allocation6 + $0x1624] sm:$0xf0]  ;;  %6498 = vmatmul.bf16.vlgmr.msrb.gmra.mxu0 %v20378_v4 }
 0x331   :  { %v15365_v58 = vld [vmem:[#allocation6 + $0x19c8] sm:$0xf]  ;;  %v14886_v46 = vor.u32 %v18560_v35, %v14885_v29  ;;  %6525 = vmatpush.bf16.msrb.mxu2 %v14630_v36  ;;  %v12522_v29 = vor.u32 %v17964_v7, %v12519_v34  ;;  %v20472_v36 = vpop.f32.mrf.mxu2 }
 0x332   :  { %v18680_v41 = vld [vmem:[#allocation6 + $0x19e4] sm:$0xf0]  ;;  %6512 = vmatmul.bf16.vlgmr.msrb.gmra.mxu1 %v20380_v16  ;;  %21232 = vst [vmem:[#allocation39_spill] sm:$0xff] %v20472_v36  ;;  %v17901_v36 = vld [vmem:[#allocation6 + $0x194] sm:$0xf] }
 0x333   :  { %v15621_v0 = vld [vmem:[#allocation6 + $0x1bc8] sm:$0xf]  ;;  %v15366_v5 = vor.u32 %v18680_v41, %v15365_v58  ;;  %6539 = vmatpush.bf16.msrb.mxu3 %v14886_v46  ;;  %v17892_v41 = vld [vmem:[#allocation6 + $0x14c] sm:$0xf] }
 0x334   :  { %v18744_v24 = vld [vmem:[#allocation6 + $0x1be4] sm:$0xf0]  ;;  %6526 = vmatmul.bf16.vlgmr.msrb.gmra.mxu2 %v20382_v40  ;;  %v12199_v46 = vld [vmem:[#allocation6 + $0x128] sm:$0xf0] }
 0x335   :  { %v15622_v14 = vor.u32 %v18744_v24, %v15621_v0  ;;  %v15333_v38 = vld [vmem:[#allocation6 + $0x1988] sm:$0xf]  ;;  %6546 = vmatpush.bf16.msra.mxu0 %v15366_v5  ;;  %6574 = vmatpush.bf16.msra.mxu2 %v12298_v37  ;;  %v12231_v0 = vld [vmem:[#allocation6 + $0x168] sm:$0xf0] }
 0x336   :  { %v18672_v32 = vld [vmem:[#allocation6 + $0x19a4] sm:$0xf0]  ;;  %v17956_v24 = vld [vmem:[#allocation6 + $0x34c] sm:$0xf]  ;;  %6540 = vmatmul.bf16.vlgmr.msrb.gmra.mxu3 %v20384_v2  ;;  %v12234_v11 = vor.u32 %v17892_v41, %v12231_v0 }
 0x337   :  { %v18736_v56 = vld [vmem:[#allocation6 + $0x1ba4] sm:$0xf0]  ;;  %6560 = vmatpush.bf16.msra.mxu1 %v15622_v14  ;;  %v15334_v43 = vor.u32 %v18672_v32, %v15333_v38  ;;  %6588 = vmatpush.bf16.msra.mxu3 %v12554_v54  ;;  %v12490_v27 = vor.u32 %v17956_v24, %v12487_v30  ;;  %v17948_v5 = vld [vmem:[#allocation6 + $0x30c] sm:$0xf]  ;;  %v6275_v38 = vpop.f32.mrf.mxu0  ;;  %v20474_v32 = vpop.f32.mrf.mxu3 }
 0x338   :  { %v15590_v18 = vor.u32 %v18736_v56, %v15589_v20  ;;  %v15301_v28 = vld [vmem:[#allocation6 + $0x1948] sm:$0xf]  ;;  %v12455_v14 = vld [vmem:[#allocation6 + $0x328] sm:$0xf0]  ;;  %21233 = vst [vmem:[#allocation40_spill] sm:$0xff] %v20474_v32  ;;  %v6276_v37 = vadd.f32 %v6275_v38, %v20462_v1 }
 0x339   :  { %v18664_v12 = vld [vmem:[#allocation6 + $0x1964] sm:$0xf0]  ;;  %6547 = vmatpush.bf16.msra.mxu0 %v15334_v43  ;;  %6575 = vmatpush.bf16.msra.mxu2 %v12266_v42  ;;  %v12167_v41 = vld [vmem:[#allocation6 + $0xe8] sm:$0xf0]  ;;  %v12525_v32 = vld [vmem:[#allocation6 + $0x390] sm:$0xf] }
 0x33a   :  { %v15557_v35 = vld [vmem:[#allocation6 + $0x1b48] sm:$0xf]  ;;  %v15302_v20 = vor.u32 %v18664_v12, %v15301_v28  ;;  %v12202_v28 = vor.u32 %v17884_v60, %v12199_v46  ;;  %v12458_v12 = vor.u32 %v17948_v5, %v12455_v14  ;;  %v17940_v0 = vld [vmem:[#allocation6 + $0x2cc] sm:$0xf] }
 0x33b   :  { %v18728_v58 = vld [vmem:[#allocation6 + $0x1b64] sm:$0xf0]  ;;  %6561 = vmatpush.bf16.msra.mxu1 %v15590_v18  ;;  %6589 = vmatpush.bf16.msra.mxu3 %v12522_v29  ;;  %v6289_v18 = vpop.f32.mrf.mxu1  ;;  %v12423_v24 = vld [vmem:[#allocation6 + $0x2e8] sm:$0xf0] }
 0x33c   :  { %v15558_v56 = vor.u32 %v18728_v58, %v15557_v35  ;;  %v15269_v54 = vld [vmem:[#allocation6 + $0x1908] sm:$0xf]  ;;  %v17876_v35 = vld [vmem:[#allocation6 + $0xcc] sm:$0xf]  ;;  %v6290_v58 = vadd.f32 %v6289_v18, %v6276_v37 }
 0x33d   :  { %v18656_v15 = vld [vmem:[#allocation6 + $0x1924] sm:$0xf0]  ;;  %6548 = vmatpush.bf16.msra.mxu0 %v15302_v20  ;;  %6576 = vmatpush.bf16.msra.mxu2 %v12234_v11  ;;  %v12135_v60 = vld [vmem:[#allocation6 + $0xa8] sm:$0xf0] }
 0x33e   :  { %v15525_v22 = vld [vmem:[#allocation6 + $0x1b08] sm:$0xf]  ;;  %v15270_v33 = vor.u32 %v18656_v15, %v15269_v54  ;;  %v12170_v54 = vor.u32 %v17876_v35, %v12167_v41  ;;  %v12426_v15 = vor.u32 %v17940_v0, %v12423_v24  ;;  %v17932_v46 = vld [vmem:[#allocation6 + $0x28c] sm:$0xf] }
 0x33f   :  { %v18720_v49 = vld [vmem:[#allocation6 + $0x1b24] sm:$0xf0]  ;;  %6562 = vmatpush.bf16.msra.mxu1 %v15558_v56  ;;  %6590 = vmatpush.bf16.msra.mxu3 %v12490_v27  ;;  %v12391_v5 = vld [vmem:[#allocation6 + $0x2a8] sm:$0xf0]  ;;  %v6317_v38 = vpop.f32.mrf.mxu3 }
 0x340   :  { %v15526_v7 = vor.u32 %v18720_v49, %v15525_v22  ;;  %v15237_v34 = vld [vmem:[#allocation6 + $0x18c8] sm:$0xf]  ;;  %v17868_v22 = vld [vmem:[#allocation6 + $0x8c] sm:$0xf]  ;;  %v6303_v49 = vpop.f32.mrf.mxu2 }
 0x341   :  { %v18648_v43 = vld [vmem:[#allocation6 + $0x18e4] sm:$0xf0]  ;;  %6549 = vmatpush.bf16.msra.mxu0 %v15270_v33  ;;  %6577 = vmatpush.bf16.msra.mxu2 %v12202_v28  ;;  %v6304_v14 = vadd.f32 %v6303_v49, %v6290_v58  ;;  %v12138_v18 = vor.u32 %v17868_v22, %v12135_v60  ;;  %v12394_v28 = vor.u32 %v17932_v46, %v12391_v5  ;;  %v12103_v35 = vld [vmem:[#allocation6 + $0x68] sm:$0xf0] }
 0x342   :  { %v15493_v42 = vld [vmem:[#allocation6 + $0x1ac8] sm:$0xf]  ;;  %v15238_v30 = vor.u32 %v18648_v43, %v15237_v34  ;;  %v17924_v41 = vld [vmem:[#allocation6 + $0x24c] sm:$0xf] }
 0x343   :  { %v18712_v29 = vld [vmem:[#allocation6 + $0x1ae4] sm:$0xf0]  ;;  %6563 = vmatpush.bf16.msra.mxu1 %v15526_v7  ;;  %6591 = vmatpush.bf16.msra.mxu3 %v12458_v12  ;;  %v20477_v43 = vadd.f32 %v6317_v38, %v6304_v14  ;;  %v12359_v0 = vld [vmem:[#allocation6 + $0x268] sm:$0xf0] }
 0x344   :  { %v15494_v1 = vor.u32 %v18712_v29, %v15493_v42  ;;  %v15205_v20 = vld [vmem:[#allocation6 + $0x1888] sm:$0xf]  ;;  %v17860_v29 = vld [vmem:[#allocation6 + $0x4c] sm:$0xf] }
 0x345   :  { %v18640_v56 = vld [vmem:[#allocation6 + $0x18a4] sm:$0xf0]  ;;  %6550 = vmatpush.bf16.msra.mxu0 %v15238_v30  ;;  %6578 = vmatpush.bf16.msra.mxu2 %v12170_v54  ;;  %v12106_v54 = vor.u32 %v17860_v29, %v12103_v35  ;;  %v17916_v22 = vld [vmem:[#allocation6 + $0x20c] sm:$0xf] }
 0x346   :  { %v15461_v11 = vld [vmem:[#allocation6 + $0x1a88] sm:$0xf]  ;;  %v15206_v37 = vor.u32 %v18640_v56, %v15205_v20  ;;  %v12327_v49 = vld [vmem:[#allocation6 + $0x228] sm:$0xf0] }
 0x347   :  { %v18704_v27 = vld [vmem:[#allocation6 + $0x1aa4] sm:$0xf0]  ;;  %6564 = vmatpush.bf16.msra.mxu1 %v15494_v1  ;;  %6592 = vmatpush.bf16.msra.mxu3 %v12426_v15  ;;  %v12362_v15 = vor.u32 %v17924_v41, %v12359_v0  ;;  %v18036_v60 = vld [vmem:[#allocation6 + $0x5cc] sm:$0xf] }
 0x348   :  { %v15462_v33 = vor.u32 %v18704_v27, %v15461_v11  ;;  %v15173_v7 = vld [vmem:[#allocation6 + $0x1848] sm:$0xf]  ;;  %v17852_v11 = vld [vmem:[#allocation6 + $0xc] sm:$0xf] }
 0x349   :  { %v18632_v34 = vld [vmem:[#allocation6 + $0x1864] sm:$0xf0]  ;;  %6551 = vmatpush.bf16.msra.mxu0 %v15206_v37  ;;  %6579 = vmatpush.bf16.msra.mxu2 %v12138_v18  ;;  %v12071_v27 = vld [vmem:[#allocation6 + $0x28] sm:$0xf0] }
 0x34a   :  { %v15429_v12 = vld [vmem:[#allocation6 + $0x1a48] sm:$0xf]  ;;  %v15174_v24 = vor.u32 %v18632_v34, %v15173_v7  ;;  %v12807_v46 = vld [vmem:[#allocation6 + $0x5e8] sm:$0xf0]  ;;  %v12074_v18 = vor.u32 %v17852_v11, %v12071_v27  ;;  %v20481_v11 = vpop.f32.mrf.mxu1 }
 0x34b   :  { %v18696_v42 = vld [vmem:[#allocation6 + $0x1a64] sm:$0xf0]  ;;  %6565 = vmatpush.bf16.msra.mxu1 %v15462_v33  ;;  %6593 = vmatpush.bf16.msra.mxu3 %v12394_v28  ;;  %v18100_v5 = vld [vmem:[#allocation6 + $0x7cc] sm:$0xf]  ;;  %v12330_v28 = vor.u32 %v17916_v22, %v12327_v49  ;;  %21235 = vst [vmem:[#allocation42_spill] sm:$0xff] %v20481_v11 }
 0x34c   :  { %v15141_v58 = vld [vmem:[#allocation6 + $0x1808] sm:$0xf]  ;;  %v15430_v30 = vor.u32 %v18696_v42, %v15429_v12  ;;  %v13063_v14 = vld [vmem:[#allocation6 + $0x7e8] sm:$0xf0]  ;;  %v12810_v42 = vor.u32 %v18036_v60, %v12807_v46 }
 0x34d   :  { %v18624_v1 = vld [vmem:[#allocation6 + $0x1824] sm:$0xf0]  ;;  %v18164_v38 = vld [vmem:[#allocation6 + $0x9cc] sm:$0xf]  ;;  %6552 = vmatpush.bf16.msra.mxu0 %v15174_v24  ;;  %6580 = vmatpush.bf16.msra.mxu2 %v12106_v54  ;;  %v13066_v29 = vor.u32 %v18100_v5, %v13063_v14 }
 0x34e   :  { %v15397_v20 = vld [vmem:[#allocation6 + $0x1a08] sm:$0xf]  ;;  %v15142_v37 = vor.u32 %v18624_v1, %v15141_v58  ;;  %v13319_v7 = vld [vmem:[#allocation6 + $0x9e8] sm:$0xf0]  ;;  %v20479_v1 = vpop.f32.mrf.mxu0 }
 0x34f   :  { %v18688_v56 = vld [vmem:[#allocation6 + $0x1a24] sm:$0xf0]  ;;  %6566 = vmatpush.bf16.msra.mxu1 %v15430_v30  ;;  %v18228_v34 = vld [vmem:[#allocation6 + $0xbcc] sm:$0xf]  ;;  %6594 = vmatpush.bf16.msra.mxu3 %v12362_v15  ;;  %v13322_v0 = vor.u32 %v18164_v38, %v13319_v7  ;;  %21234 = vst [vmem:[#allocation41_spill] sm:$0xff] %v20479_v1 }
 0x350   :  { %v15398_v33 = vor.u32 %v18688_v56, %v15397_v20  ;;  %v13575_v12 = vld [vmem:[#allocation6 + $0xbe8] sm:$0xf0]  ;;  %v13034_v56 = vor.u32 %v18092_v51, %v13031_v13 }
 0x351   :  { %v18028_v35 = vld [vmem:[#allocation6 + $0x58c] sm:$0xf]  ;;  %v13578_v55 = vor.u32 %v18228_v34, %v13575_v12  ;;  %6553 = vmatpush.bf16.msra.mxu0 %v15142_v37  ;;  %6581 = vmatpush.bf16.msra.mxu2 %v12074_v18  ;;  %v20487_v18 = vpop.f32.mrf.mxu2 }
 0x352   :  { %v12775_v41 = vld [vmem:[#allocation6 + $0x5a8] sm:$0xf0]  ;;  %21236 = vst [vmem:[#allocation43_spill] sm:$0xff] %v20487_v18 }
 0x353   :  { %6567 = vmatpush.bf16.msra.mxu1 %v15398_v33  ;;  %v13287_v58 = vld [vmem:[#allocation6 + $0x9a8] sm:$0xf0]  ;;  %6595 = vmatpush.bf16.msra.mxu3 %v12330_v28  ;;  %v12778_v20 = vor.u32 %v18028_v35, %v12775_v41  ;;  %v20489_v41 = vpop.f32.mrf.mxu3 }
 0x354   :  { %v18220_v24 = vld [vmem:[#allocation6 + $0xb8c] sm:$0xf]  ;;  %v13290_v27 = vor.u32 %v18156_v6, %v13287_v58  ;;  %6554 = vmatmul.bf16.vlgmr.msra.gmra.mxu0 %v20347_v23  ;;  %6582 = vmatmul.bf16.vlgmr.msra.gmra.mxu2 %v20187_v52  ;;  %21237 = vst [vmem:[#allocation44_spill] sm:$0xff] %v20489_v41 }
 0x355   :  { %v13543_v30 = vld [vmem:[#allocation6 + $0xba8] sm:$0xf0]  ;;  %6602 = vmatpush.bf16.msrb.mxu0 %v12810_v42  ;;  %6630 = vmatpush.bf16.msrb.mxu2 %v13322_v0 }
 0x356   :  { %v18020_v54 = vld [vmem:[#allocation6 + $0x54c] sm:$0xf]  ;;  %v13546_v22 = vor.u32 %v18220_v24, %v13543_v30  ;;  %6568 = vmatmul.bf16.vlgmr.msra.gmra.mxu1 %v20355_v3  ;;  %6596 = vmatmul.bf16.vlgmr.msra.gmra.mxu3 %v20189_v59  ;;  %v6331_v35 = vpop.f32.mrf.mxu0 }
 0x357   :  { %6616 = vmatpush.bf16.msrb.mxu1 %v13066_v29  ;;  %v12743_v15 = vld [vmem:[#allocation6 + $0x568] sm:$0xf0]  ;;  %6644 = vmatpush.bf16.msrb.mxu3 %v13578_v55  ;;  %v6332_v0 = vadd.f32 %v6331_v35, %v20477_v43 }
 0x358   :  { %v18084_v49 = vld [vmem:[#allocation6 + $0x74c] sm:$0xf]  ;;  %v12746_v13 = vor.u32 %v18020_v54, %v12743_v15 }
 0x359   :  { %v12999_v60 = vld [vmem:[#allocation6 + $0x768] sm:$0xf0]  ;;  %6603 = vmatpush.bf16.msrb.mxu0 %v12778_v20  ;;  %6631 = vmatpush.bf16.msrb.mxu2 %v13290_v27 }
 0x35a   :  { %v18148_v46 = vld [vmem:[#allocation6 + $0x94c] sm:$0xf]  ;;  %v13002_v51 = vor.u32 %v18084_v49, %v12999_v60 }
 0x35b   :  { %v13255_v5 = vld [vmem:[#allocation6 + $0x968] sm:$0xf0]  ;;  %6617 = vmatpush.bf16.msrb.mxu1 %v13034_v56  ;;  %6645 = vmatpush.bf16.msrb.mxu3 %v13546_v22  ;;  %v6345_v56 = vpop.f32.mrf.mxu1  ;;  %v6373_v35 = vpop.f32.mrf.mxu3 }
 0x35c   :  { %v18212_v14 = vld [vmem:[#allocation6 + $0xb4c] sm:$0xf]  ;;  %v13258_v37 = vor.u32 %v18148_v46, %v13255_v5  ;;  %v6346_v60 = vadd.f32 %v6345_v56, %v6332_v0 }
 0x35d   :  { %v13511_v38 = vld [vmem:[#allocation6 + $0xb68] sm:$0xf0]  ;;  %6604 = vmatpush.bf16.msrb.mxu0 %v12746_v13 }
 0x35e   :  { %v18012_v6 = vld [vmem:[#allocation6 + $0x50c] sm:$0xf]  ;;  %v13514_v33 = vor.u32 %v18212_v14, %v13511_v38  ;;  %6632 = vmatpush.bf16.msrb.mxu2 %v13258_v37 }
 0x35f   :  { %v12711_v55 = vld [vmem:[#allocation6 + $0x528] sm:$0xf0]  ;;  %6618 = vmatpush.bf16.msrb.mxu1 %v13002_v51 }
 0x360   :  { %v18076_v7 = vld [vmem:[#allocation6 + $0x70c] sm:$0xf]  ;;  %v12714_v58 = vor.u32 %v18012_v6, %v12711_v55  ;;  %6646 = vmatpush.bf16.msrb.mxu3 %v13514_v33 }
 0x361   :  { %v12967_v34 = vld [vmem:[#allocation6 + $0x728] sm:$0xf0] }
 0x362   :  { %v18140_v12 = vld [vmem:[#allocation6 + $0x90c] sm:$0xf]  ;;  %v12970_v24 = vor.u32 %v18076_v7, %v12967_v34  ;;  %6605 = vmatpush.bf16.msrb.mxu0 %v12714_v58  ;;  %v6359_v34 = vpop.f32.mrf.mxu2 }
 0x363   :  { %v13223_v28 = vld [vmem:[#allocation6 + $0x928] sm:$0xf0] }
 0x364   :  { %v18204_v42 = vld [vmem:[#allocation6 + $0xb0c] sm:$0xf]  ;;  %v13226_v54 = vor.u32 %v18140_v12, %v13223_v28  ;;  %6619 = vmatpush.bf16.msrb.mxu1 %v12970_v24 }
 0x365   :  { %v13479_v29 = vld [vmem:[#allocation6 + $0xb28] sm:$0xf0] }
 0x366   :  { %v18004_v30 = vld [vmem:[#allocation6 + $0x4cc] sm:$0xf]  ;;  %v13482_v15 = vor.u32 %v18204_v42, %v13479_v29  ;;  %6633 = vmatpush.bf16.msrb.mxu2 %v13226_v54  ;;  %v6360_v29 = vadd.f32 %v6359_v34, %v6346_v60 }
 0x367   :  { %v12679_v20 = vld [vmem:[#allocation6 + $0x4e8] sm:$0xf0] }
 0x368   :  { %v18068_v27 = vld [vmem:[#allocation6 + $0x6cc] sm:$0xf]  ;;  %v12682_v38 = vor.u32 %v18004_v30, %v12679_v20  ;;  %6647 = vmatpush.bf16.msrb.mxu3 %v13482_v15  ;;  %v20492_v20 = vadd.f32 %v6373_v35, %v6360_v29 }
 0x369   :  { %v12935_v22 = vld [vmem:[#allocation6 + $0x6e8] sm:$0xf0] }
 0x36a   :  { %v18132_v49 = vld [vmem:[#allocation6 + $0x8cc] sm:$0xf]  ;;  %v12938_v43 = vor.u32 %v18068_v27, %v12935_v22  ;;  %6606 = vmatpush.bf16.msrb.mxu0 %v12682_v38  ;;  %21238 = vst [vmem:[#allocation45_spill] sm:$0xff] %v20492_v20 }
 0x36b   :  { %v13191_v46 = vld [vmem:[#allocation6 + $0x8e8] sm:$0xf0] }
 0x36c   :  { %v18196_v5 = vld [vmem:[#allocation6 + $0xacc] sm:$0xf]  ;;  %v13194_v6 = vor.u32 %v18132_v49, %v13191_v46  ;;  %6620 = vmatpush.bf16.msrb.mxu1 %v12938_v43 }
 0x36d   :  { %v13447_v14 = vld [vmem:[#allocation6 + $0xae8] sm:$0xf0] }
 0x36e   :  { %v17996_v13 = vld [vmem:[#allocation6 + $0x48c] sm:$0xf]  ;;  %v13450_v55 = vor.u32 %v18196_v5, %v13447_v14  ;;  %6634 = vmatpush.bf16.msrb.mxu2 %v13194_v6 }
 0x36f   :  { %v12647_v51 = vld [vmem:[#allocation6 + $0x4a8] sm:$0xf0] }
 0x370   :  { %v18060_v37 = vld [vmem:[#allocation6 + $0x68c] sm:$0xf]  ;;  %v12650_v0 = vor.u32 %v17996_v13, %v12647_v51  ;;  %6648 = vmatpush.bf16.msrb.mxu3 %v13450_v55 }
 0x371   :  { %v12903_v33 = vld [vmem:[#allocation6 + $0x6a8] sm:$0xf0] }
 0x372   :  { %v18124_v7 = vld [vmem:[#allocation6 + $0x88c] sm:$0xf]  ;;  %v12906_v58 = vor.u32 %v18060_v37, %v12903_v33  ;;  %6607 = vmatpush.bf16.msrb.mxu0 %v12650_v0 }
 0x373   :  { %v13159_v12 = vld [vmem:[#allocation6 + $0x8a8] sm:$0xf0] }
 0x374   :  { %v18188_v28 = vld [vmem:[#allocation6 + $0xa8c] sm:$0xf]  ;;  %v13162_v56 = vor.u32 %v18124_v7, %v13159_v12  ;;  %6621 = vmatpush.bf16.msrb.mxu1 %v12906_v58 }
 0x375   :  { %v13415_v42 = vld [vmem:[#allocation6 + $0xaa8] sm:$0xf0] }
 0x376   :  { %v17988_v24 = vld [vmem:[#allocation6 + $0x44c] sm:$0xf]  ;;  %v13418_v54 = vor.u32 %v18188_v28, %v13415_v42  ;;  %6635 = vmatpush.bf16.msrb.mxu2 %v13162_v56 }
 0x377   :  { %v12615_v30 = vld [vmem:[#allocation6 + $0x468] sm:$0xf0] }
 0x378   :  { %v18052_v15 = vld [vmem:[#allocation6 + $0x64c] sm:$0xf]  ;;  %v12618_v14 = vor.u32 %v17988_v24, %v12615_v30  ;;  %6649 = vmatpush.bf16.msrb.mxu3 %v13418_v54 }
 0x379   :  { %v12871_v27 = vld [vmem:[#allocation6 + $0x668] sm:$0xf0] }
 0x37a   :  { %v18116_v22 = vld [vmem:[#allocation6 + $0x84c] sm:$0xf]  ;;  %v12874_v38 = vor.u32 %v18052_v15, %v12871_v27  ;;  %6608 = vmatpush.bf16.msrb.mxu0 %v12618_v14 }
 0x37b   :  { %v13127_v49 = vld [vmem:[#allocation6 + $0x868] sm:$0xf0] }
 0x37c   :  { %v18180_v46 = vld [vmem:[#allocation6 + $0xa4c] sm:$0xf]  ;;  %v13130_v6 = vor.u32 %v18116_v22, %v13127_v49  ;;  %6622 = vmatpush.bf16.msrb.mxu1 %v12874_v38 }
 0x37d   :  { %v13383_v5 = vld [vmem:[#allocation6 + $0xa68] sm:$0xf0] }
 0x37e   :  { %v17980_v60 = vld [vmem:[#allocation6 + $0x40c] sm:$0xf]  ;;  %v13386_v55 = vor.u32 %v18180_v46, %v13383_v5  ;;  %6636 = vmatpush.bf16.msrb.mxu2 %v13130_v6 }
 0x37f   :  { %v12583_v43 = vld [vmem:[#allocation6 + $0x428] sm:$0xf0] }
 0x380   :  { %v18044_v13 = vld [vmem:[#allocation6 + $0x60c] sm:$0xf]  ;;  %v12586_v0 = vor.u32 %v17980_v60, %v12583_v43  ;;  %6650 = vmatpush.bf16.msrb.mxu3 %v13386_v55  ;;  %v20494_v43 = vpop.f32.mrf.mxu0 }
 0x381   :  { %v12839_v51 = vld [vmem:[#allocation6 + $0x628] sm:$0xf0]  ;;  %21239 = vst [vmem:[#allocation46_spill] sm:$0xff] %v20494_v43 }
 0x382   :  { %v18108_v37 = vld [vmem:[#allocation6 + $0x80c] sm:$0xf]  ;;  %v12842_v58 = vor.u32 %v18044_v13, %v12839_v51  ;;  %6609 = vmatpush.bf16.msrb.mxu0 %v12586_v0 }
 0x383   :  { %v13095_v33 = vld [vmem:[#allocation6 + $0x828] sm:$0xf0] }
 0x384   :  { %v18172_v7 = vld [vmem:[#allocation6 + $0xa0c] sm:$0xf]  ;;  %v13098_v56 = vor.u32 %v18108_v37, %v13095_v33  ;;  %6623 = vmatpush.bf16.msrb.mxu1 %v12842_v58  ;;  %v20496_v37 = vpop.f32.mrf.mxu1 }
 0x385   :  { %v13351_v34 = vld [vmem:[#allocation6 + $0xa28] sm:$0xf0]  ;;  %21240 = vst [vmem:[#allocation47_spill] sm:$0xff] %v20496_v37  ;;  %6610 = vmatmul.bf16.vlgmr.msrb.gmra.mxu0 %v20191_v62 }
 0x386   :  { %v18292_v12 = vld [vmem:[#allocation6 + $0xdcc] sm:$0xf]  ;;  %v13354_v54 = vor.u32 %v18172_v7, %v13351_v34  ;;  %6637 = vmatpush.bf16.msrb.mxu2 %v13098_v56 }
 0x387   :  { %v13831_v28 = vld [vmem:[#allocation6 + $0xde8] sm:$0xf0]  ;;  %6624 = vmatmul.bf16.vlgmr.msrb.gmra.mxu1 %v20193_v48 }
 0x388   :  { %v18356_v42 = vld [vmem:[#allocation6 + $0xfcc] sm:$0xf]  ;;  %v13834_v27 = vor.u32 %v18292_v12, %v13831_v28  ;;  %6651 = vmatpush.bf16.msrb.mxu3 %v13354_v54 }
 0x389   :  { %v14087_v29 = vld [vmem:[#allocation6 + $0xfe8] sm:$0xf0]  ;;  %6638 = vmatmul.bf16.vlgmr.msrb.gmra.mxu2 %v20284_v9 }
 0x38a   :  { %v18420_v35 = vld [vmem:[#allocation6 + $0x11cc] sm:$0xf]  ;;  %v14090_v22 = vor.u32 %v18356_v42, %v14087_v29  ;;  %6658 = vmatpush.bf16.msra.mxu0 %v13834_v27  ;;  %v20505_v27 = vpop.f32.mrf.mxu2 }
 0x38b   :  { %v14343_v24 = vld [vmem:[#allocation6 + $0x11e8] sm:$0xf0]  ;;  %6652 = vmatmul.bf16.vlgmr.msrb.gmra.mxu3 %v20286_v63  ;;  %21241 = vst [vmem:[#allocation48_spill] sm:$0xff] %v20505_v27 }
 0x38c   :  { %v18484_v30 = vld [vmem:[#allocation6 + $0x13cc] sm:$0xf]  ;;  %v14346_v5 = vor.u32 %v18420_v35, %v14343_v24  ;;  %6672 = vmatpush.bf16.msra.mxu1 %v14090_v22 }
 0x38d   :  { %v14599_v15 = vld [vmem:[#allocation6 + $0x13e8] sm:$0xf0] }
 0x38e   :  { %v18284_v49 = vld [vmem:[#allocation6 + $0xd8c] sm:$0xf]  ;;  %v14602_v20 = vor.u32 %v18484_v30, %v14599_v15  ;;  %6686 = vmatpush.bf16.msra.mxu2 %v14346_v5  ;;  %v6387_v5 = vpop.f32.mrf.mxu0 }
 0x38f   :  { %v13799_v46 = vld [vmem:[#allocation6 + $0xda8] sm:$0xf0] }
 0x390   :  { %v18348_v41 = vld [vmem:[#allocation6 + $0xf8c] sm:$0xf]  ;;  %v13802_v13 = vor.u32 %v18284_v49, %v13799_v46  ;;  %6700 = vmatpush.bf16.msra.mxu3 %v14602_v20 }
 0x391   :  { %v14055_v18 = vld [vmem:[#allocation6 + $0xfa8] sm:$0xf0] }
 0x392   :  { %v18412_v11 = vld [vmem:[#allocation6 + $0x118c] sm:$0xf]  ;;  %v14058_v51 = vor.u32 %v18348_v41, %v14055_v18  ;;  %6659 = vmatpush.bf16.msra.mxu0 %v13802_v13 }
 0x393   :  { %v14311_v60 = vld [vmem:[#allocation6 + $0x11a8] sm:$0xf0] }
 0x394   :  { %v18476_v14 = vld [vmem:[#allocation6 + $0x138c] sm:$0xf]  ;;  %v14314_v33 = vor.u32 %v18412_v11, %v14311_v60  ;;  %6673 = vmatpush.bf16.msra.mxu1 %v14058_v51  ;;  %v20502_v11 = vld [vmem:[#allocation7] sm:$0xff]  ;;  %v20507_v60 = vpop.f32.mrf.mxu3 }
 0x395   :  { %v14567_v38 = vld [vmem:[#allocation6 + $0x13a8] sm:$0xf0]  ;;  %v21207_v20 = vperm.slane %v20502_v11, 2  ;;  %21242 = vst [vmem:[#allocation49_spill] sm:$0xff] %v20507_v60 }
 0x396   :  { %v18276_v6 = vld [vmem:[#allocation6 + $0xd4c] sm:$0xf]  ;;  %v14570_v7 = vor.u32 %v18476_v14, %v14567_v38  ;;  %6687 = vmatpush.bf16.msra.mxu2 %v14314_v33 }
 0x397   :  { %v13767_v55 = vld [vmem:[#allocation6 + $0xd68] sm:$0xf0]  ;;  %v6388_v14 = vadd.f32 %v6387_v5, %v21207_v20 }
 0x398   :  { %v18340_v34 = vld [vmem:[#allocation6 + $0xf4c] sm:$0xf]  ;;  %v13770_v18 = vor.u32 %v18276_v6, %v13767_v55  ;;  %6701 = vmatpush.bf16.msra.mxu3 %v14570_v7  ;;  %v6401_v55 = vpop.f32.mrf.mxu1 }
 0x399   :  { %v14023_v12 = vld [vmem:[#allocation6 + $0xf68] sm:$0xf0] }
 0x39a   :  { %v18404_v28 = vld [vmem:[#allocation6 + $0x114c] sm:$0xf]  ;;  %v14026_v41 = vor.u32 %v18340_v34, %v14023_v12  ;;  %6660 = vmatpush.bf16.msra.mxu0 %v13770_v18 }
 0x39b   :  { %v14279_v42 = vld [vmem:[#allocation6 + $0x1168] sm:$0xf0] }
 0x39c   :  { %v18468_v29 = vld [vmem:[#allocation6 + $0x134c] sm:$0xf]  ;;  %v14282_v24 = vor.u32 %v18404_v28, %v14279_v42  ;;  %6674 = vmatpush.bf16.msra.mxu1 %v14026_v41  ;;  %v6402_v42 = vadd.f32 %v6401_v55, %v6388_v14 }
 0x39d   :  { %v14535_v35 = vld [vmem:[#allocation6 + $0x1368] sm:$0xf0] }
 0x39e   :  { %v18268_v0 = vld [vmem:[#allocation6 + $0xd0c] sm:$0xf]  ;;  %v14538_v30 = vor.u32 %v18468_v29, %v14535_v35  ;;  %6688 = vmatpush.bf16.msra.mxu2 %v14282_v24 }
 0x39f   :  { %v13735_v58 = vld [vmem:[#allocation6 + $0xd28] sm:$0xf0] }
 0x3a0   :  { %v18332_v15 = vld [vmem:[#allocation6 + $0xf0c] sm:$0xf]  ;;  %v13738_v38 = vor.u32 %v18268_v0, %v13735_v58  ;;  %6702 = vmatpush.bf16.msra.mxu3 %v14538_v30 }
 0x3a1   :  { %v13991_v56 = vld [vmem:[#allocation6 + $0xf28] sm:$0xf0] }
 0x3a2   :  { %v18396_v54 = vld [vmem:[#allocation6 + $0x110c] sm:$0xf]  ;;  %v13994_v13 = vor.u32 %v18332_v15, %v13991_v56  ;;  %6661 = vmatpush.bf16.msra.mxu0 %v13738_v38  ;;  %v6429_v38 = vpop.f32.mrf.mxu3 }
 0x3a3   :  { %v14247_v22 = vld [vmem:[#allocation6 + $0x1128] sm:$0xf0] }
 0x3a4   :  { %v18460_v49 = vld [vmem:[#allocation6 + $0x130c] sm:$0xf]  ;;  %v14250_v33 = vor.u32 %v18396_v54, %v14247_v22  ;;  %6675 = vmatpush.bf16.msra.mxu1 %v13994_v13  ;;  %v6415_v22 = vpop.f32.mrf.mxu2 }
 0x3a5   :  { %v14503_v46 = vld [vmem:[#allocation6 + $0x1328] sm:$0xf0]  ;;  %v6416_v55 = vadd.f32 %v6415_v22, %v6402_v42 }
 0x3a6   :  { %v18260_v51 = vld [vmem:[#allocation6 + $0xccc] sm:$0xf]  ;;  %v14506_v7 = vor.u32 %v18460_v49, %v14503_v46  ;;  %6689 = vmatpush.bf16.msra.mxu2 %v14250_v33 }
 0x3a7   :  { %v13703_v6 = vld [vmem:[#allocation6 + $0xce8] sm:$0xf0]  ;;  %v20511_v33 = vadd.f32 %v6429_v38, %v6416_v55 }
 0x3a8   :  { %v18324_v34 = vld [vmem:[#allocation6 + $0xecc] sm:$0xf]  ;;  %v13706_v41 = vor.u32 %v18260_v51, %v13703_v6  ;;  %6703 = vmatpush.bf16.msra.mxu3 %v14506_v7 }
 0x3a9   :  { %v13959_v12 = vld [vmem:[#allocation6 + $0xee8] sm:$0xf0] }
 0x3aa   :  { %v18388_v28 = vld [vmem:[#allocation6 + $0x10cc] sm:$0xf]  ;;  %v13962_v5 = vor.u32 %v18324_v34, %v13959_v12  ;;  %6662 = vmatpush.bf16.msra.mxu0 %v13706_v41 }
 0x3ab   :  { %v14215_v29 = vld [vmem:[#allocation6 + $0x10e8] sm:$0xf0] }
 0x3ac   :  { %v18452_v35 = vld [vmem:[#allocation6 + $0x12cc] sm:$0xf]  ;;  %v14218_v24 = vor.u32 %v18388_v28, %v14215_v29  ;;  %6676 = vmatpush.bf16.msra.mxu1 %v13962_v5 }
 0x3ad   :  { %v14471_v18 = vld [vmem:[#allocation6 + $0x12e8] sm:$0xf0] }
 0x3ae   :  { %v18252_v0 = vld [vmem:[#allocation6 + $0xc8c] sm:$0xf]  ;;  %v14474_v30 = vor.u32 %v18452_v35, %v14471_v18  ;;  %6690 = vmatpush.bf16.msra.mxu2 %v14218_v24 }
 0x3af   :  { %v13671_v58 = vld [vmem:[#allocation6 + $0xca8] sm:$0xf0] }
 0x3b0   :  { %v18316_v15 = vld [vmem:[#allocation6 + $0xe8c] sm:$0xf]  ;;  %v13674_v13 = vor.u32 %v18252_v0, %v13671_v58  ;;  %6704 = vmatpush.bf16.msra.mxu3 %v14474_v30 }
 0x3b1   :  { %v13927_v56 = vld [vmem:[#allocation6 + $0xea8] sm:$0xf0] }
 0x3b2   :  { %v18380_v54 = vld [vmem:[#allocation6 + $0x108c] sm:$0xf]  ;;  %v13930_v51 = vor.u32 %v18316_v15, %v13927_v56  ;;  %6663 = vmatpush.bf16.msra.mxu0 %v13674_v13 }
 0x3b3   :  { %v14183_v49 = vld [vmem:[#allocation6 + $0x10a8] sm:$0xf0] }
 0x3b4   :  { %v18444_v46 = vld [vmem:[#allocation6 + $0x128c] sm:$0xf]  ;;  %v14186_v7 = vor.u32 %v18380_v54, %v14183_v49  ;;  %6677 = vmatpush.bf16.msra.mxu1 %v13930_v51 }
 0x3b5   :  { %v14439_v14 = vld [vmem:[#allocation6 + $0x12a8] sm:$0xf0] }
 0x3b6   :  { %v18244_v6 = vld [vmem:[#allocation6 + $0xc4c] sm:$0xf]  ;;  %v14442_v12 = vor.u32 %v18444_v46, %v14439_v14  ;;  %6691 = vmatpush.bf16.msra.mxu2 %v14186_v7 }
 0x3b7   :  { %v13639_v34 = vld [vmem:[#allocation6 + $0xc68] sm:$0xf0] }
 0x3b8   :  { %v18308_v28 = vld [vmem:[#allocation6 + $0xe4c] sm:$0xf]  ;;  %v13642_v41 = vor.u32 %v18244_v6, %v13639_v34  ;;  %6705 = vmatpush.bf16.msra.mxu3 %v14442_v12 }
 0x3b9   :  { %v13895_v29 = vld [vmem:[#allocation6 + $0xe68] sm:$0xf0] }
 0x3ba   :  { %v18372_v35 = vld [vmem:[#allocation6 + $0x104c] sm:$0xf]  ;;  %v13898_v5 = vor.u32 %v18308_v28, %v13895_v29  ;;  %6664 = vmatpush.bf16.msra.mxu0 %v13642_v41 }
 0x3bb   :  { %v14151_v18 = vld [vmem:[#allocation6 + $0x1068] sm:$0xf0] }
 0x3bc   :  { %v18436_v20 = vld [vmem:[#allocation6 + $0x124c] sm:$0xf]  ;;  %v14154_v24 = vor.u32 %v18372_v35, %v14151_v18  ;;  %6678 = vmatpush.bf16.msra.mxu1 %v13898_v5 }
 0x3bd   :  { %v14407_v60 = vld [vmem:[#allocation6 + $0x1268] sm:$0xf0] }
 0x3be   :  { %v18236_v42 = vld [vmem:[#allocation6 + $0xc0c] sm:$0xf]  ;;  %v14410_v30 = vor.u32 %v18436_v20, %v14407_v60  ;;  %6692 = vmatpush.bf16.msra.mxu2 %v14154_v24 }
 0x3bf   :  { %v13607_v0 = vld [vmem:[#allocation6 + $0xc28] sm:$0xf0] }
 0x3c0   :  { %v18300_v58 = vld [vmem:[#allocation6 + $0xe0c] sm:$0xf]  ;;  %v13610_v13 = vor.u32 %v18236_v42, %v13607_v0  ;;  %6706 = vmatpush.bf16.msra.mxu3 %v14410_v30  ;;  %v20513_v0 = vpop.f32.mrf.mxu0 }
 0x3c1   :  { %v13863_v15 = vld [vmem:[#allocation6 + $0xe28] sm:$0xf0] }
 0x3c2   :  { %v18364_v56 = vld [vmem:[#allocation6 + $0x100c] sm:$0xf]  ;;  %v13866_v51 = vor.u32 %v18300_v58, %v13863_v15  ;;  %6665 = vmatpush.bf16.msra.mxu0 %v13610_v13 }
 0x3c3   :  { %v14119_v54 = vld [vmem:[#allocation6 + $0x1028] sm:$0xf0] }
 0x3c4   :  { %v18428_v22 = vld [vmem:[#allocation6 + $0x120c] sm:$0xf]  ;;  %v14122_v7 = vor.u32 %v18364_v56, %v14119_v54  ;;  %6679 = vmatpush.bf16.msra.mxu1 %v13866_v51 }
 0x3c5   :  { %v14375_v49 = vld [vmem:[#allocation6 + $0x1228] sm:$0xf0]  ;;  %6666 = vmatmul.bf16.vlgmr.msra.gmra.mxu0 %v20293_v19 }
 0x3c6   :  { %v18548_v46 = vld [vmem:[#allocation6 + $0x15cc] sm:$0xf]  ;;  %v14378_v20 = vor.u32 %v18428_v22, %v14375_v49  ;;  %6693 = vmatpush.bf16.msra.mxu2 %v14122_v7  ;;  %v20521_v7 = vpop.f32.mrf.mxu2 }
 0x3c7   :  { %v14855_v14 = vld [vmem:[#allocation6 + $0x15e8] sm:$0xf0]  ;;  %6680 = vmatmul.bf16.vlgmr.msra.gmra.mxu1 %v20295_v61 }
 0x3c8   :  { %v18612_v55 = vld [vmem:[#allocation6 + $0x17cc] sm:$0xf]  ;;  %v14858_v60 = vor.u32 %v18548_v46, %v14855_v14  ;;  %6707 = vmatpush.bf16.msra.mxu3 %v14378_v20 }
 0x3c9   :  { %v15111_v38 = vld [vmem:[#allocation6 + $0x17e8] sm:$0xf0]  ;;  %6694 = vmatmul.bf16.vlgmr.msra.gmra.mxu2 %v20378_v4 }
 0x3ca   :  { %v18676_v27 = vld [vmem:[#allocation6 + $0x19cc] sm:$0xf]  ;;  %v15114_v12 = vor.u32 %v18612_v55, %v15111_v38  ;;  %6714 = vmatpush.bf16.msrb.mxu0 %v14858_v60 }
 0x3cb   :  { %v15367_v6 = vld [vmem:[#allocation6 + $0x19e8] sm:$0xf0]  ;;  %6708 = vmatmul.bf16.vlgmr.msra.gmra.mxu3 %v20380_v16 }
 0x3cc   :  { %v18740_v34 = vld [vmem:[#allocation6 + $0x1bcc] sm:$0xf]  ;;  %v15370_v18 = vor.u32 %v18676_v27, %v15367_v6  ;;  %6728 = vmatpush.bf16.msrb.mxu1 %v15114_v12  ;;  %v20515_v27 = vpop.f32.mrf.mxu1 }
 0x3cd   :  { %v15623_v28 = vld [vmem:[#allocation6 + $0x1be8] sm:$0xf0] }
 0x3ce   :  { %v18540_v29 = vld [vmem:[#allocation6 + $0x158c] sm:$0xf]  ;;  %v15626_v37 = vor.u32 %v18740_v34, %v15623_v28  ;;  %6742 = vmatpush.bf16.msrb.mxu2 %v15370_v18 }
 0x3cf   :  { %v14823_v35 = vld [vmem:[#allocation6 + $0x15a8] sm:$0xf0] }
 0x3d0   :  { %v18604_v43 = vld [vmem:[#allocation6 + $0x178c] sm:$0xf]  ;;  %v14826_v58 = vor.u32 %v18540_v29, %v14823_v35  ;;  %6756 = vmatpush.bf16.msrb.mxu3 %v15626_v37  ;;  %v6443_v29 = vpop.f32.mrf.mxu0  ;;  %v20523_v35 = vpop.f32.mrf.mxu3 }
 0x3d1   :  { %v18668_v1 = vld [vmem:[#allocation6 + $0x198c] sm:$0xf]  ;;  %v15082_v15 = vor.u32 %v18604_v43, %v15079_v8  ;;  %21243 = vst [vmem:[#allocation50_spill] sm:$0xff] %v20523_v35  ;;  %v6444_v18 = vadd.f32 %v6443_v29, %v20511_v33  ;;  %v17969_v35 = vld [vmem:[#allocation6 + $0x3ac] sm:$0xf0] }
 0x3d2   :  { %v15335_v42 = vld [vmem:[#allocation6 + $0x19a8] sm:$0xf0]  ;;  %6715 = vmatpush.bf16.msrb.mxu0 %v14826_v58 }
 0x3d3   :  { %v18732_v41 = vld [vmem:[#allocation6 + $0x1b8c] sm:$0xf]  ;;  %v15338_v56 = vor.u32 %v18668_v1, %v15335_v42  ;;  %6729 = vmatpush.bf16.msrb.mxu1 %v15082_v15 }
 0x3d4   :  { %v15591_v5 = vld [vmem:[#allocation6 + $0x1ba8] sm:$0xf0]  ;;  %v6457_v15 = vpop.f32.mrf.mxu1 }
 0x3d5   :  { %v18532_v24 = vld [vmem:[#allocation6 + $0x154c] sm:$0xf]  ;;  %v15594_v54 = vor.u32 %v18732_v41, %v15591_v5  ;;  %6743 = vmatpush.bf16.msrb.mxu2 %v15338_v56 }
 0x3d6   :  { %v14791_v30 = vld [vmem:[#allocation6 + $0x1568] sm:$0xf0] }
 0x3d7   :  { %v18596_v22 = vld [vmem:[#allocation6 + $0x174c] sm:$0xf]  ;;  %v14794_v8 = vor.u32 %v18532_v24, %v14791_v30  ;;  %6757 = vmatpush.bf16.msrb.mxu3 %v15594_v54 }
 0x3d8   :  { %v15047_v49 = vld [vmem:[#allocation6 + $0x1768] sm:$0xf0]  ;;  %v6485_v29 = vpop.f32.mrf.mxu3 }
 0x3d9   :  { %v18660_v46 = vld [vmem:[#allocation6 + $0x194c] sm:$0xf]  ;;  %v15050_v43 = vor.u32 %v18596_v22, %v15047_v49  ;;  %6716 = vmatpush.bf16.msrb.mxu0 %v14794_v8  ;;  %v6458_v49 = vadd.f32 %v6457_v15, %v6444_v18 }
 0x3da   :  { %v15303_v14 = vld [vmem:[#allocation6 + $0x1968] sm:$0xf0] }
 0x3db   :  { %v18724_v55 = vld [vmem:[#allocation6 + $0x1b4c] sm:$0xf]  ;;  %v15306_v13 = vor.u32 %v18660_v46, %v15303_v14  ;;  %6730 = vmatpush.bf16.msrb.mxu1 %v15050_v43 }
 0x3dc   :  { %v15559_v38 = vld [vmem:[#allocation6 + $0x1b68] sm:$0xf0] }
 0x3dd   :  { %v18524_v1 = vld [vmem:[#allocation6 + $0x150c] sm:$0xf]  ;;  %v15562_v51 = vor.u32 %v18724_v55, %v15559_v38  ;;  %6744 = vmatpush.bf16.msrb.mxu2 %v15306_v13 }
 0x3de   :  { %v14759_v37 = vld [vmem:[#allocation6 + $0x1528] sm:$0xf0] }
 0x3df   :  { %v18588_v6 = vld [vmem:[#allocation6 + $0x170c] sm:$0xf]  ;;  %v14762_v42 = vor.u32 %v18524_v1, %v14759_v37  ;;  %6758 = vmatpush.bf16.msrb.mxu3 %v15562_v51 }
 0x3e0   :  { %v15015_v34 = vld [vmem:[#allocation6 + $0x1728] sm:$0xf0] }
 0x3e1   :  { %v18652_v28 = vld [vmem:[#allocation6 + $0x190c] sm:$0xf]  ;;  %v15018_v41 = vor.u32 %v18588_v6, %v15015_v34  ;;  %6717 = vmatpush.bf16.msrb.mxu0 %v14762_v42  ;;  %v6471_v34 = vpop.f32.mrf.mxu2 }
 0x3e2   :  { %v15271_v20 = vld [vmem:[#allocation6 + $0x1928] sm:$0xf0] }
 0x3e3   :  { %v18716_v60 = vld [vmem:[#allocation6 + $0x1b0c] sm:$0xf]  ;;  %v15274_v24 = vor.u32 %v18652_v28, %v15271_v20  ;;  %6731 = vmatpush.bf16.msrb.mxu1 %v15018_v41 }
 0x3e4   :  { %v15527_v12 = vld [vmem:[#allocation6 + $0x1b28] sm:$0xf0] }
 0x3e5   :  { %v18516_v5 = vld [vmem:[#allocation6 + $0x14cc] sm:$0xf]  ;;  %v15530_v30 = vor.u32 %v18716_v60, %v15527_v12  ;;  %6745 = vmatpush.bf16.msrb.mxu2 %v15274_v24  ;;  %v6472_v12 = vadd.f32 %v6471_v34, %v6458_v49 }
 0x3e6   :  { %v14727_v58 = vld [vmem:[#allocation6 + $0x14e8] sm:$0xf0] }
 0x3e7   :  { %v18580_v56 = vld [vmem:[#allocation6 + $0x16cc] sm:$0xf]  ;;  %v14730_v38 = vor.u32 %v18516_v5, %v14727_v58  ;;  %6759 = vmatpush.bf16.msrb.mxu3 %v15530_v30  ;;  %v20526_v58 = vadd.f32 %v6485_v29, %v6472_v12  ;;  %v17977_v12 = vld [vmem:[#allocation6 + $0x3ec] sm:$0xf0] }
 0x3e8   :  { %v14983_v54 = vld [vmem:[#allocation6 + $0x16e8] sm:$0xf0]  ;;  %v12813_v29 = vld [vmem:[#allocation6 + $0x5d0] sm:$0xf] }
 0x3e9   :  { %v18644_v22 = vld [vmem:[#allocation6 + $0x18cc] sm:$0xf]  ;;  %v14986_v33 = vor.u32 %v18580_v56, %v14983_v54  ;;  %6718 = vmatpush.bf16.msrb.mxu0 %v14730_v38 }
 0x3ea   :  { %v15239_v46 = vld [vmem:[#allocation6 + $0x18e8] sm:$0xf0] }
 0x3eb   :  { %v18708_v14 = vld [vmem:[#allocation6 + $0x1acc] sm:$0xf]  ;;  %v15242_v1 = vor.u32 %v18644_v22, %v15239_v46  ;;  %6732 = vmatpush.bf16.msrb.mxu1 %v14986_v33 }
 0x3ec   :  { %v15495_v55 = vld [vmem:[#allocation6 + $0x1ae8] sm:$0xf0] }
 0x3ed   :  { %v18508_v8 = vld [vmem:[#allocation6 + $0x148c] sm:$0xf]  ;;  %v15498_v37 = vor.u32 %v18708_v14, %v15495_v55  ;;  %6746 = vmatpush.bf16.msrb.mxu2 %v15242_v1 }
 0x3ee   :  { %v14695_v43 = vld [vmem:[#allocation6 + $0x14a8] sm:$0xf0] }
 0x3ef   :  { %v18572_v13 = vld [vmem:[#allocation6 + $0x168c] sm:$0xf]  ;;  %v14698_v18 = vor.u32 %v18508_v8, %v14695_v43  ;;  %6760 = vmatpush.bf16.msrb.mxu3 %v15498_v37 }
 0x3f0   :  { %v14951_v51 = vld [vmem:[#allocation6 + $0x16a8] sm:$0xf0] }
 0x3f1   :  { %v18636_v6 = vld [vmem:[#allocation6 + $0x188c] sm:$0xf]  ;;  %v14954_v42 = vor.u32 %v18572_v13, %v14951_v51  ;;  %6719 = vmatpush.bf16.msrb.mxu0 %v14698_v18 }
 0x3f2   :  { %v15207_v28 = vld [vmem:[#allocation6 + $0x18a8] sm:$0xf0] }
 0x3f3   :  { %v18700_v20 = vld [vmem:[#allocation6 + $0x1a8c] sm:$0xf]  ;;  %v15210_v15 = vor.u32 %v18636_v6, %v15207_v28  ;;  %6733 = vmatpush.bf16.msrb.mxu1 %v14954_v42  ;;  %v12301_v28 = vld [vmem:[#allocation6 + $0x1d0] sm:$0xf] }
 0x3f4   :  { %v15463_v60 = vld [vmem:[#allocation6 + $0x1aa8] sm:$0xf0] }
 0x3f5   :  { %v18500_v41 = vld [vmem:[#allocation6 + $0x144c] sm:$0xf]  ;;  %v15466_v24 = vor.u32 %v18700_v20, %v15463_v60  ;;  %6747 = vmatpush.bf16.msrb.mxu2 %v15210_v15  ;;  %v17913_v20 = vld [vmem:[#allocation6 + $0x1ec] sm:$0xf0] }
 0x3f6   :  { %v14663_v5 = vld [vmem:[#allocation6 + $0x1468] sm:$0xf0]  ;;  %v12557_v60 = vld [vmem:[#allocation6 + $0x3d0] sm:$0xf] }
 0x3f7   :  { %v18564_v30 = vld [vmem:[#allocation6 + $0x164c] sm:$0xf]  ;;  %v14666_v55 = vor.u32 %v18500_v41, %v14663_v5  ;;  %6761 = vmatpush.bf16.msrb.mxu3 %v15466_v24  ;;  %v18041_v41 = vld [vmem:[#allocation6 + $0x5ec] sm:$0xf0] }
 0x3f8   :  { %v14919_v56 = vld [vmem:[#allocation6 + $0x1668] sm:$0xf0]  ;;  %v13069_v5 = vld [vmem:[#allocation6 + $0x7d0] sm:$0xf] }
 0x3f9   :  { %v18628_v54 = vld [vmem:[#allocation6 + $0x184c] sm:$0xf]  ;;  %v14922_v38 = vor.u32 %v18564_v30, %v14919_v56  ;;  %6720 = vmatpush.bf16.msrb.mxu0 %v14666_v55  ;;  %v18105_v30 = vld [vmem:[#allocation6 + $0x7ec] sm:$0xf0]  ;;  %v12302_v56 = vor.u32 %v17913_v20, %v12301_v28 }
 0x3fa   :  { %v15175_v22 = vld [vmem:[#allocation6 + $0x1868] sm:$0xf0]  ;;  %v13070_v50 = vor.u32 %v18105_v30, %v13069_v5  ;;  %v13037_v55 = vld [vmem:[#allocation6 + $0x790] sm:$0xf] }
 0x3fb   :  { %v18692_v46 = vld [vmem:[#allocation6 + $0x1a4c] sm:$0xf]  ;;  %v15178_v1 = vor.u32 %v18628_v54, %v15175_v22  ;;  %6734 = vmatpush.bf16.msrb.mxu1 %v14922_v38  ;;  %v12558_v54 = vor.u32 %v17977_v12, %v12557_v60  ;;  %v12269_v22 = vld [vmem:[#allocation6 + $0x190] sm:$0xf] }
 0x3fc   :  { %v15431_v14 = vld [vmem:[#allocation6 + $0x1a68] sm:$0xf0]  ;;  %v18097_v38 = vld [vmem:[#allocation6 + $0x7ac] sm:$0xf0] }
 0x3fd   :  { %v18492_v49 = vld [vmem:[#allocation6 + $0x140c] sm:$0xf]  ;;  %v15434_v37 = vor.u32 %v18692_v46, %v15431_v14  ;;  %6748 = vmatpush.bf16.msrb.mxu2 %v15178_v1  ;;  %v17905_v46 = vld [vmem:[#allocation6 + $0x1ac] sm:$0xf0]  ;;  %v12814_v14 = vor.u32 %v18041_v41, %v12813_v29 }
 0x3fe   :  { %v14631_v33 = vld [vmem:[#allocation6 + $0x1428] sm:$0xf0]  ;;  %v12237_v1 = vld [vmem:[#allocation6 + $0x150] sm:$0xf] }
 0x3ff   :  { %v18556_v8 = vld [vmem:[#allocation6 + $0x160c] sm:$0xf]  ;;  %v14634_v18 = vor.u32 %v18492_v49, %v14631_v33  ;;  %6762 = vmatpush.bf16.msrb.mxu3 %v15434_v37  ;;  %v18033_v49 = vld [vmem:[#allocation6 + $0x5ac] sm:$0xf0]  ;;  %v20528_v33 = vpop.f32.mrf.mxu0 }
 0x400   :  { %v14887_v43 = vld [vmem:[#allocation6 + $0x1628] sm:$0xf0]  ;;  %21244 = vst [vmem:[#allocation51_spill] sm:$0xff] %v20528_v33  ;;  %v17897_v37 = vld [vmem:[#allocation6 + $0x16c] sm:$0xf0] }
 0x401   :  { %v18620_v13 = vld [vmem:[#allocation6 + $0x180c] sm:$0xf]  ;;  %v14890_v42 = vor.u32 %v18556_v8, %v14887_v43  ;;  %6721 = vmatpush.bf16.msrb.mxu0 %v14634_v18  ;;  %v12270_v8 = vor.u32 %v17905_v46, %v12269_v22  ;;  %v12526_v43 = vor.u32 %v17969_v35, %v12525_v32  ;;  %v17961_v28 = vld [vmem:[#allocation6 + $0x36c] sm:$0xf0]  ;;  %v12238_v32 = vor.u32 %v17897_v37, %v12237_v1  ;;  %v20538_v46 = vpop.f32.mrf.mxu3 }
 0x402   :  { %v15143_v51 = vld [vmem:[#allocation6 + $0x1828] sm:$0xf0]  ;;  %v12749_v20 = vld [vmem:[#allocation6 + $0x550] sm:$0xf]  ;;  %21247 = vst [vmem:[#allocation54_spill] sm:$0xff] %v20538_v46 }
 0x403   :  { %v18684_v6 = vld [vmem:[#allocation6 + $0x1a0c] sm:$0xf]  ;;  %v15146_v15 = vor.u32 %v18620_v13, %v15143_v51  ;;  %6735 = vmatpush.bf16.msrb.mxu1 %v14890_v42  ;;  %v20530_v13 = vpop.f32.mrf.mxu1  ;;  %v12782_v51 = vor.u32 %v18033_v49, %v12781_v25  ;;  %v18025_v60 = vld [vmem:[#allocation6 + $0x56c] sm:$0xf0] }
 0x404   :  { %v15399_v34 = vld [vmem:[#allocation6 + $0x1a28] sm:$0xf0]  ;;  %21245 = vst [vmem:[#allocation52_spill] sm:$0xff] %v20530_v13  ;;  %6722 = vmatmul.bf16.vlgmr.msrb.gmra.mxu0 %v20382_v40  ;;  %v13005_v12 = vld [vmem:[#allocation6 + $0x750] sm:$0xf]  ;;  %v12750_v18 = vor.u32 %v18025_v60, %v12749_v20 }
 0x405   :  { %v15402_v24 = vor.u32 %v18684_v6, %v15399_v34  ;;  %6749 = vmatpush.bf16.msrb.mxu2 %v15146_v15  ;;  %6770 = vmatpush.bf16.msra.mxu0 %v12302_v56  ;;  %v13038_v6 = vor.u32 %v18097_v38, %v13037_v55  ;;  %v12493_v34 = vld [vmem:[#allocation6 + $0x350] sm:$0xf]  ;;  %v20536_v15 = vpop.f32.mrf.mxu2 }
 0x406   :  { %6736 = vmatmul.bf16.vlgmr.msrb.gmra.mxu1 %v20384_v2  ;;  %v18089_v29 = vld [vmem:[#allocation6 + $0x76c] sm:$0xf0]  ;;  %21246 = vst [vmem:[#allocation53_spill] sm:$0xff] %v20536_v15 }
 0x407   :  { %6763 = vmatpush.bf16.msrb.mxu3 %v15402_v24  ;;  %6784 = vmatpush.bf16.msra.mxu1 %v12558_v54  ;;  %v12205_v25 = vld [vmem:[#allocation6 + $0x110] sm:$0xf]  ;;  %v13006_v42 = vor.u32 %v18089_v29, %v13005_v12  ;;  %v6499_v22 = vpop.f32.mrf.mxu0 }
 0x408   :  { %6750 = vmatmul.bf16.vlgmr.msrb.gmra.mxu2 %v20347_v23  ;;  %v17889_v35 = vld [vmem:[#allocation6 + $0x12c] sm:$0xf0] }
 0x409   :  { %6798 = vmatpush.bf16.msra.mxu2 %v12814_v14  ;;  %6771 = vmatpush.bf16.msra.mxu0 %v12270_v8  ;;  %v12461_v41 = vld [vmem:[#allocation6 + $0x310] sm:$0xf]  ;;  %v6500_v14 = vadd.f32 %v6499_v22, %v20526_v58  ;;  %v12206_v49 = vor.u32 %v17889_v35, %v12205_v25  ;;  %v6541_v22 = vpop.f32.mrf.mxu3 }
 0x40a   :  { %6764 = vmatmul.bf16.vlgmr.msrb.gmra.mxu3 %v20355_v3  ;;  %v17953_v5 = vld [vmem:[#allocation6 + $0x32c] sm:$0xf0] }
 0x40b   :  { %6812 = vmatpush.bf16.msra.mxu3 %v13070_v50  ;;  %6785 = vmatpush.bf16.msra.mxu1 %v12526_v43  ;;  %v12494_v50 = vor.u32 %v17961_v28, %v12493_v34  ;;  %v12717_v30 = vld [vmem:[#allocation6 + $0x510] sm:$0xf]  ;;  %v12462_v55 = vor.u32 %v17953_v5, %v12461_v41  ;;  %v6513_v43 = vpop.f32.mrf.mxu1 }
 0x40c   :  { %v18017_v24 = vld [vmem:[#allocation6 + $0x52c] sm:$0xf0]  ;;  %v6514_v28 = vadd.f32 %v6513_v43, %v6500_v14 }
 0x40d   :  { %6799 = vmatpush.bf16.msra.mxu2 %v12782_v51  ;;  %v12973_v56 = vld [vmem:[#allocation6 + $0x710] sm:$0xf]  ;;  %6772 = vmatpush.bf16.msra.mxu0 %v12238_v32  ;;  %v12718_v1 = vor.u32 %v18017_v24, %v12717_v30  ;;  %v6527_v5 = vpop.f32.mrf.mxu2 }
 0x40e   :  { %v18081_v54 = vld [vmem:[#allocation6 + $0x72c] sm:$0xf0] }
 0x40f   :  { %6813 = vmatpush.bf16.msra.mxu3 %v13038_v6  ;;  %6786 = vmatpush.bf16.msra.mxu1 %v12494_v50  ;;  %v12173_v38 = vld [vmem:[#allocation6 + $0xd0] sm:$0xf]  ;;  %v12974_v37 = vor.u32 %v18081_v54, %v12973_v56  ;;  %v6528_v54 = vadd.f32 %v6527_v5, %v6514_v28 }
 0x410   :  { %v17881_v8 = vld [vmem:[#allocation6 + $0xec] sm:$0xf0] }
 0x411   :  { %6800 = vmatpush.bf16.msra.mxu2 %v12750_v18  ;;  %v12429_v51 = vld [vmem:[#allocation6 + $0x2d0] sm:$0xf]  ;;  %6773 = vmatpush.bf16.msra.mxu0 %v12206_v49  ;;  %v12174_v29 = vor.u32 %v17881_v8, %v12173_v38  ;;  %v20541_v8 = vadd.f32 %v6541_v22, %v6528_v54 }
 0x412   :  { %v17945_v6 = vld [vmem:[#allocation6 + $0x2ec] sm:$0xf0] }
 0x413   :  { %6814 = vmatpush.bf16.msra.mxu3 %v13006_v42  ;;  %v12685_v34 = vld [vmem:[#allocation6 + $0x4d0] sm:$0xf]  ;;  %6787 = vmatpush.bf16.msra.mxu1 %v12462_v55  ;;  %v12430_v58 = vor.u32 %v17945_v6, %v12429_v51 }
 0x414   :  { %v18009_v20 = vld [vmem:[#allocation6 + $0x4ec] sm:$0xf0] }
 0x415   :  { %v12941_v60 = vld [vmem:[#allocation6 + $0x6d0] sm:$0xf]  ;;  %6801 = vmatpush.bf16.msra.mxu2 %v12718_v1  ;;  %v12686_v25 = vor.u32 %v18009_v20, %v12685_v34  ;;  %6774 = vmatpush.bf16.msra.mxu0 %v12174_v29 }
 0x416   :  { %v18073_v12 = vld [vmem:[#allocation6 + $0x6ec] sm:$0xf0] }
 0x417   :  { %v12141_v32 = vld [vmem:[#allocation6 + $0x90] sm:$0xf]  ;;  %6815 = vmatpush.bf16.msra.mxu3 %v12974_v37  ;;  %v12942_v35 = vor.u32 %v18073_v12, %v12941_v60  ;;  %6788 = vmatpush.bf16.msra.mxu1 %v12430_v58 }
 0x418   :  { %v17873_v50 = vld [vmem:[#allocation6 + $0xac] sm:$0xf0] }
 0x419   :  { %v12397_v18 = vld [vmem:[#allocation6 + $0x290] sm:$0xf]  ;;  %v12142_v14 = vor.u32 %v17873_v50, %v12141_v32  ;;  %6802 = vmatpush.bf16.msra.mxu2 %v12686_v25 }
 0x41a   :  { %v17937_v42 = vld [vmem:[#allocation6 + $0x2ac] sm:$0xf0] }
 0x41b   :  { %v12653_v41 = vld [vmem:[#allocation6 + $0x490] sm:$0xf]  ;;  %v12398_v49 = vor.u32 %v17937_v42, %v12397_v18  ;;  %6816 = vmatpush.bf16.msra.mxu3 %v12942_v35  ;;  %6775 = vmatpush.bf16.msra.mxu0 %v12142_v14 }
 0x41c   :  { %v18001_v30 = vld [vmem:[#allocation6 + $0x4ac] sm:$0xf0] }
 0x41d   :  { %v12909_v24 = vld [vmem:[#allocation6 + $0x690] sm:$0xf]  ;;  %v12654_v43 = vor.u32 %v18001_v30, %v12653_v41  ;;  %6789 = vmatpush.bf16.msra.mxu1 %v12398_v49 }
 0x41e   :  { %v18065_v56 = vld [vmem:[#allocation6 + $0x6ac] sm:$0xf0] }
 0x41f   :  { %v12109_v55 = vld [vmem:[#allocation6 + $0x50] sm:$0xf]  ;;  %v12910_v1 = vor.u32 %v18065_v56, %v12909_v24  ;;  %6803 = vmatpush.bf16.msra.mxu2 %v12654_v43 }
 0x420   :  { %v17865_v38 = vld [vmem:[#allocation6 + $0x6c] sm:$0xf0] }
 0x421   :  { %v12365_v37 = vld [vmem:[#allocation6 + $0x250] sm:$0xf]  ;;  %v12110_v12 = vor.u32 %v17865_v38, %v12109_v55  ;;  %6817 = vmatpush.bf16.msra.mxu3 %v12910_v1 }
 0x422   :  { %v17929_v51 = vld [vmem:[#allocation6 + $0x26c] sm:$0xf0] }
 0x423   :  { %v12621_v6 = vld [vmem:[#allocation6 + $0x450] sm:$0xf]  ;;  %v12366_v29 = vor.u32 %v17929_v51, %v12365_v37  ;;  %6776 = vmatpush.bf16.msra.mxu0 %v12110_v12 }
 0x424   :  { %v17993_v34 = vld [vmem:[#allocation6 + $0x46c] sm:$0xf0] }
 0x425   :  { %v12877_v20 = vld [vmem:[#allocation6 + $0x650] sm:$0xf]  ;;  %v12622_v25 = vor.u32 %v17993_v34, %v12621_v6  ;;  %6790 = vmatpush.bf16.msra.mxu1 %v12366_v29 }
 0x426   :  { %v18057_v60 = vld [vmem:[#allocation6 + $0x66c] sm:$0xf0] }
 0x427   :  { %v12077_v28 = vld [vmem:[#allocation6 + $0x10] sm:$0xf]  ;;  %v12878_v35 = vor.u32 %v18057_v60, %v12877_v20  ;;  %6804 = vmatpush.bf16.msra.mxu2 %v12622_v25 }
 0x428   :  { %v17857_v58 = vld [vmem:[#allocation6 + $0x2c] sm:$0xf0] }
 0x429   :  { %v12333_v32 = vld [vmem:[#allocation6 + $0x210] sm:$0xf]  ;;  %v12078_v14 = vor.u32 %v17857_v58, %v12077_v28  ;;  %6818 = vmatpush.bf16.msra.mxu3 %v12878_v35  ;;  %v20543_v58 = vpop.f32.mrf.mxu0 }
 0x42a   :  { %v17921_v50 = vld [vmem:[#allocation6 + $0x22c] sm:$0xf0]  ;;  %21248 = vst [vmem:[#allocation55_spill] sm:$0xff] %v20543_v58 }
 0x42b   :  { %v12589_v18 = vld [vmem:[#allocation6 + $0x410] sm:$0xf]  ;;  %v12334_v49 = vor.u32 %v17921_v50, %v12333_v32  ;;  %6777 = vmatpush.bf16.msra.mxu0 %v12078_v14 }
 0x42c   :  { %v17985_v42 = vld [vmem:[#allocation6 + $0x42c] sm:$0xf0] }
 0x42d   :  { %v12845_v41 = vld [vmem:[#allocation6 + $0x610] sm:$0xf]  ;;  %v12590_v43 = vor.u32 %v17985_v42, %v12589_v18  ;;  %6791 = vmatpush.bf16.msra.mxu1 %v12334_v49  ;;  %v20545_v18 = vpop.f32.mrf.mxu1 }
 0x42e   :  { %v18049_v5 = vld [vmem:[#allocation6 + $0x62c] sm:$0xf0]  ;;  %21249 = vst [vmem:[#allocation56_spill] sm:$0xff] %v20545_v18  ;;  %6778 = vmatmul.bf16.vlgmr.msra.gmra.mxu0 %v20187_v52 }
 0x42f   :  { %v13325_v30 = vld [vmem:[#allocation6 + $0x9d0] sm:$0xf]  ;;  %v12846_v1 = vor.u32 %v18049_v5, %v12845_v41  ;;  %6805 = vmatpush.bf16.msra.mxu2 %v12590_v43  ;;  %v20551_v43 = vpop.f32.mrf.mxu2 }
 0x430   :  { %v18169_v24 = vld [vmem:[#allocation6 + $0x9ec] sm:$0xf0]  ;;  %6792 = vmatmul.bf16.vlgmr.msra.gmra.mxu1 %v20189_v59  ;;  %21250 = vst [vmem:[#allocation57_spill] sm:$0xff] %v20551_v43 }
 0x431   :  { %v13581_v56 = vld [vmem:[#allocation6 + $0xbd0] sm:$0xf]  ;;  %v13326_v51 = vor.u32 %v18169_v24, %v13325_v30  ;;  %6819 = vmatpush.bf16.msra.mxu3 %v12846_v1 }
 0x432   :  { %v18233_v54 = vld [vmem:[#allocation6 + $0xbec] sm:$0xf0]  ;;  %6806 = vmatmul.bf16.vlgmr.msra.gmra.mxu2 %v20191_v62 }
 0x433   :  { %v13837_v22 = vld [vmem:[#allocation6 + $0xdd0] sm:$0xf]  ;;  %v13582_v6 = vor.u32 %v18233_v54, %v13581_v56  ;;  %6826 = vmatpush.bf16.msrb.mxu0 %v13326_v51 }
 0x434   :  { %v18297_v55 = vld [vmem:[#allocation6 + $0xdec] sm:$0xf0]  ;;  %6820 = vmatmul.bf16.vlgmr.msra.gmra.mxu3 %v20193_v48 }
 0x435   :  { %v14093_v38 = vld [vmem:[#allocation6 + $0xfd0] sm:$0xf]  ;;  %v13838_v60 = vor.u32 %v18297_v55, %v13837_v22  ;;  %6840 = vmatpush.bf16.msrb.mxu1 %v13582_v6 }
 0x436   :  { %v18361_v37 = vld [vmem:[#allocation6 + $0xfec] sm:$0xf0] }
 0x437   :  { %v13293_v34 = vld [vmem:[#allocation6 + $0x990] sm:$0xf]  ;;  %v14094_v46 = vor.u32 %v18361_v37, %v14093_v38  ;;  %6854 = vmatpush.bf16.msrb.mxu2 %v13838_v60 }
 0x438   :  { %v18161_v20 = vld [vmem:[#allocation6 + $0x9ac] sm:$0xf0] }
 0x439   :  { %v13549_v15 = vld [vmem:[#allocation6 + $0xb90] sm:$0xf]  ;;  %v13294_v32 = vor.u32 %v18161_v20, %v13293_v34  ;;  %6868 = vmatpush.bf16.msrb.mxu3 %v14094_v46  ;;  %v6555_v34 = vpop.f32.mrf.mxu0  ;;  %v20553_v20 = vpop.f32.mrf.mxu3 }
 0x43a   :  { %v18225_v13 = vld [vmem:[#allocation6 + $0xbac] sm:$0xf0]  ;;  %21251 = vst [vmem:[#allocation58_spill] sm:$0xff] %v20553_v20  ;;  %v6556_v60 = vadd.f32 %v6555_v34, %v20541_v8 }
 0x43b   :  { %v13805_v33 = vld [vmem:[#allocation6 + $0xd90] sm:$0xf]  ;;  %v13550_v50 = vor.u32 %v18225_v13, %v13549_v15  ;;  %6827 = vmatpush.bf16.msrb.mxu0 %v13294_v32 }
 0x43c   :  { %v18289_v28 = vld [vmem:[#allocation6 + $0xdac] sm:$0xf0] }
 0x43d   :  { %v14061_v12 = vld [vmem:[#allocation6 + $0xf90] sm:$0xf]  ;;  %v13806_v42 = vor.u32 %v18289_v28, %v13805_v33  ;;  %6841 = vmatpush.bf16.msrb.mxu1 %v13550_v50  ;;  %v6569_v50 = vpop.f32.mrf.mxu1 }
 0x43e   :  { %v18353_v29 = vld [vmem:[#allocation6 + $0xfac] sm:$0xf0] }
 0x43f   :  { %v13261_v25 = vld [vmem:[#allocation6 + $0x950] sm:$0xf]  ;;  %v14062_v41 = vor.u32 %v18353_v29, %v14061_v12  ;;  %6855 = vmatpush.bf16.msrb.mxu2 %v13806_v42 }
 0x440   :  { %v18153_v35 = vld [vmem:[#allocation6 + $0x96c] sm:$0xf0] }
 0x441   :  { %v13517_v5 = vld [vmem:[#allocation6 + $0xb50] sm:$0xf]  ;;  %v13262_v13 = vor.u32 %v18153_v35, %v13261_v25  ;;  %6869 = vmatpush.bf16.msrb.mxu3 %v14062_v41 }
 0x442   :  { %v18217_v30 = vld [vmem:[#allocation6 + $0xb6c] sm:$0xf0] }
 0x443   :  { %v13773_v24 = vld [vmem:[#allocation6 + $0xd50] sm:$0xf]  ;;  %v13518_v15 = vor.u32 %v18217_v30, %v13517_v5  ;;  %6828 = vmatpush.bf16.msrb.mxu0 %v13262_v13  ;;  %v20556_v30 = vadd.f32 %v6569_v50, %v6556_v60  ;;  %v6597_v60 = vpop.f32.mrf.mxu3 }
 0x444   :  { %v18281_v56 = vld [vmem:[#allocation6 + $0xd6c] sm:$0xf0] }
 0x445   :  { %v14029_v54 = vld [vmem:[#allocation6 + $0xf50] sm:$0xf]  ;;  %v13774_v14 = vor.u32 %v18281_v56, %v13773_v24  ;;  %6842 = vmatpush.bf16.msrb.mxu1 %v13518_v15  ;;  %21252 = vst [vmem:[#allocation59_spill] sm:$0xff] %v20556_v30 }
 0x446   :  { %v18345_v22 = vld [vmem:[#allocation6 + $0xf6c] sm:$0xf0] }
 0x447   :  { %v13229_v33 = vld [vmem:[#allocation6 + $0x910] sm:$0xf]  ;;  %v14030_v49 = vor.u32 %v18345_v22, %v14029_v54  ;;  %6856 = vmatpush.bf16.msrb.mxu2 %v13774_v14  ;;  %v21208_v22 = vperm.slane %v20502_v11, 3 }
 0x448   :  { %v18145_v46 = vld [vmem:[#allocation6 + $0x92c] sm:$0xf0] }
 0x449   :  { %v13485_v55 = vld [vmem:[#allocation6 + $0xb10] sm:$0xf]  ;;  %v13230_v28 = vor.u32 %v18145_v46, %v13229_v33  ;;  %6870 = vmatpush.bf16.msrb.mxu3 %v14030_v49 }
 0x44a   :  { %v18209_v38 = vld [vmem:[#allocation6 + $0xb2c] sm:$0xf0] }
 0x44b   :  { %v13741_v37 = vld [vmem:[#allocation6 + $0xd10] sm:$0xf]  ;;  %v13486_v12 = vor.u32 %v18209_v38, %v13485_v55  ;;  %6829 = vmatpush.bf16.msrb.mxu0 %v13230_v28 }
 0x44c   :  { %v18273_v1 = vld [vmem:[#allocation6 + $0xd2c] sm:$0xf0] }
 0x44d   :  { %v13997_v51 = vld [vmem:[#allocation6 + $0xf10] sm:$0xf]  ;;  %v13742_v25 = vor.u32 %v18273_v1, %v13741_v37  ;;  %6843 = vmatpush.bf16.msrb.mxu1 %v13486_v12  ;;  %v6583_v37 = vpop.f32.mrf.mxu2 }
 0x44e   :  { %v18337_v6 = vld [vmem:[#allocation6 + $0xf2c] sm:$0xf0]  ;;  %v6584_v34 = vadd.f32 %v6583_v37, %v21208_v22 }
 0x44f   :  { %v13197_v29 = vld [vmem:[#allocation6 + $0x8d0] sm:$0xf]  ;;  %v13998_v35 = vor.u32 %v18337_v6, %v13997_v51  ;;  %6857 = vmatpush.bf16.msrb.mxu2 %v13742_v25 }
 0x450   :  { %v18137_v32 = vld [vmem:[#allocation6 + $0x8ec] sm:$0xf0]  ;;  %v20561_v50 = vadd.f32 %v6597_v60, %v6584_v34 }
 0x451   :  { %v13453_v42 = vld [vmem:[#allocation6 + $0xad0] sm:$0xf]  ;;  %v13198_v8 = vor.u32 %v18137_v32, %v13197_v29  ;;  %6871 = vmatpush.bf16.msrb.mxu3 %v13998_v35 }
 0x452   :  { %v18201_v41 = vld [vmem:[#allocation6 + $0xaec] sm:$0xf0] }
 0x453   :  { %v13709_v5 = vld [vmem:[#allocation6 + $0xcd0] sm:$0xf]  ;;  %v13454_v13 = vor.u32 %v18201_v41, %v13453_v42  ;;  %6830 = vmatpush.bf16.msrb.mxu0 %v13198_v8 }
 0x454   :  { %v18265_v24 = vld [vmem:[#allocation6 + $0xcec] sm:$0xf0] }
 0x455   :  { %v13965_v56 = vld [vmem:[#allocation6 + $0xed0] sm:$0xf]  ;;  %v13710_v46 = vor.u32 %v18265_v24, %v13709_v5  ;;  %6844 = vmatpush.bf16.msrb.mxu1 %v13454_v13 }
 0x456   :  { %v18329_v54 = vld [vmem:[#allocation6 + $0xeec] sm:$0xf0] }
 0x457   :  { %v13165_v15 = vld [vmem:[#allocation6 + $0x890] sm:$0xf]  ;;  %v13966_v14 = vor.u32 %v18329_v54, %v13965_v56  ;;  %6858 = vmatpush.bf16.msrb.mxu2 %v13710_v46 }
 0x458   :  { %v18129_v33 = vld [vmem:[#allocation6 + $0x8ac] sm:$0xf0] }
 0x459   :  { %v13421_v49 = vld [vmem:[#allocation6 + $0xa90] sm:$0xf]  ;;  %v13166_v28 = vor.u32 %v18129_v33, %v13165_v15  ;;  %6872 = vmatpush.bf16.msrb.mxu3 %v13966_v14 }
 0x45a   :  { %v18193_v55 = vld [vmem:[#allocation6 + $0xaac] sm:$0xf0] }
 0x45b   :  { %v13677_v38 = vld [vmem:[#allocation6 + $0xc90] sm:$0xf]  ;;  %v13422_v12 = vor.u32 %v18193_v55, %v13421_v49  ;;  %6831 = vmatpush.bf16.msrb.mxu0 %v13166_v28 }
 0x45c   :  { %v18257_v1 = vld [vmem:[#allocation6 + $0xcac] sm:$0xf0] }
 0x45d   :  { %v13933_v51 = vld [vmem:[#allocation6 + $0xe90] sm:$0xf]  ;;  %v13678_v25 = vor.u32 %v18257_v1, %v13677_v38  ;;  %6845 = vmatpush.bf16.msrb.mxu1 %v13422_v12 }
 0x45e   :  { %v18321_v6 = vld [vmem:[#allocation6 + $0xeac] sm:$0xf0] }
 0x45f   :  { %v13133_v29 = vld [vmem:[#allocation6 + $0x850] sm:$0xf]  ;;  %v13934_v35 = vor.u32 %v18321_v6, %v13933_v51  ;;  %6859 = vmatpush.bf16.msrb.mxu2 %v13678_v25 }
 0x460   :  { %v18121_v32 = vld [vmem:[#allocation6 + $0x86c] sm:$0xf0] }
 0x461   :  { %v13389_v42 = vld [vmem:[#allocation6 + $0xa50] sm:$0xf]  ;;  %v13134_v8 = vor.u32 %v18121_v32, %v13133_v29  ;;  %6873 = vmatpush.bf16.msrb.mxu3 %v13934_v35 }
 0x462   :  { %v18185_v41 = vld [vmem:[#allocation6 + $0xa6c] sm:$0xf0] }
 0x463   :  { %v13645_v5 = vld [vmem:[#allocation6 + $0xc50] sm:$0xf]  ;;  %v13390_v13 = vor.u32 %v18185_v41, %v13389_v42  ;;  %6832 = vmatpush.bf16.msrb.mxu0 %v13134_v8 }
 0x464   :  { %v18249_v24 = vld [vmem:[#allocation6 + $0xc6c] sm:$0xf0] }
 0x465   :  { %v13901_v56 = vld [vmem:[#allocation6 + $0xe50] sm:$0xf]  ;;  %v13646_v46 = vor.u32 %v18249_v24, %v13645_v5  ;;  %6846 = vmatpush.bf16.msrb.mxu1 %v13390_v13 }
 0x466   :  { %v18313_v54 = vld [vmem:[#allocation6 + $0xe6c] sm:$0xf0] }
 0x467   :  { %v13101_v37 = vld [vmem:[#allocation6 + $0x810] sm:$0xf]  ;;  %v13902_v14 = vor.u32 %v18313_v54, %v13901_v56  ;;  %6860 = vmatpush.bf16.msrb.mxu2 %v13646_v46 }
 0x468   :  { %v18113_v15 = vld [vmem:[#allocation6 + $0x82c] sm:$0xf0] }
 0x469   :  { %v13357_v33 = vld [vmem:[#allocation6 + $0xa10] sm:$0xf]  ;;  %v13102_v28 = vor.u32 %v18113_v15, %v13101_v37  ;;  %6874 = vmatpush.bf16.msrb.mxu3 %v13902_v14  ;;  %v20563_v15 = vpop.f32.mrf.mxu0 }
 0x46a   :  { %v18177_v49 = vld [vmem:[#allocation6 + $0xa2c] sm:$0xf0]  ;;  %21253 = vst [vmem:[#allocation60_spill] sm:$0xff] %v20563_v15 }
 0x46b   :  { %v13613_v55 = vld [vmem:[#allocation6 + $0xc10] sm:$0xf]  ;;  %v13358_v12 = vor.u32 %v18177_v49, %v13357_v33  ;;  %6833 = vmatpush.bf16.msrb.mxu0 %v13102_v28 }
 0x46c   :  { %v18241_v38 = vld [vmem:[#allocation6 + $0xc2c] sm:$0xf0] }
 0x46d   :  { %v13869_v1 = vld [vmem:[#allocation6 + $0xe10] sm:$0xf]  ;;  %v13614_v25 = vor.u32 %v18241_v38, %v13613_v55  ;;  %6847 = vmatpush.bf16.msrb.mxu1 %v13358_v12 }
 0x46e   :  { %v18305_v51 = vld [vmem:[#allocation6 + $0xe2c] sm:$0xf0]  ;;  %6834 = vmatmul.bf16.vlgmr.msrb.gmra.mxu0 %v20284_v9 }
 0x46f   :  { %v14349_v6 = vld [vmem:[#allocation6 + $0x11d0] sm:$0xf]  ;;  %v13870_v35 = vor.u32 %v18305_v51, %v13869_v1  ;;  %6861 = vmatpush.bf16.msrb.mxu2 %v13614_v25  ;;  %v20571_v25 = vpop.f32.mrf.mxu2 }
 0x470   :  { %v18425_v34 = vld [vmem:[#allocation6 + $0x11ec] sm:$0xf0]  ;;  %6848 = vmatmul.bf16.vlgmr.msrb.gmra.mxu1 %v20286_v63 }
 0x471   :  { %v14605_v60 = vld [vmem:[#allocation6 + $0x13d0] sm:$0xf]  ;;  %v14350_v41 = vor.u32 %v18425_v34, %v14349_v6  ;;  %6875 = vmatpush.bf16.msrb.mxu3 %v13870_v35 }
 0x472   :  { %v18489_v22 = vld [vmem:[#allocation6 + $0x13ec] sm:$0xf0]  ;;  %6862 = vmatmul.bf16.vlgmr.msrb.gmra.mxu2 %v20293_v19 }
 0x473   :  { %v14861_v30 = vld [vmem:[#allocation6 + $0x15d0] sm:$0xf]  ;;  %v14606_v5 = vor.u32 %v18489_v22, %v14605_v60  ;;  %6882 = vmatpush.bf16.msra.mxu0 %v14350_v41 }
 0x474   :  { %v18553_v29 = vld [vmem:[#allocation6 + $0x15ec] sm:$0xf0]  ;;  %6876 = vmatmul.bf16.vlgmr.msrb.gmra.mxu3 %v20295_v61 }
 0x475   :  { %v15117_v32 = vld [vmem:[#allocation6 + $0x17d0] sm:$0xf]  ;;  %v14862_v54 = vor.u32 %v18553_v29, %v14861_v30  ;;  %6896 = vmatpush.bf16.msra.mxu1 %v14606_v5  ;;  %v20565_v30 = vpop.f32.mrf.mxu1 }
 0x476   :  { %v18617_v42 = vld [vmem:[#allocation6 + $0x17ec] sm:$0xf0]  ;;  %21254 = vst [vmem:[#allocation61_spill] sm:$0xff] %v20565_v30 }
 0x477   :  { %v14317_v24 = vld [vmem:[#allocation6 + $0x1190] sm:$0xf]  ;;  %v15118_v20 = vor.u32 %v18617_v42, %v15117_v32  ;;  %6910 = vmatpush.bf16.msra.mxu2 %v14862_v54 }
 0x478   :  { %v18417_v56 = vld [vmem:[#allocation6 + $0x11ac] sm:$0xf0] }
 0x479   :  { %v14573_v43 = vld [vmem:[#allocation6 + $0x1390] sm:$0xf]  ;;  %v14318_v33 = vor.u32 %v18417_v56, %v14317_v24  ;;  %6924 = vmatpush.bf16.msra.mxu3 %v15118_v20  ;;  %v6611_v24 = vpop.f32.mrf.mxu0  ;;  %v20573_v56 = vpop.f32.mrf.mxu3 }
 0x47a   :  { %v18481_v18 = vld [vmem:[#allocation6 + $0x13ac] sm:$0xf0]  ;;  %21255 = vst [vmem:[#allocation62_spill] sm:$0xff] %v20573_v56  ;;  %v6612_v54 = vadd.f32 %v6611_v24, %v20561_v50 }
 0x47b   :  { %v14829_v58 = vld [vmem:[#allocation6 + $0x1590] sm:$0xf]  ;;  %v14574_v22 = vor.u32 %v18481_v18, %v14573_v43  ;;  %6883 = vmatpush.bf16.msra.mxu0 %v14318_v33 }
 0x47c   :  { %v18545_v37 = vld [vmem:[#allocation6 + $0x15ac] sm:$0xf0] }
 0x47d   :  { %v15085_v8 = vld [vmem:[#allocation6 + $0x1790] sm:$0xf]  ;;  %v14830_v14 = vor.u32 %v18545_v37, %v14829_v58  ;;  %6897 = vmatpush.bf16.msra.mxu1 %v14574_v22  ;;  %v6625_v22 = vpop.f32.mrf.mxu1 }
 0x47e   :  { %v18609_v13 = vld [vmem:[#allocation6 + $0x17ac] sm:$0xf0] }
 0x47f   :  { %v14285_v49 = vld [vmem:[#allocation6 + $0x1150] sm:$0xf]  ;;  %v15086_v55 = vor.u32 %v18609_v13, %v15085_v8  ;;  %6911 = vmatpush.bf16.msra.mxu2 %v14830_v14 }
 0x480   :  { %v18409_v46 = vld [vmem:[#allocation6 + $0x116c] sm:$0xf0] }
 0x481   :  { %v14541_v38 = vld [vmem:[#allocation6 + $0x1350] sm:$0xf]  ;;  %v14286_v18 = vor.u32 %v18409_v46, %v14285_v49  ;;  %6925 = vmatpush.bf16.msra.mxu3 %v15086_v55  ;;  %v6653_v24 = vpop.f32.mrf.mxu3 }
 0x482   :  { %v18473_v1 = vld [vmem:[#allocation6 + $0x136c] sm:$0xf0] }
 0x483   :  { %v14797_v51 = vld [vmem:[#allocation6 + $0x1550] sm:$0xf]  ;;  %v14542_v43 = vor.u32 %v18473_v1, %v14541_v38  ;;  %6884 = vmatpush.bf16.msra.mxu0 %v14286_v18  ;;  %v6626_v1 = vadd.f32 %v6625_v22, %v6612_v54 }
 0x484   :  { %v18537_v6 = vld [vmem:[#allocation6 + $0x156c] sm:$0xf0] }
 0x485   :  { %v15053_v34 = vld [vmem:[#allocation6 + $0x1750] sm:$0xf]  ;;  %v14798_v28 = vor.u32 %v18537_v6, %v14797_v51  ;;  %6898 = vmatpush.bf16.msra.mxu1 %v14542_v43 }
 0x486   :  { %v18601_v60 = vld [vmem:[#allocation6 + $0x176c] sm:$0xf0] }
 0x487   :  { %v14253_v58 = vld [vmem:[#allocation6 + $0x1110] sm:$0xf]  ;;  %v15054_v12 = vor.u32 %v18601_v60, %v15053_v34  ;;  %6912 = vmatpush.bf16.msra.mxu2 %v14798_v28 }
 0x488   :  { %v18401_v20 = vld [vmem:[#allocation6 + $0x112c] sm:$0xf0] }
 0x489   :  { %v14509_v29 = vld [vmem:[#allocation6 + $0x1310] sm:$0xf]  ;;  %v14254_v37 = vor.u32 %v18401_v20, %v14253_v58  ;;  %6926 = vmatpush.bf16.msra.mxu3 %v15054_v12 }
 0x48a   :  { %v18465_v32 = vld [vmem:[#allocation6 + $0x132c] sm:$0xf0] }
 0x48b   :  { %v14765_v42 = vld [vmem:[#allocation6 + $0x1510] sm:$0xf]  ;;  %v14510_v8 = vor.u32 %v18465_v32, %v14509_v29  ;;  %6885 = vmatpush.bf16.msra.mxu0 %v14254_v37  ;;  %v6639_v32 = vpop.f32.mrf.mxu2 }
 0x48c   :  { %v18529_v35 = vld [vmem:[#allocation6 + $0x152c] sm:$0xf0] }
 0x48d   :  { %v15021_v41 = vld [vmem:[#allocation6 + $0x1710] sm:$0xf]  ;;  %v14766_v49 = vor.u32 %v18529_v35, %v14765_v42  ;;  %6899 = vmatpush.bf16.msra.mxu1 %v14510_v8 }
 0x48e   :  { %v18593_v5 = vld [vmem:[#allocation6 + $0x172c] sm:$0xf0] }
 0x48f   :  { %v14221_v13 = vld [vmem:[#allocation6 + $0x10d0] sm:$0xf]  ;;  %v15022_v46 = vor.u32 %v18593_v5, %v15021_v41  ;;  %6913 = vmatpush.bf16.msra.mxu2 %v14766_v49  ;;  %v6640_v5 = vadd.f32 %v6639_v32, %v6626_v1 }
 0x490   :  { %v18393_v33 = vld [vmem:[#allocation6 + $0x10ec] sm:$0xf0] }
 0x491   :  { %v14477_v14 = vld [vmem:[#allocation6 + $0x12d0] sm:$0xf]  ;;  %v14222_v60 = vor.u32 %v18393_v33, %v14221_v13  ;;  %6927 = vmatpush.bf16.msra.mxu3 %v15022_v46  ;;  %v20576_v33 = vadd.f32 %v6653_v24, %v6640_v5  ;;  %v17909_v24 = vld [vmem:[#allocation6 + $0x1d4] sm:$0xf] }
 0x492   :  { %v18457_v55 = vld [vmem:[#allocation6 + $0x12ec] sm:$0xf0] }
 0x493   :  { %v14733_v38 = vld [vmem:[#allocation6 + $0x14d0] sm:$0xf]  ;;  %v14478_v50 = vor.u32 %v18457_v55, %v14477_v14  ;;  %6886 = vmatpush.bf16.msra.mxu0 %v14222_v60 }
 0x494   :  { %v18521_v51 = vld [vmem:[#allocation6 + $0x14ec] sm:$0xf0] }
 0x495   :  { %v14989_v6 = vld [vmem:[#allocation6 + $0x16d0] sm:$0xf]  ;;  %v14734_v58 = vor.u32 %v18521_v51, %v14733_v38  ;;  %6900 = vmatpush.bf16.msra.mxu1 %v14478_v50 }
 0x496   :  { %v18585_v34 = vld [vmem:[#allocation6 + $0x16ec] sm:$0xf0] }
 0x497   :  { %v14189_v18 = vld [vmem:[#allocation6 + $0x1090] sm:$0xf]  ;;  %v14990_v20 = vor.u32 %v18585_v34, %v14989_v6  ;;  %6914 = vmatpush.bf16.msra.mxu2 %v14734_v58 }
 0x498   :  { %v18385_v43 = vld [vmem:[#allocation6 + $0x10ac] sm:$0xf0] }
 0x499   :  { %v14445_v28 = vld [vmem:[#allocation6 + $0x1290] sm:$0xf]  ;;  %v14190_v54 = vor.u32 %v18385_v43, %v14189_v18  ;;  %6928 = vmatpush.bf16.msra.mxu3 %v14990_v20 }
 0x49a   :  { %v18449_v12 = vld [vmem:[#allocation6 + $0x12ac] sm:$0xf0] }
 0x49b   :  { %v14701_v29 = vld [vmem:[#allocation6 + $0x1490] sm:$0xf]  ;;  %v14446_v37 = vor.u32 %v18449_v12, %v14445_v28  ;;  %6887 = vmatpush.bf16.msra.mxu0 %v14190_v54 }
 0x49c   :  { %v18513_v42 = vld [vmem:[#allocation6 + $0x14ac] sm:$0xf0] }
 0x49d   :  { %v14957_v35 = vld [vmem:[#allocation6 + $0x1690] sm:$0xf]  ;;  %v14702_v22 = vor.u32 %v18513_v42, %v14701_v29  ;;  %6901 = vmatpush.bf16.msra.mxu1 %v14446_v37 }
 0x49e   :  { %v18577_v41 = vld [vmem:[#allocation6 + $0x16ac] sm:$0xf0] }
 0x49f   :  { %v14157_v8 = vld [vmem:[#allocation6 + $0x1050] sm:$0xf]  ;;  %v14958_v49 = vor.u32 %v18577_v41, %v14957_v35  ;;  %6915 = vmatpush.bf16.msra.mxu2 %v14702_v22 }
 0x4a0   :  { %v18377_v13 = vld [vmem:[#allocation6 + $0x106c] sm:$0xf0] }
 0x4a1   :  { %v14413_v46 = vld [vmem:[#allocation6 + $0x1250] sm:$0xf]  ;;  %v14158_v34 = vor.u32 %v18377_v13, %v14157_v8  ;;  %6929 = vmatpush.bf16.msra.mxu3 %v14958_v49  ;;  %v12303_v8 = vld [vmem:[#allocation6 + $0x1f0] sm:$0xf0] }
 0x4a2   :  { %v18441_v14 = vld [vmem:[#allocation6 + $0x126c] sm:$0xf0]  ;;  %v17973_v13 = vld [vmem:[#allocation6 + $0x3d4] sm:$0xf] }
 0x4a3   :  { %v14669_v55 = vld [vmem:[#allocation6 + $0x1450] sm:$0xf]  ;;  %v14414_v60 = vor.u32 %v18441_v14, %v14413_v46  ;;  %6888 = vmatpush.bf16.msra.mxu0 %v14158_v34  ;;  %v12559_v46 = vld [vmem:[#allocation6 + $0x3f0] sm:$0xf0] }
 0x4a4   :  { %v18505_v38 = vld [vmem:[#allocation6 + $0x146c] sm:$0xf0]  ;;  %v12562_v30 = vor.u32 %v17973_v13, %v12559_v46  ;;  %v17965_v34 = vld [vmem:[#allocation6 + $0x394] sm:$0xf] }
 0x4a5   :  { %v14925_v51 = vld [vmem:[#allocation6 + $0x1650] sm:$0xf]  ;;  %v14670_v58 = vor.u32 %v18505_v38, %v14669_v55  ;;  %6902 = vmatpush.bf16.msra.mxu1 %v14414_v60  ;;  %v12527_v60 = vld [vmem:[#allocation6 + $0x3b0] sm:$0xf0] }
 0x4a6   :  { %v18569_v6 = vld [vmem:[#allocation6 + $0x166c] sm:$0xf0]  ;;  %v17885_v46 = vld [vmem:[#allocation6 + $0x114] sm:$0xf] }
 0x4a7   :  { %v14125_v1 = vld [vmem:[#allocation6 + $0x1010] sm:$0xf]  ;;  %v14926_v20 = vor.u32 %v18569_v6, %v14925_v51  ;;  %6916 = vmatpush.bf16.msra.mxu2 %v14670_v58  ;;  %v12306_v6 = vor.u32 %v17909_v24, %v12303_v8  ;;  %v12495_v24 = vld [vmem:[#allocation6 + $0x370] sm:$0xf0] }
 0x4a8   :  { %v18369_v50 = vld [vmem:[#allocation6 + $0x102c] sm:$0xf0] }
 0x4a9   :  { %v14381_v18 = vld [vmem:[#allocation6 + $0x1210] sm:$0xf]  ;;  %v14126_v54 = vor.u32 %v18369_v50, %v14125_v1  ;;  %6930 = vmatpush.bf16.msra.mxu3 %v14926_v20  ;;  %v12271_v1 = vld [vmem:[#allocation6 + $0x1b0] sm:$0xf0]  ;;  %v20578_v50 = vpop.f32.mrf.mxu0 }
 0x4aa   :  { %v18433_v43 = vld [vmem:[#allocation6 + $0x122c] sm:$0xf0]  ;;  %21256 = vst [vmem:[#allocation63_spill] sm:$0xff] %v20578_v50  ;;  %v18157_v50 = vld [vmem:[#allocation6 + $0x994] sm:$0xf] }
 0x4ab   :  { %v14637_v28 = vld [vmem:[#allocation6 + $0x1410] sm:$0xf]  ;;  %v14382_v37 = vor.u32 %v18433_v43, %v14381_v18  ;;  %6889 = vmatpush.bf16.msra.mxu0 %v14126_v54 }
 0x4ac   :  { %v18497_v12 = vld [vmem:[#allocation6 + $0x142c] sm:$0xf0] }
 0x4ad   :  { %v14893_v29 = vld [vmem:[#allocation6 + $0x1610] sm:$0xf]  ;;  %v14638_v22 = vor.u32 %v18497_v12, %v14637_v28  ;;  %6903 = vmatpush.bf16.msra.mxu1 %v14382_v37  ;;  %v20580_v28 = vpop.f32.mrf.mxu1  ;;  %v12274_v12 = vor.u32 %v17901_v36, %v12271_v1 }
 0x4ae   :  { %v18561_v32 = vld [vmem:[#allocation6 + $0x162c] sm:$0xf0]  ;;  %21257 = vst [vmem:[#allocation64_spill] sm:$0xff] %v20580_v28  ;;  %6890 = vmatmul.bf16.vlgmr.msra.gmra.mxu0 %v20378_v4  ;;  %v13039_v28 = vld [vmem:[#allocation6 + $0x7b0] sm:$0xf0] }
 0x4af   :  { %v15373_v42 = vld [vmem:[#allocation6 + $0x19d0] sm:$0xf]  ;;  %v14894_v49 = vor.u32 %v18561_v32, %v14893_v29  ;;  %6917 = vmatpush.bf16.msra.mxu2 %v14638_v22  ;;  %v12530_v29 = vor.u32 %v17965_v34, %v12527_v60  ;;  %v20586_v22 = vpop.f32.mrf.mxu2 }
 0x4b0   :  { %v18681_v35 = vld [vmem:[#allocation6 + $0x19ec] sm:$0xf0]  ;;  %6904 = vmatmul.bf16.vlgmr.msra.gmra.mxu1 %v20380_v16  ;;  %21258 = vst [vmem:[#allocation65_spill] sm:$0xff] %v20586_v22  ;;  %v18093_v22 = vld [vmem:[#allocation6 + $0x794] sm:$0xf] }
 0x4b1   :  { %v15629_v41 = vld [vmem:[#allocation6 + $0x1bd0] sm:$0xf]  ;;  %v15374_v14 = vor.u32 %v18681_v35, %v15373_v42  ;;  %6931 = vmatpush.bf16.msra.mxu3 %v14894_v49  ;;  %v17893_v35 = vld [vmem:[#allocation6 + $0x154] sm:$0xf] }
 0x4b2   :  { %v18745_v5 = vld [vmem:[#allocation6 + $0x1bec] sm:$0xf0]  ;;  %6918 = vmatmul.bf16.vlgmr.msra.gmra.mxu2 %v20382_v40  ;;  %v12207_v49 = vld [vmem:[#allocation6 + $0x130] sm:$0xf0] }
 0x4b3   :  { %v15630_v55 = vor.u32 %v18745_v5, %v15629_v41  ;;  %v15341_v38 = vld [vmem:[#allocation6 + $0x1990] sm:$0xf]  ;;  %6938 = vmatpush.bf16.msrb.mxu0 %v15374_v14  ;;  %6966 = vmatpush.bf16.msrb.mxu2 %v12306_v6  ;;  %v12239_v41 = vld [vmem:[#allocation6 + $0x170] sm:$0xf0] }
 0x4b4   :  { %v18673_v51 = vld [vmem:[#allocation6 + $0x19ac] sm:$0xf0]  ;;  %v17957_v5 = vld [vmem:[#allocation6 + $0x354] sm:$0xf]  ;;  %6932 = vmatmul.bf16.vlgmr.msra.gmra.mxu3 %v20384_v2  ;;  %v12242_v54 = vor.u32 %v17893_v35, %v12239_v41 }
 0x4b5   :  { %v15597_v15 = vld [vmem:[#allocation6 + $0x1b90] sm:$0xf]  ;;  %6952 = vmatpush.bf16.msrb.mxu1 %v15630_v55  ;;  %v15342_v18 = vor.u32 %v18673_v51, %v15341_v38  ;;  %6980 = vmatpush.bf16.msrb.mxu3 %v12562_v30  ;;  %v12498_v37 = vor.u32 %v17957_v5, %v12495_v24  ;;  %v17949_v14 = vld [vmem:[#allocation6 + $0x314] sm:$0xf]  ;;  %v6667_v38 = vpop.f32.mrf.mxu0  ;;  %v20588_v51 = vpop.f32.mrf.mxu3 }
 0x4b6   :  { %v18737_v56 = vld [vmem:[#allocation6 + $0x1bac] sm:$0xf0]  ;;  %v12463_v55 = vld [vmem:[#allocation6 + $0x330] sm:$0xf0]  ;;  %21259 = vst [vmem:[#allocation66_spill] sm:$0xff] %v20588_v51  ;;  %v6668_v6 = vadd.f32 %v6667_v38, %v20576_v33 }
 0x4b7   :  { %v15598_v43 = vor.u32 %v18737_v56, %v15597_v15  ;;  %v15309_v58 = vld [vmem:[#allocation6 + $0x1950] sm:$0xf]  ;;  %6939 = vmatpush.bf16.msrb.mxu0 %v15342_v18  ;;  %6967 = vmatpush.bf16.msrb.mxu2 %v12274_v12  ;;  %v12175_v35 = vld [vmem:[#allocation6 + $0xf0] sm:$0xf0] }
 0x4b8   :  { %v18665_v20 = vld [vmem:[#allocation6 + $0x196c] sm:$0xf0]  ;;  %v17941_v41 = vld [vmem:[#allocation6 + $0x2d4] sm:$0xf] }
 0x4b9   :  { %v15565_v32 = vld [vmem:[#allocation6 + $0x1b50] sm:$0xf]  ;;  %6953 = vmatpush.bf16.msrb.mxu1 %v15598_v43  ;;  %v15310_v15 = vor.u32 %v18665_v20, %v15309_v58  ;;  %6981 = vmatpush.bf16.msrb.mxu3 %v12530_v29  ;;  %v6681_v43 = vpop.f32.mrf.mxu1  ;;  %v12210_v58 = vor.u32 %v17885_v46, %v12207_v49  ;;  %v12466_v20 = vor.u32 %v17949_v14, %v12463_v55  ;;  %v12431_v5 = vld [vmem:[#allocation6 + $0x2f0] sm:$0xf0] }
 0x4ba   :  { %v18729_v42 = vld [vmem:[#allocation6 + $0x1b6c] sm:$0xf0]  ;;  %v12143_v46 = vld [vmem:[#allocation6 + $0xb0] sm:$0xf0] }
 0x4bb   :  { %v15566_v30 = vor.u32 %v18729_v42, %v15565_v32  ;;  %v15277_v36 = vld [vmem:[#allocation6 + $0x1910] sm:$0xf]  ;;  %6940 = vmatpush.bf16.msrb.mxu0 %v15310_v15  ;;  %6968 = vmatpush.bf16.msrb.mxu2 %v12242_v54  ;;  %v17877_v32 = vld [vmem:[#allocation6 + $0xd4] sm:$0xf]  ;;  %v6682_v42 = vadd.f32 %v6681_v43, %v6668_v6 }
 0x4bc   :  { %v18657_v56 = vld [vmem:[#allocation6 + $0x192c] sm:$0xf0]  ;;  %v17933_v49 = vld [vmem:[#allocation6 + $0x294] sm:$0xf] }
 0x4bd   :  { %v15533_v8 = vld [vmem:[#allocation6 + $0x1b10] sm:$0xf]  ;;  %6954 = vmatpush.bf16.msrb.mxu1 %v15566_v30  ;;  %v15278_v1 = vor.u32 %v18657_v56, %v15277_v36  ;;  %6982 = vmatpush.bf16.msrb.mxu3 %v12498_v37  ;;  %v12178_v36 = vor.u32 %v17877_v32, %v12175_v35  ;;  %v12434_v56 = vor.u32 %v17941_v41, %v12431_v5  ;;  %v12399_v14 = vld [vmem:[#allocation6 + $0x2b0] sm:$0xf0]  ;;  %v6709_v38 = vpop.f32.mrf.mxu3 }
 0x4be   :  { %v18721_v13 = vld [vmem:[#allocation6 + $0x1b2c] sm:$0xf0]  ;;  %v12111_v32 = vld [vmem:[#allocation6 + $0x70] sm:$0xf0] }
 0x4bf   :  { %v15534_v34 = vor.u32 %v18721_v13, %v15533_v8  ;;  %v15245_v60 = vld [vmem:[#allocation6 + $0x18d0] sm:$0xf]  ;;  %6941 = vmatpush.bf16.msrb.mxu0 %v15278_v1  ;;  %6969 = vmatpush.bf16.msrb.mxu2 %v12210_v58  ;;  %v17869_v8 = vld [vmem:[#allocation6 + $0x94] sm:$0xf]  ;;  %v6695_v13 = vpop.f32.mrf.mxu2  ;;  %v12402_v58 = vor.u32 %v17933_v49, %v12399_v14 }
 0x4c0   :  { %v18649_v18 = vld [vmem:[#allocation6 + $0x18ec] sm:$0xf0]  ;;  %v6696_v55 = vadd.f32 %v6695_v13, %v6682_v42  ;;  %v12146_v43 = vor.u32 %v17869_v8, %v12143_v46  ;;  %v17925_v35 = vld [vmem:[#allocation6 + $0x254] sm:$0xf] }
 0x4c1   :  { %v15501_v12 = vld [vmem:[#allocation6 + $0x1ad0] sm:$0xf]  ;;  %6955 = vmatpush.bf16.msrb.mxu1 %v15534_v34  ;;  %v15246_v24 = vor.u32 %v18649_v18, %v15245_v60  ;;  %6983 = vmatpush.bf16.msrb.mxu3 %v12466_v20  ;;  %v12367_v41 = vld [vmem:[#allocation6 + $0x270] sm:$0xf0] }
 0x4c2   :  { %v18713_v29 = vld [vmem:[#allocation6 + $0x1aec] sm:$0xf0]  ;;  %v20591_v18 = vadd.f32 %v6709_v38, %v6696_v55  ;;  %v17917_v8 = vld [vmem:[#allocation6 + $0x214] sm:$0xf] }
 0x4c3   :  { %v15502_v33 = vor.u32 %v18713_v29, %v15501_v12  ;;  %v15213_v15 = vld [vmem:[#allocation6 + $0x1890] sm:$0xf]  ;;  %6942 = vmatpush.bf16.msrb.mxu0 %v15246_v24  ;;  %6970 = vmatpush.bf16.msrb.mxu2 %v12178_v36  ;;  %v17861_v29 = vld [vmem:[#allocation6 + $0x54] sm:$0xf] }
 0x4c4   :  { %v18641_v30 = vld [vmem:[#allocation6 + $0x18ac] sm:$0xf0]  ;;  %v12114_v36 = vor.u32 %v17861_v29, %v12111_v32  ;;  %v12335_v13 = vld [vmem:[#allocation6 + $0x230] sm:$0xf0] }
 0x4c5   :  { %v15469_v54 = vld [vmem:[#allocation6 + $0x1a90] sm:$0xf]  ;;  %6956 = vmatpush.bf16.msrb.mxu1 %v15502_v33  ;;  %v15214_v6 = vor.u32 %v18641_v30, %v15213_v15  ;;  %6984 = vmatpush.bf16.msrb.mxu3 %v12434_v56  ;;  %v12370_v56 = vor.u32 %v17925_v35, %v12367_v41  ;;  %v18037_v46 = vld [vmem:[#allocation6 + $0x5d4] sm:$0xf] }
 0x4c6   :  { %v18705_v37 = vld [vmem:[#allocation6 + $0x1aac] sm:$0xf0]  ;;  %v12815_v49 = vld [vmem:[#allocation6 + $0x5f0] sm:$0xf0] }
 0x4c7   :  { %v15470_v1 = vor.u32 %v18705_v37, %v15469_v54  ;;  %v15181_v34 = vld [vmem:[#allocation6 + $0x1850] sm:$0xf]  ;;  %6943 = vmatpush.bf16.msrb.mxu0 %v15214_v6  ;;  %6971 = vmatpush.bf16.msrb.mxu2 %v12146_v43  ;;  %v17853_v54 = vld [vmem:[#allocation6 + $0x14] sm:$0xf] }
 0x4c8   :  { %v18633_v60 = vld [vmem:[#allocation6 + $0x186c] sm:$0xf0]  ;;  %v12079_v37 = vld [vmem:[#allocation6 + $0x30] sm:$0xf0] }
 0x4c9   :  { %v15437_v20 = vld [vmem:[#allocation6 + $0x1a50] sm:$0xf]  ;;  %6957 = vmatpush.bf16.msrb.mxu1 %v15470_v1  ;;  %v15182_v5 = vor.u32 %v18633_v60, %v15181_v34  ;;  %6985 = vmatpush.bf16.msrb.mxu3 %v12402_v58  ;;  %v18101_v14 = vld [vmem:[#allocation6 + $0x7d4] sm:$0xf]  ;;  %v12082_v43 = vor.u32 %v17853_v54, %v12079_v37  ;;  %v12338_v58 = vor.u32 %v17917_v8, %v12335_v13  ;;  %v20595_v54 = vpop.f32.mrf.mxu1 }
 0x4ca   :  { %v18697_v12 = vld [vmem:[#allocation6 + $0x1a6c] sm:$0xf0]  ;;  %v13071_v55 = vld [vmem:[#allocation6 + $0x7f0] sm:$0xf0]  ;;  %21261 = vst [vmem:[#allocation68_spill] sm:$0xff] %v20595_v54 }
 0x4cb   :  { %v15149_v42 = vld [vmem:[#allocation6 + $0x1810] sm:$0xf]  ;;  %v15438_v24 = vor.u32 %v18697_v12, %v15437_v20  ;;  %v18165_v38 = vld [vmem:[#allocation6 + $0x9d4] sm:$0xf]  ;;  %6944 = vmatpush.bf16.msrb.mxu0 %v15182_v5  ;;  %6972 = vmatpush.bf16.msrb.mxu2 %v12114_v36  ;;  %v12818_v12 = vor.u32 %v18037_v46, %v12815_v49  ;;  %v13074_v29 = vor.u32 %v18101_v14, %v13071_v55 }
 0x4cc   :  { %v18625_v33 = vld [vmem:[#allocation6 + $0x182c] sm:$0xf0]  ;;  %v13327_v34 = vld [vmem:[#allocation6 + $0x9f0] sm:$0xf0] }
 0x4cd   :  { %v15405_v15 = vld [vmem:[#allocation6 + $0x1a10] sm:$0xf]  ;;  %6958 = vmatpush.bf16.msrb.mxu1 %v15438_v24  ;;  %v15150_v6 = vor.u32 %v18625_v33, %v15149_v42  ;;  %v18229_v60 = vld [vmem:[#allocation6 + $0xbd4] sm:$0xf]  ;;  %6986 = vmatpush.bf16.msrb.mxu3 %v12370_v56  ;;  %v13330_v41 = vor.u32 %v18165_v38, %v13327_v34  ;;  %v20593_v33 = vpop.f32.mrf.mxu0 }
 0x4ce   :  { %v18689_v30 = vld [vmem:[#allocation6 + $0x1a2c] sm:$0xf0]  ;;  %v13583_v20 = vld [vmem:[#allocation6 + $0xbf0] sm:$0xf0]  ;;  %21260 = vst [vmem:[#allocation67_spill] sm:$0xff] %v20593_v33 }
 0x4cf   :  { %v15406_v1 = vor.u32 %v18689_v30, %v15405_v15  ;;  %v18029_v32 = vld [vmem:[#allocation6 + $0x594] sm:$0xf]  ;;  %v13586_v51 = vor.u32 %v18229_v60, %v13583_v20  ;;  %6945 = vmatpush.bf16.msrb.mxu0 %v15150_v6  ;;  %6973 = vmatpush.bf16.msrb.mxu2 %v12082_v43  ;;  %v13042_v30 = vor.u32 %v18093_v22, %v13039_v28  ;;  %v20601_v43 = vpop.f32.mrf.mxu2 }
 0x4d0   :  { %v12783_v35 = vld [vmem:[#allocation6 + $0x5b0] sm:$0xf0]  ;;  %21262 = vst [vmem:[#allocation69_spill] sm:$0xff] %v20601_v43 }
 0x4d1   :  { %6959 = vmatpush.bf16.msrb.mxu1 %v15406_v1  ;;  %v13295_v42 = vld [vmem:[#allocation6 + $0x9b0] sm:$0xf0]  ;;  %6987 = vmatpush.bf16.msrb.mxu3 %v12338_v58  ;;  %v12786_v15 = vor.u32 %v18029_v32, %v12783_v35  ;;  %v20603_v35 = vpop.f32.mrf.mxu3 }
 0x4d2   :  { %v18221_v5 = vld [vmem:[#allocation6 + $0xb94] sm:$0xf]  ;;  %v13298_v37 = vor.u32 %v18157_v50, %v13295_v42  ;;  %6946 = vmatmul.bf16.vlgmr.msrb.gmra.mxu0 %v20347_v23  ;;  %6974 = vmatmul.bf16.vlgmr.msrb.gmra.mxu2 %v20187_v52  ;;  %21263 = vst [vmem:[#allocation70_spill] sm:$0xff] %v20603_v35 }
 0x4d3   :  { %v13551_v24 = vld [vmem:[#allocation6 + $0xbb0] sm:$0xf0]  ;;  %6994 = vmatpush.bf16.msra.mxu0 %v12818_v12  ;;  %7022 = vmatpush.bf16.msra.mxu2 %v13330_v41 }
 0x4d4   :  { %v18021_v36 = vld [vmem:[#allocation6 + $0x554] sm:$0xf]  ;;  %v13554_v8 = vor.u32 %v18221_v5, %v13551_v24  ;;  %6960 = vmatmul.bf16.vlgmr.msrb.gmra.mxu1 %v20355_v3  ;;  %6988 = vmatmul.bf16.vlgmr.msrb.gmra.mxu3 %v20189_v59 }
 0x4d5   :  { %7008 = vmatpush.bf16.msra.mxu1 %v13074_v29  ;;  %v12751_v56 = vld [vmem:[#allocation6 + $0x570] sm:$0xf0]  ;;  %7036 = vmatpush.bf16.msra.mxu3 %v13586_v51  ;;  %v6723_v32 = vpop.f32.mrf.mxu0 }
 0x4d6   :  { %v18085_v13 = vld [vmem:[#allocation6 + $0x754] sm:$0xf]  ;;  %v12754_v28 = vor.u32 %v18021_v36, %v12751_v56  ;;  %v6724_v41 = vadd.f32 %v6723_v32, %v20591_v18 }
 0x4d7   :  { %v13007_v46 = vld [vmem:[#allocation6 + $0x770] sm:$0xf0]  ;;  %6995 = vmatpush.bf16.msra.mxu0 %v12786_v15  ;;  %7023 = vmatpush.bf16.msra.mxu2 %v13298_v37 }
 0x4d8   :  { %v18149_v49 = vld [vmem:[#allocation6 + $0x954] sm:$0xf]  ;;  %v13010_v22 = vor.u32 %v18085_v13, %v13007_v46 }
 0x4d9   :  { %v13263_v14 = vld [vmem:[#allocation6 + $0x970] sm:$0xf0]  ;;  %7009 = vmatpush.bf16.msra.mxu1 %v13042_v30  ;;  %7037 = vmatpush.bf16.msra.mxu3 %v13554_v8  ;;  %v6737_v30 = vpop.f32.mrf.mxu1  ;;  %v6765_v32 = vpop.f32.mrf.mxu3 }
 0x4da   :  { %v18213_v55 = vld [vmem:[#allocation6 + $0xb54] sm:$0xf]  ;;  %v13266_v6 = vor.u32 %v18149_v49, %v13263_v14  ;;  %v6738_v46 = vadd.f32 %v6737_v30, %v6724_v41 }
 0x4db   :  { %v13519_v38 = vld [vmem:[#allocation6 + $0xb70] sm:$0xf0]  ;;  %6996 = vmatpush.bf16.msra.mxu0 %v12754_v28 }
 0x4dc   :  { %v18013_v50 = vld [vmem:[#allocation6 + $0x514] sm:$0xf]  ;;  %v13522_v1 = vor.u32 %v18213_v55, %v13519_v38  ;;  %7024 = vmatpush.bf16.msra.mxu2 %v13266_v6 }
 0x4dd   :  { %v12719_v51 = vld [vmem:[#allocation6 + $0x530] sm:$0xf0]  ;;  %7010 = vmatpush.bf16.msra.mxu1 %v13010_v22 }
 0x4de   :  { %v18077_v34 = vld [vmem:[#allocation6 + $0x714] sm:$0xf]  ;;  %v12722_v42 = vor.u32 %v18013_v50, %v12719_v51  ;;  %7038 = vmatpush.bf16.msra.mxu3 %v13522_v1 }
 0x4df   :  { %v12975_v60 = vld [vmem:[#allocation6 + $0x730] sm:$0xf0] }
 0x4e0   :  { %v18141_v20 = vld [vmem:[#allocation6 + $0x914] sm:$0xf]  ;;  %v12978_v5 = vor.u32 %v18077_v34, %v12975_v60  ;;  %6997 = vmatpush.bf16.msra.mxu0 %v12722_v42  ;;  %v6751_v60 = vpop.f32.mrf.mxu2 }
 0x4e1   :  { %v13231_v58 = vld [vmem:[#allocation6 + $0x930] sm:$0xf0] }
 0x4e2   :  { %v18205_v12 = vld [vmem:[#allocation6 + $0xb14] sm:$0xf]  ;;  %v13234_v36 = vor.u32 %v18141_v20, %v13231_v58  ;;  %7011 = vmatpush.bf16.msra.mxu1 %v12978_v5 }
 0x4e3   :  { %v13487_v29 = vld [vmem:[#allocation6 + $0xb30] sm:$0xf0] }
 0x4e4   :  { %v18005_v24 = vld [vmem:[#allocation6 + $0x4d4] sm:$0xf]  ;;  %v13490_v56 = vor.u32 %v18205_v12, %v13487_v29  ;;  %7025 = vmatpush.bf16.msra.mxu2 %v13234_v36  ;;  %v6752_v29 = vadd.f32 %v6751_v60, %v6738_v46 }
 0x4e5   :  { %v12687_v15 = vld [vmem:[#allocation6 + $0x4f0] sm:$0xf0] }
 0x4e6   :  { %v18069_v37 = vld [vmem:[#allocation6 + $0x6d4] sm:$0xf]  ;;  %v12690_v38 = vor.u32 %v18005_v24, %v12687_v15  ;;  %7039 = vmatpush.bf16.msra.mxu3 %v13490_v56  ;;  %v20606_v15 = vadd.f32 %v6765_v32, %v6752_v29 }
 0x4e7   :  { %v12943_v8 = vld [vmem:[#allocation6 + $0x6f0] sm:$0xf0] }
 0x4e8   :  { %v18133_v13 = vld [vmem:[#allocation6 + $0x8d4] sm:$0xf]  ;;  %v12946_v18 = vor.u32 %v18069_v37, %v12943_v8  ;;  %6998 = vmatpush.bf16.msra.mxu0 %v12690_v38  ;;  %21264 = vst [vmem:[#allocation71_spill] sm:$0xff] %v20606_v15 }
 0x4e9   :  { %v13199_v49 = vld [vmem:[#allocation6 + $0x8f0] sm:$0xf0] }
 0x4ea   :  { %v18197_v14 = vld [vmem:[#allocation6 + $0xad4] sm:$0xf]  ;;  %v13202_v50 = vor.u32 %v18133_v13, %v13199_v49  ;;  %7012 = vmatpush.bf16.msra.mxu1 %v12946_v18 }
 0x4eb   :  { %v13455_v55 = vld [vmem:[#allocation6 + $0xaf0] sm:$0xf0] }
 0x4ec   :  { %v17997_v28 = vld [vmem:[#allocation6 + $0x494] sm:$0xf]  ;;  %v13458_v51 = vor.u32 %v18197_v14, %v13455_v55  ;;  %7026 = vmatpush.bf16.msra.mxu2 %v13202_v50 }
 0x4ed   :  { %v12655_v22 = vld [vmem:[#allocation6 + $0x4b0] sm:$0xf0] }
 0x4ee   :  { %v18061_v6 = vld [vmem:[#allocation6 + $0x694] sm:$0xf]  ;;  %v12658_v41 = vor.u32 %v17997_v28, %v12655_v22  ;;  %7040 = vmatpush.bf16.msra.mxu3 %v13458_v51 }
 0x4ef   :  { %v12911_v1 = vld [vmem:[#allocation6 + $0x6b0] sm:$0xf0] }
 0x4f0   :  { %v18125_v34 = vld [vmem:[#allocation6 + $0x894] sm:$0xf]  ;;  %v12914_v42 = vor.u32 %v18061_v6, %v12911_v1  ;;  %6999 = vmatpush.bf16.msra.mxu0 %v12658_v41 }
 0x4f1   :  { %v13167_v20 = vld [vmem:[#allocation6 + $0x8b0] sm:$0xf0] }
 0x4f2   :  { %v18189_v58 = vld [vmem:[#allocation6 + $0xa94] sm:$0xf]  ;;  %v13170_v30 = vor.u32 %v18125_v34, %v13167_v20  ;;  %7013 = vmatpush.bf16.msra.mxu1 %v12914_v42 }
 0x4f3   :  { %v13423_v12 = vld [vmem:[#allocation6 + $0xab0] sm:$0xf0] }
 0x4f4   :  { %v17989_v5 = vld [vmem:[#allocation6 + $0x454] sm:$0xf]  ;;  %v13426_v36 = vor.u32 %v18189_v58, %v13423_v12  ;;  %7027 = vmatpush.bf16.msra.mxu2 %v13170_v30 }
 0x4f5   :  { %v12623_v24 = vld [vmem:[#allocation6 + $0x470] sm:$0xf0] }
 0x4f6   :  { %v18053_v56 = vld [vmem:[#allocation6 + $0x654] sm:$0xf]  ;;  %v12626_v55 = vor.u32 %v17989_v5, %v12623_v24  ;;  %7041 = vmatpush.bf16.msra.mxu3 %v13426_v36 }
 0x4f7   :  { %v12879_v37 = vld [vmem:[#allocation6 + $0x670] sm:$0xf0] }
 0x4f8   :  { %v18117_v8 = vld [vmem:[#allocation6 + $0x854] sm:$0xf]  ;;  %v12882_v38 = vor.u32 %v18053_v56, %v12879_v37  ;;  %7000 = vmatpush.bf16.msra.mxu0 %v12626_v55 }
 0x4f9   :  { %v13135_v13 = vld [vmem:[#allocation6 + $0x870] sm:$0xf0] }
 0x4fa   :  { %v18181_v49 = vld [vmem:[#allocation6 + $0xa54] sm:$0xf]  ;;  %v13138_v50 = vor.u32 %v18117_v8, %v13135_v13  ;;  %7014 = vmatpush.bf16.msra.mxu1 %v12882_v38 }
 0x4fb   :  { %v13391_v14 = vld [vmem:[#allocation6 + $0xa70] sm:$0xf0] }
 0x4fc   :  { %v17981_v46 = vld [vmem:[#allocation6 + $0x414] sm:$0xf]  ;;  %v13394_v51 = vor.u32 %v18181_v49, %v13391_v14  ;;  %7028 = vmatpush.bf16.msra.mxu2 %v13138_v50 }
 0x4fd   :  { %v12591_v18 = vld [vmem:[#allocation6 + $0x430] sm:$0xf0] }
 0x4fe   :  { %v18045_v28 = vld [vmem:[#allocation6 + $0x614] sm:$0xf]  ;;  %v12594_v41 = vor.u32 %v17981_v46, %v12591_v18  ;;  %7042 = vmatpush.bf16.msra.mxu3 %v13394_v51  ;;  %v20608_v18 = vpop.f32.mrf.mxu0 }
 0x4ff   :  { %v12847_v22 = vld [vmem:[#allocation6 + $0x630] sm:$0xf0]  ;;  %21265 = vst [vmem:[#allocation72_spill] sm:$0xff] %v20608_v18 }
 0x500   :  { %v18109_v6 = vld [vmem:[#allocation6 + $0x814] sm:$0xf]  ;;  %v12850_v42 = vor.u32 %v18045_v28, %v12847_v22  ;;  %7001 = vmatpush.bf16.msra.mxu0 %v12594_v41 }
 0x501   :  { %v13103_v1 = vld [vmem:[#allocation6 + $0x830] sm:$0xf0] }
 0x502   :  { %v18173_v34 = vld [vmem:[#allocation6 + $0xa14] sm:$0xf]  ;;  %v13106_v30 = vor.u32 %v18109_v6, %v13103_v1  ;;  %7015 = vmatpush.bf16.msra.mxu1 %v12850_v42  ;;  %v20610_v6 = vpop.f32.mrf.mxu1 }
 0x503   :  { %v13359_v60 = vld [vmem:[#allocation6 + $0xa30] sm:$0xf0]  ;;  %21266 = vst [vmem:[#allocation73_spill] sm:$0xff] %v20610_v6  ;;  %7002 = vmatmul.bf16.vlgmr.msra.gmra.mxu0 %v20191_v62 }
 0x504   :  { %v18293_v20 = vld [vmem:[#allocation6 + $0xdd4] sm:$0xf]  ;;  %v13362_v36 = vor.u32 %v18173_v34, %v13359_v60  ;;  %7029 = vmatpush.bf16.msra.mxu2 %v13106_v30 }
 0x505   :  { %v13839_v58 = vld [vmem:[#allocation6 + $0xdf0] sm:$0xf0]  ;;  %7016 = vmatmul.bf16.vlgmr.msra.gmra.mxu1 %v20193_v48 }
 0x506   :  { %v18357_v12 = vld [vmem:[#allocation6 + $0xfd4] sm:$0xf]  ;;  %v13842_v37 = vor.u32 %v18293_v20, %v13839_v58  ;;  %7043 = vmatpush.bf16.msra.mxu3 %v13362_v36 }
 0x507   :  { %v14095_v29 = vld [vmem:[#allocation6 + $0xff0] sm:$0xf0]  ;;  %7030 = vmatmul.bf16.vlgmr.msra.gmra.mxu2 %v20284_v9 }
 0x508   :  { %v18421_v32 = vld [vmem:[#allocation6 + $0x11d4] sm:$0xf]  ;;  %v14098_v8 = vor.u32 %v18357_v12, %v14095_v29  ;;  %7050 = vmatpush.bf16.msrb.mxu0 %v13842_v37  ;;  %v20619_v37 = vpop.f32.mrf.mxu2 }
 0x509   :  { %v14351_v5 = vld [vmem:[#allocation6 + $0x11f0] sm:$0xf0]  ;;  %7044 = vmatmul.bf16.vlgmr.msra.gmra.mxu3 %v20286_v63  ;;  %21267 = vst [vmem:[#allocation74_spill] sm:$0xff] %v20619_v37 }
 0x50a   :  { %v18485_v24 = vld [vmem:[#allocation6 + $0x13d4] sm:$0xf]  ;;  %v14354_v14 = vor.u32 %v18421_v32, %v14351_v5  ;;  %7064 = vmatpush.bf16.msrb.mxu1 %v14098_v8 }
 0x50b   :  { %v14607_v56 = vld [vmem:[#allocation6 + $0x13f0] sm:$0xf0] }
 0x50c   :  { %v18285_v13 = vld [vmem:[#allocation6 + $0xd94] sm:$0xf]  ;;  %v14610_v15 = vor.u32 %v18485_v24, %v14607_v56  ;;  %7078 = vmatpush.bf16.msrb.mxu2 %v14354_v14  ;;  %v6779_v14 = vpop.f32.mrf.mxu0 }
 0x50d   :  { %v13807_v49 = vld [vmem:[#allocation6 + $0xdb0] sm:$0xf0] }
 0x50e   :  { %v18349_v35 = vld [vmem:[#allocation6 + $0xf94] sm:$0xf]  ;;  %v13810_v28 = vor.u32 %v18285_v13, %v13807_v49  ;;  %7092 = vmatpush.bf16.msrb.mxu3 %v14610_v15 }
 0x50f   :  { %v14063_v43 = vld [vmem:[#allocation6 + $0xfb0] sm:$0xf0] }
 0x510   :  { %v18413_v54 = vld [vmem:[#allocation6 + $0x1194] sm:$0xf]  ;;  %v14066_v22 = vor.u32 %v18349_v35, %v14063_v43  ;;  %7051 = vmatpush.bf16.msrb.mxu0 %v13810_v28 }
 0x511   :  { %v14319_v46 = vld [vmem:[#allocation6 + $0x11b0] sm:$0xf0] }
 0x512   :  { %v18477_v55 = vld [vmem:[#allocation6 + $0x1394] sm:$0xf]  ;;  %v14322_v1 = vor.u32 %v18413_v54, %v14319_v46  ;;  %7065 = vmatpush.bf16.msrb.mxu1 %v14066_v22  ;;  %v20616_v54 = vld [vmem:[#allocation7] sm:$0xff]  ;;  %v20621_v46 = vpop.f32.mrf.mxu3 }
 0x513   :  { %v14575_v38 = vld [vmem:[#allocation6 + $0x13b0] sm:$0xf0]  ;;  %v21209_v15 = vperm.slane %v20616_v54, 4  ;;  %21268 = vst [vmem:[#allocation75_spill] sm:$0xff] %v20621_v46 }
 0x514   :  { %v18277_v50 = vld [vmem:[#allocation6 + $0xd54] sm:$0xf]  ;;  %v14578_v34 = vor.u32 %v18477_v55, %v14575_v38  ;;  %7079 = vmatpush.bf16.msrb.mxu2 %v14322_v1 }
 0x515   :  { %v13775_v51 = vld [vmem:[#allocation6 + $0xd70] sm:$0xf0]  ;;  %v6780_v55 = vadd.f32 %v6779_v14, %v21209_v15 }
 0x516   :  { %v18341_v60 = vld [vmem:[#allocation6 + $0xf54] sm:$0xf]  ;;  %v13778_v43 = vor.u32 %v18277_v50, %v13775_v51  ;;  %7093 = vmatpush.bf16.msrb.mxu3 %v14578_v34  ;;  %v6793_v51 = vpop.f32.mrf.mxu1 }
 0x517   :  { %v14031_v20 = vld [vmem:[#allocation6 + $0xf70] sm:$0xf0] }
 0x518   :  { %v18405_v58 = vld [vmem:[#allocation6 + $0x1154] sm:$0xf]  ;;  %v14034_v35 = vor.u32 %v18341_v60, %v14031_v20  ;;  %7052 = vmatpush.bf16.msrb.mxu0 %v13778_v43 }
 0x519   :  { %v14287_v12 = vld [vmem:[#allocation6 + $0x1170] sm:$0xf0] }
 0x51a   :  { %v18469_v29 = vld [vmem:[#allocation6 + $0x1354] sm:$0xf]  ;;  %v14290_v5 = vor.u32 %v18405_v58, %v14287_v12  ;;  %7066 = vmatpush.bf16.msrb.mxu1 %v14034_v35  ;;  %v6794_v12 = vadd.f32 %v6793_v51, %v6780_v55 }
 0x51b   :  { %v14543_v32 = vld [vmem:[#allocation6 + $0x1370] sm:$0xf0] }
 0x51c   :  { %v18269_v41 = vld [vmem:[#allocation6 + $0xd14] sm:$0xf]  ;;  %v14546_v24 = vor.u32 %v18469_v29, %v14543_v32  ;;  %7080 = vmatpush.bf16.msrb.mxu2 %v14290_v5 }
 0x51d   :  { %v13743_v42 = vld [vmem:[#allocation6 + $0xd30] sm:$0xf0] }
 0x51e   :  { %v18333_v56 = vld [vmem:[#allocation6 + $0xf14] sm:$0xf]  ;;  %v13746_v38 = vor.u32 %v18269_v41, %v13743_v42  ;;  %7094 = vmatpush.bf16.msrb.mxu3 %v14546_v24 }
 0x51f   :  { %v13999_v30 = vld [vmem:[#allocation6 + $0xf30] sm:$0xf0] }
 0x520   :  { %v18397_v36 = vld [vmem:[#allocation6 + $0x1114] sm:$0xf]  ;;  %v14002_v28 = vor.u32 %v18333_v56, %v13999_v30  ;;  %7053 = vmatpush.bf16.msrb.mxu0 %v13746_v38  ;;  %v6821_v38 = vpop.f32.mrf.mxu3 }
 0x521   :  { %v14255_v8 = vld [vmem:[#allocation6 + $0x1130] sm:$0xf0] }
 0x522   :  { %v18461_v13 = vld [vmem:[#allocation6 + $0x1314] sm:$0xf]  ;;  %v14258_v1 = vor.u32 %v18397_v36, %v14255_v8  ;;  %7067 = vmatpush.bf16.msrb.mxu1 %v14002_v28  ;;  %v6807_v8 = vpop.f32.mrf.mxu2 }
 0x523   :  { %v14511_v49 = vld [vmem:[#allocation6 + $0x1330] sm:$0xf0]  ;;  %v6808_v51 = vadd.f32 %v6807_v8, %v6794_v12 }
 0x524   :  { %v18261_v22 = vld [vmem:[#allocation6 + $0xcd4] sm:$0xf]  ;;  %v14514_v34 = vor.u32 %v18461_v13, %v14511_v49  ;;  %7081 = vmatpush.bf16.msrb.mxu2 %v14258_v1 }
 0x525   :  { %v13711_v50 = vld [vmem:[#allocation6 + $0xcf0] sm:$0xf0]  ;;  %v20625_v1 = vadd.f32 %v6821_v38, %v6808_v51 }
 0x526   :  { %v18325_v60 = vld [vmem:[#allocation6 + $0xed4] sm:$0xf]  ;;  %v13714_v35 = vor.u32 %v18261_v22, %v13711_v50  ;;  %7095 = vmatpush.bf16.msrb.mxu3 %v14514_v34 }
 0x527   :  { %v13967_v20 = vld [vmem:[#allocation6 + $0xef0] sm:$0xf0] }
 0x528   :  { %v18389_v58 = vld [vmem:[#allocation6 + $0x10d4] sm:$0xf]  ;;  %v13970_v14 = vor.u32 %v18325_v60, %v13967_v20  ;;  %7054 = vmatpush.bf16.msrb.mxu0 %v13714_v35 }
 0x529   :  { %v14223_v29 = vld [vmem:[#allocation6 + $0x10f0] sm:$0xf0] }
 0x52a   :  { %v18453_v32 = vld [vmem:[#allocation6 + $0x12d4] sm:$0xf]  ;;  %v14226_v5 = vor.u32 %v18389_v58, %v14223_v29  ;;  %7068 = vmatpush.bf16.msrb.mxu1 %v13970_v14 }
 0x52b   :  { %v14479_v43 = vld [vmem:[#allocation6 + $0x12f0] sm:$0xf0] }
 0x52c   :  { %v18253_v41 = vld [vmem:[#allocation6 + $0xc94] sm:$0xf]  ;;  %v14482_v24 = vor.u32 %v18453_v32, %v14479_v43  ;;  %7082 = vmatpush.bf16.msrb.mxu2 %v14226_v5 }
 0x52d   :  { %v13679_v42 = vld [vmem:[#allocation6 + $0xcb0] sm:$0xf0] }
 0x52e   :  { %v18317_v56 = vld [vmem:[#allocation6 + $0xe94] sm:$0xf]  ;;  %v13682_v28 = vor.u32 %v18253_v41, %v13679_v42  ;;  %7096 = vmatpush.bf16.msrb.mxu3 %v14482_v24 }
 0x52f   :  { %v13935_v30 = vld [vmem:[#allocation6 + $0xeb0] sm:$0xf0] }
 0x530   :  { %v18381_v36 = vld [vmem:[#allocation6 + $0x1094] sm:$0xf]  ;;  %v13938_v22 = vor.u32 %v18317_v56, %v13935_v30  ;;  %7055 = vmatpush.bf16.msrb.mxu0 %v13682_v28 }
 0x531   :  { %v14191_v13 = vld [vmem:[#allocation6 + $0x10b0] sm:$0xf0] }
 0x532   :  { %v18445_v49 = vld [vmem:[#allocation6 + $0x1294] sm:$0xf]  ;;  %v14194_v34 = vor.u32 %v18381_v36, %v14191_v13  ;;  %7069 = vmatpush.bf16.msrb.mxu1 %v13938_v22 }
 0x533   :  { %v14447_v55 = vld [vmem:[#allocation6 + $0x12b0] sm:$0xf0] }
 0x534   :  { %v18245_v50 = vld [vmem:[#allocation6 + $0xc54] sm:$0xf]  ;;  %v14450_v20 = vor.u32 %v18445_v49, %v14447_v55  ;;  %7083 = vmatpush.bf16.msrb.mxu2 %v14194_v34 }
 0x535   :  { %v13647_v60 = vld [vmem:[#allocation6 + $0xc70] sm:$0xf0] }
 0x536   :  { %v18309_v58 = vld [vmem:[#allocation6 + $0xe54] sm:$0xf]  ;;  %v13650_v35 = vor.u32 %v18245_v50, %v13647_v60  ;;  %7097 = vmatpush.bf16.msrb.mxu3 %v14450_v20 }
 0x537   :  { %v13903_v29 = vld [vmem:[#allocation6 + $0xe70] sm:$0xf0] }
 0x538   :  { %v18373_v32 = vld [vmem:[#allocation6 + $0x1054] sm:$0xf]  ;;  %v13906_v14 = vor.u32 %v18309_v58, %v13903_v29  ;;  %7056 = vmatpush.bf16.msrb.mxu0 %v13650_v35 }
 0x539   :  { %v14159_v43 = vld [vmem:[#allocation6 + $0x1070] sm:$0xf0] }
 0x53a   :  { %v18437_v15 = vld [vmem:[#allocation6 + $0x1254] sm:$0xf]  ;;  %v14162_v5 = vor.u32 %v18373_v32, %v14159_v43  ;;  %7070 = vmatpush.bf16.msrb.mxu1 %v13906_v14 }
 0x53b   :  { %v14415_v46 = vld [vmem:[#allocation6 + $0x1270] sm:$0xf0] }
 0x53c   :  { %v18237_v12 = vld [vmem:[#allocation6 + $0xc14] sm:$0xf]  ;;  %v14418_v24 = vor.u32 %v18437_v15, %v14415_v46  ;;  %7084 = vmatpush.bf16.msrb.mxu2 %v14162_v5 }
 0x53d   :  { %v13615_v41 = vld [vmem:[#allocation6 + $0xc30] sm:$0xf0] }
 0x53e   :  { %v18301_v42 = vld [vmem:[#allocation6 + $0xe14] sm:$0xf]  ;;  %v13618_v28 = vor.u32 %v18237_v12, %v13615_v41  ;;  %7098 = vmatpush.bf16.msrb.mxu3 %v14418_v24  ;;  %v20627_v41 = vpop.f32.mrf.mxu0 }
 0x53f   :  { %v13871_v56 = vld [vmem:[#allocation6 + $0xe30] sm:$0xf0]  ;;  %21269 = vst [vmem:[#allocation76_spill] sm:$0xff] %v20627_v41  ;;  %v12789_v41 = vld [vmem:[#allocation6 + $0x598] sm:$0xf] }
 0x540   :  { %v18365_v30 = vld [vmem:[#allocation6 + $0x1014] sm:$0xf]  ;;  %v13874_v22 = vor.u32 %v18301_v42, %v13871_v56  ;;  %7057 = vmatpush.bf16.msrb.mxu0 %v13618_v28 }
 0x541   :  { %v14127_v36 = vld [vmem:[#allocation6 + $0x1030] sm:$0xf0] }
 0x542   :  { %v18429_v8 = vld [vmem:[#allocation6 + $0x1214] sm:$0xf]  ;;  %v14130_v34 = vor.u32 %v18365_v30, %v14127_v36  ;;  %7071 = vmatpush.bf16.msrb.mxu1 %v13874_v22 }
 0x543   :  { %v14383_v13 = vld [vmem:[#allocation6 + $0x1230] sm:$0xf0]  ;;  %7058 = vmatmul.bf16.vlgmr.msrb.gmra.mxu0 %v20293_v19 }
 0x544   :  { %v18549_v49 = vld [vmem:[#allocation6 + $0x15d4] sm:$0xf]  ;;  %v14386_v15 = vor.u32 %v18429_v8, %v14383_v13  ;;  %7085 = vmatpush.bf16.msrb.mxu2 %v14130_v34  ;;  %v20635_v34 = vpop.f32.mrf.mxu2 }
 0x545   :  { %v14863_v55 = vld [vmem:[#allocation6 + $0x15f0] sm:$0xf0]  ;;  %7072 = vmatmul.bf16.vlgmr.msrb.gmra.mxu1 %v20295_v61  ;;  %21271 = vst [vmem:[#allocation78_spill] sm:$0xff] %v20635_v34  ;;  %v12533_v34 = vld [vmem:[#allocation6 + $0x398] sm:$0xf] }
 0x546   :  { %v18613_v51 = vld [vmem:[#allocation6 + $0x17d4] sm:$0xf]  ;;  %v14866_v46 = vor.u32 %v18549_v49, %v14863_v55  ;;  %7099 = vmatpush.bf16.msrb.mxu3 %v14386_v15 }
 0x547   :  { %v15119_v38 = vld [vmem:[#allocation6 + $0x17f0] sm:$0xf0]  ;;  %7086 = vmatmul.bf16.vlgmr.msrb.gmra.mxu2 %v20378_v4 }
 0x548   :  { %v18677_v37 = vld [vmem:[#allocation6 + $0x19d4] sm:$0xf]  ;;  %v15122_v20 = vor.u32 %v18613_v51, %v15119_v38  ;;  %7106 = vmatpush.bf16.msra.mxu0 %v14866_v46 }
 0x549   :  { %v15375_v50 = vld [vmem:[#allocation6 + $0x19f0] sm:$0xf0]  ;;  %7100 = vmatmul.bf16.vlgmr.msrb.gmra.mxu3 %v20380_v16 }
 0x54a   :  { %v18741_v60 = vld [vmem:[#allocation6 + $0x1bd4] sm:$0xf]  ;;  %v15378_v43 = vor.u32 %v18677_v37, %v15375_v50  ;;  %7120 = vmatpush.bf16.msra.mxu1 %v15122_v20  ;;  %v20629_v37 = vpop.f32.mrf.mxu1 }
 0x54b   :  { %v15631_v58 = vld [vmem:[#allocation6 + $0x1bf0] sm:$0xf0]  ;;  %21270 = vst [vmem:[#allocation77_spill] sm:$0xff] %v20629_v37  ;;  %v17970_v37 = vld [vmem:[#allocation6 + $0x3b4] sm:$0xf0] }
 0x54c   :  { %v18541_v29 = vld [vmem:[#allocation6 + $0x1594] sm:$0xf]  ;;  %v15634_v6 = vor.u32 %v18741_v60, %v15631_v58  ;;  %7134 = vmatpush.bf16.msra.mxu2 %v15378_v43 }
 0x54d   :  { %v14831_v32 = vld [vmem:[#allocation6 + $0x15b0] sm:$0xf0] }
 0x54e   :  { %v18605_v18 = vld [vmem:[#allocation6 + $0x1794] sm:$0xf]  ;;  %v14834_v42 = vor.u32 %v18541_v29, %v14831_v32  ;;  %7148 = vmatpush.bf16.msra.mxu3 %v15634_v6  ;;  %v6835_v29 = vpop.f32.mrf.mxu0  ;;  %v20637_v32 = vpop.f32.mrf.mxu3 }
 0x54f   :  { %v15087_v33 = vld [vmem:[#allocation6 + $0x17b0] sm:$0xf0]  ;;  %21272 = vst [vmem:[#allocation79_spill] sm:$0xff] %v20637_v32  ;;  %v6836_v43 = vadd.f32 %v6835_v29, %v20625_v1 }
 0x550   :  { %v15343_v12 = vld [vmem:[#allocation6 + $0x19b0] sm:$0xf0]  ;;  %v15090_v56 = vor.u32 %v18605_v18, %v15087_v33  ;;  %7107 = vmatpush.bf16.msra.mxu0 %v14834_v42 }
 0x551   :  { %v18733_v35 = vld [vmem:[#allocation6 + $0x1b94] sm:$0xf]  ;;  %v15346_v30 = vor.u32 %v18669_v57, %v15343_v12 }
 0x552   :  { %v15599_v14 = vld [vmem:[#allocation6 + $0x1bb0] sm:$0xf0]  ;;  %7121 = vmatpush.bf16.msra.mxu1 %v15090_v56  ;;  %v6849_v56 = vpop.f32.mrf.mxu1 }
 0x553   :  { %v18533_v5 = vld [vmem:[#allocation6 + $0x1554] sm:$0xf]  ;;  %v15602_v36 = vor.u32 %v18733_v35, %v15599_v14  ;;  %7135 = vmatpush.bf16.msra.mxu2 %v15346_v30 }
 0x554   :  { %v14799_v24 = vld [vmem:[#allocation6 + $0x1570] sm:$0xf0] }
 0x555   :  { %v18597_v8 = vld [vmem:[#allocation6 + $0x1754] sm:$0xf]  ;;  %v14802_v33 = vor.u32 %v18533_v5, %v14799_v24  ;;  %7149 = vmatpush.bf16.msra.mxu3 %v15602_v36 }
 0x556   :  { %v15055_v13 = vld [vmem:[#allocation6 + $0x1770] sm:$0xf0]  ;;  %v6877_v29 = vpop.f32.mrf.mxu3 }
 0x557   :  { %v18661_v49 = vld [vmem:[#allocation6 + $0x1954] sm:$0xf]  ;;  %v15058_v18 = vor.u32 %v18597_v8, %v15055_v13  ;;  %7108 = vmatpush.bf16.msra.mxu0 %v14802_v33  ;;  %v6850_v13 = vadd.f32 %v6849_v56, %v6836_v43 }
 0x558   :  { %v15311_v55 = vld [vmem:[#allocation6 + $0x1970] sm:$0xf0] }
 0x559   :  { %v18725_v51 = vld [vmem:[#allocation6 + $0x1b54] sm:$0xf]  ;;  %v15314_v28 = vor.u32 %v18661_v49, %v15311_v55  ;;  %7122 = vmatpush.bf16.msra.mxu1 %v15058_v18 }
 0x55a   :  { %v15567_v38 = vld [vmem:[#allocation6 + $0x1b70] sm:$0xf0] }
 0x55b   :  { %v18525_v57 = vld [vmem:[#allocation6 + $0x1514] sm:$0xf]  ;;  %v15570_v22 = vor.u32 %v18725_v51, %v15567_v38  ;;  %7136 = vmatpush.bf16.msra.mxu2 %v15314_v28 }
 0x55c   :  { %v14767_v6 = vld [vmem:[#allocation6 + $0x1530] sm:$0xf0] }
 0x55d   :  { %v18589_v50 = vld [vmem:[#allocation6 + $0x1714] sm:$0xf]  ;;  %v14770_v12 = vor.u32 %v18525_v57, %v14767_v6  ;;  %7150 = vmatpush.bf16.msra.mxu3 %v15570_v22 }
 0x55e   :  { %v15023_v60 = vld [vmem:[#allocation6 + $0x1730] sm:$0xf0] }
 0x55f   :  { %v18653_v58 = vld [vmem:[#allocation6 + $0x1914] sm:$0xf]  ;;  %v15026_v35 = vor.u32 %v18589_v50, %v15023_v60  ;;  %7109 = vmatpush.bf16.msra.mxu0 %v14770_v12  ;;  %v6863_v60 = vpop.f32.mrf.mxu2 }
 0x560   :  { %v15279_v15 = vld [vmem:[#allocation6 + $0x1930] sm:$0xf0] }
 0x561   :  { %v18717_v46 = vld [vmem:[#allocation6 + $0x1b14] sm:$0xf]  ;;  %v15282_v5 = vor.u32 %v18653_v58, %v15279_v15  ;;  %7123 = vmatpush.bf16.msra.mxu1 %v15026_v35 }
 0x562   :  { %v15535_v20 = vld [vmem:[#allocation6 + $0x1b30] sm:$0xf0] }
 0x563   :  { %v18517_v14 = vld [vmem:[#allocation6 + $0x14d4] sm:$0xf]  ;;  %v15538_v24 = vor.u32 %v18717_v46, %v15535_v20  ;;  %7137 = vmatpush.bf16.msra.mxu2 %v15282_v5  ;;  %v6864_v20 = vadd.f32 %v6863_v60, %v6850_v13 }
 0x564   :  { %v14735_v42 = vld [vmem:[#allocation6 + $0x14f0] sm:$0xf0] }
 0x565   :  { %v18581_v30 = vld [vmem:[#allocation6 + $0x16d4] sm:$0xf]  ;;  %v14738_v38 = vor.u32 %v18517_v14, %v14735_v42  ;;  %7151 = vmatpush.bf16.msra.mxu3 %v15538_v24  ;;  %v20640_v42 = vadd.f32 %v6877_v29, %v6864_v20  ;;  %v17978_v20 = vld [vmem:[#allocation6 + $0x3f4] sm:$0xf0] }
 0x566   :  { %v14991_v36 = vld [vmem:[#allocation6 + $0x16f0] sm:$0xf0]  ;;  %v12821_v29 = vld [vmem:[#allocation6 + $0x5d8] sm:$0xf] }
 0x567   :  { %v18645_v8 = vld [vmem:[#allocation6 + $0x18d4] sm:$0xf]  ;;  %v14994_v1 = vor.u32 %v18581_v30, %v14991_v36  ;;  %7110 = vmatpush.bf16.msra.mxu0 %v14738_v38 }
 0x568   :  { %v15247_v49 = vld [vmem:[#allocation6 + $0x18f0] sm:$0xf0] }
 0x569   :  { %v18709_v55 = vld [vmem:[#allocation6 + $0x1ad4] sm:$0xf]  ;;  %v15250_v57 = vor.u32 %v18645_v8, %v15247_v49  ;;  %7124 = vmatpush.bf16.msra.mxu1 %v14994_v1 }
 0x56a   :  { %v15503_v51 = vld [vmem:[#allocation6 + $0x1af0] sm:$0xf0] }
 0x56b   :  { %v18509_v33 = vld [vmem:[#allocation6 + $0x1494] sm:$0xf]  ;;  %v15506_v6 = vor.u32 %v18709_v55, %v15503_v51  ;;  %7138 = vmatpush.bf16.msra.mxu2 %v15250_v57 }
 0x56c   :  { %v14703_v18 = vld [vmem:[#allocation6 + $0x14b0] sm:$0xf0] }
 0x56d   :  { %v18573_v28 = vld [vmem:[#allocation6 + $0x1694] sm:$0xf]  ;;  %v14706_v43 = vor.u32 %v18509_v33, %v14703_v18  ;;  %7152 = vmatpush.bf16.msra.mxu3 %v15506_v6 }
 0x56e   :  { %v14959_v22 = vld [vmem:[#allocation6 + $0x16b0] sm:$0xf0] }
 0x56f   :  { %v18637_v50 = vld [vmem:[#allocation6 + $0x1894] sm:$0xf]  ;;  %v14962_v12 = vor.u32 %v18573_v28, %v14959_v22  ;;  %7111 = vmatpush.bf16.msra.mxu0 %v14706_v43 }
 0x570   :  { %v15215_v58 = vld [vmem:[#allocation6 + $0x18b0] sm:$0xf0] }
 0x571   :  { %v18701_v15 = vld [vmem:[#allocation6 + $0x1a94] sm:$0xf]  ;;  %v15218_v56 = vor.u32 %v18637_v50, %v15215_v58  ;;  %7125 = vmatpush.bf16.msra.mxu1 %v14962_v12  ;;  %v12309_v58 = vld [vmem:[#allocation6 + $0x1d8] sm:$0xf] }
 0x572   :  { %v15471_v46 = vld [vmem:[#allocation6 + $0x1ab0] sm:$0xf0] }
 0x573   :  { %v18501_v35 = vld [vmem:[#allocation6 + $0x1454] sm:$0xf]  ;;  %v15474_v5 = vor.u32 %v18701_v15, %v15471_v46  ;;  %7139 = vmatpush.bf16.msra.mxu2 %v15218_v56  ;;  %v17914_v15 = vld [vmem:[#allocation6 + $0x1f4] sm:$0xf0] }
 0x574   :  { %v14671_v14 = vld [vmem:[#allocation6 + $0x1470] sm:$0xf0]  ;;  %v12565_v46 = vld [vmem:[#allocation6 + $0x3d8] sm:$0xf] }
 0x575   :  { %v18565_v24 = vld [vmem:[#allocation6 + $0x1654] sm:$0xf]  ;;  %v14674_v51 = vor.u32 %v18501_v35, %v14671_v14  ;;  %7153 = vmatpush.bf16.msra.mxu3 %v15474_v5  ;;  %v18042_v35 = vld [vmem:[#allocation6 + $0x5f4] sm:$0xf0] }
 0x576   :  { %v14927_v30 = vld [vmem:[#allocation6 + $0x1670] sm:$0xf0]  ;;  %v13077_v14 = vld [vmem:[#allocation6 + $0x7d8] sm:$0xf] }
 0x577   :  { %v18629_v36 = vld [vmem:[#allocation6 + $0x1854] sm:$0xf]  ;;  %v14930_v38 = vor.u32 %v18565_v24, %v14927_v30  ;;  %7112 = vmatpush.bf16.msra.mxu0 %v14674_v51  ;;  %v18106_v24 = vld [vmem:[#allocation6 + $0x7f4] sm:$0xf0]  ;;  %v12310_v30 = vor.u32 %v17914_v15, %v12309_v58 }
 0x578   :  { %v15183_v8 = vld [vmem:[#allocation6 + $0x1870] sm:$0xf0]  ;;  %v13078_v32 = vor.u32 %v18106_v24, %v13077_v14  ;;  %v13045_v51 = vld [vmem:[#allocation6 + $0x798] sm:$0xf] }
 0x579   :  { %v18693_v49 = vld [vmem:[#allocation6 + $0x1a54] sm:$0xf]  ;;  %v15186_v57 = vor.u32 %v18629_v36, %v15183_v8  ;;  %7126 = vmatpush.bf16.msra.mxu1 %v14930_v38  ;;  %v12566_v36 = vor.u32 %v17978_v20, %v12565_v46  ;;  %v12277_v8 = vld [vmem:[#allocation6 + $0x198] sm:$0xf] }
 0x57a   :  { %v15439_v55 = vld [vmem:[#allocation6 + $0x1a70] sm:$0xf0]  ;;  %v18098_v38 = vld [vmem:[#allocation6 + $0x7b4] sm:$0xf0] }
 0x57b   :  { %v18493_v13 = vld [vmem:[#allocation6 + $0x1414] sm:$0xf]  ;;  %v15442_v6 = vor.u32 %v18693_v49, %v15439_v55  ;;  %7140 = vmatpush.bf16.msra.mxu2 %v15186_v57  ;;  %v17906_v49 = vld [vmem:[#allocation6 + $0x1b4] sm:$0xf0]  ;;  %v12822_v55 = vor.u32 %v18042_v35, %v12821_v29 }
 0x57c   :  { %v14639_v1 = vld [vmem:[#allocation6 + $0x1430] sm:$0xf0]  ;;  %v12245_v57 = vld [vmem:[#allocation6 + $0x158] sm:$0xf] }
 0x57d   :  { %v18557_v33 = vld [vmem:[#allocation6 + $0x1614] sm:$0xf]  ;;  %v14642_v43 = vor.u32 %v18493_v13, %v14639_v1  ;;  %7154 = vmatpush.bf16.msra.mxu3 %v15442_v6  ;;  %v18034_v13 = vld [vmem:[#allocation6 + $0x5b4] sm:$0xf0]  ;;  %v20642_v1 = vpop.f32.mrf.mxu0 }
 0x57e   :  { %v14895_v18 = vld [vmem:[#allocation6 + $0x1630] sm:$0xf0]  ;;  %21273 = vst [vmem:[#allocation80_spill] sm:$0xff] %v20642_v1  ;;  %v17898_v6 = vld [vmem:[#allocation6 + $0x174] sm:$0xf0] }
 0x57f   :  { %v18621_v28 = vld [vmem:[#allocation6 + $0x1814] sm:$0xf]  ;;  %v14898_v12 = vor.u32 %v18557_v33, %v14895_v18  ;;  %7113 = vmatpush.bf16.msra.mxu0 %v14642_v43  ;;  %v12278_v33 = vor.u32 %v17906_v49, %v12277_v8  ;;  %v12534_v18 = vor.u32 %v17970_v37, %v12533_v34  ;;  %v17962_v58 = vld [vmem:[#allocation6 + $0x374] sm:$0xf0]  ;;  %v12246_v37 = vor.u32 %v17898_v6, %v12245_v57  ;;  %v20652_v49 = vpop.f32.mrf.mxu3 }
 0x580   :  { %v15151_v22 = vld [vmem:[#allocation6 + $0x1830] sm:$0xf0]  ;;  %v12757_v15 = vld [vmem:[#allocation6 + $0x558] sm:$0xf]  ;;  %21276 = vst [vmem:[#allocation83_spill] sm:$0xff] %v20652_v49 }
 0x581   :  { %v18685_v50 = vld [vmem:[#allocation6 + $0x1a14] sm:$0xf]  ;;  %v15154_v56 = vor.u32 %v18621_v28, %v15151_v22  ;;  %7127 = vmatpush.bf16.msra.mxu1 %v14898_v12  ;;  %v20644_v28 = vpop.f32.mrf.mxu1  ;;  %v12790_v22 = vor.u32 %v18034_v13, %v12789_v41  ;;  %v18026_v46 = vld [vmem:[#allocation6 + $0x574] sm:$0xf0] }
 0x582   :  { %v15407_v60 = vld [vmem:[#allocation6 + $0x1a30] sm:$0xf0]  ;;  %21274 = vst [vmem:[#allocation81_spill] sm:$0xff] %v20644_v28  ;;  %7114 = vmatmul.bf16.vlgmr.msra.gmra.mxu0 %v20382_v40  ;;  %v13013_v20 = vld [vmem:[#allocation6 + $0x758] sm:$0xf]  ;;  %v12758_v43 = vor.u32 %v18026_v46, %v12757_v15 }
 0x583   :  { %v15410_v5 = vor.u32 %v18685_v50, %v15407_v60  ;;  %7141 = vmatpush.bf16.msra.mxu2 %v15154_v56  ;;  %7162 = vmatpush.bf16.msrb.mxu0 %v12310_v30  ;;  %v13046_v50 = vor.u32 %v18098_v38, %v13045_v51  ;;  %v12501_v60 = vld [vmem:[#allocation6 + $0x358] sm:$0xf]  ;;  %v20650_v56 = vpop.f32.mrf.mxu2 }
 0x584   :  { %7128 = vmatmul.bf16.vlgmr.msra.gmra.mxu1 %v20384_v2  ;;  %v18090_v29 = vld [vmem:[#allocation6 + $0x774] sm:$0xf0]  ;;  %v12502_v34 = vor.u32 %v17962_v58, %v12501_v60  ;;  %21275 = vst [vmem:[#allocation82_spill] sm:$0xff] %v20650_v56 }
 0x585   :  { %7155 = vmatpush.bf16.msra.mxu3 %v15410_v5  ;;  %7176 = vmatpush.bf16.msrb.mxu1 %v12566_v36  ;;  %v12213_v41 = vld [vmem:[#allocation6 + $0x118] sm:$0xf]  ;;  %v13014_v12 = vor.u32 %v18090_v29, %v13013_v20  ;;  %v6891_v8 = vpop.f32.mrf.mxu0 }
 0x586   :  { %7142 = vmatmul.bf16.vlgmr.msra.gmra.mxu2 %v20347_v23  ;;  %v12469_v35 = vld [vmem:[#allocation6 + $0x318] sm:$0xf] }
 0x587   :  { %7190 = vmatpush.bf16.msrb.mxu2 %v12822_v55  ;;  %7163 = vmatpush.bf16.msrb.mxu0 %v12278_v33  ;;  %v17954_v14 = vld [vmem:[#allocation6 + $0x334] sm:$0xf0]  ;;  %v6892_v55 = vadd.f32 %v6891_v8, %v20640_v42  ;;  %v6933_v8 = vpop.f32.mrf.mxu3 }
 0x588   :  { %7156 = vmatmul.bf16.vlgmr.msra.gmra.mxu3 %v20355_v3  ;;  %v12725_v24 = vld [vmem:[#allocation6 + $0x518] sm:$0xf]  ;;  %v12470_v51 = vor.u32 %v17954_v14, %v12469_v35 }
 0x589   :  { %7204 = vmatpush.bf16.msrb.mxu3 %v13078_v32  ;;  %7177 = vmatpush.bf16.msrb.mxu1 %v12534_v18  ;;  %v17890_v32 = vld [vmem:[#allocation6 + $0x134] sm:$0xf0]  ;;  %v6905_v18 = vpop.f32.mrf.mxu1 }
 0x58a   :  { %v18018_v5 = vld [vmem:[#allocation6 + $0x534] sm:$0xf0]  ;;  %v12214_v13 = vor.u32 %v17890_v32, %v12213_v41  ;;  %v6906_v58 = vadd.f32 %v6905_v18, %v6892_v55 }
 0x58b   :  { %7191 = vmatpush.bf16.msrb.mxu2 %v12790_v22  ;;  %v12981_v30 = vld [vmem:[#allocation6 + $0x718] sm:$0xf]  ;;  %7164 = vmatpush.bf16.msrb.mxu0 %v12246_v37  ;;  %v12726_v57 = vor.u32 %v18018_v5, %v12725_v24  ;;  %v6919_v14 = vpop.f32.mrf.mxu2 }
 0x58c   :  { %v18082_v36 = vld [vmem:[#allocation6 + $0x734] sm:$0xf0] }
 0x58d   :  { %7205 = vmatpush.bf16.msrb.mxu3 %v13046_v50  ;;  %7178 = vmatpush.bf16.msrb.mxu1 %v12502_v34  ;;  %v12181_v38 = vld [vmem:[#allocation6 + $0xd8] sm:$0xf]  ;;  %v12982_v6 = vor.u32 %v18082_v36, %v12981_v30  ;;  %v6920_v36 = vadd.f32 %v6919_v14, %v6906_v58 }
 0x58e   :  { %v17882_v33 = vld [vmem:[#allocation6 + $0xf4] sm:$0xf0] }
 0x58f   :  { %7192 = vmatpush.bf16.msrb.mxu2 %v12758_v43  ;;  %v12437_v22 = vld [vmem:[#allocation6 + $0x2d8] sm:$0xf]  ;;  %7165 = vmatpush.bf16.msrb.mxu0 %v12214_v13  ;;  %v12182_v29 = vor.u32 %v17882_v33, %v12181_v38  ;;  %v20655_v33 = vadd.f32 %v6933_v8, %v6920_v36 }
 0x590   :  { %v17946_v50 = vld [vmem:[#allocation6 + $0x2f4] sm:$0xf0] }
 0x591   :  { %7206 = vmatpush.bf16.msrb.mxu3 %v13014_v12  ;;  %v12693_v60 = vld [vmem:[#allocation6 + $0x4d8] sm:$0xf]  ;;  %7179 = vmatpush.bf16.msrb.mxu1 %v12470_v51  ;;  %v12438_v42 = vor.u32 %v17946_v50, %v12437_v22 }
 0x592   :  { %v18010_v15 = vld [vmem:[#allocation6 + $0x4f4] sm:$0xf0] }
 0x593   :  { %v12949_v46 = vld [vmem:[#allocation6 + $0x6d8] sm:$0xf]  ;;  %7193 = vmatpush.bf16.msrb.mxu2 %v12726_v57  ;;  %v12694_v41 = vor.u32 %v18010_v15, %v12693_v60  ;;  %7166 = vmatpush.bf16.msrb.mxu0 %v12182_v29 }
 0x594   :  { %v18074_v20 = vld [vmem:[#allocation6 + $0x6f4] sm:$0xf0] }
 0x595   :  { %v12149_v37 = vld [vmem:[#allocation6 + $0x98] sm:$0xf]  ;;  %7207 = vmatpush.bf16.msrb.mxu3 %v12982_v6  ;;  %v12950_v32 = vor.u32 %v18074_v20, %v12949_v46  ;;  %7180 = vmatpush.bf16.msrb.mxu1 %v12438_v42 }
 0x596   :  { %v17874_v34 = vld [vmem:[#allocation6 + $0xb4] sm:$0xf0] }
 0x597   :  { %v12405_v43 = vld [vmem:[#allocation6 + $0x298] sm:$0xf]  ;;  %v12150_v55 = vor.u32 %v17874_v34, %v12149_v37  ;;  %7194 = vmatpush.bf16.msrb.mxu2 %v12694_v41 }
 0x598   :  { %v17938_v12 = vld [vmem:[#allocation6 + $0x2b4] sm:$0xf0] }
 0x599   :  { %v12661_v35 = vld [vmem:[#allocation6 + $0x498] sm:$0xf]  ;;  %v12406_v13 = vor.u32 %v17938_v12, %v12405_v43  ;;  %7208 = vmatpush.bf16.msrb.mxu3 %v12950_v32  ;;  %7167 = vmatpush.bf16.msrb.mxu0 %v12150_v55 }
 0x59a   :  { %v18002_v24 = vld [vmem:[#allocation6 + $0x4b4] sm:$0xf0] }
 0x59b   :  { %v12917_v5 = vld [vmem:[#allocation6 + $0x698] sm:$0xf]  ;;  %v12662_v18 = vor.u32 %v18002_v24, %v12661_v35  ;;  %7181 = vmatpush.bf16.msrb.mxu1 %v12406_v13 }
 0x59c   :  { %v18066_v30 = vld [vmem:[#allocation6 + $0x6b4] sm:$0xf0] }
 0x59d   :  { %v12117_v51 = vld [vmem:[#allocation6 + $0x58] sm:$0xf]  ;;  %v12918_v57 = vor.u32 %v18066_v30, %v12917_v5  ;;  %7195 = vmatpush.bf16.msrb.mxu2 %v12662_v18 }
 0x59e   :  { %v17866_v38 = vld [vmem:[#allocation6 + $0x74] sm:$0xf0] }
 0x59f   :  { %v12373_v6 = vld [vmem:[#allocation6 + $0x258] sm:$0xf]  ;;  %v12118_v20 = vor.u32 %v17866_v38, %v12117_v51  ;;  %7209 = vmatpush.bf16.msrb.mxu3 %v12918_v57 }
 0x5a0   :  { %v17930_v22 = vld [vmem:[#allocation6 + $0x274] sm:$0xf0] }
 0x5a1   :  { %v12629_v50 = vld [vmem:[#allocation6 + $0x458] sm:$0xf]  ;;  %v12374_v29 = vor.u32 %v17930_v22, %v12373_v6  ;;  %7168 = vmatpush.bf16.msrb.mxu0 %v12118_v20 }
 0x5a2   :  { %v17994_v60 = vld [vmem:[#allocation6 + $0x474] sm:$0xf0] }
 0x5a3   :  { %v12885_v15 = vld [vmem:[#allocation6 + $0x658] sm:$0xf]  ;;  %v12630_v41 = vor.u32 %v17994_v60, %v12629_v50  ;;  %7182 = vmatpush.bf16.msrb.mxu1 %v12374_v29 }
 0x5a4   :  { %v18058_v46 = vld [vmem:[#allocation6 + $0x674] sm:$0xf0] }
 0x5a5   :  { %v12085_v58 = vld [vmem:[#allocation6 + $0x18] sm:$0xf]  ;;  %v12886_v32 = vor.u32 %v18058_v46, %v12885_v15  ;;  %7196 = vmatpush.bf16.msrb.mxu2 %v12630_v41 }
 0x5a6   :  { %v17858_v42 = vld [vmem:[#allocation6 + $0x34] sm:$0xf0] }
 0x5a7   :  { %v12341_v37 = vld [vmem:[#allocation6 + $0x218] sm:$0xf]  ;;  %v12086_v55 = vor.u32 %v17858_v42, %v12085_v58  ;;  %7210 = vmatpush.bf16.msrb.mxu3 %v12886_v32  ;;  %v20657_v42 = vpop.f32.mrf.mxu0 }
 0x5a8   :  { %v17922_v34 = vld [vmem:[#allocation6 + $0x234] sm:$0xf0]  ;;  %21277 = vst [vmem:[#allocation84_spill] sm:$0xff] %v20657_v42 }
 0x5a9   :  { %v12597_v43 = vld [vmem:[#allocation6 + $0x418] sm:$0xf]  ;;  %v12342_v13 = vor.u32 %v17922_v34, %v12341_v37  ;;  %7169 = vmatpush.bf16.msrb.mxu0 %v12086_v55 }
 0x5aa   :  { %v17986_v12 = vld [vmem:[#allocation6 + $0x434] sm:$0xf0] }
 0x5ab   :  { %v12853_v35 = vld [vmem:[#allocation6 + $0x618] sm:$0xf]  ;;  %v12598_v18 = vor.u32 %v17986_v12, %v12597_v43  ;;  %7183 = vmatpush.bf16.msrb.mxu1 %v12342_v13  ;;  %v20659_v43 = vpop.f32.mrf.mxu1 }
 0x5ac   :  { %v18050_v14 = vld [vmem:[#allocation6 + $0x634] sm:$0xf0]  ;;  %21278 = vst [vmem:[#allocation85_spill] sm:$0xff] %v20659_v43  ;;  %7170 = vmatmul.bf16.vlgmr.msrb.gmra.mxu0 %v20187_v52 }
 0x5ad   :  { %v13333_v24 = vld [vmem:[#allocation6 + $0x9d8] sm:$0xf]  ;;  %v12854_v57 = vor.u32 %v18050_v14, %v12853_v35  ;;  %7197 = vmatpush.bf16.msrb.mxu2 %v12598_v18  ;;  %v20665_v18 = vpop.f32.mrf.mxu2 }
 0x5ae   :  { %v18170_v5 = vld [vmem:[#allocation6 + $0x9f4] sm:$0xf0]  ;;  %7184 = vmatmul.bf16.vlgmr.msrb.gmra.mxu1 %v20189_v59  ;;  %21279 = vst [vmem:[#allocation86_spill] sm:$0xff] %v20665_v18 }
 0x5af   :  { %v13589_v30 = vld [vmem:[#allocation6 + $0xbd8] sm:$0xf]  ;;  %v13334_v22 = vor.u32 %v18170_v5, %v13333_v24  ;;  %7211 = vmatpush.bf16.msrb.mxu3 %v12854_v57 }
 0x5b0   :  { %v18234_v36 = vld [vmem:[#allocation6 + $0xbf4] sm:$0xf0]  ;;  %7198 = vmatmul.bf16.vlgmr.msrb.gmra.mxu2 %v20191_v62 }
 0x5b1   :  { %v13845_v8 = vld [vmem:[#allocation6 + $0xdd8] sm:$0xf]  ;;  %v13590_v50 = vor.u32 %v18234_v36, %v13589_v30  ;;  %7218 = vmatpush.bf16.msra.mxu0 %v13334_v22 }
 0x5b2   :  { %v18298_v51 = vld [vmem:[#allocation6 + $0xdf4] sm:$0xf0]  ;;  %7212 = vmatmul.bf16.vlgmr.msrb.gmra.mxu3 %v20193_v48 }
 0x5b3   :  { %v14101_v38 = vld [vmem:[#allocation6 + $0xfd8] sm:$0xf]  ;;  %v13846_v46 = vor.u32 %v18298_v51, %v13845_v8  ;;  %7232 = vmatpush.bf16.msra.mxu1 %v13590_v50 }
 0x5b4   :  { %v18362_v6 = vld [vmem:[#allocation6 + $0xff4] sm:$0xf0] }
 0x5b5   :  { %v13301_v60 = vld [vmem:[#allocation6 + $0x998] sm:$0xf]  ;;  %v14102_v49 = vor.u32 %v18362_v6, %v14101_v38  ;;  %7246 = vmatpush.bf16.msra.mxu2 %v13846_v46 }
 0x5b6   :  { %v18162_v15 = vld [vmem:[#allocation6 + $0x9b4] sm:$0xf0] }
 0x5b7   :  { %v13557_v56 = vld [vmem:[#allocation6 + $0xb98] sm:$0xf]  ;;  %v13302_v37 = vor.u32 %v18162_v15, %v13301_v60  ;;  %7260 = vmatpush.bf16.msra.mxu3 %v14102_v49  ;;  %v6947_v60 = vpop.f32.mrf.mxu0  ;;  %v20667_v15 = vpop.f32.mrf.mxu3 }
 0x5b8   :  { %v18226_v28 = vld [vmem:[#allocation6 + $0xbb4] sm:$0xf0]  ;;  %21280 = vst [vmem:[#allocation87_spill] sm:$0xff] %v20667_v15  ;;  %v6948_v46 = vadd.f32 %v6947_v60, %v20655_v33 }
 0x5b9   :  { %v13813_v1 = vld [vmem:[#allocation6 + $0xd98] sm:$0xf]  ;;  %v13558_v34 = vor.u32 %v18226_v28, %v13557_v56  ;;  %7219 = vmatpush.bf16.msra.mxu0 %v13302_v37 }
 0x5ba   :  { %v18290_v58 = vld [vmem:[#allocation6 + $0xdb4] sm:$0xf0] }
 0x5bb   :  { %v14069_v20 = vld [vmem:[#allocation6 + $0xf98] sm:$0xf]  ;;  %v13814_v12 = vor.u32 %v18290_v58, %v13813_v1  ;;  %7233 = vmatpush.bf16.msra.mxu1 %v13558_v34  ;;  %v6961_v34 = vpop.f32.mrf.mxu1 }
 0x5bc   :  { %v18354_v29 = vld [vmem:[#allocation6 + $0xfb4] sm:$0xf0] }
 0x5bd   :  { %v13269_v41 = vld [vmem:[#allocation6 + $0x958] sm:$0xf]  ;;  %v14070_v35 = vor.u32 %v18354_v29, %v14069_v20  ;;  %7247 = vmatpush.bf16.msra.mxu2 %v13814_v12 }
 0x5be   :  { %v18154_v32 = vld [vmem:[#allocation6 + $0x974] sm:$0xf0] }
 0x5bf   :  { %v13525_v14 = vld [vmem:[#allocation6 + $0xb58] sm:$0xf]  ;;  %v13270_v28 = vor.u32 %v18154_v32, %v13269_v41  ;;  %7261 = vmatpush.bf16.msra.mxu3 %v14070_v35 }
 0x5c0   :  { %v18218_v24 = vld [vmem:[#allocation6 + $0xb74] sm:$0xf0] }
 0x5c1   :  { %v13781_v5 = vld [vmem:[#allocation6 + $0xd58] sm:$0xf]  ;;  %v13526_v56 = vor.u32 %v18218_v24, %v13525_v14  ;;  %7220 = vmatpush.bf16.msra.mxu0 %v13270_v28  ;;  %v20670_v24 = vadd.f32 %v6961_v34, %v6948_v46  ;;  %v6989_v46 = vpop.f32.mrf.mxu3 }
 0x5c2   :  { %v18282_v30 = vld [vmem:[#allocation6 + $0xd74] sm:$0xf0] }
 0x5c3   :  { %v14037_v36 = vld [vmem:[#allocation6 + $0xf58] sm:$0xf]  ;;  %v13782_v55 = vor.u32 %v18282_v30, %v13781_v5  ;;  %7234 = vmatpush.bf16.msra.mxu1 %v13526_v56  ;;  %21281 = vst [vmem:[#allocation88_spill] sm:$0xff] %v20670_v24 }
 0x5c4   :  { %v18346_v8 = vld [vmem:[#allocation6 + $0xf74] sm:$0xf0] }
 0x5c5   :  { %v13237_v1 = vld [vmem:[#allocation6 + $0x918] sm:$0xf]  ;;  %v14038_v13 = vor.u32 %v18346_v8, %v14037_v36  ;;  %7248 = vmatpush.bf16.msra.mxu2 %v13782_v55  ;;  %v21210_v8 = vperm.slane %v20616_v54, 5 }
 0x5c6   :  { %v18146_v49 = vld [vmem:[#allocation6 + $0x934] sm:$0xf0] }
 0x5c7   :  { %v13493_v51 = vld [vmem:[#allocation6 + $0xb18] sm:$0xf]  ;;  %v13238_v58 = vor.u32 %v18146_v49, %v13237_v1  ;;  %7262 = vmatpush.bf16.msra.mxu3 %v14038_v13 }
 0x5c8   :  { %v18210_v38 = vld [vmem:[#allocation6 + $0xb34] sm:$0xf0] }
 0x5c9   :  { %v13749_v6 = vld [vmem:[#allocation6 + $0xd18] sm:$0xf]  ;;  %v13494_v20 = vor.u32 %v18210_v38, %v13493_v51  ;;  %7221 = vmatpush.bf16.msra.mxu0 %v13238_v58 }
 0x5ca   :  { %v18274_v57 = vld [vmem:[#allocation6 + $0xd34] sm:$0xf0] }
 0x5cb   :  { %v14005_v22 = vld [vmem:[#allocation6 + $0xf18] sm:$0xf]  ;;  %v13750_v41 = vor.u32 %v18274_v57, %v13749_v6  ;;  %7235 = vmatpush.bf16.msra.mxu1 %v13494_v20  ;;  %v6975_v6 = vpop.f32.mrf.mxu2 }
 0x5cc   :  { %v18338_v50 = vld [vmem:[#allocation6 + $0xf34] sm:$0xf0]  ;;  %v6976_v60 = vadd.f32 %v6975_v6, %v21210_v8 }
 0x5cd   :  { %v13205_v29 = vld [vmem:[#allocation6 + $0x8d8] sm:$0xf]  ;;  %v14006_v32 = vor.u32 %v18338_v50, %v14005_v22  ;;  %7249 = vmatpush.bf16.msra.mxu2 %v13750_v41 }
 0x5ce   :  { %v18138_v37 = vld [vmem:[#allocation6 + $0x8f4] sm:$0xf0]  ;;  %v20675_v34 = vadd.f32 %v6989_v46, %v6976_v60 }
 0x5cf   :  { %v13461_v12 = vld [vmem:[#allocation6 + $0xad8] sm:$0xf]  ;;  %v13206_v33 = vor.u32 %v18138_v37, %v13205_v29  ;;  %7263 = vmatpush.bf16.msra.mxu3 %v14006_v32 }
 0x5d0   :  { %v18202_v35 = vld [vmem:[#allocation6 + $0xaf4] sm:$0xf0] }
 0x5d1   :  { %v13717_v14 = vld [vmem:[#allocation6 + $0xcd8] sm:$0xf]  ;;  %v13462_v28 = vor.u32 %v18202_v35, %v13461_v12  ;;  %7222 = vmatpush.bf16.msra.mxu0 %v13206_v33 }
 0x5d2   :  { %v18266_v5 = vld [vmem:[#allocation6 + $0xcf4] sm:$0xf0] }
 0x5d3   :  { %v13973_v30 = vld [vmem:[#allocation6 + $0xed8] sm:$0xf]  ;;  %v13718_v49 = vor.u32 %v18266_v5, %v13717_v14  ;;  %7236 = vmatpush.bf16.msra.mxu1 %v13462_v28 }
 0x5d4   :  { %v18330_v36 = vld [vmem:[#allocation6 + $0xef4] sm:$0xf0] }
 0x5d5   :  { %v13173_v56 = vld [vmem:[#allocation6 + $0x898] sm:$0xf]  ;;  %v13974_v55 = vor.u32 %v18330_v36, %v13973_v30  ;;  %7250 = vmatpush.bf16.msra.mxu2 %v13718_v49 }
 0x5d6   :  { %v18130_v1 = vld [vmem:[#allocation6 + $0x8b4] sm:$0xf0] }
 0x5d7   :  { %v13429_v13 = vld [vmem:[#allocation6 + $0xa98] sm:$0xf]  ;;  %v13174_v58 = vor.u32 %v18130_v1, %v13173_v56  ;;  %7264 = vmatpush.bf16.msra.mxu3 %v13974_v55 }
 0x5d8   :  { %v18194_v51 = vld [vmem:[#allocation6 + $0xab4] sm:$0xf0] }
 0x5d9   :  { %v13685_v38 = vld [vmem:[#allocation6 + $0xc98] sm:$0xf]  ;;  %v13430_v20 = vor.u32 %v18194_v51, %v13429_v13  ;;  %7223 = vmatpush.bf16.msra.mxu0 %v13174_v58 }
 0x5da   :  { %v18258_v57 = vld [vmem:[#allocation6 + $0xcb4] sm:$0xf0] }
 0x5db   :  { %v13941_v22 = vld [vmem:[#allocation6 + $0xe98] sm:$0xf]  ;;  %v13686_v41 = vor.u32 %v18258_v57, %v13685_v38  ;;  %7237 = vmatpush.bf16.msra.mxu1 %v13430_v20 }
 0x5dc   :  { %v18322_v50 = vld [vmem:[#allocation6 + $0xeb4] sm:$0xf0] }
 0x5dd   :  { %v13141_v29 = vld [vmem:[#allocation6 + $0x858] sm:$0xf]  ;;  %v13942_v32 = vor.u32 %v18322_v50, %v13941_v22  ;;  %7251 = vmatpush.bf16.msra.mxu2 %v13686_v41 }
 0x5de   :  { %v18122_v37 = vld [vmem:[#allocation6 + $0x874] sm:$0xf0] }
 0x5df   :  { %v13397_v12 = vld [vmem:[#allocation6 + $0xa58] sm:$0xf]  ;;  %v13142_v33 = vor.u32 %v18122_v37, %v13141_v29  ;;  %7265 = vmatpush.bf16.msra.mxu3 %v13942_v32 }
 0x5e0   :  { %v18186_v35 = vld [vmem:[#allocation6 + $0xa74] sm:$0xf0] }
 0x5e1   :  { %v13653_v14 = vld [vmem:[#allocation6 + $0xc58] sm:$0xf]  ;;  %v13398_v28 = vor.u32 %v18186_v35, %v13397_v12  ;;  %7224 = vmatpush.bf16.msra.mxu0 %v13142_v33 }
 0x5e2   :  { %v18250_v5 = vld [vmem:[#allocation6 + $0xc74] sm:$0xf0] }
 0x5e3   :  { %v13909_v30 = vld [vmem:[#allocation6 + $0xe58] sm:$0xf]  ;;  %v13654_v49 = vor.u32 %v18250_v5, %v13653_v14  ;;  %7238 = vmatpush.bf16.msra.mxu1 %v13398_v28 }
 0x5e4   :  { %v18314_v36 = vld [vmem:[#allocation6 + $0xe74] sm:$0xf0] }
 0x5e5   :  { %v13109_v6 = vld [vmem:[#allocation6 + $0x818] sm:$0xf]  ;;  %v13910_v55 = vor.u32 %v18314_v36, %v13909_v30  ;;  %7252 = vmatpush.bf16.msra.mxu2 %v13654_v49 }
 0x5e6   :  { %v18114_v56 = vld [vmem:[#allocation6 + $0x834] sm:$0xf0] }
 0x5e7   :  { %v13365_v1 = vld [vmem:[#allocation6 + $0xa18] sm:$0xf]  ;;  %v13110_v58 = vor.u32 %v18114_v56, %v13109_v6  ;;  %7266 = vmatpush.bf16.msra.mxu3 %v13910_v55  ;;  %v20677_v56 = vpop.f32.mrf.mxu0 }
 0x5e8   :  { %v18178_v13 = vld [vmem:[#allocation6 + $0xa34] sm:$0xf0]  ;;  %21282 = vst [vmem:[#allocation89_spill] sm:$0xff] %v20677_v56 }
 0x5e9   :  { %v13621_v51 = vld [vmem:[#allocation6 + $0xc18] sm:$0xf]  ;;  %v13366_v20 = vor.u32 %v18178_v13, %v13365_v1  ;;  %7225 = vmatpush.bf16.msra.mxu0 %v13110_v58 }
 0x5ea   :  { %v18242_v38 = vld [vmem:[#allocation6 + $0xc34] sm:$0xf0] }
 0x5eb   :  { %v13877_v57 = vld [vmem:[#allocation6 + $0xe18] sm:$0xf]  ;;  %v13622_v41 = vor.u32 %v18242_v38, %v13621_v51  ;;  %7239 = vmatpush.bf16.msra.mxu1 %v13366_v20 }
 0x5ec   :  { %v18306_v22 = vld [vmem:[#allocation6 + $0xe34] sm:$0xf0]  ;;  %7226 = vmatmul.bf16.vlgmr.msra.gmra.mxu0 %v20284_v9 }
 0x5ed   :  { %v14357_v50 = vld [vmem:[#allocation6 + $0x11d8] sm:$0xf]  ;;  %v13878_v32 = vor.u32 %v18306_v22, %v13877_v57  ;;  %7253 = vmatpush.bf16.msra.mxu2 %v13622_v41  ;;  %v20685_v41 = vpop.f32.mrf.mxu2 }
 0x5ee   :  { %v18426_v60 = vld [vmem:[#allocation6 + $0x11f4] sm:$0xf0]  ;;  %7240 = vmatmul.bf16.vlgmr.msra.gmra.mxu1 %v20286_v63  ;;  %21284 = vst [vmem:[#allocation91_spill] sm:$0xff] %v20685_v41  ;;  %v17902_v41 = vld [vmem:[#allocation6 + $0x19c] sm:$0xf] }
 0x5ef   :  { %v14613_v46 = vld [vmem:[#allocation6 + $0x13d8] sm:$0xf]  ;;  %v14358_v35 = vor.u32 %v18426_v60, %v14357_v50  ;;  %7267 = vmatpush.bf16.msra.mxu3 %v13878_v32 }
 0x5f0   :  { %v18490_v8 = vld [vmem:[#allocation6 + $0x13f4] sm:$0xf0]  ;;  %7254 = vmatmul.bf16.vlgmr.msra.gmra.mxu2 %v20293_v19 }
 0x5f1   :  { %v14869_v24 = vld [vmem:[#allocation6 + $0x15d8] sm:$0xf]  ;;  %v14614_v14 = vor.u32 %v18490_v8, %v14613_v46  ;;  %7274 = vmatpush.bf16.msrb.mxu0 %v14358_v35 }
 0x5f2   :  { %v18554_v29 = vld [vmem:[#allocation6 + $0x15f4] sm:$0xf0]  ;;  %7268 = vmatmul.bf16.vlgmr.msra.gmra.mxu3 %v20295_v61 }
 0x5f3   :  { %v15125_v37 = vld [vmem:[#allocation6 + $0x17d8] sm:$0xf]  ;;  %v14870_v36 = vor.u32 %v18554_v29, %v14869_v24  ;;  %7288 = vmatpush.bf16.msrb.mxu1 %v14614_v14  ;;  %v20679_v24 = vpop.f32.mrf.mxu1 }
 0x5f4   :  { %v18618_v12 = vld [vmem:[#allocation6 + $0x17f4] sm:$0xf0]  ;;  %21283 = vst [vmem:[#allocation90_spill] sm:$0xff] %v20679_v24 }
 0x5f5   :  { %v14325_v5 = vld [vmem:[#allocation6 + $0x1198] sm:$0xf]  ;;  %v15126_v15 = vor.u32 %v18618_v12, %v15125_v37  ;;  %7302 = vmatpush.bf16.msrb.mxu2 %v14870_v36 }
 0x5f6   :  { %v18418_v30 = vld [vmem:[#allocation6 + $0x11b4] sm:$0xf0] }
 0x5f7   :  { %v14581_v18 = vld [vmem:[#allocation6 + $0x1398] sm:$0xf]  ;;  %v14326_v1 = vor.u32 %v18418_v30, %v14325_v5  ;;  %7316 = vmatpush.bf16.msrb.mxu3 %v15126_v15  ;;  %v7003_v5 = vpop.f32.mrf.mxu0  ;;  %v20687_v30 = vpop.f32.mrf.mxu3 }
 0x5f8   :  { %v18482_v43 = vld [vmem:[#allocation6 + $0x13b4] sm:$0xf0]  ;;  %21285 = vst [vmem:[#allocation92_spill] sm:$0xff] %v20687_v30  ;;  %v7004_v36 = vadd.f32 %v7003_v5, %v20675_v34 }
 0x5f9   :  { %v14837_v42 = vld [vmem:[#allocation6 + $0x1598] sm:$0xf]  ;;  %v14582_v8 = vor.u32 %v18482_v43, %v14581_v18  ;;  %7275 = vmatpush.bf16.msrb.mxu0 %v14326_v1 }
 0x5fa   :  { %v18546_v6 = vld [vmem:[#allocation6 + $0x15b4] sm:$0xf0] }
 0x5fb   :  { %v15093_v33 = vld [vmem:[#allocation6 + $0x1798] sm:$0xf]  ;;  %v14838_v55 = vor.u32 %v18546_v6, %v14837_v42  ;;  %7289 = vmatpush.bf16.msrb.mxu1 %v14582_v8  ;;  %v7017_v8 = vpop.f32.mrf.mxu1 }
 0x5fc   :  { %v18610_v28 = vld [vmem:[#allocation6 + $0x17b4] sm:$0xf0] }
 0x5fd   :  { %v14293_v13 = vld [vmem:[#allocation6 + $0x1158] sm:$0xf]  ;;  %v15094_v51 = vor.u32 %v18610_v28, %v15093_v33  ;;  %7303 = vmatpush.bf16.msrb.mxu2 %v14838_v55 }
 0x5fe   :  { %v18410_v49 = vld [vmem:[#allocation6 + $0x1174] sm:$0xf0] }
 0x5ff   :  { %v14549_v38 = vld [vmem:[#allocation6 + $0x1358] sm:$0xf]  ;;  %v14294_v43 = vor.u32 %v18410_v49, %v14293_v13  ;;  %7317 = vmatpush.bf16.msrb.mxu3 %v15094_v51  ;;  %v7045_v5 = vpop.f32.mrf.mxu3 }
 0x600   :  { %v18474_v57 = vld [vmem:[#allocation6 + $0x1374] sm:$0xf0] }
 0x601   :  { %v14805_v22 = vld [vmem:[#allocation6 + $0x1558] sm:$0xf]  ;;  %v14550_v18 = vor.u32 %v18474_v57, %v14549_v38  ;;  %7276 = vmatpush.bf16.msrb.mxu0 %v14294_v43  ;;  %v7018_v57 = vadd.f32 %v7017_v8, %v7004_v36 }
 0x602   :  { %v18538_v50 = vld [vmem:[#allocation6 + $0x1574] sm:$0xf0] }
 0x603   :  { %v15061_v60 = vld [vmem:[#allocation6 + $0x1758] sm:$0xf]  ;;  %v14806_v58 = vor.u32 %v18538_v50, %v14805_v22  ;;  %7290 = vmatpush.bf16.msrb.mxu1 %v14550_v18 }
 0x604   :  { %v18602_v46 = vld [vmem:[#allocation6 + $0x1774] sm:$0xf0] }
 0x605   :  { %v14261_v42 = vld [vmem:[#allocation6 + $0x1118] sm:$0xf]  ;;  %v15062_v20 = vor.u32 %v18602_v46, %v15061_v60  ;;  %7304 = vmatpush.bf16.msrb.mxu2 %v14806_v58 }
 0x606   :  { %v18402_v15 = vld [vmem:[#allocation6 + $0x1134] sm:$0xf0] }
 0x607   :  { %v14517_v29 = vld [vmem:[#allocation6 + $0x1318] sm:$0xf]  ;;  %v14262_v6 = vor.u32 %v18402_v15, %v14261_v42  ;;  %7318 = vmatpush.bf16.msrb.mxu3 %v15062_v20 }
 0x608   :  { %v18466_v37 = vld [vmem:[#allocation6 + $0x1334] sm:$0xf0] }
 0x609   :  { %v14773_v12 = vld [vmem:[#allocation6 + $0x1518] sm:$0xf]  ;;  %v14518_v33 = vor.u32 %v18466_v37, %v14517_v29  ;;  %7277 = vmatpush.bf16.msrb.mxu0 %v14262_v6  ;;  %v7031_v37 = vpop.f32.mrf.mxu2 }
 0x60a   :  { %v18530_v32 = vld [vmem:[#allocation6 + $0x1534] sm:$0xf0] }
 0x60b   :  { %v15029_v35 = vld [vmem:[#allocation6 + $0x1718] sm:$0xf]  ;;  %v14774_v13 = vor.u32 %v18530_v32, %v14773_v12  ;;  %7291 = vmatpush.bf16.msrb.mxu1 %v14518_v33 }
 0x60c   :  { %v18594_v14 = vld [vmem:[#allocation6 + $0x1734] sm:$0xf0] }
 0x60d   :  { %v14229_v28 = vld [vmem:[#allocation6 + $0x10d8] sm:$0xf]  ;;  %v15030_v49 = vor.u32 %v18594_v14, %v15029_v35  ;;  %7305 = vmatpush.bf16.msrb.mxu2 %v14774_v13  ;;  %v7032_v14 = vadd.f32 %v7031_v37, %v7018_v57 }
 0x60e   :  { %v18394_v1 = vld [vmem:[#allocation6 + $0x10f4] sm:$0xf0] }
 0x60f   :  { %v14485_v55 = vld [vmem:[#allocation6 + $0x12d8] sm:$0xf]  ;;  %v14230_v46 = vor.u32 %v18394_v1, %v14229_v28  ;;  %7319 = vmatpush.bf16.msrb.mxu3 %v15030_v49  ;;  %v20690_v1 = vadd.f32 %v7045_v5, %v7032_v14  ;;  %v17910_v5 = vld [vmem:[#allocation6 + $0x1dc] sm:$0xf] }
 0x610   :  { %v18458_v51 = vld [vmem:[#allocation6 + $0x12f4] sm:$0xf0] }
 0x611   :  { %v14741_v38 = vld [vmem:[#allocation6 + $0x14d8] sm:$0xf]  ;;  %v14486_v34 = vor.u32 %v18458_v51, %v14485_v55  ;;  %7278 = vmatpush.bf16.msrb.mxu0 %v14230_v46 }
 0x612   :  { %v18522_v22 = vld [vmem:[#allocation6 + $0x14f4] sm:$0xf0] }
 0x613   :  { %v14997_v50 = vld [vmem:[#allocation6 + $0x16d8] sm:$0xf]  ;;  %v14742_v42 = vor.u32 %v18522_v22, %v14741_v38  ;;  %7292 = vmatpush.bf16.msrb.mxu1 %v14486_v34 }
 0x614   :  { %v18586_v60 = vld [vmem:[#allocation6 + $0x16f4] sm:$0xf0] }
 0x615   :  { %v14197_v43 = vld [vmem:[#allocation6 + $0x1098] sm:$0xf]  ;;  %v14998_v15 = vor.u32 %v18586_v60, %v14997_v50  ;;  %7306 = vmatpush.bf16.msrb.mxu2 %v14742_v42 }
 0x616   :  { %v18386_v18 = vld [vmem:[#allocation6 + $0x10b4] sm:$0xf0] }
 0x617   :  { %v14453_v58 = vld [vmem:[#allocation6 + $0x1298] sm:$0xf]  ;;  %v14198_v36 = vor.u32 %v18386_v18, %v14197_v43  ;;  %7320 = vmatpush.bf16.msrb.mxu3 %v14998_v15 }
 0x618   :  { %v18450_v20 = vld [vmem:[#allocation6 + $0x12b4] sm:$0xf0] }
 0x619   :  { %v14709_v29 = vld [vmem:[#allocation6 + $0x1498] sm:$0xf]  ;;  %v14454_v6 = vor.u32 %v18450_v20, %v14453_v58  ;;  %7279 = vmatpush.bf16.msrb.mxu0 %v14198_v36 }
 0x61a   :  { %v18514_v12 = vld [vmem:[#allocation6 + $0x14b4] sm:$0xf0] }
 0x61b   :  { %v14965_v32 = vld [vmem:[#allocation6 + $0x1698] sm:$0xf]  ;;  %v14710_v8 = vor.u32 %v18514_v12, %v14709_v29  ;;  %7293 = vmatpush.bf16.msrb.mxu1 %v14454_v6 }
 0x61c   :  { %v18578_v35 = vld [vmem:[#allocation6 + $0x16b4] sm:$0xf0] }
 0x61d   :  { %v14165_v33 = vld [vmem:[#allocation6 + $0x1058] sm:$0xf]  ;;  %v14966_v13 = vor.u32 %v18578_v35, %v14965_v32  ;;  %7307 = vmatpush.bf16.msrb.mxu2 %v14710_v8 }
 0x61e   :  { %v18378_v28 = vld [vmem:[#allocation6 + $0x1074] sm:$0xf0] }
 0x61f   :  { %v14421_v49 = vld [vmem:[#allocation6 + $0x1258] sm:$0xf]  ;;  %v14166_v60 = vor.u32 %v18378_v28, %v14165_v33  ;;  %7321 = vmatpush.bf16.msrb.mxu3 %v14966_v13  ;;  %v12311_v33 = vld [vmem:[#allocation6 + $0x1f8] sm:$0xf0] }
 0x620   :  { %v18442_v55 = vld [vmem:[#allocation6 + $0x1274] sm:$0xf0]  ;;  %v17974_v28 = vld [vmem:[#allocation6 + $0x3dc] sm:$0xf] }
 0x621   :  { %v14677_v51 = vld [vmem:[#allocation6 + $0x1458] sm:$0xf]  ;;  %v14422_v46 = vor.u32 %v18442_v55, %v14421_v49  ;;  %7280 = vmatpush.bf16.msrb.mxu0 %v14166_v60  ;;  %v12567_v49 = vld [vmem:[#allocation6 + $0x3f8] sm:$0xf0] }
 0x622   :  { %v18506_v38 = vld [vmem:[#allocation6 + $0x1474] sm:$0xf0]  ;;  %v12570_v24 = vor.u32 %v17974_v28, %v12567_v49  ;;  %v17966_v60 = vld [vmem:[#allocation6 + $0x39c] sm:$0xf] }
 0x623   :  { %v14933_v22 = vld [vmem:[#allocation6 + $0x1658] sm:$0xf]  ;;  %v14678_v42 = vor.u32 %v18506_v38, %v14677_v51  ;;  %7294 = vmatpush.bf16.msrb.mxu1 %v14422_v46  ;;  %v12535_v46 = vld [vmem:[#allocation6 + $0x3b8] sm:$0xf0] }
 0x624   :  { %v18570_v50 = vld [vmem:[#allocation6 + $0x1674] sm:$0xf0]  ;;  %v17886_v49 = vld [vmem:[#allocation6 + $0x11c] sm:$0xf] }
 0x625   :  { %v14133_v57 = vld [vmem:[#allocation6 + $0x1018] sm:$0xf]  ;;  %v14934_v15 = vor.u32 %v18570_v50, %v14933_v22  ;;  %7308 = vmatpush.bf16.msrb.mxu2 %v14678_v42  ;;  %v12314_v50 = vor.u32 %v17910_v5, %v12311_v33  ;;  %v12503_v5 = vld [vmem:[#allocation6 + $0x378] sm:$0xf0] }
 0x626   :  { %v18370_v34 = vld [vmem:[#allocation6 + $0x1034] sm:$0xf0] }
 0x627   :  { %v14389_v43 = vld [vmem:[#allocation6 + $0x1218] sm:$0xf]  ;;  %v14134_v36 = vor.u32 %v18370_v34, %v14133_v57  ;;  %7322 = vmatpush.bf16.msrb.mxu3 %v14934_v15  ;;  %v12279_v57 = vld [vmem:[#allocation6 + $0x1b8] sm:$0xf0]  ;;  %v20692_v34 = vpop.f32.mrf.mxu0 }
 0x628   :  { %v18434_v18 = vld [vmem:[#allocation6 + $0x1234] sm:$0xf0]  ;;  %21286 = vst [vmem:[#allocation93_spill] sm:$0xff] %v20692_v34  ;;  %v18158_v34 = vld [vmem:[#allocation6 + $0x99c] sm:$0xf] }
 0x629   :  { %v14645_v58 = vld [vmem:[#allocation6 + $0x1418] sm:$0xf]  ;;  %v14390_v6 = vor.u32 %v18434_v18, %v14389_v43  ;;  %7281 = vmatpush.bf16.msrb.mxu0 %v14134_v36 }
 0x62a   :  { %v18498_v20 = vld [vmem:[#allocation6 + $0x1434] sm:$0xf0] }
 0x62b   :  { %v14901_v29 = vld [vmem:[#allocation6 + $0x1618] sm:$0xf]  ;;  %v14646_v8 = vor.u32 %v18498_v20, %v14645_v58  ;;  %7295 = vmatpush.bf16.msrb.mxu1 %v14390_v6  ;;  %v20694_v58 = vpop.f32.mrf.mxu1  ;;  %v12282_v20 = vor.u32 %v17902_v41, %v12279_v57 }
 0x62c   :  { %v18562_v37 = vld [vmem:[#allocation6 + $0x1634] sm:$0xf0]  ;;  %21287 = vst [vmem:[#allocation94_spill] sm:$0xff] %v20694_v58  ;;  %7282 = vmatmul.bf16.vlgmr.msrb.gmra.mxu0 %v20378_v4  ;;  %v13047_v58 = vld [vmem:[#allocation6 + $0x7b8] sm:$0xf0] }
 0x62d   :  { %v15381_v12 = vld [vmem:[#allocation6 + $0x19d8] sm:$0xf]  ;;  %v14902_v13 = vor.u32 %v18562_v37, %v14901_v29  ;;  %7309 = vmatpush.bf16.msrb.mxu2 %v14646_v8  ;;  %v12538_v29 = vor.u32 %v17966_v60, %v12535_v46  ;;  %v20700_v8 = vpop.f32.mrf.mxu2 }
 0x62e   :  { %v18682_v32 = vld [vmem:[#allocation6 + $0x19f4] sm:$0xf0]  ;;  %7296 = vmatmul.bf16.vlgmr.msrb.gmra.mxu1 %v20380_v16  ;;  %21288 = vst [vmem:[#allocation95_spill] sm:$0xff] %v20700_v8  ;;  %v18094_v8 = vld [vmem:[#allocation6 + $0x79c] sm:$0xf] }
 0x62f   :  { %v15637_v35 = vld [vmem:[#allocation6 + $0x1bd8] sm:$0xf]  ;;  %v15382_v55 = vor.u32 %v18682_v32, %v15381_v12  ;;  %7323 = vmatpush.bf16.msrb.mxu3 %v14902_v13  ;;  %v17894_v32 = vld [vmem:[#allocation6 + $0x15c] sm:$0xf] }
 0x630   :  { %v18746_v14 = vld [vmem:[#allocation6 + $0x1bf4] sm:$0xf0]  ;;  %7310 = vmatmul.bf16.vlgmr.msrb.gmra.mxu2 %v20382_v40  ;;  %v12215_v13 = vld [vmem:[#allocation6 + $0x138] sm:$0xf0] }
 0x631   :  { %v15638_v51 = vor.u32 %v18746_v14, %v15637_v35  ;;  %v15349_v38 = vld [vmem:[#allocation6 + $0x1998] sm:$0xf]  ;;  %7330 = vmatpush.bf16.msra.mxu0 %v15382_v55  ;;  %7358 = vmatpush.bf16.msra.mxu2 %v12314_v50  ;;  %v12247_v35 = vld [vmem:[#allocation6 + $0x178] sm:$0xf0] }
 0x632   :  { %v18674_v22 = vld [vmem:[#allocation6 + $0x19b4] sm:$0xf0]  ;;  %v17958_v14 = vld [vmem:[#allocation6 + $0x35c] sm:$0xf]  ;;  %7324 = vmatmul.bf16.vlgmr.msrb.gmra.mxu3 %v20384_v2  ;;  %v12250_v36 = vor.u32 %v17894_v32, %v12247_v35 }
 0x633   :  { %v15605_v56 = vld [vmem:[#allocation6 + $0x1b98] sm:$0xf]  ;;  %7344 = vmatpush.bf16.msra.mxu1 %v15638_v51  ;;  %v15350_v43 = vor.u32 %v18674_v22, %v15349_v38  ;;  %7372 = vmatpush.bf16.msra.mxu3 %v12570_v24  ;;  %v12506_v6 = vor.u32 %v17958_v14, %v12503_v5  ;;  %v17950_v55 = vld [vmem:[#allocation6 + $0x31c] sm:$0xf]  ;;  %v7059_v38 = vpop.f32.mrf.mxu0  ;;  %v20702_v22 = vpop.f32.mrf.mxu3 }
 0x634   :  { %v18738_v30 = vld [vmem:[#allocation6 + $0x1bb4] sm:$0xf0]  ;;  %v12471_v51 = vld [vmem:[#allocation6 + $0x338] sm:$0xf0]  ;;  %21289 = vst [vmem:[#allocation96_spill] sm:$0xff] %v20702_v22  ;;  %v7060_v50 = vadd.f32 %v7059_v38, %v20690_v1 }
 0x635   :  { %v15606_v18 = vor.u32 %v18738_v30, %v15605_v56  ;;  %v15317_v42 = vld [vmem:[#allocation6 + $0x1958] sm:$0xf]  ;;  %7331 = vmatpush.bf16.msra.mxu0 %v15350_v43  ;;  %7359 = vmatpush.bf16.msra.mxu2 %v12282_v20  ;;  %v12183_v32 = vld [vmem:[#allocation6 + $0xf8] sm:$0xf0] }
 0x636   :  { %v18666_v15 = vld [vmem:[#allocation6 + $0x1974] sm:$0xf0]  ;;  %v17942_v35 = vld [vmem:[#allocation6 + $0x2dc] sm:$0xf] }
 0x637   :  { %v15573_v37 = vld [vmem:[#allocation6 + $0x1b58] sm:$0xf]  ;;  %7345 = vmatpush.bf16.msra.mxu1 %v15606_v18  ;;  %v15318_v56 = vor.u32 %v18666_v15, %v15317_v42  ;;  %7373 = vmatpush.bf16.msra.mxu3 %v12538_v29  ;;  %v7073_v18 = vpop.f32.mrf.mxu1  ;;  %v12218_v42 = vor.u32 %v17886_v49, %v12215_v13  ;;  %v12474_v15 = vor.u32 %v17950_v55, %v12471_v51  ;;  %v12439_v14 = vld [vmem:[#allocation6 + $0x2f8] sm:$0xf0] }
 0x638   :  { %v18730_v12 = vld [vmem:[#allocation6 + $0x1b74] sm:$0xf0]  ;;  %v12151_v49 = vld [vmem:[#allocation6 + $0xb8] sm:$0xf0] }
 0x639   :  { %v15574_v24 = vor.u32 %v18730_v12, %v15573_v37  ;;  %v15285_v41 = vld [vmem:[#allocation6 + $0x1918] sm:$0xf]  ;;  %7332 = vmatpush.bf16.msra.mxu0 %v15318_v56  ;;  %7360 = vmatpush.bf16.msra.mxu2 %v12250_v36  ;;  %v17878_v37 = vld [vmem:[#allocation6 + $0xdc] sm:$0xf]  ;;  %v7074_v12 = vadd.f32 %v7073_v18, %v7060_v50 }
 0x63a   :  { %v18658_v30 = vld [vmem:[#allocation6 + $0x1934] sm:$0xf0]  ;;  %v17934_v13 = vld [vmem:[#allocation6 + $0x29c] sm:$0xf] }
 0x63b   :  { %v15541_v33 = vld [vmem:[#allocation6 + $0x1b18] sm:$0xf]  ;;  %7346 = vmatpush.bf16.msra.mxu1 %v15574_v24  ;;  %v15286_v57 = vor.u32 %v18658_v30, %v15285_v41  ;;  %7374 = vmatpush.bf16.msra.mxu3 %v12506_v6  ;;  %v12186_v41 = vor.u32 %v17878_v37, %v12183_v32  ;;  %v12442_v30 = vor.u32 %v17942_v35, %v12439_v14  ;;  %v12407_v55 = vld [vmem:[#allocation6 + $0x2b8] sm:$0xf0]  ;;  %v7101_v38 = vpop.f32.mrf.mxu3 }
 0x63c   :  { %v18722_v28 = vld [vmem:[#allocation6 + $0x1b34] sm:$0xf0]  ;;  %v12119_v37 = vld [vmem:[#allocation6 + $0x78] sm:$0xf0] }
 0x63d   :  { %v15542_v60 = vor.u32 %v18722_v28, %v15541_v33  ;;  %v15253_v46 = vld [vmem:[#allocation6 + $0x18d8] sm:$0xf]  ;;  %7333 = vmatpush.bf16.msra.mxu0 %v15286_v57  ;;  %7361 = vmatpush.bf16.msra.mxu2 %v12218_v42  ;;  %v17870_v33 = vld [vmem:[#allocation6 + $0x9c] sm:$0xf]  ;;  %v7087_v28 = vpop.f32.mrf.mxu2  ;;  %v12410_v42 = vor.u32 %v17934_v13, %v12407_v55 }
 0x63e   :  { %v18650_v43 = vld [vmem:[#allocation6 + $0x18f4] sm:$0xf0]  ;;  %v7088_v51 = vadd.f32 %v7087_v28, %v7074_v12  ;;  %v12154_v18 = vor.u32 %v17870_v33, %v12151_v49  ;;  %v17926_v32 = vld [vmem:[#allocation6 + $0x25c] sm:$0xf] }
 0x63f   :  { %v15509_v20 = vld [vmem:[#allocation6 + $0x1ad8] sm:$0xf]  ;;  %7347 = vmatpush.bf16.msra.mxu1 %v15542_v60  ;;  %v15254_v5 = vor.u32 %v18650_v43, %v15253_v46  ;;  %7375 = vmatpush.bf16.msra.mxu3 %v12474_v15  ;;  %v12375_v35 = vld [vmem:[#allocation6 + $0x278] sm:$0xf0] }
 0x640   :  { %v18714_v29 = vld [vmem:[#allocation6 + $0x1af4] sm:$0xf0]  ;;  %v20705_v43 = vadd.f32 %v7101_v38, %v7088_v51  ;;  %v17918_v33 = vld [vmem:[#allocation6 + $0x21c] sm:$0xf] }
 0x641   :  { %v15510_v1 = vor.u32 %v18714_v29, %v15509_v20  ;;  %v15221_v56 = vld [vmem:[#allocation6 + $0x1898] sm:$0xf]  ;;  %7334 = vmatpush.bf16.msra.mxu0 %v15254_v5  ;;  %7362 = vmatpush.bf16.msra.mxu2 %v12186_v41  ;;  %v17862_v29 = vld [vmem:[#allocation6 + $0x5c] sm:$0xf] }
 0x642   :  { %v18642_v24 = vld [vmem:[#allocation6 + $0x18b4] sm:$0xf0]  ;;  %v12122_v41 = vor.u32 %v17862_v29, %v12119_v37  ;;  %v12343_v28 = vld [vmem:[#allocation6 + $0x238] sm:$0xf0] }
 0x643   :  { %v15477_v36 = vld [vmem:[#allocation6 + $0x1a98] sm:$0xf]  ;;  %7348 = vmatpush.bf16.msra.mxu1 %v15510_v1  ;;  %v15222_v50 = vor.u32 %v18642_v24, %v15221_v56  ;;  %7376 = vmatpush.bf16.msra.mxu3 %v12442_v30  ;;  %v12378_v30 = vor.u32 %v17926_v32, %v12375_v35  ;;  %v18038_v49 = vld [vmem:[#allocation6 + $0x5dc] sm:$0xf] }
 0x644   :  { %v18706_v6 = vld [vmem:[#allocation6 + $0x1ab4] sm:$0xf0]  ;;  %v12823_v13 = vld [vmem:[#allocation6 + $0x5f8] sm:$0xf0] }
 0x645   :  { %v15478_v57 = vor.u32 %v18706_v6, %v15477_v36  ;;  %v15189_v60 = vld [vmem:[#allocation6 + $0x1858] sm:$0xf]  ;;  %7335 = vmatpush.bf16.msra.mxu0 %v15222_v50  ;;  %7363 = vmatpush.bf16.msra.mxu2 %v12154_v18  ;;  %v17854_v36 = vld [vmem:[#allocation6 + $0x1c] sm:$0xf] }
 0x646   :  { %v18634_v46 = vld [vmem:[#allocation6 + $0x1874] sm:$0xf0]  ;;  %v12087_v6 = vld [vmem:[#allocation6 + $0x38] sm:$0xf0] }
 0x647   :  { %v15445_v15 = vld [vmem:[#allocation6 + $0x1a58] sm:$0xf]  ;;  %7349 = vmatpush.bf16.msra.mxu1 %v15478_v57  ;;  %v15190_v14 = vor.u32 %v18634_v46, %v15189_v60  ;;  %7377 = vmatpush.bf16.msra.mxu3 %v12410_v42  ;;  %v18102_v55 = vld [vmem:[#allocation6 + $0x7dc] sm:$0xf]  ;;  %v12090_v18 = vor.u32 %v17854_v36, %v12087_v6  ;;  %v12346_v42 = vor.u32 %v17918_v33, %v12343_v28  ;;  %v20709_v36 = vpop.f32.mrf.mxu1 }
 0x648   :  { %v18698_v20 = vld [vmem:[#allocation6 + $0x1a74] sm:$0xf0]  ;;  %v13079_v51 = vld [vmem:[#allocation6 + $0x7f8] sm:$0xf0] }
 0x649   :  { %v15157_v12 = vld [vmem:[#allocation6 + $0x1818] sm:$0xf]  ;;  %v15446_v5 = vor.u32 %v18698_v20, %v15445_v15  ;;  %v18166_v38 = vld [vmem:[#allocation6 + $0x9dc] sm:$0xf]  ;;  %7336 = vmatpush.bf16.msra.mxu0 %v15190_v14  ;;  %7364 = vmatpush.bf16.msra.mxu2 %v12122_v41  ;;  %v12826_v20 = vor.u32 %v18038_v49, %v12823_v13  ;;  %v13082_v29 = vor.u32 %v18102_v55, %v13079_v51 }
 0x64a   :  { %v18626_v1 = vld [vmem:[#allocation6 + $0x1834] sm:$0xf0]  ;;  %v13335_v60 = vld [vmem:[#allocation6 + $0x9f8] sm:$0xf0] }
 0x64b   :  { %v15413_v56 = vld [vmem:[#allocation6 + $0x1a18] sm:$0xf]  ;;  %7350 = vmatpush.bf16.msra.mxu1 %v15446_v5  ;;  %v15158_v50 = vor.u32 %v18626_v1, %v15157_v12  ;;  %v18230_v46 = vld [vmem:[#allocation6 + $0xbdc] sm:$0xf]  ;;  %7378 = vmatpush.bf16.msra.mxu3 %v12378_v30  ;;  %v13338_v35 = vor.u32 %v18166_v38, %v13335_v60  ;;  %v20707_v1 = vpop.f32.mrf.mxu0 }
 0x64c   :  { %v18690_v24 = vld [vmem:[#allocation6 + $0x1a34] sm:$0xf0]  ;;  %v13591_v15 = vld [vmem:[#allocation6 + $0xbf8] sm:$0xf0] }
 0x64d   :  { %v15414_v57 = vor.u32 %v18690_v24, %v15413_v56  ;;  %v18030_v37 = vld [vmem:[#allocation6 + $0x59c] sm:$0xf]  ;;  %v13594_v22 = vor.u32 %v18230_v46, %v13591_v15  ;;  %7337 = vmatpush.bf16.msra.mxu0 %v15158_v50  ;;  %7365 = vmatpush.bf16.msra.mxu2 %v12090_v18  ;;  %v13050_v24 = vor.u32 %v18094_v8, %v13047_v58 }
 0x64e   :  { %v12791_v32 = vld [vmem:[#allocation6 + $0x5b8] sm:$0xf0] }
 0x64f   :  { %7351 = vmatpush.bf16.msra.mxu1 %v15414_v57  ;;  %v13303_v12 = vld [vmem:[#allocation6 + $0x9b8] sm:$0xf0]  ;;  %7379 = vmatpush.bf16.msra.mxu3 %v12346_v42  ;;  %v12794_v56 = vor.u32 %v18030_v37, %v12791_v32 }
 0x650   :  { %v18222_v14 = vld [vmem:[#allocation6 + $0xb9c] sm:$0xf]  ;;  %v13306_v6 = vor.u32 %v18158_v34, %v13303_v12  ;;  %7338 = vmatmul.bf16.vlgmr.msra.gmra.mxu0 %v20347_v23  ;;  %7366 = vmatmul.bf16.vlgmr.msra.gmra.mxu2 %v20187_v52  ;;  %v7129_v12 = vpop.f32.mrf.mxu1 }
 0x651   :  { %v13559_v5 = vld [vmem:[#allocation6 + $0xbb8] sm:$0xf0]  ;;  %7386 = vmatpush.bf16.msrb.mxu0 %v12826_v20  ;;  %7414 = vmatpush.bf16.msrb.mxu2 %v13338_v35 }
 0x652   :  { %v18022_v41 = vld [vmem:[#allocation6 + $0x55c] sm:$0xf]  ;;  %v13562_v33 = vor.u32 %v18222_v14, %v13559_v5  ;;  %7352 = vmatmul.bf16.vlgmr.msra.gmra.mxu1 %v20355_v3  ;;  %7380 = vmatmul.bf16.vlgmr.msra.gmra.mxu3 %v20189_v59 }
 0x653   :  { %7400 = vmatpush.bf16.msrb.mxu1 %v13082_v29  ;;  %v12759_v30 = vld [vmem:[#allocation6 + $0x578] sm:$0xf0]  ;;  %7428 = vmatpush.bf16.msrb.mxu3 %v13594_v22  ;;  %v7115_v29 = vpop.f32.mrf.mxu0 }
 0x654   :  { %v18086_v28 = vld [vmem:[#allocation6 + $0x75c] sm:$0xf]  ;;  %v12762_v58 = vor.u32 %v18022_v41, %v12759_v30  ;;  %v7116_v52 = vadd.f32 %v7115_v29, %v20705_v43 }
 0x655   :  { %v13015_v49 = vld [vmem:[#allocation6 + $0x778] sm:$0xf0]  ;;  %7387 = vmatpush.bf16.msrb.mxu0 %v12794_v56  ;;  %7415 = vmatpush.bf16.msrb.mxu2 %v13306_v6 }
 0x656   :  { %v18150_v13 = vld [vmem:[#allocation6 + $0x95c] sm:$0xf]  ;;  %v13018_v8 = vor.u32 %v18086_v28, %v13015_v49  ;;  %v20716_v30 = vadd.f32 %v7129_v12, %v7116_v52 }
 0x657   :  { %v13271_v55 = vld [vmem:[#allocation6 + $0x978] sm:$0xf0]  ;;  %7401 = vmatpush.bf16.msrb.mxu1 %v13050_v24  ;;  %7429 = vmatpush.bf16.msrb.mxu3 %v13562_v33 }
 0x658   :  { %v18214_v51 = vld [vmem:[#allocation6 + $0xb5c] sm:$0xf]  ;;  %v13274_v50 = vor.u32 %v18150_v13, %v13271_v55 }
 0x659   :  { %v13527_v38 = vld [vmem:[#allocation6 + $0xb78] sm:$0xf0]  ;;  %7388 = vmatpush.bf16.msrb.mxu0 %v12762_v58 }
 0x65a   :  { %v18014_v34 = vld [vmem:[#allocation6 + $0x51c] sm:$0xf]  ;;  %v13530_v57 = vor.u32 %v18214_v51, %v13527_v38  ;;  %7416 = vmatpush.bf16.msrb.mxu2 %v13274_v50 }
 0x65b   :  { %v12727_v22 = vld [vmem:[#allocation6 + $0x538] sm:$0xf0]  ;;  %7402 = vmatpush.bf16.msrb.mxu1 %v13018_v8 }
 0x65c   :  { %v18078_v60 = vld [vmem:[#allocation6 + $0x71c] sm:$0xf]  ;;  %v12730_v59 = vor.u32 %v18014_v34, %v12727_v22  ;;  %7430 = vmatpush.bf16.msrb.mxu3 %v13530_v57 }
 0x65d   :  { %v12983_v46 = vld [vmem:[#allocation6 + $0x738] sm:$0xf0] }
 0x65e   :  { %v18142_v15 = vld [vmem:[#allocation6 + $0x91c] sm:$0xf]  ;;  %v12986_v37 = vor.u32 %v18078_v60, %v12983_v46  ;;  %7389 = vmatpush.bf16.msrb.mxu0 %v12730_v59 }
 0x65f   :  { %v13239_v18 = vld [vmem:[#allocation6 + $0x938] sm:$0xf0] }
 0x660   :  { %v18206_v42 = vld [vmem:[#allocation6 + $0xb1c] sm:$0xf]  ;;  %v13242_v14 = vor.u32 %v18142_v15, %v13239_v18  ;;  %7403 = vmatpush.bf16.msrb.mxu1 %v12986_v37 }
 0x661   :  { %v13495_v20 = vld [vmem:[#allocation6 + $0xb38] sm:$0xf0] }
 0x662   :  { %v18006_v32 = vld [vmem:[#allocation6 + $0x4dc] sm:$0xf]  ;;  %v13498_v5 = vor.u32 %v18206_v42, %v13495_v20  ;;  %7417 = vmatpush.bf16.msrb.mxu2 %v13242_v14 }
 0x663   :  { %v12695_v35 = vld [vmem:[#allocation6 + $0x4f8] sm:$0xf0] }
 0x664   :  { %v18070_v56 = vld [vmem:[#allocation6 + $0x6dc] sm:$0xf]  ;;  %v12698_v43 = vor.u32 %v18006_v32, %v12695_v35  ;;  %7431 = vmatpush.bf16.msrb.mxu3 %v13498_v5 }
 0x665   :  { %v12951_v24 = vld [vmem:[#allocation6 + $0x6f8] sm:$0xf0] }
 0x666   :  { %v18134_v41 = vld [vmem:[#allocation6 + $0x8dc] sm:$0xf]  ;;  %v12954_v49 = vor.u32 %v18070_v56, %v12951_v24  ;;  %7390 = vmatpush.bf16.msrb.mxu0 %v12698_v43 }
 0x667   :  { %v13207_v6 = vld [vmem:[#allocation6 + $0x8f8] sm:$0xf0] }
 0x668   :  { %v18198_v33 = vld [vmem:[#allocation6 + $0xadc] sm:$0xf]  ;;  %v13210_v51 = vor.u32 %v18134_v41, %v13207_v6  ;;  %7404 = vmatpush.bf16.msrb.mxu1 %v12954_v49 }
 0x669   :  { %v13463_v28 = vld [vmem:[#allocation6 + $0xaf8] sm:$0xf0] }
 0x66a   :  { %v17998_v13 = vld [vmem:[#allocation6 + $0x49c] sm:$0xf]  ;;  %v13466_v38 = vor.u32 %v18198_v33, %v13463_v28  ;;  %7418 = vmatpush.bf16.msrb.mxu2 %v13210_v51 }
 0x66b   :  { %v12663_v55 = vld [vmem:[#allocation6 + $0x4b8] sm:$0xf0] }
 0x66c   :  { %v18062_v58 = vld [vmem:[#allocation6 + $0x69c] sm:$0xf]  ;;  %v12666_v60 = vor.u32 %v17998_v13, %v12663_v55  ;;  %7432 = vmatpush.bf16.msrb.mxu3 %v13466_v38 }
 0x66d   :  { %v12919_v8 = vld [vmem:[#allocation6 + $0x6b8] sm:$0xf0] }
 0x66e   :  { %v18126_v34 = vld [vmem:[#allocation6 + $0x89c] sm:$0xf]  ;;  %v12922_v46 = vor.u32 %v18062_v58, %v12919_v8  ;;  %7391 = vmatpush.bf16.msrb.mxu0 %v12666_v60 }
 0x66f   :  { %v13175_v22 = vld [vmem:[#allocation6 + $0x8b8] sm:$0xf0] }
 0x670   :  { %v18190_v50 = vld [vmem:[#allocation6 + $0xa9c] sm:$0xf]  ;;  %v13178_v42 = vor.u32 %v18126_v34, %v13175_v22  ;;  %7405 = vmatpush.bf16.msrb.mxu1 %v12922_v46 }
 0x671   :  { %v13431_v57 = vld [vmem:[#allocation6 + $0xab8] sm:$0xf0] }
 0x672   :  { %v17990_v15 = vld [vmem:[#allocation6 + $0x45c] sm:$0xf]  ;;  %v13434_v20 = vor.u32 %v18190_v50, %v13431_v57  ;;  %7419 = vmatpush.bf16.msrb.mxu2 %v13178_v42 }
 0x673   :  { %v12631_v18 = vld [vmem:[#allocation6 + $0x478] sm:$0xf0] }
 0x674   :  { %v18054_v29 = vld [vmem:[#allocation6 + $0x65c] sm:$0xf]  ;;  %v12634_v14 = vor.u32 %v17990_v15, %v12631_v18  ;;  %7433 = vmatpush.bf16.msrb.mxu3 %v13434_v20 }
 0x675   :  { %v12887_v52 = vld [vmem:[#allocation6 + $0x678] sm:$0xf0] }
 0x676   :  { %v18118_v59 = vld [vmem:[#allocation6 + $0x85c] sm:$0xf]  ;;  %v12890_v5 = vor.u32 %v18054_v29, %v12887_v52  ;;  %7392 = vmatpush.bf16.msrb.mxu0 %v12634_v14 }
 0x677   :  { %v13143_v37 = vld [vmem:[#allocation6 + $0x878] sm:$0xf0] }
 0x678   :  { %v18182_v32 = vld [vmem:[#allocation6 + $0xa5c] sm:$0xf]  ;;  %v13146_v6 = vor.u32 %v18118_v59, %v13143_v37  ;;  %7406 = vmatpush.bf16.msrb.mxu1 %v12890_v5 }
 0x679   :  { %v13399_v35 = vld [vmem:[#allocation6 + $0xa78] sm:$0xf0] }
 0x67a   :  { %v17982_v12 = vld [vmem:[#allocation6 + $0x41c] sm:$0xf]  ;;  %v13402_v33 = vor.u32 %v18182_v32, %v13399_v35  ;;  %7420 = vmatpush.bf16.msrb.mxu2 %v13146_v6 }
 0x67b   :  { %v12599_v56 = vld [vmem:[#allocation6 + $0x438] sm:$0xf0] }
 0x67c   :  { %v18046_v24 = vld [vmem:[#allocation6 + $0x61c] sm:$0xf]  ;;  %v12602_v34 = vor.u32 %v17982_v12, %v12599_v56  ;;  %7434 = vmatpush.bf16.msrb.mxu3 %v13402_v33 }
 0x67d   :  { %v12855_v41 = vld [vmem:[#allocation6 + $0x638] sm:$0xf0] }
 0x67e   :  { %v18110_v28 = vld [vmem:[#allocation6 + $0x81c] sm:$0xf]  ;;  %v12858_v22 = vor.u32 %v18046_v24, %v12855_v41  ;;  %7393 = vmatpush.bf16.msrb.mxu0 %v12602_v34 }
 0x67f   :  { %v13111_v43 = vld [vmem:[#allocation6 + $0x838] sm:$0xf0] }
 0x680   :  { %v18174_v49 = vld [vmem:[#allocation6 + $0xa1c] sm:$0xf]  ;;  %v13114_v46 = vor.u32 %v18110_v28, %v13111_v43  ;;  %7407 = vmatpush.bf16.msrb.mxu1 %v12858_v22 }
 0x681   :  { %v13367_v13 = vld [vmem:[#allocation6 + $0xa38] sm:$0xf0]  ;;  %7394 = vmatmul.bf16.vlgmr.msrb.gmra.mxu0 %v20191_v62 }
 0x682   :  { %v18294_v55 = vld [vmem:[#allocation6 + $0xddc] sm:$0xf]  ;;  %v13370_v15 = vor.u32 %v18174_v49, %v13367_v13  ;;  %7421 = vmatpush.bf16.msrb.mxu2 %v13114_v46 }
 0x683   :  { %v13847_v51 = vld [vmem:[#allocation6 + $0xdf8] sm:$0xf0]  ;;  %7408 = vmatmul.bf16.vlgmr.msrb.gmra.mxu1 %v20193_v48 }
 0x684   :  { %v18358_v38 = vld [vmem:[#allocation6 + $0xfdc] sm:$0xf]  ;;  %v13850_v18 = vor.u32 %v18294_v55, %v13847_v51  ;;  %7435 = vmatpush.bf16.msrb.mxu3 %v13370_v15 }
 0x685   :  { %v14103_v58 = vld [vmem:[#allocation6 + $0xff8] sm:$0xf0]  ;;  %7422 = vmatmul.bf16.vlgmr.msrb.gmra.mxu2 %v20284_v9 }
 0x686   :  { %v18422_v8 = vld [vmem:[#allocation6 + $0x11dc] sm:$0xf]  ;;  %v14106_v42 = vor.u32 %v18358_v38, %v14103_v58  ;;  %7442 = vmatpush.bf16.msra.mxu0 %v13850_v18 }
 0x687   :  { %v14359_v50 = vld [vmem:[#allocation6 + $0x11f8] sm:$0xf0]  ;;  %7436 = vmatmul.bf16.vlgmr.msrb.gmra.mxu3 %v20286_v63 }
 0x688   :  { %v18486_v57 = vld [vmem:[#allocation6 + $0x13dc] sm:$0xf]  ;;  %v14362_v52 = vor.u32 %v18422_v8, %v14359_v50  ;;  %7456 = vmatpush.bf16.msra.mxu1 %v14106_v42 }
 0x689   :  { %v14615_v60 = vld [vmem:[#allocation6 + $0x13f8] sm:$0xf0] }
 0x68a   :  { %v18286_v20 = vld [vmem:[#allocation6 + $0xd9c] sm:$0xf]  ;;  %v14618_v59 = vor.u32 %v18486_v57, %v14615_v60  ;;  %7470 = vmatpush.bf16.msra.mxu2 %v14362_v52 }
 0x68b   :  { %v13815_v29 = vld [vmem:[#allocation6 + $0xdb8] sm:$0xf0] }
 0x68c   :  { %v18350_v37 = vld [vmem:[#allocation6 + $0xf9c] sm:$0xf]  ;;  %v13818_v56 = vor.u32 %v18286_v20, %v13815_v29  ;;  %7484 = vmatpush.bf16.msra.mxu3 %v14618_v59 }
 0x68d   :  { %v14071_v32 = vld [vmem:[#allocation6 + $0xfb8] sm:$0xf0] }
 0x68e   :  { %v18414_v35 = vld [vmem:[#allocation6 + $0x119c] sm:$0xf]  ;;  %v14074_v24 = vor.u32 %v18350_v37, %v14071_v32  ;;  %7443 = vmatpush.bf16.msra.mxu0 %v13818_v56 }
 0x68f   :  { %v14327_v12 = vld [vmem:[#allocation6 + $0x11b8] sm:$0xf0] }
 0x690   :  { %v18478_v14 = vld [vmem:[#allocation6 + $0x139c] sm:$0xf]  ;;  %v14330_v33 = vor.u32 %v18414_v35, %v14327_v12  ;;  %7457 = vmatpush.bf16.msra.mxu1 %v14074_v24 }
 0x691   :  { %v14583_v5 = vld [vmem:[#allocation6 + $0x13b8] sm:$0xf0] }
 0x692   :  { %v18278_v41 = vld [vmem:[#allocation6 + $0xd5c] sm:$0xf]  ;;  %v14586_v28 = vor.u32 %v18478_v14, %v14583_v5  ;;  %7471 = vmatpush.bf16.msra.mxu2 %v14330_v33 }
 0x693   :  { %v13783_v6 = vld [vmem:[#allocation6 + $0xd78] sm:$0xf0] }
 0x694   :  { %v18342_v43 = vld [vmem:[#allocation6 + $0xf5c] sm:$0xf]  ;;  %v13786_v58 = vor.u32 %v18278_v41, %v13783_v6  ;;  %7485 = vmatpush.bf16.msra.mxu3 %v14586_v28 }
 0x695   :  { %v14039_v49 = vld [vmem:[#allocation6 + $0xf78] sm:$0xf0] }
 0x696   :  { %v18406_v13 = vld [vmem:[#allocation6 + $0x115c] sm:$0xf]  ;;  %v14042_v8 = vor.u32 %v18342_v43, %v14039_v49  ;;  %7444 = vmatpush.bf16.msra.mxu0 %v13786_v58 }
 0x697   :  { %v14295_v55 = vld [vmem:[#allocation6 + $0x1178] sm:$0xf0] }
 0x698   :  { %v18470_v51 = vld [vmem:[#allocation6 + $0x135c] sm:$0xf]  ;;  %v14298_v50 = vor.u32 %v18406_v13, %v14295_v55  ;;  %7458 = vmatpush.bf16.msra.mxu1 %v14042_v8 }
 0x699   :  { %v14551_v38 = vld [vmem:[#allocation6 + $0x1378] sm:$0xf0] }
 0x69a   :  { %v18270_v34 = vld [vmem:[#allocation6 + $0xd1c] sm:$0xf]  ;;  %v14554_v57 = vor.u32 %v18470_v51, %v14551_v38  ;;  %7472 = vmatpush.bf16.msra.mxu2 %v14298_v50 }
 0x69b   :  { %v13751_v22 = vld [vmem:[#allocation6 + $0xd38] sm:$0xf0] }
 0x69c   :  { %v18334_v62 = vld [vmem:[#allocation6 + $0xf1c] sm:$0xf]  ;;  %v13754_v9 = vor.u32 %v18270_v34, %v13751_v22  ;;  %7486 = vmatpush.bf16.msra.mxu3 %v14554_v57 }
 0x69d   :  { %v14007_v60 = vld [vmem:[#allocation6 + $0xf38] sm:$0xf0] }
 0x69e   :  { %v18398_v48 = vld [vmem:[#allocation6 + $0x111c] sm:$0xf]  ;;  %v14010_v63 = vor.u32 %v18334_v62, %v14007_v60  ;;  %7445 = vmatpush.bf16.msra.mxu0 %v13754_v9 }
 0x69f   :  { %v14263_v46 = vld [vmem:[#allocation6 + $0x1138] sm:$0xf0] }
 0x6a0   :  { %v18462_v15 = vld [vmem:[#allocation6 + $0x131c] sm:$0xf]  ;;  %v14266_v29 = vor.u32 %v18398_v48, %v14263_v46  ;;  %7459 = vmatpush.bf16.msra.mxu1 %v14010_v63 }
 0x6a1   :  { %v14519_v18 = vld [vmem:[#allocation6 + $0x1338] sm:$0xf0] }
 0x6a2   :  { %v18262_v42 = vld [vmem:[#allocation6 + $0xcdc] sm:$0xf]  ;;  %v14522_v52 = vor.u32 %v18462_v15, %v14519_v18  ;;  %7473 = vmatpush.bf16.msra.mxu2 %v14266_v29 }
 0x6a3   :  { %v13719_v20 = vld [vmem:[#allocation6 + $0xcf8] sm:$0xf0] }
 0x6a4   :  { %v18326_v59 = vld [vmem:[#allocation6 + $0xedc] sm:$0xf]  ;;  %v13722_v5 = vor.u32 %v18262_v42, %v13719_v20  ;;  %7487 = vmatpush.bf16.msra.mxu3 %v14522_v52 }
 0x6a5   :  { %v13975_v37 = vld [vmem:[#allocation6 + $0xef8] sm:$0xf0] }
 0x6a6   :  { %v18390_v32 = vld [vmem:[#allocation6 + $0x10dc] sm:$0xf]  ;;  %v13978_v56 = vor.u32 %v18326_v59, %v13975_v37  ;;  %7446 = vmatpush.bf16.msra.mxu0 %v13722_v5 }
 0x6a7   :  { %v14231_v35 = vld [vmem:[#allocation6 + $0x10f8] sm:$0xf0] }
 0x6a8   :  { %v18454_v12 = vld [vmem:[#allocation6 + $0x12dc] sm:$0xf]  ;;  %v14234_v6 = vor.u32 %v18390_v32, %v14231_v35  ;;  %7460 = vmatpush.bf16.msra.mxu1 %v13978_v56 }
 0x6a9   :  { %v14487_v14 = vld [vmem:[#allocation6 + $0x12f8] sm:$0xf0] }
 0x6aa   :  { %v18254_v24 = vld [vmem:[#allocation6 + $0xc9c] sm:$0xf]  ;;  %v14490_v33 = vor.u32 %v18454_v12, %v14487_v14  ;;  %7474 = vmatpush.bf16.msra.mxu2 %v14234_v6 }
 0x6ab   :  { %v13687_v41 = vld [vmem:[#allocation6 + $0xcb8] sm:$0xf0] }
 0x6ac   :  { %v18318_v28 = vld [vmem:[#allocation6 + $0xe9c] sm:$0xf]  ;;  %v13690_v38 = vor.u32 %v18254_v24, %v13687_v41  ;;  %7488 = vmatpush.bf16.msra.mxu3 %v14490_v33 }
 0x6ad   :  { %v13943_v43 = vld [vmem:[#allocation6 + $0xeb8] sm:$0xf0] }
 0x6ae   :  { %v18382_v49 = vld [vmem:[#allocation6 + $0x109c] sm:$0xf]  ;;  %v13946_v58 = vor.u32 %v18318_v28, %v13943_v43  ;;  %7447 = vmatpush.bf16.msra.mxu0 %v13690_v38 }
 0x6af   :  { %v14199_v13 = vld [vmem:[#allocation6 + $0x10b8] sm:$0xf0] }
 0x6b0   :  { %v18446_v55 = vld [vmem:[#allocation6 + $0x129c] sm:$0xf]  ;;  %v14202_v22 = vor.u32 %v18382_v49, %v14199_v13  ;;  %7461 = vmatpush.bf16.msra.mxu1 %v13946_v58 }
 0x6b1   :  { %v14455_v51 = vld [vmem:[#allocation6 + $0x12b8] sm:$0xf0] }
 0x6b2   :  { %v18246_v8 = vld [vmem:[#allocation6 + $0xc5c] sm:$0xf]  ;;  %v14458_v50 = vor.u32 %v18446_v55, %v14455_v51  ;;  %7475 = vmatpush.bf16.msra.mxu2 %v14202_v22  ;;  %v21290_v51 = vperm.slane %v20398_v39, 0 }
 0x6b3   :  { %v13655_v34 = vld [vmem:[#allocation6 + $0xc78] sm:$0xf0] }
 0x6b4   :  { %v18310_v57 = vld [vmem:[#allocation6 + $0xe5c] sm:$0xf]  ;;  %v13658_v9 = vor.u32 %v18246_v8, %v13655_v34  ;;  %7489 = vmatpush.bf16.msra.mxu3 %v14458_v50  ;;  %v5998_v38 = vadd.f32 %v20407_v44, %v21290_v51  ;;  %v20725_v50 = vpop.f32.mrf.mxu2 }
 0x6b5   :  { %v13911_v62 = vld [vmem:[#allocation6 + $0xe78] sm:$0xf0] }
 0x6b6   :  { %v18374_v60 = vld [vmem:[#allocation6 + $0x105c] sm:$0xf]  ;;  %v13914_v63 = vor.u32 %v18310_v57, %v13911_v62  ;;  %7448 = vmatpush.bf16.msra.mxu0 %v13658_v9  ;;  %v6012_v44 = vadd.f32 %v20409_v17, %v5998_v38 }
 0x6b7   :  { %v14167_v48 = vld [vmem:[#allocation6 + $0x1078] sm:$0xf0] }
 0x6b8   :  { %v18438_v46 = vld [vmem:[#allocation6 + $0x125c] sm:$0xf]  ;;  %v14170_v52 = vor.u32 %v18374_v60, %v14167_v48  ;;  %7462 = vmatpush.bf16.msra.mxu1 %v13914_v63 }
 0x6b9   :  { %v14423_v15 = vld [vmem:[#allocation6 + $0x1278] sm:$0xf0] }
 0x6ba   :  { %v18238_v18 = vld [vmem:[#allocation6 + $0xc1c] sm:$0xf]  ;;  %v14426_v59 = vor.u32 %v18438_v46, %v14423_v15  ;;  %7476 = vmatpush.bf16.msra.mxu2 %v14170_v52  ;;  %v21291_v52 = vperm.slane %v20398_v39, 1 }
 0x6bb   :  { %v13623_v42 = vld [vmem:[#allocation6 + $0xc38] sm:$0xf0] }
 0x6bc   :  { %v18302_v20 = vld [vmem:[#allocation6 + $0xe1c] sm:$0xf]  ;;  %v13626_v6 = vor.u32 %v18238_v18, %v13623_v42  ;;  %7490 = vmatpush.bf16.msra.mxu3 %v14426_v59  ;;  %v6194_v59 = vadd.f32 %v20457_v26, %v21291_v52 }
 0x6bd   :  { %v13879_v29 = vld [vmem:[#allocation6 + $0xe38] sm:$0xf0] }
 0x6be   :  { %v18366_v37 = vld [vmem:[#allocation6 + $0x101c] sm:$0xf]  ;;  %v13882_v33 = vor.u32 %v18302_v20, %v13879_v29  ;;  %7449 = vmatpush.bf16.msra.mxu0 %v13626_v6 }
 0x6bf   :  { %v14135_v32 = vld [vmem:[#allocation6 + $0x1038] sm:$0xf0] }
 0x6c0   :  { %v18430_v35 = vld [vmem:[#allocation6 + $0x121c] sm:$0xf]  ;;  %v14138_v13 = vor.u32 %v18366_v37, %v14135_v32  ;;  %7463 = vmatpush.bf16.msra.mxu1 %v13882_v33 }
 0x6c1   :  { %v14391_v12 = vld [vmem:[#allocation6 + $0x1238] sm:$0xf0]  ;;  %7450 = vmatmul.bf16.vlgmr.msra.gmra.mxu0 %v20293_v19  ;;  %v6208_v19 = vadd.f32 %v20459_v45, %v6194_v59 }
 0x6c2   :  { %v18550_v14 = vld [vmem:[#allocation6 + $0x15dc] sm:$0xf]  ;;  %v14394_v55 = vor.u32 %v18430_v35, %v14391_v12  ;;  %7477 = vmatpush.bf16.msra.mxu2 %v14138_v13 }
 0x6c3   :  { %v14871_v5 = vld [vmem:[#allocation6 + $0x15f8] sm:$0xf0]  ;;  %7464 = vmatmul.bf16.vlgmr.msra.gmra.mxu1 %v20295_v61  ;;  %v20739_v61 = vpop.f32.mrf.mxu2 }
 0x6c4   :  { %v18614_v56 = vld [vmem:[#allocation6 + $0x17dc] sm:$0xf]  ;;  %v14874_v58 = vor.u32 %v18550_v14, %v14871_v5  ;;  %7491 = vmatpush.bf16.msra.mxu3 %v14394_v55 }
 0x6c5   :  { %v15127_v24 = vld [vmem:[#allocation6 + $0x17f8] sm:$0xf0]  ;;  %7478 = vmatmul.bf16.vlgmr.msra.gmra.mxu2 %v20378_v4 }
 0x6c6   :  { %v18678_v41 = vld [vmem:[#allocation6 + $0x19dc] sm:$0xf]  ;;  %v15130_v8 = vor.u32 %v18614_v56, %v15127_v24  ;;  %7498 = vmatpush.bf16.msrb.mxu0 %v14874_v58  ;;  %v6026_v24 = vadd.f32 %v20411_v47, %v6012_v44 }
 0x6c7   :  { %v15383_v28 = vld [vmem:[#allocation6 + $0x19f8] sm:$0xf0]  ;;  %7492 = vmatmul.bf16.vlgmr.msra.gmra.mxu3 %v20380_v16  ;;  %v21292_v16 = vperm.slane %v20502_v11, 2 }
 0x6c8   :  { %v18742_v43 = vld [vmem:[#allocation6 + $0x1bdc] sm:$0xf]  ;;  %v15386_v57 = vor.u32 %v18678_v41, %v15383_v28  ;;  %7512 = vmatpush.bf16.msrb.mxu1 %v15130_v8  ;;  %v20734_v41 = vpop.f32.mrf.mxu3  ;;  %v20741_v28 = vpop.f32.mrf.mxu0  ;;  %v6040_v45 = vadd.f32 %v20413_v53, %v6026_v24  ;;  %v6222_v8 = vadd.f32 %v20464_v21, %v6208_v19  ;;  %v21297_v19 = vld [vmem:[#allocation62_spill] sm:$0xff] }
 0x6c9   :  { %v15639_v49 = vld [vmem:[#allocation6 + $0x1bf8] sm:$0xf0]  ;;  %v6390_v55 = vadd.f32 %v20513_v0, %v21292_v16 }
 0x6ca   :  { %v18542_v34 = vld [vmem:[#allocation6 + $0x159c] sm:$0xf]  ;;  %v15642_v62 = vor.u32 %v18742_v43, %v15639_v49  ;;  %7526 = vmatpush.bf16.msrb.mxu2 %v15386_v57 }
 0x6cb   :  { %v14839_v22 = vld [vmem:[#allocation6 + $0x15b8] sm:$0xf0]  ;;  %v6404_v53 = vadd.f32 %v20515_v27, %v6390_v55 }
 0x6cc   :  { %v18606_v60 = vld [vmem:[#allocation6 + $0x179c] sm:$0xf]  ;;  %v14842_v63 = vor.u32 %v18542_v34, %v14839_v22  ;;  %7540 = vmatpush.bf16.msrb.mxu3 %v15642_v62 }
 0x6cd   :  { %v15095_v48 = vld [vmem:[#allocation6 + $0x17b8] sm:$0xf0]  ;;  %v6418_v52 = vadd.f32 %v20521_v7, %v6404_v53 }
 0x6ce   :  { %v18670_v46 = vld [vmem:[#allocation6 + $0x199c] sm:$0xf]  ;;  %v15098_v42 = vor.u32 %v18606_v60, %v15095_v48  ;;  %7499 = vmatpush.bf16.msrb.mxu0 %v14842_v63  ;;  %v6054_v60 = vadd.f32 %v20415_v10, %v6040_v45  ;;  %v20749_v48 = vpop.f32.mrf.mxu1 }
 0x6cf   :  { %v15351_v15 = vld [vmem:[#allocation6 + $0x19b8] sm:$0xf0] }
 0x6d0   :  { %v18734_v18 = vld [vmem:[#allocation6 + $0x1b9c] sm:$0xf]  ;;  %v15354_v37 = vor.u32 %v18670_v46, %v15351_v15  ;;  %7513 = vmatpush.bf16.msrb.mxu1 %v15098_v42  ;;  %v6236_v42 = vadd.f32 %v20466_v31, %v6222_v8 }
 0x6d1   :  { %v15607_v9 = vld [vmem:[#allocation6 + $0x1bb8] sm:$0xf0] }
 0x6d2   :  { %v18534_v20 = vld [vmem:[#allocation6 + $0x155c] sm:$0xf]  ;;  %v15610_v32 = vor.u32 %v18734_v18, %v15607_v9  ;;  %7527 = vmatpush.bf16.msrb.mxu2 %v15354_v37 }
 0x6d3   :  { %v14807_v29 = vld [vmem:[#allocation6 + $0x1578] sm:$0xf0] }
 0x6d4   :  { %v18598_v35 = vld [vmem:[#allocation6 + $0x175c] sm:$0xf]  ;;  %v14810_v39 = vor.u32 %v18534_v20, %v14807_v29  ;;  %7541 = vmatpush.bf16.msrb.mxu3 %v15610_v32  ;;  %v21293_v20 = vperm.slane %v20502_v11, 3  ;;  %v20756_v29 = vpop.f32.mrf.mxu3 }
 0x6d5   :  { %v15063_v12 = vld [vmem:[#allocation6 + $0x1778] sm:$0xf0] }
 0x6d6   :  { %v18662_v14 = vld [vmem:[#allocation6 + $0x195c] sm:$0xf]  ;;  %v15066_v26 = vor.u32 %v18598_v35, %v15063_v12  ;;  %7500 = vmatpush.bf16.msrb.mxu0 %v14810_v39  ;;  %v6586_v10 = vadd.f32 %v20571_v25, %v21293_v20  ;;  %v20769_v45 = vpop.f32.mrf.mxu1 }
 0x6d7   :  { %v15319_v17 = vld [vmem:[#allocation6 + $0x1978] sm:$0xf0] }
 0x6d8   :  { %v18726_v5 = vld [vmem:[#allocation6 + $0x1b5c] sm:$0xf]  ;;  %v15322_v47 = vor.u32 %v18662_v14, %v15319_v17  ;;  %7514 = vmatpush.bf16.msrb.mxu1 %v15066_v26  ;;  %v20760_v14 = vpop.f32.mrf.mxu0 }
 0x6d9   :  { %v15575_v56 = vld [vmem:[#allocation6 + $0x1b78] sm:$0xf0] }
 0x6da   :  { %v18526_v6 = vld [vmem:[#allocation6 + $0x151c] sm:$0xf]  ;;  %v15578_v43 = vor.u32 %v18726_v5, %v15575_v56  ;;  %7528 = vmatpush.bf16.msrb.mxu2 %v15322_v47  ;;  %v21295_v56 = vld [vmem:[#allocation39_spill] sm:$0xff]  ;;  %v6600_v47 = vadd.f32 %v21297_v19, %v6586_v10 }
 0x6db   :  { %v14775_v33 = vld [vmem:[#allocation6 + $0x1538] sm:$0xf0]  ;;  %v6250_v24 = vadd.f32 %v21295_v56, %v6236_v42  ;;  %v21305_v56 = vld [vmem:[#allocation52_spill] sm:$0xff] }
 0x6dc   :  { %v18590_v49 = vld [vmem:[#allocation6 + $0x171c] sm:$0xf]  ;;  %v14778_v34 = vor.u32 %v18526_v6, %v14775_v33  ;;  %7542 = vmatpush.bf16.msrb.mxu3 %v15578_v43  ;;  %v21296_v6 = vld [vmem:[#allocation30_spill] sm:$0xff]  ;;  %v20765_v43 = vpop.f32.mrf.mxu2 }
 0x6dd   :  { %v15031_v4 = vld [vmem:[#allocation6 + $0x1738] sm:$0xf0] }
 0x6de   :  { %v18654_v13 = vld [vmem:[#allocation6 + $0x191c] sm:$0xf]  ;;  %v15034_v22 = vor.u32 %v18590_v49, %v15031_v4  ;;  %7501 = vmatpush.bf16.msrb.mxu0 %v14778_v34  ;;  %v21298_v49 = vld [vmem:[#allocation50_spill] sm:$0xff] }
 0x6df   :  { %v15287_v51 = vld [vmem:[#allocation6 + $0x1938] sm:$0xf0]  ;;  %v6432_v4 = vadd.f32 %v21298_v49, %v6418_v52 }
 0x6e0   :  { %v18718_v38 = vld [vmem:[#allocation6 + $0x1b1c] sm:$0xf]  ;;  %v15290_v0 = vor.u32 %v18654_v13, %v15287_v51  ;;  %7515 = vmatpush.bf16.msrb.mxu1 %v15034_v22 }
 0x6e1   :  { %v15543_v58 = vld [vmem:[#allocation6 + $0x1b38] sm:$0xf0] }
 0x6e2   :  { %v18518_v57 = vld [vmem:[#allocation6 + $0x14dc] sm:$0xf]  ;;  %v15546_v46 = vor.u32 %v18718_v38, %v15543_v58  ;;  %7529 = vmatpush.bf16.msrb.mxu2 %v15290_v0  ;;  %v21299_v38 = vld [vmem:[#allocation63_spill] sm:$0xff] }
 0x6e3   :  { %v14743_v62 = vld [vmem:[#allocation6 + $0x14f8] sm:$0xf0]  ;;  %v6614_v58 = vadd.f32 %v21299_v38, %v6600_v47 }
 0x6e4   :  { %v18582_v15 = vld [vmem:[#allocation6 + $0x16dc] sm:$0xf]  ;;  %v14746_v59 = vor.u32 %v18518_v57, %v14743_v62  ;;  %7543 = vmatpush.bf16.msrb.mxu3 %v15546_v46  ;;  %v21301_v46 = vld [vmem:[#allocation51_spill] sm:$0xff]  ;;  %v20781_v49 = vpop.f32.mrf.mxu2 }
 0x6e5   :  { %v14999_v18 = vld [vmem:[#allocation6 + $0x16f8] sm:$0xf0] }
 0x6e6   :  { %v18646_v9 = vld [vmem:[#allocation6 + $0x18dc] sm:$0xf]  ;;  %v15002_v37 = vor.u32 %v18582_v15, %v14999_v18  ;;  %7502 = vmatpush.bf16.msrb.mxu0 %v14746_v59  ;;  %v6446_v15 = vadd.f32 %v21301_v46, %v6432_v4  ;;  %v20783_v4 = vpop.f32.mrf.mxu0 }
 0x6e7   :  { %v15255_v21 = vld [vmem:[#allocation6 + $0x18f8] sm:$0xf0] }
 0x6e8   :  { %v18710_v44 = vld [vmem:[#allocation6 + $0x1adc] sm:$0xf]  ;;  %v15258_v31 = vor.u32 %v18646_v9, %v15255_v21  ;;  %7516 = vmatpush.bf16.msrb.mxu1 %v15002_v37  ;;  %v21302_v21 = vld [vmem:[#allocation31_spill] sm:$0xff] }
 0x6e9   :  { %v15511_v63 = vld [vmem:[#allocation6 + $0x1af8] sm:$0xf0] }
 0x6ea   :  { %v18510_v32 = vld [vmem:[#allocation6 + $0x149c] sm:$0xf]  ;;  %v15514_v11 = vor.u32 %v18710_v44, %v15511_v63  ;;  %7530 = vmatpush.bf16.msrb.mxu2 %v15258_v31 }
 0x6eb   :  { %v14711_v35 = vld [vmem:[#allocation6 + $0x14b8] sm:$0xf0] }
 0x6ec   :  { %v21294_v27 = vld [vmem:[#allocation29_spill] sm:$0xff]  ;;  %v14714_v13 = vor.u32 %v18510_v32, %v14711_v35  ;;  %7544 = vmatpush.bf16.msrb.mxu3 %v15514_v11  ;;  %v21304_v35 = vld [vmem:[#allocation64_spill] sm:$0xff] }
 0x6ed   :  { %v6068_v12 = vadd.f32 %v21294_v27, %v6054_v60  ;;  %v18574_v17 = vld [vmem:[#allocation6 + $0x169c] sm:$0xf]  ;;  %v21300_v60 = vld [vmem:[#allocation40_spill] sm:$0xff]  ;;  %v6628_v27 = vadd.f32 %v21304_v35, %v6614_v58  ;;  %v15997_v35 = vld [vmem:[#allocation9 + $0x2c0] sm:$0xf] }
 0x6ee   :  { %v14967_v25 = vld [vmem:[#allocation6 + $0x16b8] sm:$0xf0]  ;;  %v6264_v0 = vadd.f32 %v21300_v60, %v6250_v24  ;;  %7503 = vmatpush.bf16.msrb.mxu0 %v14714_v13  ;;  %v6460_v24 = vadd.f32 %v21305_v56, %v6446_v15  ;;  %v15885_v13 = vld [vmem:[#allocation9 + $0x1e0] sm:$0xf] }
 0x6ef   :  { %v18638_v5 = vld [vmem:[#allocation6 + $0x189c] sm:$0xf]  ;;  %v6082_v33 = vadd.f32 %v21296_v6, %v6068_v12  ;;  %v14970_v16 = vor.u32 %v18574_v17, %v14967_v25  ;;  %v20776_v12 = vpop.f32.mrf.mxu3  ;;  %v21306_v6 = vld [vmem:[#allocation32_spill] sm:$0xff]  ;;  %v21314_v56 = vld [vmem:[#allocation67_spill] sm:$0xff] }
 0x6f0   :  { %v15223_v7 = vld [vmem:[#allocation6 + $0x18b8] sm:$0xf0] }
 0x6f1   :  { %v18702_v39 = vld [vmem:[#allocation6 + $0x1a9c] sm:$0xf]  ;;  %v15226_v8 = vor.u32 %v18638_v5, %v15223_v7  ;;  %v6096_v44 = vadd.f32 %v21302_v21, %v6082_v33  ;;  %7517 = vmatpush.bf16.msrb.mxu1 %v14970_v16  ;;  %v18809_v16 = vld [vmem:[#allocation9 + $0x1ec] sm:$0xf0]  ;;  %v21310_v21 = vld [vmem:[#allocation43_spill] sm:$0xff] }
 0x6f2   :  { %v15479_v26 = vld [vmem:[#allocation6 + $0x1ab8] sm:$0xf0] }
 0x6f3   :  { %v18502_v55 = vld [vmem:[#allocation6 + $0x145c] sm:$0xf]  ;;  %v15482_v34 = vor.u32 %v18702_v39, %v15479_v26  ;;  %7531 = vmatpush.bf16.msrb.mxu2 %v15226_v8  ;;  %v15757_v39 = vld [vmem:[#allocation9 + $0xe0] sm:$0xf]  ;;  %v18777_v26 = vld [vmem:[#allocation9 + $0xec] sm:$0xf0]  ;;  %v6110_v33 = vadd.f32 %v21306_v6, %v6096_v44 }
 0x6f4   :  { %v14679_v51 = vld [vmem:[#allocation6 + $0x1478] sm:$0xf0]  ;;  %v15758_v15 = vor.u32 %v18777_v26, %v15757_v39  ;;  %v21315_v39 = vld [vmem:[#allocation55_spill] sm:$0xff] }
 0x6f5   :  { %v18566_v22 = vld [vmem:[#allocation6 + $0x165c] sm:$0xf]  ;;  %v14682_v10 = vor.u32 %v18502_v55, %v14679_v51  ;;  %7545 = vmatpush.bf16.msrb.mxu3 %v15482_v34  ;;  %v16013_v55 = vld [vmem:[#allocation9 + $0x2e0] sm:$0xf]  ;;  %v18841_v34 = vld [vmem:[#allocation9 + $0x2ec] sm:$0xf0] }
 0x6f6   :  { %v14935_v57 = vld [vmem:[#allocation6 + $0x1678] sm:$0xf0] }
 0x6f7   :  { %v18630_v62 = vld [vmem:[#allocation6 + $0x185c] sm:$0xf]  ;;  %v14938_v52 = vor.u32 %v18566_v22, %v14935_v57  ;;  %7504 = vmatpush.bf16.msrb.mxu0 %v14682_v10  ;;  %v16141_v22 = vld [vmem:[#allocation9 + $0x3e0] sm:$0xf]  ;;  %v18873_v57 = vld [vmem:[#allocation9 + $0x3ec] sm:$0xf0] }
 0x6f8   :  { %v15191_v18 = vld [vmem:[#allocation6 + $0x1878] sm:$0xf0] }
 0x6f9   :  { %v18694_v9 = vld [vmem:[#allocation6 + $0x1a5c] sm:$0xf]  ;;  %v15194_v31 = vor.u32 %v18630_v62, %v15191_v18  ;;  %7518 = vmatpush.bf16.msrb.mxu1 %v14938_v52  ;;  %v21309_v62 = vld [vmem:[#allocation42_spill] sm:$0xff]  ;;  %v15886_v18 = vor.u32 %v18809_v16, %v15885_v13  ;;  %v20789_v52 = vpop.f32.mrf.mxu1  ;;  %v18769_v13 = vld [vmem:[#allocation9 + $0xac] sm:$0xf0] }
 0x6fa   :  { %v15447_v53 = vld [vmem:[#allocation6 + $0x1a78] sm:$0xf0]  ;;  %v21316_v16 = vld [vmem:[#allocation44_spill] sm:$0xff] }
 0x6fb   :  { %v18494_v63 = vld [vmem:[#allocation6 + $0x141c] sm:$0xf]  ;;  %v15450_v11 = vor.u32 %v18694_v9, %v15447_v53  ;;  %7532 = vmatpush.bf16.msrb.mxu2 %v15194_v31  ;;  %v15741_v9 = vld [vmem:[#allocation9 + $0xc0] sm:$0xf]  ;;  %v18773_v53 = vld [vmem:[#allocation9 + $0xcc] sm:$0xf0] }
 0x6fc   :  { %v21303_v42 = vld [vmem:[#allocation41_spill] sm:$0xff]  ;;  %v15742_v6 = vor.u32 %v18773_v53, %v15741_v9  ;;  %v20805_v53 = vpop.f32.mrf.mxu2 }
 0x6fd   :  { %v6278_v20 = vadd.f32 %v21303_v42, %v6264_v0  ;;  %v14647_v59 = vld [vmem:[#allocation6 + $0x1438] sm:$0xf0]  ;;  %7546 = vmatpush.bf16.msrb.mxu3 %v15450_v11  ;;  %v21311_v42 = vld [vmem:[#allocation66_spill] sm:$0xff]  ;;  %v18837_v31 = vld [vmem:[#allocation9 + $0x2cc] sm:$0xf0] }
 0x6fe   :  { %v18558_v37 = vld [vmem:[#allocation6 + $0x161c] sm:$0xf]  ;;  %v14650_v58 = vor.u32 %v18494_v63, %v14647_v59  ;;  %v16014_v63 = vor.u32 %v18841_v34, %v16013_v55  ;;  %v16142_v59 = vor.u32 %v18873_v57, %v16141_v22  ;;  %v16125_v11 = vld [vmem:[#allocation9 + $0x3c0] sm:$0xf]  ;;  %v18833_v22 = vld [vmem:[#allocation9 + $0x2ac] sm:$0xf0] }
 0x6ff   :  { %v14903_v32 = vld [vmem:[#allocation6 + $0x1638] sm:$0xf0]  ;;  %v6292_v60 = vadd.f32 %v21309_v62, %v6278_v20  ;;  %v21312_v20 = vld [vmem:[#allocation54_spill] sm:$0xff]  ;;  %v15981_v34 = vld [vmem:[#allocation9 + $0x2a0] sm:$0xf] }
 0x700   :  { %v18622_v17 = vld [vmem:[#allocation6 + $0x181c] sm:$0xf]  ;;  %v14906_v8 = vor.u32 %v18558_v37, %v14903_v32  ;;  %v15869_v37 = vld [vmem:[#allocation9 + $0x1c0] sm:$0xf]  ;;  %v18805_v32 = vld [vmem:[#allocation9 + $0x1cc] sm:$0xf0]  ;;  %7505 = vmatpush.bf16.msrb.mxu0 %v14650_v58 }
 0x701   :  { %v15159_v25 = vld [vmem:[#allocation6 + $0x1838] sm:$0xf0]  ;;  %v6306_v44 = vadd.f32 %v21310_v21, %v6292_v60  ;;  %v15853_v58 = vld [vmem:[#allocation9 + $0x1a0] sm:$0xf]  ;;  %v18865_v62 = vld [vmem:[#allocation9 + $0x3ac] sm:$0xf0] }
 0x702   :  { %v18686_v5 = vld [vmem:[#allocation6 + $0x1a1c] sm:$0xf]  ;;  %v15162_v0 = vor.u32 %v18622_v17, %v15159_v25  ;;  %7519 = vmatpush.bf16.msrb.mxu1 %v14906_v8  ;;  %v18869_v17 = vld [vmem:[#allocation9 + $0x3cc] sm:$0xf0]  ;;  %v16109_v57 = vld [vmem:[#allocation9 + $0x3a0] sm:$0xf] }
 0x703   :  { %v15415_v7 = vld [vmem:[#allocation6 + $0x1a38] sm:$0xf0]  ;;  %v6320_v55 = vadd.f32 %v21316_v16, %v6306_v44  ;;  %v18801_v8 = vld [vmem:[#allocation9 + $0x1ac] sm:$0xf0]  ;;  %7506 = vmatmul.bf16.vlgmr.msrb.gmra.mxu0 %v20382_v40  ;;  %v21317_v60 = vld [vmem:[#allocation34_spill] sm:$0xff] }
 0x704   :  { %v21307_v19 = vld [vmem:[#allocation65_spill] sm:$0xff]  ;;  %v15418_v46 = vor.u32 %v18686_v5, %v15415_v7  ;;  %v20794_v7 = vpop.f32.mrf.mxu3  ;;  %7533 = vmatpush.bf16.msrb.mxu2 %v15162_v0  ;;  %9124 = vmatpush.bf16.msra.mxu0 %v15758_v15  ;;  %v21320_v21 = vld [vmem:[#allocation56_spill] sm:$0xff] }
 0x705   :  { %v6642_v47 = vadd.f32 %v21307_v19, %v6628_v27  ;;  %v21308_v51 = vld [vmem:[#allocation53_spill] sm:$0xff]  ;;  %v15870_v19 = vor.u32 %v18805_v32, %v15869_v37  ;;  %7520 = vmatmul.bf16.vlgmr.msrb.gmra.mxu1 %v20384_v2  ;;  %v15854_v2 = vor.u32 %v18801_v8, %v15853_v58  ;;  %v20811_v37 = vpop.f32.mrf.mxu1  ;;  %v15982_v32 = vor.u32 %v18833_v22, %v15981_v34  ;;  %v15693_v8 = vld [vmem:[#allocation9 + $0x60] sm:$0xf]  ;;  %v21329_v22 = vld [vmem:[#allocation70_spill] sm:$0xff] }
 0x706   :  { %v6474_v38 = vadd.f32 %v21308_v51, %v6460_v24  ;;  %v21313_v25 = vld [vmem:[#allocation33_spill] sm:$0xff]  ;;  %7547 = vmatpush.bf16.msrb.mxu3 %v15418_v46  ;;  %9138 = vmatpush.bf16.msra.mxu1 %v15886_v18  ;;  %v20798_v51 = vpop.f32.mrf.mxu0  ;;  %v21318_v46 = vld [vmem:[#allocation46_spill] sm:$0xff]  ;;  %v21319_v18 = vld [vmem:[#allocation68_spill] sm:$0xff] }
 0x707   :  { %v6656_v10 = vadd.f32 %v21311_v42, %v6642_v47  ;;  %v6124_v5 = vadd.f32 %v21313_v25, %v6110_v33  ;;  %v15725_v47 = vld [vmem:[#allocation9 + $0xa0] sm:$0xf]  ;;  %v15998_v33 = vor.u32 %v18837_v31, %v15997_v35  ;;  %v6334_v15 = vadd.f32 %v21318_v46, %v6320_v55  ;;  %7534 = vmatmul.bf16.vlgmr.msrb.gmra.mxu2 %v20347_v23  ;;  %v18797_v23 = vld [vmem:[#allocation9 + $0x18c] sm:$0xf0]  ;;  %v20822_v55 = vld [vmem:[#allocation7] sm:$0xff] }
 0x708   :  { %v6488_v27 = vadd.f32 %v21312_v20, %v6474_v38  ;;  %9152 = vmatpush.bf16.msra.mxu2 %v16014_v63  ;;  %v16126_v38 = vor.u32 %v18869_v17, %v16125_v11  ;;  %9125 = vmatpush.bf16.msra.mxu0 %v15742_v6  ;;  %v15726_v40 = vor.u32 %v18769_v13, %v15725_v47  ;;  %v15709_v42 = vld [vmem:[#allocation9 + $0x80] sm:$0xf]  ;;  %v21321_v63 = vld [vmem:[#allocation69_spill] sm:$0xff]  ;;  %v21326_v6 = vperm.slane %v20616_v54, 5 }
 0x709   :  { %v6670_v24 = vadd.f32 %v21314_v56, %v6656_v10  ;;  %v6138_v0 = vadd.f32 %v21317_v60, %v6124_v5  ;;  %7548 = vmatmul.bf16.vlgmr.msrb.gmra.mxu3 %v20355_v3  ;;  %v18765_v10 = vld [vmem:[#allocation9 + $0x8c] sm:$0xf0]  ;;  %v16110_v35 = vor.u32 %v18865_v62, %v16109_v57  ;;  %v15837_v20 = vld [vmem:[#allocation9 + $0x180] sm:$0xf] }
 0x70a   :  { %v6502_v26 = vadd.f32 %v21315_v39, %v6488_v27  ;;  %9166 = vmatpush.bf16.msra.mxu3 %v16142_v59  ;;  %9139 = vmatpush.bf16.msra.mxu1 %v15870_v19  ;;  %v15965_v27 = vld [vmem:[#allocation9 + $0x280] sm:$0xf]  ;;  %v18829_v3 = vld [vmem:[#allocation9 + $0x28c] sm:$0xf0]  ;;  %v21325_v39 = vld [vmem:[#allocation76_spill] sm:$0xff]  ;;  %v15838_v58 = vor.u32 %v18797_v23, %v15837_v20 }
 0x70b   :  { %v6684_v9 = vadd.f32 %v21319_v18, %v6670_v24  ;;  %v16093_v31 = vld [vmem:[#allocation9 + $0x380] sm:$0xf]  ;;  %v18861_v11 = vld [vmem:[#allocation9 + $0x38c] sm:$0xf0]  ;;  %v21324_v24 = vperm.slane %v20616_v54, 4  ;;  %v15966_v54 = vor.u32 %v18829_v3, %v15965_v27  ;;  %v21333_v20 = vld [vmem:[#allocation72_spill] sm:$0xff]  ;;  %v20834_v27 = vpop.f32.mrf.mxu2 }
 0x70c   :  { %v6516_v44 = vadd.f32 %v21320_v21, %v6502_v26  ;;  %9153 = vmatpush.bf16.msra.mxu2 %v15998_v33  ;;  %v21322_v17 = vld [vmem:[#allocation35_spill] sm:$0xff]  ;;  %v21323_v5 = vld [vmem:[#allocation57_spill] sm:$0xff]  ;;  %v1496_v33 = vperm.slane %v20822_v55, 6  ;;  %9126 = vmatpush.bf16.msra.mxu0 %v15726_v40  ;;  %v20826_v62 = vpop.f32.mrf.mxu3  ;;  %v16094_v60 = vor.u32 %v18861_v11, %v16093_v31  ;;  %v21331_v21 = vld [vmem:[#allocation48_spill] sm:$0xff] }
 0x70d   :  { %v6698_v59 = vadd.f32 %v21321_v63, %v6684_v9  ;;  %v6152_v25 = vadd.f32 %v21322_v17, %v6138_v0  ;;  %v6782_v26 = vadd.f32 %v21325_v39, %v21324_v24  ;;  %v21327_v19 = vld [vmem:[#allocation91_spill] sm:$0xff]  ;;  %v18761_v34 = vld [vmem:[#allocation9 + $0x6c] sm:$0xf0] }
 0x70e   :  { %9167 = vmatpush.bf16.msra.mxu3 %v16126_v38  ;;  %v6530_v56 = vadd.f32 %v21323_v5, %v6516_v44  ;;  %v6978_v47 = vadd.f32 %v21327_v19, %v21326_v6  ;;  %v21328_v13 = vld [vmem:[#allocation47_spill] sm:$0xff]  ;;  %9140 = vmatpush.bf16.msra.mxu1 %v15854_v2  ;;  %v15710_v38 = vor.u32 %v18765_v10, %v15709_v42  ;;  %v18793_v46 = vld [vmem:[#allocation9 + $0x16c] sm:$0xf0]  ;;  %v21332_v10 = vld [vmem:[#allocation58_spill] sm:$0xff]  ;;  %v20836_v3 = vpop.f32.mrf.mxu0 }
 0x70f   :  { %v6348_v16 = vadd.f32 %v21328_v13, %v6334_v15  ;;  %v6712_v57 = vadd.f32 %v21329_v22, %v6698_v59  ;;  %v15821_v0 = vld [vmem:[#allocation9 + $0x160] sm:$0xf]  ;;  %v21330_v18 = vld [vmem:[#allocation37_spill] sm:$0xff]  ;;  %v7174_v31 = vadd.f32 %v20783_v4, %v1496_v33  ;;  %v15694_v11 = vor.u32 %v18761_v34, %v15693_v8  ;;  %v21336_v13 = vld [vmem:[#allocation38_spill] sm:$0xff] }
 0x710   :  { %9154 = vmatpush.bf16.msra.mxu2 %v15982_v32  ;;  %v15949_v15 = vld [vmem:[#allocation9 + $0x260] sm:$0xf]  ;;  %v6166_v9 = vadd.f32 %v21330_v18, %v6152_v25  ;;  %v18825_v40 = vld [vmem:[#allocation9 + $0x26c] sm:$0xf0]  ;;  %v6544_v63 = vadd.f32 %v21332_v10, %v6530_v56  ;;  %v21335_v32 = vld [vmem:[#allocation92_spill] sm:$0xff]  ;;  %9127 = vmatpush.bf16.msra.mxu0 %v15710_v38  ;;  %v15822_v25 = vor.u32 %v18793_v46, %v15821_v0 }
 0x711   :  { %v6362_v44 = vadd.f32 %v21331_v21, %v6348_v16  ;;  %v16077_v2 = vld [vmem:[#allocation9 + $0x360] sm:$0xf]  ;;  %v18857_v42 = vld [vmem:[#allocation9 + $0x36c] sm:$0xf0]  ;;  %v6726_v59 = vadd.f32 %v21333_v20, %v6712_v57  ;;  %v7172_v56 = vadd.f32 %v20760_v14, %v1496_v33  ;;  %v15950_v39 = vor.u32 %v18825_v40, %v15949_v15  ;;  %v21338_v34 = vld [vmem:[#allocation60_spill] sm:$0xff]  ;;  %v20850_v15 = vpop.f32.mrf.mxu1 }
 0x712   :  { %9168 = vmatpush.bf16.msra.mxu3 %v16110_v35  ;;  %v21334_v23 = vld [vmem:[#allocation77_spill] sm:$0xff]  ;;  %v6992_v35 = vadd.f32 %v21335_v32, %v6978_v47  ;;  %9141 = vmatpush.bf16.msra.mxu1 %v15838_v58  ;;  %v15677_v5 = vld [vmem:[#allocation9 + $0x40] sm:$0xf]  ;;  %v20841_v16 = vadd.f32 %v21336_v13, %v6166_v9  ;;  %v6558_v57 = vadd.f32 %v21338_v34, %v6544_v63  ;;  %v21340_v33 = vld [vmem:[#allocation78_spill] sm:$0xff] }
 0x713   :  { %v6796_v17 = vadd.f32 %v21334_v23, %v6782_v26  ;;  %v18757_v24 = vld [vmem:[#allocation9 + $0x4c] sm:$0xf0]  ;;  %v16078_v26 = vor.u32 %v18857_v42, %v16077_v2  ;;  %v15805_v6 = vld [vmem:[#allocation9 + $0x140] sm:$0xf]  ;;  %v21342_v18 = vld [vmem:[#allocation36_spill] sm:$0xff]  ;;  %v7188_v9 = vadd.f32 %v20789_v52, %v7174_v31  ;;  %v7186_v10 = vadd.f32 %v20769_v45, %v7172_v56 }
 0x714   :  { %9155 = vmatpush.bf16.msra.mxu2 %v15966_v54  ;;  %v18789_v19 = vld [vmem:[#allocation9 + $0x14c] sm:$0xf0]  ;;  %v15933_v47 = vld [vmem:[#allocation9 + $0x240] sm:$0xf]  ;;  %v7554_v21 = vmax.f32 %v21342_v18, 0.0  ;;  %9128 = vmatpush.bf16.msra.mxu0 %v15694_v11  ;;  %v20855_v63 = vpop.f32.mrf.mxu3 }
 0x715   :  { %v21337_v22 = vld [vmem:[#allocation49_spill] sm:$0xff]  ;;  %v16061_v58 = vld [vmem:[#allocation9 + $0x340] sm:$0xf]  ;;  %v6810_v54 = vadd.f32 %v21340_v33, %v6796_v17  ;;  %v15806_v40 = vor.u32 %v18789_v19, %v15805_v6  ;;  %v7202_v52 = vadd.f32 %v20805_v53, %v7188_v9 }
 0x716   :  { %9169 = vmatpush.bf16.msra.mxu3 %v16094_v60  ;;  %v20844_v4 = vadd.f32 %v21337_v22, %v6362_v44  ;;  %v18821_v38 = vld [vmem:[#allocation9 + $0x24c] sm:$0xf0]  ;;  %9142 = vmatpush.bf16.msra.mxu1 %v15822_v25  ;;  %v15678_v44 = vor.u32 %v18757_v24, %v15677_v5  ;;  %v15661_v2 = vld [vmem:[#allocation9 + $0x20] sm:$0xf]  ;;  %v7562_v5 = vmax.f32 %v20841_v16, 0.0  ;;  %v7257_v16 = vpop.f32.mrf.mxu2 }
 0x717   :  { %v18853_v8 = vld [vmem:[#allocation9 + $0x34c] sm:$0xf0]  ;;  %v15934_v20 = vor.u32 %v18821_v38, %v15933_v47  ;;  %v15789_v23 = vld [vmem:[#allocation9 + $0x120] sm:$0xf] }
 0x718   :  { %v21339_v0 = vld [vmem:[#allocation73_spill] sm:$0xff]  ;;  %9156 = vmatpush.bf16.msra.mxu2 %v15950_v39  ;;  %v15917_v32 = vld [vmem:[#allocation9 + $0x220] sm:$0xf]  ;;  %v7563_v45 = vmax.f32 %v20844_v4, 0.0  ;;  %v7200_v39 = vadd.f32 %v20781_v49, %v7186_v10  ;;  %9129 = vmatpush.bf16.msra.mxu0 %v15678_v44 }
 0x719   :  { %v6740_v14 = vadd.f32 %v21339_v0, %v6726_v59  ;;  %v21341_v60 = vld [vmem:[#allocation93_spill] sm:$0xff]  ;;  %v16062_v59 = vor.u32 %v18853_v8, %v16061_v58  ;;  %v16045_v11 = vld [vmem:[#allocation9 + $0x320] sm:$0xf]  ;;  %v21346_v8 = vld [vmem:[#allocation94_spill] sm:$0xff] }
 0x71a   :  { %v7006_v46 = vadd.f32 %v21341_v60, %v6992_v35  ;;  %v18753_v42 = vld [vmem:[#allocation9 + $0x2c] sm:$0xf0]  ;;  %9170 = vmatpush.bf16.msra.mxu3 %v16078_v26  ;;  %v21343_v35 = vld [vmem:[#allocation74_spill] sm:$0xff]  ;;  %v20863_v26 = vpop.f32.mrf.mxu0  ;;  %v21345_v6 = vld [vmem:[#allocation79_spill] sm:$0xff]  ;;  %9143 = vmatpush.bf16.msra.mxu1 %v15806_v40 }
 0x71b   :  { %v18785_v17 = vld [vmem:[#allocation9 + $0x12c] sm:$0xf0]  ;;  %v6754_v13 = vadd.f32 %v21343_v35, %v6740_v14  ;;  %v6824_v19 = vadd.f32 %v21345_v6, %v6810_v54  ;;  %v15662_v47 = vor.u32 %v18753_v42, %v15661_v2  ;;  %v15645_v53 = vld [vmem:[#allocation9] sm:$0xf]  ;;  %v7216_v54 = vadd.f32 %v20826_v62, %v7202_v52  ;;  %v21348_v2 = vld [vmem:[#allocation80_spill] sm:$0xff] }
 0x71c   :  { %v18817_v31 = vld [vmem:[#allocation9 + $0x22c] sm:$0xf0]  ;;  %v15790_v22 = vor.u32 %v18785_v17, %v15789_v23  ;;  %v15773_v58 = vld [vmem:[#allocation9 + $0x100] sm:$0xf]  ;;  %v7020_v34 = vadd.f32 %v21346_v8, %v7006_v46  ;;  %9157 = vmatpush.bf16.msra.mxu2 %v15934_v20  ;;  %v7214_v46 = vadd.f32 %v20794_v7, %v7200_v39  ;;  %v20872_v20 = vpop.f32.mrf.mxu1 }
 0x71d   :  { %v18849_v25 = vld [vmem:[#allocation9 + $0x32c] sm:$0xf0]  ;;  %v15918_v4 = vor.u32 %v18817_v31, %v15917_v32  ;;  %v15901_v49 = vld [vmem:[#allocation9 + $0x200] sm:$0xf]  ;;  %v6838_v42 = vadd.f32 %v21348_v2, %v6824_v19  ;;  %v7230_v31 = vadd.f32 %v20836_v3, %v7216_v54  ;;  %9130 = vmatpush.bf16.msra.mxu0 %v15662_v47  ;;  %v20880_v47 = vpack.c.bf16 %v7562_v5, %v7554_v21 }
 0x71e   :  { %v21344_v24 = vld [vmem:[#allocation61_spill] sm:$0xff]  ;;  %9171 = vmatpush.bf16.msra.mxu3 %v16062_v59  ;;  %v21347_v33 = vld [vmem:[#allocation75_spill] sm:$0xff]  ;;  %9144 = vmatpush.bf16.msra.mxu1 %v15790_v22  ;;  %v7228_v6 = vadd.f32 %v20798_v51, %v7214_v46 }
 0x71f   :  { %v6572_v56 = vadd.f32 %v21344_v24, %v6558_v57  ;;  %v18749_v38 = vld [vmem:[#allocation9 + $0xc] sm:$0xf0]  ;;  %v16046_v57 = vor.u32 %v18849_v25, %v16045_v11  ;;  %v6768_v60 = vadd.f32 %v21347_v33, %v6754_v13  ;;  %v16029_v9 = vld [vmem:[#allocation9 + $0x300] sm:$0xf] }
 0x720   :  { %v18781_v0 = vld [vmem:[#allocation9 + $0x10c] sm:$0xf0]  ;;  %v16269_v40 = vld [vmem:[#allocation9 + $0x4e0] sm:$0xf]  ;;  %v15646_v62 = vor.u32 %v18749_v38, %v15645_v53  ;;  %9158 = vmatpush.bf16.msra.mxu2 %v15918_v4  ;;  %v21353_v38 = vld [vmem:[#allocation96_spill] sm:$0xff] }
 0x721   :  { %v18813_v14 = vld [vmem:[#allocation9 + $0x20c] sm:$0xf0]  ;;  %v21349_v10 = vld [vmem:[#allocation95_spill] sm:$0xff]  ;;  %v7564_v35 = vmax.f32 %v6572_v56, 0.0  ;;  %v15774_v13 = vor.u32 %v18781_v0, %v15773_v58  ;;  %v7271_v0 = vpop.f32.mrf.mxu3 }
 0x722   :  { %v18845_v44 = vld [vmem:[#allocation9 + $0x30c] sm:$0xf0]  ;;  %v7034_v23 = vadd.f32 %v21349_v10, %v7020_v34  ;;  %v16397_v17 = vld [vmem:[#allocation9 + $0x5e0] sm:$0xf]  ;;  %9172 = vmatpush.bf16.msra.mxu3 %v16046_v57  ;;  %v15902_v7 = vor.u32 %v18813_v14, %v15901_v49  ;;  %v7565_v34 = vmax.f32 %v6768_v60, 0.0  ;;  %v7244_v60 = vadd.f32 %v20850_v15, %v7230_v31  ;;  %9131 = vmatpush.bf16.msra.mxu0 %v15646_v62  ;;  %v20893_v10 = vpop.f32.mrf.mxu2 }
 0x723   :  { %v18905_v59 = vld [vmem:[#allocation9 + $0x4ec] sm:$0xf0]  ;;  %v16525_v52 = vld [vmem:[#allocation9 + $0x6e0] sm:$0xf]  ;;  %v16030_v39 = vor.u32 %v18845_v44, %v16029_v9  ;;  %9145 = vmatpush.bf16.msra.mxu1 %v15774_v13  ;;  %v21355_v44 = vld [vmem:[#allocation82_spill] sm:$0xff] }
 0x724   :  { %v18937_v32 = vld [vmem:[#allocation9 + $0x5ec] sm:$0xf0]  ;;  %v21351_v19 = vld [vmem:[#allocation59_spill] sm:$0xff]  ;;  %v16270_v56 = vor.u32 %v18905_v59, %v16269_v40  ;;  %v7048_v58 = vadd.f32 %v21353_v38, %v7034_v23  ;;  %9159 = vmatpush.bf16.msra.mxu2 %v15902_v7  ;;  %v7258_v23 = vadd.f32 %v7257_v16, %v7244_v60 }
 0x725   :  { %v18969_v11 = vld [vmem:[#allocation9 + $0x6ec] sm:$0xf0]  ;;  %v7556_v8 = vmax.f32 %v21351_v19, 0.0  ;;  %v16398_v33 = vor.u32 %v18937_v32, %v16397_v17  ;;  %v16253_v3 = vld [vmem:[#allocation9 + $0x4c0] sm:$0xf]  ;;  %9132 = vmatmul.bf16.vlgmr.msra.gmra.mxu0 %v20880_v47 }
 0x726   :  { %v21350_v25 = vld [vmem:[#allocation45_spill] sm:$0xff]  ;;  %v16526_v51 = vor.u32 %v18969_v11, %v16525_v52  ;;  %v16381_v57 = vld [vmem:[#allocation9 + $0x5c0] sm:$0xf]  ;;  %v7062_v2 = vadd.f32 %v20707_v1, %v7048_v58  ;;  %9173 = vmatpush.bf16.msra.mxu3 %v16030_v39  ;;  %9180 = vmatpush.bf16.msrb.mxu0 %v16270_v56  ;;  %v21357_v39 = vld [vmem:[#allocation84_spill] sm:$0xff] }
 0x727   :  { %v7555_v24 = vmax.f32 %v21350_v25, 0.0  ;;  %v21352_v22 = vld [vmem:[#allocation81_spill] sm:$0xff]  ;;  %v20886_v54 = vpack.c.bf16 %v7564_v35, %v7556_v8  ;;  %v16509_v18 = vld [vmem:[#allocation9 + $0x6c0] sm:$0xf]  ;;  %9194 = vmatpush.bf16.msrb.mxu1 %v16398_v33  ;;  %v7299_v25 = vpop.f32.mrf.mxu1 }
 0x728   :  { %v6852_v53 = vadd.f32 %v21352_v22, %v6838_v42  ;;  %v18901_v4 = vld [vmem:[#allocation9 + $0x4cc] sm:$0xf0]  ;;  %v21354_v5 = vld [vmem:[#allocation71_spill] sm:$0xff]  ;;  %v7242_v42 = vadd.f32 %v20811_v37, %v7228_v6  ;;  %9208 = vmatpush.bf16.msrb.mxu2 %v16526_v51  ;;  %v7076_v11 = vadd.f32 %v20709_v36, %v7062_v2 }
 0x729   :  { %v18933_v49 = vld [vmem:[#allocation9 + $0x5cc] sm:$0xf0]  ;;  %v20884_v14 = vpack.c.bf16 %v7563_v45, %v7555_v24  ;;  %v7557_v9 = vmax.f32 %v21354_v5, 0.0  ;;  %v7285_v45 = vpop.f32.mrf.mxu0  ;;  %v16254_v15 = vor.u32 %v18901_v4, %v16253_v3  ;;  %v16237_v59 = vld [vmem:[#allocation9 + $0x4a0] sm:$0xf]  ;;  %9160 = vmatmul.bf16.vlgmr.msra.gmra.mxu2 %v20886_v54  ;;  %v20907_v56 = vpop.f32.mrf.mxu3 }
 0x72a   :  { %v18965_v21 = vld [vmem:[#allocation9 + $0x6cc] sm:$0xf0]  ;;  %v6866_v40 = vadd.f32 %v21355_v44, %v6852_v53  ;;  %v16382_v46 = vor.u32 %v18933_v49, %v16381_v57  ;;  %v7256_v32 = vadd.f32 %v20834_v27, %v7242_v42  ;;  %v16365_v35 = vld [vmem:[#allocation9 + $0x5a0] sm:$0xf]  ;;  %v7272_v27 = vadd.f32 %v7271_v0, %v7258_v23 }
 0x72b   :  { %v20895_v17 = vpack.c.bf16 %v7565_v34, %v7557_v9  ;;  %v16510_v1 = vor.u32 %v18965_v21, %v16509_v18  ;;  %v18897_v37 = vld [vmem:[#allocation9 + $0x4ac] sm:$0xf0]  ;;  %9146 = vmatmul.bf16.vlgmr.msra.gmra.mxu1 %v20884_v14  ;;  %v16493_v16 = vld [vmem:[#allocation9 + $0x6a0] sm:$0xf]  ;;  %9181 = vmatpush.bf16.msrb.mxu0 %v16254_v15  ;;  %v7090_v8 = vadd.f32 %v20725_v50, %v7076_v11  ;;  %v7313_v18 = vpop.f32.mrf.mxu2 }
 0x72c   :  { %v18929_v31 = vld [vmem:[#allocation9 + $0x5ac] sm:$0xf0]  ;;  %v21356_v13 = vld [vmem:[#allocation83_spill] sm:$0xff]  ;;  %9195 = vmatpush.bf16.msrb.mxu1 %v16382_v46  ;;  %v16238_v24 = vor.u32 %v18897_v37, %v16237_v59  ;;  %v7270_v34 = vadd.f32 %v20855_v63, %v7256_v32  ;;  %v7286_v53 = vadd.f32 %v7285_v45, %v7272_v27 }
 0x72d   :  { %v18961_v62 = vld [vmem:[#allocation9 + $0x6ac] sm:$0xf0]  ;;  %v6880_v52 = vadd.f32 %v21356_v13, %v6866_v40  ;;  %9174 = vmatmul.bf16.vlgmr.msra.gmra.mxu3 %v20895_v17  ;;  %v16366_v6 = vor.u32 %v18929_v31, %v16365_v35  ;;  %v16221_v7 = vld [vmem:[#allocation9 + $0x480] sm:$0xf]  ;;  %9209 = vmatpush.bf16.msrb.mxu2 %v16510_v1  ;;  %v7104_v60 = vadd.f32 %v20734_v41, %v7090_v8 }
 0x72e   :  { %v16494_v33 = vor.u32 %v18961_v62, %v16493_v16  ;;  %v18893_v36 = vld [vmem:[#allocation9 + $0x48c] sm:$0xf0]  ;;  %v16349_v3 = vld [vmem:[#allocation9 + $0x580] sm:$0xf]  ;;  %v7284_v0 = vadd.f32 %v20863_v26, %v7270_v34  ;;  %v7300_v40 = vadd.f32 %v7299_v25, %v7286_v53  ;;  %v21359_v26 = vld [vmem:[#allocation86_spill] sm:$0xff] }
 0x72f   :  { %v6894_v19 = vadd.f32 %v21357_v39, %v6880_v52  ;;  %v18925_v22 = vld [vmem:[#allocation9 + $0x58c] sm:$0xf0]  ;;  %v16477_v38 = vld [vmem:[#allocation9 + $0x680] sm:$0xf]  ;;  %9182 = vmatpush.bf16.msrb.mxu0 %v16238_v24  ;;  %v16222_v4 = vor.u32 %v18893_v36, %v16221_v7  ;;  %v7118_v23 = vadd.f32 %v20741_v28, %v7104_v60  ;;  %v7353_v46 = vpop.f32.mrf.mxu1 }
 0x730   :  { %v18957_v58 = vld [vmem:[#allocation9 + $0x68c] sm:$0xf0]  ;;  %9196 = vmatpush.bf16.msrb.mxu1 %v16366_v6  ;;  %v16350_v57 = vor.u32 %v18925_v22, %v16349_v3  ;;  %v16205_v50 = vld [vmem:[#allocation9 + $0x460] sm:$0xf]  ;;  %v7298_v15 = vadd.f32 %v20872_v20, %v7284_v0  ;;  %v7314_v59 = vadd.f32 %v7313_v18, %v7300_v40  ;;  %v15759_v40 = vld [vmem:[#allocation9 + $0xf0] sm:$0xf0] }
 0x731   :  { %v7339_v51 = vpop.f32.mrf.mxu0  ;;  %v21358_v49 = vld [vmem:[#allocation85_spill] sm:$0xff]  ;;  %9210 = vmatpush.bf16.msrb.mxu2 %v16494_v33  ;;  %v16478_v21 = vor.u32 %v18957_v58, %v16477_v38  ;;  %v16333_v9 = vld [vmem:[#allocation9 + $0x560] sm:$0xf]  ;;  %v7132_v20 = vadd.f32 %v20749_v48, %v7118_v23  ;;  %v7327_v25 = vpop.f32.mrf.mxu3  ;;  %v7144_v48 = vadd.f32 %v20739_v61, %v20716_v30  ;;  %v21363_v23 = vld [vmem:[#allocation88_spill] sm:$0xff] }
 0x732   :  { %v6908_v63 = vadd.f32 %v21358_v49, %v6894_v19  ;;  %v18889_v5 = vld [vmem:[#allocation9 + $0x46c] sm:$0xf0]  ;;  %v16461_v2 = vld [vmem:[#allocation9 + $0x660] sm:$0xf]  ;;  %v7312_v62 = vadd.f32 %v20893_v10, %v7298_v15  ;;  %v7328_v24 = vadd.f32 %v7327_v25, %v7314_v59  ;;  %v7558_v15 = vmax.f32 %v21363_v23, 0.0 }
 0x733   :  { %v18921_v44 = vld [vmem:[#allocation9 + $0x56c] sm:$0xf0]  ;;  %9183 = vmatpush.bf16.msrb.mxu0 %v16222_v4  ;;  %v16206_v41 = vor.u32 %v18889_v5, %v16205_v50  ;;  %v16189_v1 = vld [vmem:[#allocation9 + $0x440] sm:$0xf]  ;;  %v7146_v34 = vadd.f32 %v20765_v43, %v7132_v20  ;;  %v18835_v20 = vld [vmem:[#allocation9 + $0x2c4] sm:$0xf] }
 0x734   :  { %v18953_v42 = vld [vmem:[#allocation9 + $0x66c] sm:$0xf0]  ;;  %v6922_v45 = vadd.f32 %v21359_v26, %v6908_v63  ;;  %9197 = vmatpush.bf16.msrb.mxu1 %v16350_v57  ;;  %v16334_v32 = vor.u32 %v18921_v44, %v16333_v9  ;;  %v16317_v31 = vld [vmem:[#allocation9 + $0x540] sm:$0xf]  ;;  %v7326_v22 = vadd.f32 %v20907_v56, %v7312_v62  ;;  %v21362_v63 = vld [vmem:[#allocation90_spill] sm:$0xff]  ;;  %v7158_v9 = vadd.f32 %v20756_v29, %v7144_v48 }
 0x735   :  { %9211 = vmatpush.bf16.msrb.mxu2 %v16478_v21  ;;  %v16462_v37 = vor.u32 %v18953_v42, %v16461_v2  ;;  %v18885_v35 = vld [vmem:[#allocation9 + $0x44c] sm:$0xf0]  ;;  %v16445_v13 = vld [vmem:[#allocation9 + $0x640] sm:$0xf]  ;;  %v7160_v18 = vadd.f32 %v20776_v12, %v7146_v34  ;;  %v18775_v44 = vld [vmem:[#allocation9 + $0xe4] sm:$0xf] }
 0x736   :  { %v18917_v16 = vld [vmem:[#allocation9 + $0x54c] sm:$0xf0]  ;;  %v21360_v11 = vld [vmem:[#allocation87_spill] sm:$0xff]  ;;  %v16190_v6 = vor.u32 %v18885_v35, %v16189_v1  ;;  %v7340_v0 = vadd.f32 %v7339_v51, %v7326_v22  ;;  %v15887_v42 = vld [vmem:[#allocation9 + $0x1f0] sm:$0xf0]  ;;  %v15762_v35 = vor.u32 %v18775_v44, %v15759_v40 }
 0x737   :  { %v18949_v52 = vld [vmem:[#allocation9 + $0x64c] sm:$0xf0]  ;;  %v6936_v28 = vadd.f32 %v21360_v11, %v6922_v45  ;;  %9184 = vmatpush.bf16.msrb.mxu0 %v16206_v41  ;;  %v16318_v7 = vor.u32 %v18917_v16, %v16317_v31  ;;  %v16173_v39 = vld [vmem:[#allocation9 + $0x420] sm:$0xf]  ;;  %v7355_v21 = vpop.f32.mrf.mxu1  ;;  %v18807_v2 = vld [vmem:[#allocation9 + $0x1e4] sm:$0xf] }
 0x738   :  { %9198 = vmatpush.bf16.msrb.mxu1 %v16334_v32  ;;  %v21361_v19 = vld [vmem:[#allocation89_spill] sm:$0xff]  ;;  %v16446_v10 = vor.u32 %v18949_v52, %v16445_v13  ;;  %v16301_v36 = vld [vmem:[#allocation9 + $0x520] sm:$0xf]  ;;  %v18839_v26 = vld [vmem:[#allocation9 + $0x2e4] sm:$0xf]  ;;  %v7354_v59 = vadd.f32 %v7353_v46, %v7340_v0  ;;  %v7567_v1 = vmax.f32 %v7160_v18, 0.0  ;;  %v15890_v62 = vor.u32 %v18807_v2, %v15887_v42 }
 0x739   :  { %v7341_v27 = vpop.f32.mrf.mxu0  ;;  %v6950_v8 = vadd.f32 %v21361_v19, %v6936_v28  ;;  %9212 = vmatpush.bf16.msrb.mxu2 %v16462_v37  ;;  %v18881_v33 = vld [vmem:[#allocation9 + $0x42c] sm:$0xf0]  ;;  %v16429_v38 = vld [vmem:[#allocation9 + $0x620] sm:$0xf]  ;;  %v16015_v45 = vld [vmem:[#allocation9 + $0x2f0] sm:$0xf0] }
 0x73a   :  { %v18913_v3 = vld [vmem:[#allocation9 + $0x52c] sm:$0xf0]  ;;  %v7342_v53 = vadd.f32 %v7341_v27, %v7328_v24  ;;  %v16174_v4 = vor.u32 %v18881_v33, %v16173_v39  ;;  %v16157_v50 = vld [vmem:[#allocation9 + $0x400] sm:$0xf]  ;;  %v18771_v29 = vld [vmem:[#allocation9 + $0xc4] sm:$0xf]  ;;  %v16018_v13 = vor.u32 %v18839_v26, %v16015_v45 }
 0x73b   :  { %v18945_v58 = vld [vmem:[#allocation9 + $0x62c] sm:$0xf0]  ;;  %9185 = vmatpush.bf16.msrb.mxu0 %v16190_v6  ;;  %v16302_v57 = vor.u32 %v18913_v3, %v16301_v36  ;;  %v16285_v49 = vld [vmem:[#allocation9 + $0x500] sm:$0xf]  ;;  %v6964_v60 = vadd.f32 %v21362_v63, %v6950_v8  ;;  %v7559_v31 = vmax.f32 %v7158_v9, 0.0  ;;  %v7560_v46 = vmax.f32 %v7354_v59, 0.0 }
 0x73c   :  { %9199 = vmatpush.bf16.msrb.mxu1 %v16318_v7  ;;  %v18877_v43 = vld [vmem:[#allocation9 + $0x40c] sm:$0xf0]  ;;  %v16430_v30 = vor.u32 %v18945_v58, %v16429_v38  ;;  %v16413_v56 = vld [vmem:[#allocation9 + $0x600] sm:$0xf]  ;;  %v7356_v51 = vadd.f32 %v7355_v21, %v7342_v53  ;;  %v15743_v52 = vld [vmem:[#allocation9 + $0xd0] sm:$0xf0] }
 0x73d   :  { %9213 = vmatpush.bf16.msrb.mxu2 %v16446_v10  ;;  %v18909_v61 = vld [vmem:[#allocation9 + $0x50c] sm:$0xf0]  ;;  %v16158_v12 = vor.u32 %v18877_v43, %v16157_v50  ;;  %v7566_v32 = vmax.f32 %v6964_v60, 0.0  ;;  %v18803_v11 = vld [vmem:[#allocation9 + $0x1c4] sm:$0xf]  ;;  %v20929_v24 = vpack.c.bf16 %v7567_v1, %v7559_v31  ;;  %v15746_v6 = vor.u32 %v18771_v29, %v15743_v52 }
 0x73e   :  { %v18941_v5 = vld [vmem:[#allocation9 + $0x60c] sm:$0xf0]  ;;  %v16286_v41 = vor.u32 %v18909_v61, %v16285_v49  ;;  %v7568_v16 = vmax.f32 %v7356_v51, 0.0  ;;  %v15871_v28 = vld [vmem:[#allocation9 + $0x1d0] sm:$0xf0] }
 0x73f   :  { %9186 = vmatpush.bf16.msrb.mxu0 %v16174_v4  ;;  %v16414_v37 = vor.u32 %v18941_v5, %v16413_v56  ;;  %v15999_v25 = vld [vmem:[#allocation9 + $0x2d0] sm:$0xf0]  ;;  %v20927_v27 = vpack.c.bf16 %v7566_v32, %v7558_v15  ;;  %v15874_v39 = vor.u32 %v18803_v11, %v15871_v28  ;;  %v18767_v8 = vld [vmem:[#allocation9 + $0xa4] sm:$0xf]  ;;  %v16653_v48 = vld [vmem:[#allocation9 + $0x7e0] sm:$0xf] }
 0x740   :  { %9200 = vmatpush.bf16.msrb.mxu1 %v16302_v57  ;;  %v20931_v7 = vpack.c.bf16 %v7568_v16, %v7560_v46  ;;  %v16002_v19 = vor.u32 %v18835_v20, %v15999_v25  ;;  %v15727_v34 = vld [vmem:[#allocation9 + $0xb0] sm:$0xf0]  ;;  %v18799_v10 = vld [vmem:[#allocation9 + $0x1a4] sm:$0xf]  ;;  %v19001_v22 = vld [vmem:[#allocation9 + $0x7ec] sm:$0xf0] }
 0x741   :  { %9214 = vmatpush.bf16.msrb.mxu2 %v16430_v30  ;;  %v15855_v33 = vld [vmem:[#allocation9 + $0x1b0] sm:$0xf0]  ;;  %v18831_v36 = vld [vmem:[#allocation9 + $0x2a4] sm:$0xf]  ;;  %v15730_v53 = vor.u32 %v18767_v8, %v15727_v34  ;;  %v16654_v38 = vor.u32 %v19001_v22, %v16653_v48  ;;  %v16637_v60 = vld [vmem:[#allocation9 + $0x7c0] sm:$0xf]  ;;  %v20938_v48 = vpop.f32.mrf.mxu3 }
 0x742   :  { %v15983_v3 = vld [vmem:[#allocation9 + $0x2b0] sm:$0xf0]  ;;  %v15858_v58 = vor.u32 %v18799_v10, %v15855_v33  ;;  %v18763_v4 = vld [vmem:[#allocation9 + $0x84] sm:$0xf]  ;;  %v18997_v18 = vld [vmem:[#allocation9 + $0x7cc] sm:$0xf0] }
 0x743   :  { %9187 = vmatpush.bf16.msrb.mxu0 %v16158_v12  ;;  %v15986_v0 = vor.u32 %v18831_v36, %v15983_v3  ;;  %v15711_v57 = vld [vmem:[#allocation9 + $0x90] sm:$0xf0]  ;;  %v18795_v50 = vld [vmem:[#allocation9 + $0x184] sm:$0xf]  ;;  %9222 = vmatpush.bf16.msrb.mxu3 %v16654_v38  ;;  %v16638_v30 = vor.u32 %v18997_v18, %v16637_v60  ;;  %v16621_v42 = vld [vmem:[#allocation9 + $0x7a0] sm:$0xf]  ;;  %v20936_v3 = vpop.f32.mrf.mxu2 }
 0x744   :  { %9201 = vmatpush.bf16.msrb.mxu1 %v16286_v41  ;;  %v15839_v43 = vld [vmem:[#allocation9 + $0x190] sm:$0xf0]  ;;  %v18827_v49 = vld [vmem:[#allocation9 + $0x284] sm:$0xf]  ;;  %v15714_v21 = vor.u32 %v18763_v4, %v15711_v57  ;;  %v18993_v26 = vld [vmem:[#allocation9 + $0x7ac] sm:$0xf0] }
 0x745   :  { %9215 = vmatpush.bf16.msrb.mxu2 %v16414_v37  ;;  %v15967_v63 = vld [vmem:[#allocation9 + $0x290] sm:$0xf0]  ;;  %v15842_v61 = vor.u32 %v18795_v50, %v15839_v43  ;;  %v18759_v5 = vld [vmem:[#allocation9 + $0x64] sm:$0xf]  ;;  %v16622_v23 = vor.u32 %v18993_v26, %v16621_v42  ;;  %v16605_v29 = vld [vmem:[#allocation9 + $0x780] sm:$0xf] }
 0x746   :  { %9188 = vmatmul.bf16.vlgmr.msrb.gmra.mxu0 %v20927_v27  ;;  %v15970_v56 = vor.u32 %v18827_v49, %v15967_v63  ;;  %v15695_v9 = vld [vmem:[#allocation9 + $0x70] sm:$0xf0]  ;;  %v18791_v51 = vld [vmem:[#allocation9 + $0x164] sm:$0xf]  ;;  %v18989_v31 = vld [vmem:[#allocation9 + $0x78c] sm:$0xf0] }
 0x747   :  { %9236 = vmatpush.bf16.msra.mxu0 %v15762_v35  ;;  %9202 = vmatmul.bf16.vlgmr.msrb.gmra.mxu1 %v20929_v24  ;;  %v15823_v44 = vld [vmem:[#allocation9 + $0x170] sm:$0xf0]  ;;  %v18823_v40 = vld [vmem:[#allocation9 + $0x264] sm:$0xf]  ;;  %v15698_v45 = vor.u32 %v18759_v5, %v15695_v9  ;;  %v16573_v49 = vld [vmem:[#allocation9 + $0x740] sm:$0xf] }
 0x748   :  { %9250 = vmatpush.bf16.msra.mxu1 %v15890_v62  ;;  %9216 = vmatmul.bf16.vlgmr.msrb.gmra.mxu2 %v20931_v7  ;;  %v15951_v2 = vld [vmem:[#allocation9 + $0x270] sm:$0xf0]  ;;  %v15826_v15 = vor.u32 %v18791_v51, %v15823_v44  ;;  %v18755_v12 = vld [vmem:[#allocation9 + $0x44] sm:$0xf]  ;;  %v16606_v62 = vor.u32 %v18989_v31, %v16605_v29  ;;  %v18981_v63 = vld [vmem:[#allocation9 + $0x74c] sm:$0xf0] }
 0x749   :  { %9264 = vmatpush.bf16.msra.mxu2 %v16018_v13  ;;  %9223 = vmatpush.bf16.msrb.mxu3 %v16638_v30  ;;  %v15954_v59 = vor.u32 %v18823_v40, %v15951_v2  ;;  %v15679_v41 = vld [vmem:[#allocation9 + $0x50] sm:$0xf0]  ;;  %v18787_v32 = vld [vmem:[#allocation9 + $0x144] sm:$0xf]  ;;  %v16574_v30 = vor.u32 %v18981_v63, %v16573_v49  ;;  %v16557_v26 = vld [vmem:[#allocation9 + $0x720] sm:$0xf]  ;;  %v20942_v29 = vpop.f32.mrf.mxu3 }
 0x74a   :  { %v15807_v1 = vld [vmem:[#allocation9 + $0x150] sm:$0xf0]  ;;  %v18819_v37 = vld [vmem:[#allocation9 + $0x244] sm:$0xf]  ;;  %v15682_v16 = vor.u32 %v18755_v12, %v15679_v41 }
 0x74b   :  { %9237 = vmatpush.bf16.msra.mxu0 %v15746_v6  ;;  %v15935_v35 = vld [vmem:[#allocation9 + $0x250] sm:$0xf0]  ;;  %v15810_v13 = vor.u32 %v18787_v32, %v15807_v1  ;;  %v18751_v11 = vld [vmem:[#allocation9 + $0x24] sm:$0xf]  ;;  %v16541_v1 = vld [vmem:[#allocation9 + $0x700] sm:$0xf] }
 0x74c   :  { %9251 = vmatpush.bf16.msra.mxu1 %v15874_v39  ;;  %v15938_v52 = vor.u32 %v18819_v37, %v15935_v35  ;;  %v15663_v28 = vld [vmem:[#allocation9 + $0x30] sm:$0xf0]  ;;  %v18783_v20 = vld [vmem:[#allocation9 + $0x124] sm:$0xf]  ;;  %v16589_v39 = vld [vmem:[#allocation9 + $0x760] sm:$0xf]  ;;  %v20940_v35 = vpop.f32.mrf.mxu2 }
 0x74d   :  { %9265 = vmatpush.bf16.msra.mxu2 %v16002_v19  ;;  %9224 = vmatpush.bf16.msrb.mxu3 %v16622_v23  ;;  %v15791_v25 = vld [vmem:[#allocation9 + $0x130] sm:$0xf0]  ;;  %v18815_v46 = vld [vmem:[#allocation9 + $0x224] sm:$0xf]  ;;  %v18985_v19 = vld [vmem:[#allocation9 + $0x76c] sm:$0xf0]  ;;  %v15666_v8 = vor.u32 %v18751_v11, %v15663_v28 }
 0x74e   :  { %v15919_v6 = vld [vmem:[#allocation9 + $0x230] sm:$0xf0]  ;;  %v18747_v34 = vld [vmem:[#allocation9 + $0x4] sm:$0xf]  ;;  %v16590_v36 = vor.u32 %v18985_v19, %v16589_v39  ;;  %v15794_v22 = vor.u32 %v18783_v20, %v15791_v25  ;;  %v18973_v37 = vld [vmem:[#allocation9 + $0x70c] sm:$0xf0] }
 0x74f   :  { %9238 = vmatpush.bf16.msra.mxu0 %v15730_v53  ;;  %v15647_v10 = vld [vmem:[#allocation9 + $0x10] sm:$0xf0]  ;;  %v18779_v33 = vld [vmem:[#allocation9 + $0x104] sm:$0xf]  ;;  %v15922_v53 = vor.u32 %v18815_v46, %v15919_v6  ;;  %v16542_v25 = vor.u32 %v18973_v37, %v16541_v1 }
 0x750   :  { %9252 = vmatpush.bf16.msra.mxu1 %v15858_v58  ;;  %v15775_v38 = vld [vmem:[#allocation9 + $0x110] sm:$0xf0]  ;;  %v18811_v58 = vld [vmem:[#allocation9 + $0x204] sm:$0xf]  ;;  %v15650_v60 = vor.u32 %v18747_v34, %v15647_v10  ;;  %v20949_v34 = vpop.f32.mrf.mxu1 }
 0x751   :  { %9266 = vmatpush.bf16.msra.mxu2 %v15986_v0  ;;  %9225 = vmatpush.bf16.msrb.mxu3 %v16606_v62  ;;  %v15903_v0 = vld [vmem:[#allocation9 + $0x210] sm:$0xf0]  ;;  %v18903_v4 = vld [vmem:[#allocation9 + $0x4e4] sm:$0xf]  ;;  %v20954_v63 = vpop.f32.mrf.mxu3 }
 0x752   :  { %v16271_v57 = vld [vmem:[#allocation9 + $0x4f0] sm:$0xf0]  ;;  %v18935_v50 = vld [vmem:[#allocation9 + $0x5e4] sm:$0xf] }
 0x753   :  { %9239 = vmatpush.bf16.msra.mxu0 %v15714_v21  ;;  %v16399_v43 = vld [vmem:[#allocation9 + $0x5f0] sm:$0xf0]  ;;  %v18967_v18 = vld [vmem:[#allocation9 + $0x6e4] sm:$0xf]  ;;  %v16274_v5 = vor.u32 %v18903_v4, %v16271_v57  ;;  %v1497_v4 = vperm.slane %v20822_v55, 7 }
 0x754   :  { %9253 = vmatpush.bf16.msra.mxu1 %v15842_v61  ;;  %v16527_v21 = vld [vmem:[#allocation9 + $0x6f0] sm:$0xf0]  ;;  %v15778_v61 = vor.u32 %v18779_v33, %v15775_v38  ;;  %v16402_v9 = vor.u32 %v18935_v50, %v16399_v43  ;;  %v18899_v51 = vld [vmem:[#allocation9 + $0x4c4] sm:$0xf]  ;;  %v20952_v49 = vpop.f32.mrf.mxu2 }
 0x755   :  { %9267 = vmatpush.bf16.msra.mxu2 %v15970_v56  ;;  %9226 = vmatpush.bf16.msrb.mxu3 %v16590_v36  ;;  %v15906_v56 = vor.u32 %v18811_v58, %v15903_v0  ;;  %v16255_v44 = vld [vmem:[#allocation9 + $0x4d0] sm:$0xf0]  ;;  %v18931_v40 = vld [vmem:[#allocation9 + $0x5c4] sm:$0xf]  ;;  %v16530_v2 = vor.u32 %v18967_v18, %v16527_v21 }
 0x756   :  { %v16383_v42 = vld [vmem:[#allocation9 + $0x5d0] sm:$0xf0]  ;;  %v18963_v23 = vld [vmem:[#allocation9 + $0x6c4] sm:$0xf]  ;;  %v16258_v12 = vor.u32 %v18899_v51, %v16255_v44 }
 0x757   :  { %9240 = vmatpush.bf16.msra.mxu0 %v15698_v45  ;;  %v18977_v45 = vld [vmem:[#allocation9 + $0x72c] sm:$0xf0]  ;;  %v16386_v41 = vor.u32 %v18931_v40, %v16383_v42  ;;  %v18895_v32 = vld [vmem:[#allocation9 + $0x4a4] sm:$0xf]  ;;  %v16495_v28 = vld [vmem:[#allocation9 + $0x6b0] sm:$0xf0] }
 0x758   :  { %9254 = vmatpush.bf16.msra.mxu1 %v15826_v15  ;;  %v16511_v15 = vld [vmem:[#allocation9 + $0x6d0] sm:$0xf0]  ;;  %v18927_v62 = vld [vmem:[#allocation9 + $0x5a4] sm:$0xf]  ;;  %v20959_v37 = vpop.f32.mrf.mxu1 }
 0x759   :  { %9268 = vmatpush.bf16.msra.mxu2 %v15954_v59  ;;  %9227 = vmatpush.bf16.msrb.mxu3 %v16574_v30  ;;  %v16558_v59 = vor.u32 %v18977_v45, %v16557_v26  ;;  %v16514_v31 = vor.u32 %v18963_v23, %v16511_v15  ;;  %v18959_v11 = vld [vmem:[#allocation9 + $0x6a4] sm:$0xf]  ;;  %v16143_v46 = vld [vmem:[#allocation9 + $0x3f0] sm:$0xf0]  ;;  %v7368_v26 = vadd.f32 %v20936_v3, %v1497_v4 }
 0x75a   :  { %v18871_v20 = vld [vmem:[#allocation9 + $0x3e4] sm:$0xf]  ;;  %v16498_v10 = vor.u32 %v18959_v11, %v16495_v28  ;;  %v16351_v36 = vld [vmem:[#allocation9 + $0x590] sm:$0xf0] }
 0x75b   :  { %9241 = vmatpush.bf16.msra.mxu0 %v15682_v16  ;;  %v16239_v16 = vld [vmem:[#allocation9 + $0x4b0] sm:$0xf0]  ;;  %v18891_v19 = vld [vmem:[#allocation9 + $0x484] sm:$0xf] }
 0x75c   :  { %9255 = vmatpush.bf16.msra.mxu1 %v15810_v13  ;;  %v16367_v13 = vld [vmem:[#allocation9 + $0x5b0] sm:$0xf0]  ;;  %v16242_v6 = vor.u32 %v18895_v32, %v16239_v16  ;;  %v18923_v33 = vld [vmem:[#allocation9 + $0x584] sm:$0xf] }
 0x75d   :  { %9269 = vmatpush.bf16.msra.mxu2 %v15938_v52  ;;  %v20945_v52 = vpop.f32.mrf.mxu0  ;;  %9228 = vmatpush.bf16.msrb.mxu3 %v16558_v59  ;;  %v16370_v39 = vor.u32 %v18927_v62, %v16367_v13  ;;  %v16479_v38 = vld [vmem:[#allocation9 + $0x690] sm:$0xf0]  ;;  %v18867_v58 = vld [vmem:[#allocation9 + $0x3c4] sm:$0xf]  ;;  %v16354_v50 = vor.u32 %v18923_v33, %v16351_v36  ;;  %v7382_v13 = vadd.f32 %v20938_v48, %v7368_v26 }
 0x75e   :  { %v16127_v0 = vld [vmem:[#allocation9 + $0x3d0] sm:$0xf0]  ;;  %v18887_v43 = vld [vmem:[#allocation9 + $0x464] sm:$0xf] }
 0x75f   :  { %9242 = vmatpush.bf16.msra.mxu0 %v15666_v8  ;;  %v16223_v8 = vld [vmem:[#allocation9 + $0x490] sm:$0xf0]  ;;  %v18919_v21 = vld [vmem:[#allocation9 + $0x564] sm:$0xf] }
 0x760   :  { %9256 = vmatpush.bf16.msra.mxu1 %v15794_v22  ;;  %v18955_v22 = vld [vmem:[#allocation9 + $0x684] sm:$0xf]  ;;  %v16226_v57 = vor.u32 %v18891_v19, %v16223_v8  ;;  %v16207_v18 = vld [vmem:[#allocation9 + $0x470] sm:$0xf0]  ;;  %v7396_v19 = vadd.f32 %v20945_v52, %v7382_v13  ;;  %v7425_v8 = vpop.f32.mrf.mxu2 }
 0x761   :  { %9270 = vmatpush.bf16.msra.mxu2 %v15922_v53  ;;  %v16146_v53 = vor.u32 %v18871_v20, %v16143_v46  ;;  %9229 = vmatpush.bf16.msrb.mxu3 %v16542_v25  ;;  %v16335_v30 = vld [vmem:[#allocation9 + $0x570] sm:$0xf0]  ;;  %v16210_v44 = vor.u32 %v18887_v43, %v16207_v18  ;;  %v18915_v23 = vld [vmem:[#allocation9 + $0x544] sm:$0xf]  ;;  %v7370_v46 = vadd.f32 %v20940_v35, %v1497_v4  ;;  %v18778_v18 = vld [vmem:[#allocation9 + $0xf4] sm:$0xf0] }
 0x762   :  { %v16111_v55 = vld [vmem:[#allocation9 + $0x3b0] sm:$0xf0]  ;;  %v16338_v40 = vor.u32 %v18919_v21, %v16335_v30  ;;  %v18947_v59 = vld [vmem:[#allocation9 + $0x644] sm:$0xf]  ;;  %v15893_v21 = vld [vmem:[#allocation9 + $0x1e8] sm:$0xf]  ;;  %v7410_v30 = vadd.f32 %v20949_v34, %v7396_v19 }
 0x763   :  { %9243 = vmatpush.bf16.msra.mxu0 %v15650_v60  ;;  %v16482_v60 = vor.u32 %v18955_v22, %v16479_v38  ;;  %v16191_v42 = vld [vmem:[#allocation9 + $0x450] sm:$0xf0]  ;;  %v18859_v32 = vld [vmem:[#allocation9 + $0x384] sm:$0xf]  ;;  %v7384_v43 = vadd.f32 %v20942_v29, %v7370_v46  ;;  %v15861_v19 = vld [vmem:[#allocation9 + $0x1a8] sm:$0xf] }
 0x764   :  { %9257 = vmatpush.bf16.msra.mxu1 %v15778_v61  ;;  %v16130_v61 = vor.u32 %v18867_v58, %v16127_v0  ;;  %v16319_v15 = vld [vmem:[#allocation9 + $0x550] sm:$0xf0]  ;;  %v18879_v62 = vld [vmem:[#allocation9 + $0x424] sm:$0xf] }
 0x765   :  { %9271 = vmatpush.bf16.msra.mxu2 %v15906_v56  ;;  %9278 = vmatpush.bf16.msra.mxu3 %v16146_v53  ;;  %v18951_v56 = vld [vmem:[#allocation9 + $0x664] sm:$0xf]  ;;  %v20956_v51 = vpop.f32.mrf.mxu0  ;;  %v16095_v1 = vld [vmem:[#allocation9 + $0x390] sm:$0xf0]  ;;  %v16322_v16 = vor.u32 %v18915_v23, %v16319_v15  ;;  %v15749_v15 = vld [vmem:[#allocation9 + $0xc8] sm:$0xf] }
 0x766   :  { %9244 = vmatmul.bf16.vlgmr.msra.gmra.mxu0 %v20880_v47  ;;  %v16175_v11 = vld [vmem:[#allocation9 + $0x430] sm:$0xf0]  ;;  %v18911_v28 = vld [vmem:[#allocation9 + $0x524] sm:$0xf]  ;;  %v16098_v25 = vor.u32 %v18859_v32, %v16095_v1  ;;  %v16005_v1 = vld [vmem:[#allocation9 + $0x2c8] sm:$0xf] }
 0x767   :  { %9292 = vmatpush.bf16.msrb.mxu0 %v16274_v5  ;;  %9258 = vmatmul.bf16.vlgmr.msra.gmra.mxu1 %v20884_v14  ;;  %v16463_v5 = vld [vmem:[#allocation9 + $0x670] sm:$0xf0]  ;;  %v18855_v33 = vld [vmem:[#allocation9 + $0x364] sm:$0xf]  ;;  %v16178_v48 = vor.u32 %v18879_v62, %v16175_v11 }
 0x768   :  { %9306 = vmatpush.bf16.msrb.mxu1 %v16402_v9  ;;  %9272 = vmatmul.bf16.vlgmr.msra.gmra.mxu2 %v20886_v54  ;;  %v18863_v9 = vld [vmem:[#allocation9 + $0x3a4] sm:$0xf]  ;;  %v16466_v45 = vor.u32 %v18951_v56, %v16463_v5  ;;  %v16303_v20 = vld [vmem:[#allocation9 + $0x530] sm:$0xf0]  ;;  %v18810_v56 = vld [vmem:[#allocation9 + $0x1f4] sm:$0xf0] }
 0x769   :  { %9320 = vmatpush.bf16.msrb.mxu2 %v16530_v2  ;;  %v18883_v2 = vld [vmem:[#allocation9 + $0x444] sm:$0xf]  ;;  %9279 = vmatpush.bf16.msra.mxu3 %v16130_v61  ;;  %v16079_v36 = vld [vmem:[#allocation9 + $0x370] sm:$0xf0]  ;;  %v16306_v53 = vor.u32 %v18911_v28, %v16303_v20  ;;  %v20970_v61 = vpop.f32.mrf.mxu1  ;;  %v16021_v5 = vld [vmem:[#allocation9 + $0x2e8] sm:$0xf]  ;;  %v15894_v34 = vor.u32 %v18810_v56, %v15893_v21 }
 0x76a   :  { %v18875_v38 = vld [vmem:[#allocation9 + $0x404] sm:$0xf]  ;;  %v16159_v58 = vld [vmem:[#allocation9 + $0x410] sm:$0xf0]  ;;  %v16082_v52 = vor.u32 %v18855_v33, %v16079_v36  ;;  %v18834_v33 = vld [vmem:[#allocation9 + $0x2b4] sm:$0xf0] }
 0x76b   :  { %9293 = vmatpush.bf16.msrb.mxu0 %v16258_v12  ;;  %v16114_v12 = vor.u32 %v18863_v9, %v16111_v55  ;;  %v18907_v0 = vld [vmem:[#allocation9 + $0x504] sm:$0xf]  ;;  %v16287_v4 = vld [vmem:[#allocation9 + $0x510] sm:$0xf0]  ;;  %v18842_v9 = vld [vmem:[#allocation9 + $0x2f4] sm:$0xf0]  ;;  %v7398_v55 = vadd.f32 %v20956_v51, %v7384_v43 }
 0x76c   :  { %9307 = vmatpush.bf16.msrb.mxu1 %v16386_v41  ;;  %v16447_v41 = vld [vmem:[#allocation9 + $0x650] sm:$0xf0]  ;;  %v18851_v26 = vld [vmem:[#allocation9 + $0x344] sm:$0xf]  ;;  %v16022_v23 = vor.u32 %v18842_v9, %v16021_v5  ;;  %v18806_v51 = vld [vmem:[#allocation9 + $0x1d4] sm:$0xf0] }
 0x76d   :  { %9321 = vmatpush.bf16.msrb.mxu2 %v16514_v31  ;;  %v16194_v31 = vor.u32 %v18883_v2, %v16191_v42  ;;  %v16450_v3 = vor.u32 %v18947_v59, %v16447_v41  ;;  %9280 = vmatpush.bf16.msra.mxu3 %v16114_v12  ;;  %v20966_v22 = vpop.f32.mrf.mxu0  ;;  %v7424_v2 = vadd.f32 %v20952_v49, %v7410_v30  ;;  %v18774_v59 = vld [vmem:[#allocation9 + $0xd4] sm:$0xf0]  ;;  %v15877_v12 = vld [vmem:[#allocation9 + $0x1c8] sm:$0xf]  ;;  %v7479_v41 = vpop.f32.mrf.mxu2  ;;  %v16047_v11 = vld [vmem:[#allocation9 + $0x330] sm:$0xf0] }
 0x76e   :  { %v15750_v13 = vor.u32 %v18774_v59, %v15749_v15  ;;  %v18798_v43 = vld [vmem:[#allocation9 + $0x194] sm:$0xf0] }
 0x76f   :  { %9294 = vmatpush.bf16.msrb.mxu0 %v16242_v6  ;;  %v18943_v6 = vld [vmem:[#allocation9 + $0x624] sm:$0xf]  ;;  %v7438_v62 = vadd.f32 %v20954_v63, %v7424_v2  ;;  %v15989_v63 = vld [vmem:[#allocation9 + $0x2a8] sm:$0xf] }
 0x770   :  { %9308 = vmatpush.bf16.msrb.mxu1 %v16370_v39  ;;  %v16431_v39 = vld [vmem:[#allocation9 + $0x630] sm:$0xf0] }
 0x771   :  { %9322 = vmatpush.bf16.msrb.mxu2 %v16498_v10  ;;  %v20964_v10 = vpop.f32.mrf.mxu3  ;;  %v16434_v35 = vor.u32 %v18943_v6, %v16431_v39  ;;  %9281 = vmatpush.bf16.msra.mxu3 %v16098_v25  ;;  %v15878_v25 = vor.u32 %v18806_v51, %v15877_v12  ;;  %v15733_v6 = vld [vmem:[#allocation9 + $0xa8] sm:$0xf]  ;;  %v18770_v39 = vld [vmem:[#allocation9 + $0xb4] sm:$0xf0]  ;;  %v7452_v36 = vadd.f32 %v20966_v22, %v7438_v62 }
 0x772   :  { %v15973_v22 = vld [vmem:[#allocation9 + $0x288] sm:$0xf] }
 0x773   :  { %9295 = vmatpush.bf16.msrb.mxu0 %v16226_v57  ;;  %v18939_v57 = vld [vmem:[#allocation9 + $0x604] sm:$0xf]  ;;  %v15941_v62 = vld [vmem:[#allocation9 + $0x248] sm:$0xf] }
 0x774   :  { %9309 = vmatpush.bf16.msrb.mxu1 %v16354_v50  ;;  %v16415_v50 = vld [vmem:[#allocation9 + $0x610] sm:$0xf0] }
 0x775   :  { %9323 = vmatpush.bf16.msrb.mxu2 %v16482_v60  ;;  %v15765_v60 = vld [vmem:[#allocation9 + $0xe8] sm:$0xf]  ;;  %v16418_v29 = vor.u32 %v18939_v57, %v16415_v50  ;;  %9282 = vmatpush.bf16.msra.mxu3 %v16082_v52  ;;  %v7453_v20 = vpop.f32.mrf.mxu0  ;;  %v18766_v50 = vld [vmem:[#allocation9 + $0x94] sm:$0xf0]  ;;  %v7481_v56 = vpop.f32.mrf.mxu2 }
 0x776   :  { %v15766_v42 = vor.u32 %v18778_v18, %v15765_v60  ;;  %v15717_v57 = vld [vmem:[#allocation9 + $0x88] sm:$0xf]  ;;  %v18830_v60 = vld [vmem:[#allocation9 + $0x294] sm:$0xf0]  ;;  %v7466_v18 = vadd.f32 %v20970_v61, %v7452_v36 }
 0x777   :  { %9296 = vmatpush.bf16.msrb.mxu0 %v16210_v44  ;;  %v16162_v44 = vor.u32 %v18875_v38, %v16159_v58  ;;  %v18843_v38 = vld [vmem:[#allocation9 + $0x304] sm:$0xf]  ;;  %v16031_v58 = vld [vmem:[#allocation9 + $0x310] sm:$0xf0]  ;;  %v15845_v52 = vld [vmem:[#allocation9 + $0x188] sm:$0xf]  ;;  %v15718_v9 = vor.u32 %v18766_v50, %v15717_v57  ;;  %v15974_v2 = vor.u32 %v18830_v60, %v15973_v22 }
 0x778   :  { %9310 = vmatpush.bf16.msrb.mxu1 %v16338_v40  ;;  %v16290_v40 = vor.u32 %v18907_v0, %v16287_v4  ;;  %v15990_v4 = vor.u32 %v18834_v33, %v15989_v63  ;;  %v16034_v30 = vor.u32 %v18843_v38, %v16031_v58  ;;  %v18786_v63 = vld [vmem:[#allocation9 + $0x134] sm:$0xf0]  ;;  %v15925_v33 = vld [vmem:[#allocation9 + $0x228] sm:$0xf] }
 0x779   :  { %9324 = vmatpush.bf16.msrb.mxu2 %v16466_v45  ;;  %v16063_v45 = vld [vmem:[#allocation9 + $0x350] sm:$0xf0]  ;;  %v20974_v32 = vpop.f32.mrf.mxu3  ;;  %v18818_v36 = vld [vmem:[#allocation9 + $0x234] sm:$0xf0]  ;;  %v15653_v38 = vld [vmem:[#allocation9 + $0x8] sm:$0xf] }
 0x77a   :  { %v16066_v49 = vor.u32 %v18851_v26, %v16063_v45  ;;  %v18794_v26 = vld [vmem:[#allocation9 + $0x174] sm:$0xf0]  ;;  %v15957_v45 = vld [vmem:[#allocation9 + $0x268] sm:$0xf] }
 0x77b   :  { %9297 = vmatpush.bf16.msrb.mxu0 %v16194_v31  ;;  %v18838_v31 = vld [vmem:[#allocation9 + $0x2d4] sm:$0xf0]  ;;  %v15781_v57 = vld [vmem:[#allocation9 + $0x108] sm:$0xf] }
 0x77c   :  { %9311 = vmatpush.bf16.msrb.mxu1 %v16322_v16  ;;  %v7412_v16 = vadd.f32 %v20959_v37, %v7398_v55  ;;  %v16006_v46 = vor.u32 %v18838_v31, %v16005_v1  ;;  %v18802_v37 = vld [vmem:[#allocation9 + $0x1b4] sm:$0xf0]  ;;  %9283 = vmatpush.bf16.msra.mxu3 %v16066_v49  ;;  %v7480_v55 = vadd.f32 %v7479_v41, %v7466_v18  ;;  %v15685_v1 = vld [vmem:[#allocation9 + $0x48] sm:$0xf] }
 0x77d   :  { %9325 = vmatpush.bf16.msrb.mxu2 %v16450_v3  ;;  %v18847_v3 = vld [vmem:[#allocation9 + $0x324] sm:$0xf]  ;;  %v18758_v31 = vld [vmem:[#allocation9 + $0x54] sm:$0xf0]  ;;  %v16277_v60 = vld [vmem:[#allocation9 + $0x4e8] sm:$0xf] }
 0x77e   :  { %v7426_v28 = vadd.f32 %v7425_v8, %v7412_v16  ;;  %v16050_v8 = vor.u32 %v18847_v3, %v16047_v11  ;;  %v7494_v12 = vadd.f32 %v20974_v32, %v7480_v55  ;;  %v15813_v16 = vld [vmem:[#allocation9 + $0x148] sm:$0xf]  ;;  %v18790_v49 = vld [vmem:[#allocation9 + $0x154] sm:$0xf0] }
 0x77f   :  { %9298 = vmatpush.bf16.msrb.mxu0 %v16178_v48  ;;  %v7467_v48 = vpop.f32.mrf.mxu1  ;;  %v15814_v32 = vor.u32 %v18790_v49, %v15813_v16  ;;  %v18782_v50 = vld [vmem:[#allocation9 + $0x114] sm:$0xf0]  ;;  %v16533_v55 = vld [vmem:[#allocation9 + $0x6e8] sm:$0xf] }
 0x780   :  { %9312 = vmatpush.bf16.msrb.mxu1 %v16306_v53  ;;  %v15734_v53 = vor.u32 %v18770_v39, %v15733_v6  ;;  %v7440_v0 = vadd.f32 %v20964_v10, %v7426_v28  ;;  %9284 = vmatpush.bf16.msra.mxu3 %v16050_v8  ;;  %v15701_v10 = vld [vmem:[#allocation9 + $0x68] sm:$0xf]  ;;  %v18814_v22 = vld [vmem:[#allocation9 + $0x214] sm:$0xf0] }
 0x781   :  { %9326 = vmatpush.bf16.msrb.mxu2 %v16434_v35  ;;  %v15862_v35 = vor.u32 %v18802_v37, %v15861_v19  ;;  %v7495_v5 = vpop.f32.mrf.mxu3  ;;  %v15669_v39 = vld [vmem:[#allocation9 + $0x28] sm:$0xf]  ;;  %v18754_v19 = vld [vmem:[#allocation9 + $0x34] sm:$0xf0] }
 0x782   :  { %v7454_v21 = vadd.f32 %v7453_v20, %v7440_v0  ;;  %v15686_v20 = vor.u32 %v18758_v31, %v15685_v1  ;;  %v15797_v37 = vld [vmem:[#allocation9 + $0x128] sm:$0xf]  ;;  %v18999_v1 = vld [vmem:[#allocation9 + $0x7e4] sm:$0xf]  ;;  %v16655_v31 = vld [vmem:[#allocation9 + $0x7f0] sm:$0xf0] }
 0x783   :  { %9299 = vmatpush.bf16.msrb.mxu0 %v16162_v44  ;;  %v7507_v44 = vpop.f32.mrf.mxu0  ;;  %v15798_v0 = vor.u32 %v18786_v63, %v15797_v37  ;;  %v16639_v37 = vld [vmem:[#allocation9 + $0x7d0] sm:$0xf0] }
 0x784   :  { %9313 = vmatpush.bf16.msrb.mxu1 %v16290_v40  ;;  %v15846_v40 = vor.u32 %v18798_v43, %v15845_v52  ;;  %v7468_v61 = vadd.f32 %v7467_v48, %v7454_v21  ;;  %9285 = vmatpush.bf16.msra.mxu3 %v16034_v30  ;;  %v7508_v3 = vadd.f32 %v7507_v44, %v7494_v12  ;;  %v15909_v43 = vld [vmem:[#allocation9 + $0x208] sm:$0xf]  ;;  %v18906_v21 = vld [vmem:[#allocation9 + $0x4f4] sm:$0xf0] }
 0x785   :  { %9327 = vmatpush.bf16.msrb.mxu2 %v16418_v29  ;;  %v18762_v29 = vld [vmem:[#allocation9 + $0x74] sm:$0xf0]  ;;  %v16405_v30 = vld [vmem:[#allocation9 + $0x5e8] sm:$0xf] }
 0x786   :  { %9300 = vmatmul.bf16.vlgmr.msrb.gmra.mxu0 %v20927_v27  ;;  %v15702_v15 = vor.u32 %v18762_v29, %v15701_v10  ;;  %v7482_v51 = vadd.f32 %v7481_v56, %v7468_v61  ;;  %v18938_v56 = vld [vmem:[#allocation9 + $0x5f4] sm:$0xf0]  ;;  %v15782_v10 = vor.u32 %v18782_v50, %v15781_v57  ;;  %v15910_v29 = vor.u32 %v18814_v22, %v15909_v43  ;;  %v16623_v57 = vld [vmem:[#allocation9 + $0x7b0] sm:$0xf0]  ;;  %v16213_v43 = vld [vmem:[#allocation9 + $0x468] sm:$0xf] }
 0x787   :  { %9348 = vmatpush.bf16.msra.mxu0 %v15766_v42  ;;  %9314 = vmatmul.bf16.vlgmr.msrb.gmra.mxu1 %v20929_v24  ;;  %v15829_v42 = vld [vmem:[#allocation9 + $0x168] sm:$0xf]  ;;  %v18970_v44 = vld [vmem:[#allocation9 + $0x6f4] sm:$0xf0] }
 0x788   :  { %9362 = vmatpush.bf16.msra.mxu1 %v15894_v34  ;;  %9328 = vmatmul.bf16.vlgmr.msrb.gmra.mxu2 %v20931_v7  ;;  %v18826_v34 = vld [vmem:[#allocation9 + $0x274] sm:$0xf0]  ;;  %v15830_v59 = vor.u32 %v18794_v26, %v15829_v42  ;;  %v16278_v26 = vor.u32 %v18906_v21, %v16277_v60  ;;  %v16341_v21 = vld [vmem:[#allocation9 + $0x568] sm:$0xf] }
 0x789   :  { %9376 = vmatpush.bf16.msra.mxu2 %v16022_v23  ;;  %v7521_v23 = vpop.f32.mrf.mxu1  ;;  %v15958_v41 = vor.u32 %v18826_v34, %v15957_v45  ;;  %v16406_v45 = vor.u32 %v18938_v56, %v16405_v30  ;;  %v16261_v34 = vld [vmem:[#allocation9 + $0x4c8] sm:$0xf]  ;;  %v18902_v61 = vld [vmem:[#allocation9 + $0x4d4] sm:$0xf0] }
 0x78a   :  { %v7535_v11 = vpop.f32.mrf.mxu2  ;;  %v7522_v8 = vadd.f32 %v7521_v23, %v7508_v3  ;;  %v18934_v12 = vld [vmem:[#allocation9 + $0x5d4] sm:$0xf0]  ;;  %v16245_v3 = vld [vmem:[#allocation9 + $0x4a8] sm:$0xf] }
 0x78b   :  { %9349 = vmatpush.bf16.msra.mxu0 %v15750_v13  ;;  %v18822_v13 = vld [vmem:[#allocation9 + $0x254] sm:$0xf0]  ;;  %v16469_v56 = vld [vmem:[#allocation9 + $0x668] sm:$0xf] }
 0x78c   :  { %9363 = vmatpush.bf16.msra.mxu1 %v15878_v25  ;;  %v7549_v28 = vpop.f32.mrf.mxu3  ;;  %v7496_v25 = vadd.f32 %v7495_v5, %v7482_v51  ;;  %v15942_v6 = vor.u32 %v18822_v13, %v15941_v62  ;;  %v7536_v58 = vadd.f32 %v7535_v11, %v7522_v8  ;;  %v16517_v51 = vld [vmem:[#allocation9 + $0x6c8] sm:$0xf]  ;;  %v16262_v62 = vor.u32 %v18902_v61, %v16261_v34  ;;  %v18898_v11 = vld [vmem:[#allocation9 + $0x4b4] sm:$0xf0] }
 0x78d   :  { %9377 = vmatpush.bf16.msra.mxu2 %v16006_v46  ;;  %v7509_v46 = vpop.f32.mrf.mxu0  ;;  %v16246_v63 = vor.u32 %v18898_v11, %v16245_v3  ;;  %v18894_v8 = vld [vmem:[#allocation9 + $0x494] sm:$0xf0]  ;;  %v16453_v34 = vld [vmem:[#allocation9 + $0x648] sm:$0xf]  ;;  %v18979_v3 = vld [vmem:[#allocation9 + $0x744] sm:$0xf] }
 0x78e   :  { %v7510_v48 = vadd.f32 %v7509_v46, %v7496_v25  ;;  %v16658_v25 = vor.u32 %v18999_v1, %v16655_v31  ;;  %v16373_v46 = vld [vmem:[#allocation9 + $0x5a8] sm:$0xf]  ;;  %v18890_v22 = vld [vmem:[#allocation9 + $0x474] sm:$0xf0]  ;;  %v16575_v11 = vld [vmem:[#allocation9 + $0x750] sm:$0xf0] }
 0x78f   :  { %9350 = vmatpush.bf16.msra.mxu0 %v15734_v53  ;;  %v15670_v53 = vor.u32 %v18754_v19, %v15669_v39  ;;  %v18962_v39 = vld [vmem:[#allocation9 + $0x6b4] sm:$0xf0]  ;;  %v18995_v19 = vld [vmem:[#allocation9 + $0x7c4] sm:$0xf] }
 0x790   :  { %9364 = vmatpush.bf16.msra.mxu1 %v15862_v35  ;;  %v15926_v35 = vor.u32 %v18818_v36, %v15925_v33  ;;  %v16229_v36 = vld [vmem:[#allocation9 + $0x488] sm:$0xf]  ;;  %v18922_v30 = vld [vmem:[#allocation9 + $0x574] sm:$0xf0] }
 0x791   :  { %9378 = vmatpush.bf16.msra.mxu2 %v15990_v4  ;;  %v18750_v4 = vld [vmem:[#allocation9 + $0x14] sm:$0xf0]  ;;  %v7523_v52 = vpop.f32.mrf.mxu1  ;;  %v16230_v50 = vor.u32 %v18894_v8, %v16229_v36  ;;  %v18975_v36 = vld [vmem:[#allocation9 + $0x724] sm:$0xf]  ;;  %v16559_v8 = vld [vmem:[#allocation9 + $0x730] sm:$0xf0] }
 0x792   :  { %v7524_v18 = vadd.f32 %v7523_v52, %v7510_v48  ;;  %v7537_v5 = vpop.f32.mrf.mxu2  ;;  %v18950_v61 = vld [vmem:[#allocation9 + $0x654] sm:$0xf0] }
 0x793   :  { %9351 = vmatpush.bf16.msra.mxu0 %v15718_v9  ;;  %v15654_v9 = vor.u32 %v18750_v4, %v15653_v38  ;;  %v16357_v38 = vld [vmem:[#allocation9 + $0x588] sm:$0xf]  ;;  %v18991_v4 = vld [vmem:[#allocation9 + $0x7a4] sm:$0xf]  ;;  %v16454_v1 = vor.u32 %v18950_v61, %v16453_v34 }
 0x794   :  { %9365 = vmatpush.bf16.msra.mxu1 %v15846_v40  ;;  %v7550_v40 = vadd.f32 %v7549_v28, %v7536_v58  ;;  %v7551_v42 = vpop.f32.mrf.mxu3  ;;  %v18926_v58 = vld [vmem:[#allocation9 + $0x594] sm:$0xf0] }
 0x795   :  { %9379 = vmatpush.bf16.msra.mxu2 %v15974_v2  ;;  %v7538_v2 = vadd.f32 %v7537_v5, %v7524_v18  ;;  %v16358_v52 = vor.u32 %v18926_v58, %v16357_v38  ;;  %v16626_v18 = vor.u32 %v18991_v4, %v16623_v57  ;;  %v18954_v5 = vld [vmem:[#allocation9 + $0x674] sm:$0xf0]  ;;  %v18808_v38 = vld [vmem:[#allocation9 + $0x1ec] sm:$0xf]  ;;  %v15895_v58 = vld [vmem:[#allocation9 + $0x1f8] sm:$0xf0] }
 0x796   :  { %v7561_v16 = vmax.f32 %v7550_v40, 0.0  ;;  %v16197_v40 = vld [vmem:[#allocation9 + $0x448] sm:$0xf]  ;;  %v18840_v4 = vld [vmem:[#allocation9 + $0x2ec] sm:$0xf] }
 0x797   :  { %9352 = vmatpush.bf16.msra.mxu0 %v15702_v15  ;;  %v7552_v23 = vadd.f32 %v7551_v42, %v7538_v2  ;;  %v16534_v15 = vor.u32 %v18970_v44, %v16533_v55  ;;  %v16214_v55 = vor.u32 %v18890_v22, %v16213_v43  ;;  %v16342_v44 = vor.u32 %v18922_v30, %v16341_v21  ;;  %v18886_v2 = vld [vmem:[#allocation9 + $0x454] sm:$0xf0]  ;;  %v16023_v57 = vld [vmem:[#allocation9 + $0x2f8] sm:$0xf0]  ;;  %v18971_v43 = vld [vmem:[#allocation9 + $0x704] sm:$0xf] }
 0x798   :  { %9366 = vmatpush.bf16.msra.mxu1 %v15830_v59  ;;  %v16389_v59 = vld [vmem:[#allocation9 + $0x5c8] sm:$0xf]  ;;  %v18772_v21 = vld [vmem:[#allocation9 + $0xcc] sm:$0xf]  ;;  %v15751_v30 = vld [vmem:[#allocation9 + $0xd8] sm:$0xf0] }
 0x799   :  { %9380 = vmatpush.bf16.msra.mxu2 %v15958_v41  ;;  %v18966_v41 = vld [vmem:[#allocation9 + $0x6d4] sm:$0xf0]  ;;  %v7569_v49 = vmax.f32 %v7552_v23, 0.0  ;;  %v16390_v13 = vor.u32 %v18934_v12, %v16389_v59  ;;  %v18983_v23 = vld [vmem:[#allocation9 + $0x764] sm:$0xf]  ;;  %v16198_v59 = vor.u32 %v18886_v2, %v16197_v40 }
 0x79a   :  { %v18874_v40 = vld [vmem:[#allocation9 + $0x3f4] sm:$0xf0] }
 0x79b   :  { %9353 = vmatpush.bf16.msra.mxu0 %v15686_v20  ;;  %v20985_v28 = vpack.c.bf16 %v7569_v49, %v7561_v16  ;;  %v16518_v20 = vor.u32 %v18966_v41, %v16517_v51  ;;  %v16181_v51 = vld [vmem:[#allocation9 + $0x428] sm:$0xf]  ;;  %v18882_v41 = vld [vmem:[#allocation9 + $0x434] sm:$0xf0] }
 0x79c   :  { %9367 = vmatpush.bf16.msra.mxu1 %v15814_v32  ;;  %v18930_v32 = vld [vmem:[#allocation9 + $0x5b4] sm:$0xf0]  ;;  %v16309_v16 = vld [vmem:[#allocation9 + $0x528] sm:$0xf] }
 0x79d   :  { %9381 = vmatpush.bf16.msra.mxu2 %v15942_v6  ;;  %v16501_v6 = vld [vmem:[#allocation9 + $0x6a8] sm:$0xf]  ;;  %9230 = vmatmul.bf16.vlgmr.msrb.gmra.mxu3 %v20985_v28  ;;  %v16374_v33 = vor.u32 %v18930_v32, %v16373_v46  ;;  %v18914_v49 = vld [vmem:[#allocation9 + $0x534] sm:$0xf0] }
 0x79e   :  { %9334 = vmatpush.bf16.msrb.mxu3 %v16658_v25  ;;  %v16502_v48 = vor.u32 %v18962_v39, %v16501_v6  ;;  %v16310_v25 = vor.u32 %v18914_v49, %v16309_v16  ;;  %v16165_v46 = vld [vmem:[#allocation9 + $0x408] sm:$0xf]  ;;  %v18878_v32 = vld [vmem:[#allocation9 + $0x414] sm:$0xf0]  ;;  %v18764_v16 = vld [vmem:[#allocation9 + $0x8c] sm:$0xf] }
 0x79f   :  { %9354 = vmatpush.bf16.msra.mxu0 %v15670_v53  ;;  %v16642_v53 = vor.u32 %v18995_v19, %v16639_v37  ;;  %v16293_v6 = vld [vmem:[#allocation9 + $0x508] sm:$0xf]  ;;  %v16578_v19 = vor.u32 %v18979_v3, %v16575_v11  ;;  %v18910_v37 = vld [vmem:[#allocation9 + $0x514] sm:$0xf0]  ;;  %v15719_v49 = vld [vmem:[#allocation9 + $0x98] sm:$0xf0] }
 0x7a0   :  { %9368 = vmatpush.bf16.msra.mxu1 %v15798_v0  ;;  %v16485_v0 = vld [vmem:[#allocation9 + $0x688] sm:$0xf]  ;;  %v18796_v3 = vld [vmem:[#allocation9 + $0x18c] sm:$0xf]  ;;  %v15847_v11 = vld [vmem:[#allocation9 + $0x198] sm:$0xf0] }
 0x7a1   :  { %9382 = vmatpush.bf16.msra.mxu2 %v15926_v35  ;;  %v18958_v35 = vld [vmem:[#allocation9 + $0x694] sm:$0xf0] }
 0x7a2   :  { %9335 = vmatpush.bf16.msrb.mxu3 %v16642_v53  ;;  %v16486_v60 = vor.u32 %v18958_v35, %v16485_v0  ;;  %v15767_v53 = vld [vmem:[#allocation9 + $0xf8] sm:$0xf0]  ;;  %v16166_v0 = vor.u32 %v18878_v32, %v16165_v46  ;;  %v16294_v35 = vor.u32 %v18910_v37, %v16293_v6  ;;  %v16117_v46 = vld [vmem:[#allocation9 + $0x3a8] sm:$0xf]  ;;  %v18866_v32 = vld [vmem:[#allocation9 + $0x3b4] sm:$0xf0]  ;;  %v15722_v6 = vor.u32 %v18764_v16, %v15719_v49 }
 0x7a3   :  { %9355 = vmatpush.bf16.msra.mxu0 %v15654_v9  ;;  %v18987_v9 = vld [vmem:[#allocation9 + $0x784] sm:$0xf]  ;;  %v15703_v37 = vld [vmem:[#allocation9 + $0x78] sm:$0xf0]  ;;  %v16053_v16 = vld [vmem:[#allocation9 + $0x328] sm:$0xf] }
 0x7a4   :  { %9369 = vmatpush.bf16.msra.mxu1 %v15782_v10  ;;  %v16607_v10 = vld [vmem:[#allocation9 + $0x790] sm:$0xf0]  ;;  %v18850_v49 = vld [vmem:[#allocation9 + $0x334] sm:$0xf0] }
 0x7a5   :  { %9383 = vmatpush.bf16.msra.mxu2 %v15910_v29  ;;  %v16470_v29 = vor.u32 %v18954_v5, %v16469_v56  ;;  %v16610_v42 = vor.u32 %v18987_v9, %v16607_v10  ;;  %v16026_v56 = vor.u32 %v18840_v4, %v16023_v57  ;;  %v18804_v5 = vld [vmem:[#allocation9 + $0x1cc] sm:$0xf]  ;;  %v15879_v9 = vld [vmem:[#allocation9 + $0x1d8] sm:$0xf0] }
 0x7a6   :  { %9356 = vmatmul.bf16.vlgmr.msra.gmra.mxu0 %v20880_v47  ;;  %9336 = vmatpush.bf16.msrb.mxu3 %v16626_v18  ;;  %v16543_v18 = vld [vmem:[#allocation9 + $0x710] sm:$0xf0]  ;;  %v18836_v10 = vld [vmem:[#allocation9 + $0x2cc] sm:$0xf]  ;;  %v15687_v57 = vld [vmem:[#allocation9 + $0x58] sm:$0xf0] }
 0x7a7   :  { %9404 = vmatpush.bf16.msrb.mxu0 %v16278_v26  ;;  %9370 = vmatmul.bf16.vlgmr.msra.gmra.mxu1 %v20884_v14  ;;  %v16325_v26 = vld [vmem:[#allocation9 + $0x548] sm:$0xf]  ;;  %v16546_v2 = vor.u32 %v18971_v43, %v16543_v18  ;;  %v18756_v4 = vld [vmem:[#allocation9 + $0x4c] sm:$0xf]  ;;  %v15943_v18 = vld [vmem:[#allocation9 + $0x258] sm:$0xf0] }
 0x7a8   :  { %9418 = vmatpush.bf16.msrb.mxu1 %v16406_v45  ;;  %9384 = vmatmul.bf16.vlgmr.msra.gmra.mxu2 %v20886_v54  ;;  %v18918_v45 = vld [vmem:[#allocation9 + $0x554] sm:$0xf0]  ;;  %v18788_v43 = vld [vmem:[#allocation9 + $0x14c] sm:$0xf] }
 0x7a9   :  { %9432 = vmatpush.bf16.msrb.mxu2 %v16534_v15  ;;  %v16591_v15 = vld [vmem:[#allocation9 + $0x770] sm:$0xf0]  ;;  %v16326_v12 = vor.u32 %v18918_v45, %v16325_v26  ;;  %v18768_v26 = vld [vmem:[#allocation9 + $0xac] sm:$0xf]  ;;  %v15735_v45 = vld [vmem:[#allocation9 + $0xb8] sm:$0xf0] }
 0x7aa   :  { %9337 = vmatpush.bf16.msrb.mxu3 %v16610_v42  ;;  %v16594_v31 = vor.u32 %v18983_v23, %v16591_v15  ;;  %v15882_v42 = vor.u32 %v18804_v5, %v15879_v9  ;;  %v18800_v23 = vld [vmem:[#allocation9 + $0x1ac] sm:$0xf]  ;;  %v15863_v15 = vld [vmem:[#allocation9 + $0x1b8] sm:$0xf0] }
 0x7ab   :  { %9405 = vmatpush.bf16.msrb.mxu0 %v16262_v62  ;;  %v16437_v62 = vld [vmem:[#allocation9 + $0x628] sm:$0xf]  ;;  %v18752_v9 = vld [vmem:[#allocation9 + $0x2c] sm:$0xf] }
 0x7ac   :  { %9419 = vmatpush.bf16.msrb.mxu1 %v16390_v13  ;;  %v18946_v13 = vld [vmem:[#allocation9 + $0x634] sm:$0xf0] }
 0x7ad   :  { %9433 = vmatpush.bf16.msrb.mxu2 %v16518_v20  ;;  %9286 = vmatmul.bf16.vlgmr.msra.gmra.mxu3 %v20895_v17  ;;  %v16182_v20 = vor.u32 %v18882_v41, %v16181_v51  ;;  %v16438_v39 = vor.u32 %v18946_v13, %v16437_v62  ;;  %v16133_v51 = vld [vmem:[#allocation9 + $0x3c8] sm:$0xf]  ;;  %v18870_v41 = vld [vmem:[#allocation9 + $0x3d4] sm:$0xf0] }
 0x7ae   :  { %9338 = vmatpush.bf16.msrb.mxu3 %v16594_v31  ;;  %v15866_v31 = vor.u32 %v18800_v23, %v15863_v15  ;;  %v16134_v13 = vor.u32 %v18870_v41, %v16133_v51  ;;  %v18748_v23 = vld [vmem:[#allocation9 + $0xc] sm:$0xf]  ;;  %v15655_v15 = vld [vmem:[#allocation9 + $0x18] sm:$0xf0] }
 0x7af   :  { %9406 = vmatpush.bf16.msrb.mxu0 %v16246_v63  ;;  %v16421_v63 = vld [vmem:[#allocation9 + $0x608] sm:$0xf]  ;;  %v15783_v41 = vld [vmem:[#allocation9 + $0x118] sm:$0xf0] }
 0x7b0   :  { %9420 = vmatpush.bf16.msrb.mxu1 %v16374_v33  ;;  %v18942_v33 = vld [vmem:[#allocation9 + $0x614] sm:$0xf0] }
 0x7b1   :  { %9434 = vmatpush.bf16.msrb.mxu2 %v16502_v48  ;;  %v18776_v48 = vld [vmem:[#allocation9 + $0xec] sm:$0xf] }
 0x7b2   :  { %9339 = vmatpush.bf16.msrb.mxu3 %v16578_v19  ;;  %v15770_v22 = vor.u32 %v18776_v48, %v15767_v53  ;;  %v18760_v19 = vld [vmem:[#allocation9 + $0x6c] sm:$0xf]  ;;  %v15959_v53 = vld [vmem:[#allocation9 + $0x278] sm:$0xf0] }
 0x7b3   :  { %9407 = vmatpush.bf16.msrb.mxu0 %v16230_v50  ;;  %v16422_v50 = vor.u32 %v18942_v33, %v16421_v63  ;;  %v16118_v33 = vor.u32 %v18866_v32, %v16117_v46  ;;  %v18824_v48 = vld [vmem:[#allocation9 + $0x26c] sm:$0xf]  ;;  %v16535_v32 = vld [vmem:[#allocation9 + $0x6f8] sm:$0xf0] }
 0x7b4   :  { %9421 = vmatpush.bf16.msrb.mxu1 %v16358_v52  ;;  %v16562_v52 = vor.u32 %v18975_v36, %v16559_v8  ;;  %v18792_v36 = vld [vmem:[#allocation9 + $0x16c] sm:$0xf]  ;;  %v15831_v8 = vld [vmem:[#allocation9 + $0x178] sm:$0xf0] }
 0x7b5   :  { %9435 = vmatpush.bf16.msrb.mxu2 %v16486_v60  ;;  %v15898_v60 = vor.u32 %v18808_v38, %v15895_v58  ;;  %v16101_v38 = vld [vmem:[#allocation9 + $0x388] sm:$0xf]  ;;  %v18862_v58 = vld [vmem:[#allocation9 + $0x394] sm:$0xf0]  ;;  %v18968_v46 = vld [vmem:[#allocation9 + $0x6ec] sm:$0xf] }
 0x7b6   :  { %9340 = vmatpush.bf16.msrb.mxu3 %v16562_v52  ;;  %v16102_v52 = vor.u32 %v18862_v58, %v16101_v38  ;;  %v16391_v38 = vld [vmem:[#allocation9 + $0x5d8] sm:$0xf0]  ;;  %v18964_v58 = vld [vmem:[#allocation9 + $0x6cc] sm:$0xf] }
 0x7b7   :  { %9408 = vmatpush.bf16.msrb.mxu0 %v16214_v55  ;;  %v16007_v55 = vld [vmem:[#allocation9 + $0x2d8] sm:$0xf0] }
 0x7b8   :  { %9422 = vmatpush.bf16.msrb.mxu1 %v16342_v44  ;;  %v16149_v44 = vld [vmem:[#allocation9 + $0x3e8] sm:$0xf]  ;;  %v16010_v34 = vor.u32 %v18836_v10, %v16007_v55  ;;  %v15671_v10 = vld [vmem:[#allocation9 + $0x38] sm:$0xf0] }
 0x7b9   :  { %9436 = vmatpush.bf16.msrb.mxu2 %v16470_v29  ;;  %v15754_v29 = vor.u32 %v18772_v21, %v15751_v30  ;;  %v16150_v61 = vor.u32 %v18874_v40, %v16149_v44  ;;  %v16085_v21 = vld [vmem:[#allocation9 + $0x368] sm:$0xf]  ;;  %v18858_v30 = vld [vmem:[#allocation9 + $0x374] sm:$0xf0]  ;;  %v18784_v40 = vld [vmem:[#allocation9 + $0x12c] sm:$0xf] }
 0x7ba   :  { %9341 = vmatpush.bf16.msrb.mxu3 %v16546_v2  ;;  %v16086_v44 = vor.u32 %v18858_v30, %v16085_v21  ;;  %v15799_v2 = vld [vmem:[#allocation9 + $0x138] sm:$0xf0]  ;;  %v18928_v21 = vld [vmem:[#allocation9 + $0x5ac] sm:$0xf] }
 0x7bb   :  { %9409 = vmatpush.bf16.msrb.mxu0 %v16198_v59  ;;  %v18832_v59 = vld [vmem:[#allocation9 + $0x2ac] sm:$0xf]  ;;  %v16375_v30 = vld [vmem:[#allocation9 + $0x5b8] sm:$0xf0] }
 0x7bc   :  { %9423 = vmatpush.bf16.msrb.mxu1 %v16326_v12  ;;  %v15991_v12 = vld [vmem:[#allocation9 + $0x2b8] sm:$0xf0] }
 0x7bd   :  { %9437 = vmatpush.bf16.msrb.mxu2 %v16454_v1  ;;  %v15738_v1 = vor.u32 %v18768_v26, %v15735_v45  ;;  %v15994_v62 = vor.u32 %v18832_v59, %v15991_v12  ;;  %9342 = vmatmul.bf16.vlgmr.msrb.gmra.mxu3 %v20985_v28  ;;  %v16069_v26 = vld [vmem:[#allocation9 + $0x348] sm:$0xf]  ;;  %v18854_v45 = vld [vmem:[#allocation9 + $0x354] sm:$0xf0]  ;;  %v18780_v59 = vld [vmem:[#allocation9 + $0x10c] sm:$0xf] }
 0x7be   :  { %9390 = vmatpush.bf16.msra.mxu3 %v16150_v61  ;;  %v15802_v61 = vor.u32 %v18784_v40, %v15799_v2  ;;  %v16070_v51 = vor.u32 %v18854_v45, %v16069_v26  ;;  %v18892_v40 = vld [vmem:[#allocation9 + $0x48c] sm:$0xf]  ;;  %v16231_v2 = vld [vmem:[#allocation9 + $0x498] sm:$0xf0] }
 0x7bf   :  { %9410 = vmatpush.bf16.msrb.mxu0 %v16182_v20  ;;  %v18828_v20 = vld [vmem:[#allocation9 + $0x28c] sm:$0xf]  ;;  %v16359_v26 = vld [vmem:[#allocation9 + $0x598] sm:$0xf0] }
 0x7c0   :  { %9424 = vmatpush.bf16.msrb.mxu1 %v16310_v25  ;;  %v15975_v25 = vld [vmem:[#allocation9 + $0x298] sm:$0xf0]  ;;  %v18956_v45 = vld [vmem:[#allocation9 + $0x68c] sm:$0xf] }
 0x7c1   :  { %9438 = vmatpush.bf16.msrb.mxu2 %v16438_v39  ;;  %v15850_v39 = vor.u32 %v18796_v3, %v15847_v11  ;;  %v15978_v63 = vor.u32 %v18828_v20, %v15975_v25  ;;  %v18936_v3 = vld [vmem:[#allocation9 + $0x5ec] sm:$0xf]  ;;  %v16407_v11 = vld [vmem:[#allocation9 + $0x5f8] sm:$0xf0]  ;;  %v15658_v20 = vor.u32 %v18748_v23, %v15655_v15  ;;  %v15786_v25 = vor.u32 %v18780_v59, %v15783_v41 }
 0x7c2   :  { %9391 = vmatpush.bf16.msra.mxu3 %v16134_v13  ;;  %v16279_v13 = vld [vmem:[#allocation9 + $0x4f8] sm:$0xf0]  ;;  %v18888_v15 = vld [vmem:[#allocation9 + $0x46c] sm:$0xf] }
 0x7c3   :  { %9411 = vmatpush.bf16.msrb.mxu0 %v16166_v0  ;;  %v15706_v0 = vor.u32 %v18760_v19, %v15703_v37  ;;  %v16037_v19 = vld [vmem:[#allocation9 + $0x308] sm:$0xf]  ;;  %v16215_v59 = vld [vmem:[#allocation9 + $0x478] sm:$0xf0]  ;;  %v18920_v41 = vld [vmem:[#allocation9 + $0x56c] sm:$0xf] }
 0x7c4   :  { %9425 = vmatpush.bf16.msrb.mxu1 %v16294_v35  ;;  %v15834_v35 = vor.u32 %v18792_v36, %v15831_v8  ;;  %v18900_v36 = vld [vmem:[#allocation9 + $0x4cc] sm:$0xf]  ;;  %v16263_v8 = vld [vmem:[#allocation9 + $0x4d8] sm:$0xf0] }
 0x7c5   :  { %9439 = vmatpush.bf16.msrb.mxu2 %v16422_v50  ;;  %v15962_v50 = vor.u32 %v18824_v48, %v15959_v53  ;;  %v16538_v48 = vor.u32 %v18968_v46, %v16535_v32  ;;  %v18932_v53 = vld [vmem:[#allocation9 + $0x5cc] sm:$0xf] }
 0x7c6   :  { %9412 = vmatmul.bf16.vlgmr.msrb.gmra.mxu0 %v20927_v27  ;;  %9392 = vmatpush.bf16.msra.mxu3 %v16118_v33  ;;  %v18846_v33 = vld [vmem:[#allocation9 + $0x314] sm:$0xf0]  ;;  %v18916_v32 = vld [vmem:[#allocation9 + $0x54c] sm:$0xf] }
 0x7c7   :  { %9460 = vmatpush.bf16.msra.mxu0 %v15770_v22  ;;  %9426 = vmatmul.bf16.vlgmr.msrb.gmra.mxu1 %v20929_v24  ;;  %v15815_v22 = vld [vmem:[#allocation9 + $0x158] sm:$0xf0] }
 0x7c8   :  { %9474 = vmatpush.bf16.msra.mxu1 %v15898_v60  ;;  %9440 = vmatmul.bf16.vlgmr.msrb.gmra.mxu2 %v20931_v7  ;;  %v18820_v60 = vld [vmem:[#allocation9 + $0x24c] sm:$0xf]  ;;  %v15818_v5 = vor.u32 %v18788_v43, %v15815_v22  ;;  %v16247_v22 = vld [vmem:[#allocation9 + $0x4b8] sm:$0xf0] }
 0x7c9   :  { %9488 = vmatpush.bf16.msra.mxu2 %v16026_v56  ;;  %v15690_v56 = vor.u32 %v18756_v4, %v15687_v57  ;;  %v15946_v55 = vor.u32 %v18820_v60, %v15943_v18  ;;  %v19002_v4 = vld [vmem:[#allocation9 + $0x7f4] sm:$0xf0]  ;;  %v16038_v57 = vor.u32 %v18846_v33, %v16037_v19  ;;  %v18896_v43 = vld [vmem:[#allocation9 + $0x4ac] sm:$0xf]  ;;  %v16455_v19 = vld [vmem:[#allocation9 + $0x658] sm:$0xf0] }
 0x7ca   :  { %9393 = vmatpush.bf16.msra.mxu3 %v16102_v52  ;;  %v16394_v52 = vor.u32 %v18932_v53, %v16391_v38 }
 0x7cb   :  { %9461 = vmatpush.bf16.msra.mxu0 %v15754_v29  ;;  %v18816_v29 = vld [vmem:[#allocation9 + $0x22c] sm:$0xf] }
 0x7cc   :  { %9475 = vmatpush.bf16.msra.mxu1 %v15882_v42  ;;  %v15927_v42 = vld [vmem:[#allocation9 + $0x238] sm:$0xf0] }
 0x7cd   :  { %9489 = vmatpush.bf16.msra.mxu2 %v16010_v34  ;;  %v15674_v34 = vor.u32 %v18752_v9, %v15671_v10  ;;  %v15930_v12 = vor.u32 %v18816_v29, %v15927_v42  ;;  %v16645_v9 = vld [vmem:[#allocation9 + $0x7c8] sm:$0xf]  ;;  %v18998_v10 = vld [vmem:[#allocation9 + $0x7d4] sm:$0xf0]  ;;  %v18924_v42 = vld [vmem:[#allocation9 + $0x58c] sm:$0xf] }
 0x7ce   :  { %9394 = vmatpush.bf16.msra.mxu3 %v16086_v44  ;;  %v16378_v44 = vor.u32 %v18928_v21, %v16375_v30  ;;  %v16646_v29 = vor.u32 %v18998_v10, %v16645_v9  ;;  %v16362_v23 = vor.u32 %v18924_v42, %v16359_v26  ;;  %v18908_v30 = vld [vmem:[#allocation9 + $0x50c] sm:$0xf]  ;;  %v16423_v9 = vld [vmem:[#allocation9 + $0x618] sm:$0xf0]  ;;  %v16565_v10 = vld [vmem:[#allocation9 + $0x728] sm:$0xf] }
 0x7cf   :  { %9462 = vmatpush.bf16.msra.mxu0 %v15738_v1  ;;  %v18812_v1 = vld [vmem:[#allocation9 + $0x20c] sm:$0xf]  ;;  %v16549_v26 = vld [vmem:[#allocation9 + $0x708] sm:$0xf] }
 0x7d0   :  { %9476 = vmatpush.bf16.msra.mxu1 %v15866_v31  ;;  %v15911_v31 = vld [vmem:[#allocation9 + $0x218] sm:$0xf0] }
 0x7d1   :  { %9490 = vmatpush.bf16.msra.mxu2 %v15994_v62  ;;  %v18904_v62 = vld [vmem:[#allocation9 + $0x4ec] sm:$0xf] }
 0x7d2   :  { %9395 = vmatpush.bf16.msra.mxu3 %v16070_v51  ;;  %v16282_v37 = vor.u32 %v18904_v62, %v16279_v13  ;;  %v18990_v62 = vld [vmem:[#allocation9 + $0x794] sm:$0xf0]  ;;  %v16218_v13 = vor.u32 %v18888_v15, %v16215_v59 }
 0x7d3   :  { %9463 = vmatpush.bf16.msra.mxu0 %v15722_v6  ;;  %v15914_v6 = vor.u32 %v18812_v1, %v15911_v31  ;;  %v16343_v1 = vld [vmem:[#allocation9 + $0x578] sm:$0xf0]  ;;  %v18952_v31 = vld [vmem:[#allocation9 + $0x66c] sm:$0xf] }
 0x7d4   :  { %9477 = vmatpush.bf16.msra.mxu1 %v15850_v39  ;;  %v16054_v39 = vor.u32 %v18850_v49, %v16053_v16  ;;  %v16471_v16 = vld [vmem:[#allocation9 + $0x678] sm:$0xf0]  ;;  %v16613_v49 = vld [vmem:[#allocation9 + $0x788] sm:$0xf] }
 0x7d5   :  { %9491 = vmatpush.bf16.msra.mxu2 %v15978_v63  ;;  %v16410_v63 = vor.u32 %v18936_v3, %v16407_v11  ;;  %v16346_v3 = vor.u32 %v18920_v41, %v16343_v1  ;;  %v18884_v11 = vld [vmem:[#allocation9 + $0x44c] sm:$0xf]  ;;  %v16614_v46 = vor.u32 %v18990_v62, %v16613_v49  ;;  %v16135_v41 = vld [vmem:[#allocation9 + $0x3d8] sm:$0xf0]  ;;  %v16789_v1 = vld [vmem:[#allocation12 + $0xf0] sm:$0xf] }
 0x7d6   :  { %9396 = vmatpush.bf16.msra.mxu3 %v16054_v39  ;;  %v18948_v39 = vld [vmem:[#allocation9 + $0x64c] sm:$0xf] }
 0x7d7   :  { %9464 = vmatpush.bf16.msra.mxu0 %v15706_v0  ;;  %v16519_v0 = vld [vmem:[#allocation9 + $0x6d8] sm:$0xf0]  ;;  %v16458_v53 = vor.u32 %v18948_v39, %v16455_v19  ;;  %v18864_v62 = vld [vmem:[#allocation9 + $0x3ac] sm:$0xf]  ;;  %v16741_v19 = vld [vmem:[#allocation12 + $0x90] sm:$0xf] }
 0x7d8   :  { %9478 = vmatpush.bf16.msra.mxu1 %v15834_v35  ;;  %v16661_v35 = vld [vmem:[#allocation9 + $0x7e8] sm:$0xf]  ;;  %v16522_v60 = vor.u32 %v18964_v58, %v16519_v0  ;;  %v18912_v58 = vld [vmem:[#allocation9 + $0x52c] sm:$0xf]  ;;  %v16311_v0 = vld [vmem:[#allocation9 + $0x538] sm:$0xf0] }
 0x7d9   :  { %9492 = vmatpush.bf16.msra.mxu2 %v15962_v50  ;;  %v16266_v50 = vor.u32 %v18900_v36, %v16263_v8  ;;  %v16662_v18 = vor.u32 %v19002_v4, %v16661_v35  ;;  %v18880_v8 = vld [vmem:[#allocation9 + $0x42c] sm:$0xf]  ;;  %v16439_v4 = vld [vmem:[#allocation9 + $0x638] sm:$0xf0] }
 0x7da   :  { %9397 = vmatpush.bf16.msra.mxu3 %v16038_v57  ;;  %v18944_v35 = vld [vmem:[#allocation9 + $0x62c] sm:$0xf]  ;;  %v16581_v57 = vld [vmem:[#allocation9 + $0x748] sm:$0xf]  ;;  %v16103_v39 = vld [vmem:[#allocation9 + $0x398] sm:$0xf0] }
 0x7db   :  { %9465 = vmatpush.bf16.msra.mxu0 %v15690_v56  ;;  %v18960_v56 = vld [vmem:[#allocation9 + $0x6ac] sm:$0xf] }
 0x7dc   :  { %9479 = vmatpush.bf16.msra.mxu1 %v15818_v5  ;;  %v16503_v5 = vld [vmem:[#allocation9 + $0x6b8] sm:$0xf0] }
 0x7dd   :  { %9493 = vmatpush.bf16.msra.mxu2 %v15946_v55  ;;  %v16250_v55 = vor.u32 %v18896_v43, %v16247_v22  ;;  %9398 = vmatmul.bf16.vlgmr.msra.gmra.mxu3 %v20895_v17  ;;  %v16314_v43 = vor.u32 %v18912_v58, %v16311_v0  ;;  %v18876_v22 = vld [vmem:[#allocation9 + $0x40c] sm:$0xf]  ;;  %v16087_v58 = vld [vmem:[#allocation9 + $0x378] sm:$0xf0]  ;;  %v16717_v0 = vld [vmem:[#allocation12 + $0x60] sm:$0xf] }
 0x7de   :  { %9446 = vmatpush.bf16.msrb.mxu3 %v16662_v18  ;;  %v16442_v18 = vor.u32 %v18944_v35, %v16439_v4  ;;  %v19018_v35 = vld [vmem:[#allocation12 + $0x74] sm:$0xf0] }
 0x7df   :  { %9466 = vmatpush.bf16.msra.mxu0 %v15674_v34  ;;  %v18994_v34 = vld [vmem:[#allocation9 + $0x7b4] sm:$0xf0] }
 0x7e0   :  { %9480 = vmatpush.bf16.msra.mxu1 %v15802_v61  ;;  %v16234_v61 = vor.u32 %v18892_v40, %v16231_v2  ;;  %v19048_v40 = vld [vmem:[#allocation12 + $0x164] sm:$0xf0] }
 0x7e1   :  { %9494 = vmatpush.bf16.msra.mxu2 %v15930_v12 }
 0x7e2   :  { %9447 = vmatpush.bf16.msrb.mxu3 %v16646_v29 }
 0x7e3   :  { %9467 = vmatpush.bf16.msra.mxu0 %v15658_v20  ;;  %v16199_v20 = vld [vmem:[#allocation9 + $0x458] sm:$0xf0] }
 0x7e4   :  { %9481 = vmatpush.bf16.msra.mxu1 %v15786_v25  ;;  %v16474_v25 = vor.u32 %v18952_v31, %v16471_v16  ;;  %v16202_v33 = vor.u32 %v18884_v11, %v16199_v20  ;;  %v19036_v31 = vld [vmem:[#allocation12 + $0x104] sm:$0xf0]  ;;  %v17029_v16 = vld [vmem:[#allocation12 + $0x2d0] sm:$0xf]  ;;  %v16119_v11 = vld [vmem:[#allocation9 + $0x3b8] sm:$0xf0] }
 0x7e5   :  { %9495 = vmatpush.bf16.msra.mxu2 %v15914_v6  ;;  %v16327_v6 = vld [vmem:[#allocation9 + $0x558] sm:$0xf0]  ;;  %v16765_v20 = vld [vmem:[#allocation12 + $0xc0] sm:$0xf] }
 0x7e6   :  { %9468 = vmatmul.bf16.vlgmr.msra.gmra.mxu0 %v20880_v47  ;;  %v16506_v47 = vor.u32 %v18960_v56, %v16503_v5  ;;  %v16330_v36 = vor.u32 %v18916_v32, %v16327_v6  ;;  %v16295_v56 = vld [vmem:[#allocation9 + $0x518] sm:$0xf0]  ;;  %v18940_v5 = vld [vmem:[#allocation9 + $0x60c] sm:$0xf] }
 0x7e7   :  { %9516 = vmatpush.bf16.msrb.mxu0 %v16282_v37  ;;  %9482 = vmatmul.bf16.vlgmr.msra.gmra.mxu1 %v20884_v14  ;;  %v16487_v14 = vld [vmem:[#allocation9 + $0x698] sm:$0xf0]  ;;  %v16597_v37 = vld [vmem:[#allocation9 + $0x768] sm:$0xf]  ;;  %v16426_v29 = vor.u32 %v18940_v5, %v16423_v9  ;;  %v21008_v5 = vpop.f32.mrf.mxu2  ;;  %v16933_v9 = vld [vmem:[#allocation12 + $0x210] sm:$0xf] }
 0x7e8   :  { %9530 = vmatpush.bf16.msrb.mxu1 %v16410_v63  ;;  %9496 = vmatmul.bf16.vlgmr.msra.gmra.mxu2 %v20886_v54  ;;  %v16629_v54 = vld [vmem:[#allocation9 + $0x7a8] sm:$0xf]  ;;  %v16490_v12 = vor.u32 %v18956_v45, %v16487_v14  ;;  %v18986_v63 = vld [vmem:[#allocation9 + $0x774] sm:$0xf0]  ;;  %v18872_v14 = vld [vmem:[#allocation9 + $0x3ec] sm:$0xf] }
 0x7e9   :  { %9544 = vmatpush.bf16.msrb.mxu2 %v16538_v48  ;;  %v16630_v51 = vor.u32 %v18994_v34, %v16629_v54  ;;  %v16183_v48 = vld [vmem:[#allocation9 + $0x438] sm:$0xf0]  ;;  %v16598_v38 = vor.u32 %v18986_v63, %v16597_v37  ;;  %v18974_v45 = vld [vmem:[#allocation9 + $0x714] sm:$0xf0]  ;;  %v19024_v37 = vld [vmem:[#allocation12 + $0xa4] sm:$0xf0] }
 0x7ea   :  { %v16151_v34 = vld [vmem:[#allocation9 + $0x3f8] sm:$0xf0]  ;;  %v16550_v15 = vor.u32 %v18974_v45, %v16549_v26 }
 0x7eb   :  { %9517 = vmatpush.bf16.msrb.mxu0 %v16266_v50  ;;  %9448 = vmatpush.bf16.msrb.mxu3 %v16630_v51  ;;  %v18982_v50 = vld [vmem:[#allocation9 + $0x754] sm:$0xf0]  ;;  %v16154_v59 = vor.u32 %v18872_v14, %v16151_v34  ;;  %v19090_v6 = vld [vmem:[#allocation12 + $0x2b4] sm:$0xf0]  ;;  %v16909_v34 = vld [vmem:[#allocation12 + $0x1e0] sm:$0xf] }
 0x7ec   :  { %9531 = vmatpush.bf16.msrb.mxu1 %v16394_v52  ;;  %v16186_v52 = vor.u32 %v18880_v8, %v16183_v48  ;;  %v16582_v21 = vor.u32 %v18982_v50, %v16581_v57  ;;  %v18856_v48 = vld [vmem:[#allocation9 + $0x36c] sm:$0xf]  ;;  %v21006_v57 = vpop.f32.mrf.mxu1  ;;  %v16957_v50 = vld [vmem:[#allocation12 + $0x240] sm:$0xf]  ;;  %v19006_v26 = vld [vmem:[#allocation12 + $0x14] sm:$0xf0] }
 0x7ed   :  { %9545 = vmatpush.bf16.msrb.mxu2 %v16522_v60  ;;  %v16167_v60 = vld [vmem:[#allocation9 + $0x418] sm:$0xf0]  ;;  %v19045_v14 = vld [vmem:[#allocation12 + $0x154] sm:$0xf] }
 0x7ee   :  { %v16170_v2 = vor.u32 %v18876_v22, %v16167_v60  ;;  %v16718_v22 = vor.u32 %v19018_v35, %v16717_v0  ;;  %v19078_v60 = vld [vmem:[#allocation12 + $0x254] sm:$0xf0] }
 0x7ef   :  { %9518 = vmatpush.bf16.msrb.mxu0 %v16250_v55  ;;  %9449 = vmatpush.bf16.msrb.mxu3 %v16614_v46  ;;  %v18978_v55 = vld [vmem:[#allocation9 + $0x734] sm:$0xf0] }
 0x7f0   :  { %9532 = vmatpush.bf16.msrb.mxu1 %v16378_v44  ;;  %v16837_v44 = vld [vmem:[#allocation12 + $0x150] sm:$0xf]  ;;  %v16566_v42 = vor.u32 %v18978_v55, %v16565_v10  ;;  %v21010_v10 = vld [vmem:[#allocation10] sm:$0xf] }
 0x7f1   :  { %9546 = vmatpush.bf16.msrb.mxu2 %v16506_v47  ;;  %v16298_v47 = vor.u32 %v18908_v30, %v16295_v56  ;;  %v16838_v54 = vor.u32 %v19048_v40, %v16837_v44  ;;  %v19012_v30 = vld [vmem:[#allocation12 + $0x44] sm:$0xf0]  ;;  %v16958_v56 = vor.u32 %v19078_v60, %v16957_v50  ;;  %v16767_v60 = vld [vmem:[#allocation12 + $0xd8] sm:$0xf0] }
 0x7f2   :  { %v18848_v44 = vld [vmem:[#allocation9 + $0x32c] sm:$0xf] }
 0x7f3   :  { %9519 = vmatpush.bf16.msrb.mxu0 %v16234_v61  ;;  %9450 = vmatpush.bf16.msrb.mxu3 %v16598_v38  ;;  %v16813_v61 = vld [vmem:[#allocation12 + $0x120] sm:$0xf]  ;;  %v19084_v38 = vld [vmem:[#allocation12 + $0x284] sm:$0xf0] }
 0x7f4   :  { %9533 = vmatpush.bf16.msrb.mxu1 %v16362_v23  ;;  %v19042_v23 = vld [vmem:[#allocation12 + $0x134] sm:$0xf0] }
 0x7f5   :  { %9547 = vmatpush.bf16.msrb.mxu2 %v16490_v12  ;;  %v18868_v12 = vld [vmem:[#allocation9 + $0x3cc] sm:$0xf]  ;;  %v16814_v51 = vor.u32 %v19042_v23, %v16813_v61  ;;  %v7836_v61 = vperm.slane %v21010_v10, 0 }
 0x7f6   :  { %v16138_v49 = vor.u32 %v18868_v12, %v16135_v41  ;;  %v9149_v12 = vpop.f32.mrf.mxu1  ;;  %v16039_v41 = vld [vmem:[#allocation9 + $0x318] sm:$0xf0] }
 0x7f7   :  { %9520 = vmatpush.bf16.msrb.mxu0 %v16218_v13  ;;  %9451 = vmatpush.bf16.msrb.mxu3 %v16582_v21  ;;  %v16790_v13 = vor.u32 %v19036_v31, %v16789_v1  ;;  %v16693_v21 = vld [vmem:[#allocation12 + $0x30] sm:$0xf]  ;;  %v19000_v1 = vld [vmem:[#allocation9 + $0x7ec] sm:$0xf] }
 0x7f8   :  { %9534 = vmatpush.bf16.msrb.mxu1 %v16346_v3  ;;  %v19096_v3 = vld [vmem:[#allocation12 + $0x2e4] sm:$0xf0]  ;;  %v16694_v40 = vor.u32 %v19012_v30, %v16693_v21  ;;  %v17007_v21 = vld [vmem:[#allocation12 + $0x2b8] sm:$0xf0] }
 0x7f9   :  { %9548 = vmatpush.bf16.msrb.mxu2 %v16474_v25  ;;  %v19030_v25 = vld [vmem:[#allocation12 + $0xd4] sm:$0xf0]  ;;  %v17030_v46 = vor.u32 %v19096_v3, %v17029_v16  ;;  %v16815_v3 = vld [vmem:[#allocation12 + $0x138] sm:$0xf0] }
 0x7fa   :  { %v16766_v32 = vor.u32 %v19030_v25, %v16765_v20  ;;  %v19060_v20 = vld [vmem:[#allocation12 + $0x1c4] sm:$0xf0] }
 0x7fb   :  { %9521 = vmatpush.bf16.msrb.mxu0 %v16202_v33  ;;  %9452 = vmatpush.bf16.msrb.mxu3 %v16566_v42  ;;  %v21004_v33 = vpop.f32.mrf.mxu0  ;;  %v16669_v42 = vld [vmem:[#allocation12] sm:$0xf] }
 0x7fc   :  { %9535 = vmatpush.bf16.msrb.mxu1 %v16330_v36  ;;  %v16981_v36 = vld [vmem:[#allocation12 + $0x270] sm:$0xf] }
 0x7fd   :  { %9549 = vmatpush.bf16.msrb.mxu2 %v16458_v53  ;;  %v16742_v53 = vor.u32 %v19024_v37, %v16741_v19  ;;  %v16982_v4 = vor.u32 %v19084_v38, %v16981_v36  ;;  %v16647_v19 = vld [vmem:[#allocation9 + $0x7d8] sm:$0xf0]  ;;  %v19033_v37 = vld [vmem:[#allocation12 + $0xf4] sm:$0xf]  ;;  %v16861_v36 = vld [vmem:[#allocation12 + $0x180] sm:$0xf] }
 0x7fe   :  { %v19093_v38 = vld [vmem:[#allocation12 + $0x2d4] sm:$0xf]  ;;  %v9203_v0 = vpop.f32.mrf.mxu1 }
 0x7ff   :  { %9522 = vmatpush.bf16.msrb.mxu0 %v16186_v52  ;;  %9453 = vmatpush.bf16.msrb.mxu3 %v16550_v15  ;;  %v16090_v52 = vor.u32 %v18856_v48, %v16087_v58  ;;  %v16670_v15 = vor.u32 %v19006_v26, %v16669_v42  ;;  %v17031_v58 = vld [vmem:[#allocation12 + $0x2e8] sm:$0xf0]  ;;  %v19021_v42 = vld [vmem:[#allocation12 + $0x94] sm:$0xf] }
 0x800   :  { %9536 = vmatpush.bf16.msrb.mxu1 %v16314_v43  ;;  %v18852_v43 = vld [vmem:[#allocation9 + $0x34c] sm:$0xf]  ;;  %v16743_v26 = vld [vmem:[#allocation12 + $0xa8] sm:$0xf0] }
 0x801   :  { %9550 = vmatpush.bf16.msrb.mxu2 %v16442_v18  ;;  %v16071_v18 = vld [vmem:[#allocation9 + $0x358] sm:$0xf0] }
 0x802   :  { %9454 = vmatmul.bf16.vlgmr.msrb.gmra.mxu3 %v20985_v28  ;;  %v16074_v55 = vor.u32 %v18852_v43, %v16071_v18  ;;  %v16631_v43 = vld [vmem:[#allocation9 + $0x7b8] sm:$0xf0]  ;;  %v19087_v18 = vld [vmem:[#allocation12 + $0x2a4] sm:$0xf] }
 0x803   :  { %9523 = vmatpush.bf16.msrb.mxu0 %v16170_v2  ;;  %9502 = vmatpush.bf16.msra.mxu3 %v16154_v59  ;;  %v19072_v2 = vld [vmem:[#allocation12 + $0x224] sm:$0xf0]  ;;  %v19066_v59 = vld [vmem:[#allocation12 + $0x1f4] sm:$0xf0] }
 0x804   :  { %9537 = vmatpush.bf16.msrb.mxu1 %v16298_v47  ;;  %v9135_v47 = vpop.f32.mrf.mxu0  ;;  %v16934_v45 = vor.u32 %v19072_v2, %v16933_v9  ;;  %v16910_v16 = vor.u32 %v19066_v59, %v16909_v34  ;;  %v18988_v2 = vld [vmem:[#allocation9 + $0x78c] sm:$0xf] }
 0x805   :  { %9551 = vmatpush.bf16.msrb.mxu2 %v16426_v29  ;;  %v16055_v29 = vld [vmem:[#allocation9 + $0x338] sm:$0xf0]  ;;  %v9136_v48 = vadd.f32 %v9135_v47, %v7836_v61  ;;  %v18984_v34 = vld [vmem:[#allocation9 + $0x76c] sm:$0xf] }
 0x806   :  { %9524 = vmatmul.bf16.vlgmr.msrb.gmra.mxu0 %v20927_v27  ;;  %v17005_v27 = vld [vmem:[#allocation12 + $0x2a0] sm:$0xf]  ;;  %v16058_v23 = vor.u32 %v18848_v44, %v16055_v29  ;;  %v16615_v29 = vld [vmem:[#allocation9 + $0x798] sm:$0xf0] }
 0x807   :  { %10750 = vmatpush.bf16.msra.mxu0 %v16838_v54  ;;  %9538 = vmatmul.bf16.vlgmr.msrb.gmra.mxu1 %v20929_v24  ;;  %v16122_v24 = vor.u32 %v18864_v62, %v16119_v11  ;;  %v17006_v63 = vor.u32 %v19090_v6, %v17005_v27  ;;  %v16839_v54 = vld [vmem:[#allocation12 + $0x168] sm:$0xf0]  ;;  %v16663_v62 = vld [vmem:[#allocation9 + $0x7f8] sm:$0xf0]  ;;  %v16885_v11 = vld [vmem:[#allocation12 + $0x1b0] sm:$0xf]  ;;  %v9163_v27 = vpop.f32.mrf.mxu2 }
 0x808   :  { %9552 = vmatmul.bf16.vlgmr.msrb.gmra.mxu2 %v20931_v7  ;;  %10764 = vmatpush.bf16.msra.mxu1 %v17030_v46  ;;  %v18860_v7 = vld [vmem:[#allocation9 + $0x38c] sm:$0xf]  ;;  %v16842_v31 = vor.u32 %v19045_v14, %v16839_v54  ;;  %v16886_v46 = vor.u32 %v19060_v20, %v16885_v11  ;;  %v19081_v14 = vld [vmem:[#allocation12 + $0x274] sm:$0xf]  ;;  %v16983_v54 = vld [vmem:[#allocation12 + $0x288] sm:$0xf0] }
 0x809   :  { %9503 = vmatpush.bf16.msra.mxu3 %v16138_v49  ;;  %v16106_v8 = vor.u32 %v18860_v7, %v16103_v39  ;;  %v9175_v49 = vpop.f32.mrf.mxu3  ;;  %v16666_v7 = vor.u32 %v19000_v1, %v16663_v62  ;;  %v9134_v39 = vadd.f32 %v21004_v33, %v7836_v61  ;;  %v16746_v61 = vor.u32 %v19021_v42, %v16743_v26  ;;  %v9205_v1 = vpop.f32.mrf.mxu1  ;;  %v18980_v11 = vld [vmem:[#allocation9 + $0x74c] sm:$0xf] }
 0x80b   :  { %10751 = vmatpush.bf16.msra.mxu0 %v16814_v51  ;;  %v18844_v51 = vld [vmem:[#allocation9 + $0x30c] sm:$0xf]  ;;  %v9148_v33 = vadd.f32 %v21006_v57, %v9134_v39 }
 0x80c   :  { %10765 = vmatpush.bf16.msra.mxu1 %v17006_v63  ;;  %v16042_v25 = vor.u32 %v18844_v51, %v16039_v41  ;;  %v16791_v63 = vld [vmem:[#allocation12 + $0x108] sm:$0xf0]  ;;  %v19015_v51 = vld [vmem:[#allocation12 + $0x64] sm:$0xf]  ;;  %v16719_v41 = vld [vmem:[#allocation12 + $0x78] sm:$0xf0] }
 0x80d   :  { %9504 = vmatpush.bf16.msra.mxu3 %v16122_v24  ;;  %v9189_v24 = vpop.f32.mrf.mxu0  ;;  %v16794_v50 = vor.u32 %v19033_v37, %v16791_v63  ;;  %v9162_v30 = vadd.f32 %v21008_v5, %v9148_v33  ;;  %v16618_v5 = vor.u32 %v18988_v2, %v16615_v29  ;;  %v16722_v20 = vor.u32 %v19015_v51, %v16719_v41  ;;  %v16935_v37 = vld [vmem:[#allocation12 + $0x228] sm:$0xf0]  ;;  %v16797_v41 = vld [vmem:[#allocation12 + $0xf8] sm:$0xf] }
 0x80f   :  { %10752 = vmatpush.bf16.msra.mxu0 %v16790_v13  ;;  %v19039_v13 = vld [vmem:[#allocation12 + $0x124] sm:$0xf]  ;;  %v9217_v44 = vpop.f32.mrf.mxu2 }
 0x810   :  { %10766 = vmatpush.bf16.msra.mxu1 %v16982_v4  ;;  %v16818_v6 = vor.u32 %v19039_v13, %v16815_v3  ;;  %v18992_v4 = vld [vmem:[#allocation9 + $0x7ac] sm:$0xf] }
 0x811   :  { %9505 = vmatpush.bf16.msra.mxu3 %v16106_v8  ;;  %v19054_v8 = vld [vmem:[#allocation12 + $0x194] sm:$0xf0]  ;;  %v9177_v9 = vpop.f32.mrf.mxu3 }
 0x813   :  { %10753 = vmatpush.bf16.msra.mxu0 %v16766_v32  ;;  %v18996_v32 = vld [vmem:[#allocation9 + $0x7cc] sm:$0xf] }
 0x814   :  { %10767 = vmatpush.bf16.msra.mxu1 %v16958_v56  ;;  %v16650_v35 = vor.u32 %v18996_v32, %v16647_v19  ;;  %v9150_v56 = vadd.f32 %v9149_v12, %v9136_v48  ;;  %v16599_v12 = vld [vmem:[#allocation9 + $0x778] sm:$0xf0]  ;;  %v19069_v19 = vld [vmem:[#allocation12 + $0x214] sm:$0xf] }
 0x815   :  { %9506 = vmatpush.bf16.msra.mxu3 %v16090_v52  ;;  %v17034_v52 = vor.u32 %v19093_v38, %v17031_v58  ;;  %v16602_v3 = vor.u32 %v18984_v34, %v16599_v12  ;;  %v19063_v38 = vld [vmem:[#allocation12 + $0x1e4] sm:$0xf]  ;;  %v19144_v34 = vld [vmem:[#allocation12 + $0x464] sm:$0xf0] }
 0x816   :  { %v9164_v47 = vadd.f32 %v9163_v27, %v9150_v56  ;;  %v19009_v27 = vld [vmem:[#allocation12 + $0x34] sm:$0xf]  ;;  %v19003_v58 = vld [vmem:[#allocation12 + $0x4] sm:$0xf]  ;;  %v18972_v56 = vld [vmem:[#allocation9 + $0x70c] sm:$0xf] }
 0x817   :  { %10754 = vmatpush.bf16.msra.mxu0 %v16742_v53  ;;  %v16862_v53 = vor.u32 %v19054_v8, %v16861_v36  ;;  %v18976_v36 = vld [vmem:[#allocation9 + $0x72c] sm:$0xf]  ;;  %v16567_v8 = vld [vmem:[#allocation9 + $0x738] sm:$0xf0] }
 0x818   :  { %10768 = vmatpush.bf16.msra.mxu1 %v16934_v45  ;;  %v9176_v45 = vadd.f32 %v9175_v49, %v9162_v30  ;;  %v19049_v30 = vld [vmem:[#allocation12 + $0x16c] sm:$0xf0] }
 0x819   :  { %9507 = vmatpush.bf16.msra.mxu3 %v16074_v55  ;;  %v17010_v55 = vor.u32 %v19087_v18, %v17007_v21  ;;  %v16845_v21 = vld [vmem:[#allocation12 + $0x158] sm:$0xf] }
 0x81a   :  { %v9190_v59 = vadd.f32 %v9189_v24, %v9176_v45  ;;  %v9219_v24 = vpop.f32.mrf.mxu2  ;;  %v16846_v2 = vor.u32 %v19049_v30, %v16845_v21  ;;  %v19043_v45 = vld [vmem:[#allocation12 + $0x13c] sm:$0xf0]  ;;  %v17125_v21 = vld [vmem:[#allocation12 + $0x390] sm:$0xf]  ;;  %v19120_v30 = vld [vmem:[#allocation12 + $0x3a4] sm:$0xf0] }
 0x81b   :  { %10755 = vmatpush.bf16.msra.mxu0 %v16718_v22  ;;  %v19027_v22 = vld [vmem:[#allocation12 + $0xc4] sm:$0xf] }
 0x81c   :  { %10769 = vmatpush.bf16.msra.mxu1 %v16910_v16  ;;  %v16770_v57 = vor.u32 %v19027_v22, %v16767_v60  ;;  %v16959_v16 = vld [vmem:[#allocation12 + $0x258] sm:$0xf0]  ;;  %v16570_v60 = vor.u32 %v18976_v36, %v16567_v8  ;;  %v16749_v36 = vld [vmem:[#allocation12 + $0x98] sm:$0xf]  ;;  %v19025_v8 = vld [vmem:[#allocation12 + $0xac] sm:$0xf0] }
 0x81d   :  { %9508 = vmatpush.bf16.msra.mxu3 %v16058_v23  ;;  %v16986_v23 = vor.u32 %v19081_v14, %v16983_v54  ;;  %v7837_v54 = vperm.slane %v21010_v10, 1 }
 0x81f   :  { %10756 = vmatpush.bf16.msra.mxu0 %v16694_v40  ;;  %v16634_v40 = vor.u32 %v18992_v4, %v16631_v43 }
 0x820   :  { %10770 = vmatpush.bf16.msra.mxu1 %v16886_v46  ;;  %v9231_v13 = vpop.f32.mrf.mxu3  ;;  %v16583_v46 = vld [vmem:[#allocation9 + $0x758] sm:$0xf0] }
 0x821   :  { %9509 = vmatpush.bf16.msra.mxu3 %v16042_v25  ;;  %v9204_v25 = vadd.f32 %v9203_v0, %v9190_v59  ;;  %v16586_v63 = vor.u32 %v18980_v11, %v16583_v46  ;;  %v16671_v0 = vld [vmem:[#allocation12 + $0x18] sm:$0xf0]  ;;  %v19031_v46 = vld [vmem:[#allocation12 + $0xdc] sm:$0xf0] }
 0x822   :  { %v16674_v18 = vor.u32 %v19003_v58, %v16671_v0  ;;  %v16750_v58 = vor.u32 %v19025_v8, %v16749_v36  ;;  %v17149_v0 = vld [vmem:[#allocation12 + $0x3c0] sm:$0xf]  ;;  %v16799_v36 = vld [vmem:[#allocation12 + $0x110] sm:$0xf0] }
 0x823   :  { %10757 = vmatpush.bf16.msra.mxu0 %v16670_v15  ;;  %v9178_v15 = vadd.f32 %v9177_v9, %v9164_v47  ;;  %v16551_v9 = vld [vmem:[#allocation9 + $0x718] sm:$0xf0]  ;;  %v16887_v47 = vld [vmem:[#allocation12 + $0x1c8] sm:$0xf0] }
 0x824   :  { %9510 = vmatmul.bf16.vlgmr.msra.gmra.mxu3 %v20895_v17  ;;  %10771 = vmatpush.bf16.msra.mxu1 %v16862_v53  ;;  %v9191_v17 = vpop.f32.mrf.mxu0  ;;  %v16938_v53 = vor.u32 %v19069_v19, %v16935_v37  ;;  %v16554_v26 = vor.u32 %v18972_v56, %v16551_v9  ;;  %v16701_v9 = vld [vmem:[#allocation12 + $0x38] sm:$0xf] }
 0x825   :  { %9558 = vmatpush.bf16.msrb.mxu3 %v16666_v7  ;;  %v9192_v62 = vadd.f32 %v9191_v17, %v9178_v15  ;;  %v16695_v7 = vld [vmem:[#allocation12 + $0x48] sm:$0xf0]  ;;  %v16821_v17 = vld [vmem:[#allocation12 + $0x128] sm:$0xf] }
 0x826   :  { %v16698_v48 = vor.u32 %v19009_v27, %v16695_v7  ;;  %v16822_v59 = vor.u32 %v19043_v45, %v16821_v17  ;;  %v16677_v17 = vld [vmem:[#allocation12 + $0x8] sm:$0xf]  ;;  %v19007_v45 = vld [vmem:[#allocation12 + $0x1c] sm:$0xf0] }
 0x827   :  { %10806 = vmatpush.bf16.msrb.mxu0 %v16842_v31  ;;  %v19075_v31 = vld [vmem:[#allocation12 + $0x244] sm:$0xf]  ;;  %v9206_v39 = vadd.f32 %v9205_v1, %v9192_v62  ;;  %v19037_v1 = vld [vmem:[#allocation12 + $0x10c] sm:$0xf0] }
 0x828   :  { %10820 = vmatpush.bf16.msrb.mxu1 %v17034_v52  ;;  %v16962_v49 = vor.u32 %v19075_v31, %v16959_v16  ;;  %v9233_v33 = vpop.f32.mrf.mxu3 }
 0x829   :  { %9559 = vmatpush.bf16.msrb.mxu3 %v16650_v35  ;;  %v16911_v35 = vld [vmem:[#allocation12 + $0x1f8] sm:$0xf0]  ;;  %v9220_v4 = vadd.f32 %v9219_v24, %v9206_v39  ;;  %v17173_v24 = vld [vmem:[#allocation12 + $0x3f0] sm:$0xf] }
 0x82a   :  { %v16914_v43 = vor.u32 %v19063_v38, %v16911_v35  ;;  %v19126_v35 = vld [vmem:[#allocation12 + $0x3d4] sm:$0xf0] }
 0x82b   :  { %10807 = vmatpush.bf16.msrb.mxu0 %v16818_v6  ;;  %v9218_v6 = vadd.f32 %v9217_v44, %v9204_v25  ;;  %v9234_v22 = vadd.f32 %v9233_v33, %v9220_v4  ;;  %v16773_v25 = vld [vmem:[#allocation12 + $0xc8] sm:$0xf]  ;;  %v17150_v33 = vor.u32 %v19126_v35, %v17149_v0  ;;  %v19085_v0 = vld [vmem:[#allocation12 + $0x28c] sm:$0xf0]  ;;  %v19028_v35 = vld [vmem:[#allocation12 + $0xcc] sm:$0xf] }
 0x82c   :  { %10821 = vmatpush.bf16.msrb.mxu1 %v17010_v55  ;;  %v21017_v32 = vpop.f32.mrf.mxu0  ;;  %v9273_v55 = vpop.f32.mrf.mxu2  ;;  %v16774_v37 = vor.u32 %v19031_v46, %v16773_v25 }
 0x82d   :  { %9560 = vmatpush.bf16.msrb.mxu3 %v16634_v40  ;;  %v9232_v52 = vadd.f32 %v9231_v13, %v9218_v6  ;;  %v9576_v40 = vmax.f32 %v9234_v22, 0.0  ;;  %v9246_v16 = vadd.f32 %v21017_v32, %v7837_v54  ;;  %v16798_v13 = vor.u32 %v19037_v1, %v16797_v41  ;;  %v19132_v6 = vld [vmem:[#allocation12 + $0x404] sm:$0xf0] }
 0x82f   :  { %10808 = vmatpush.bf16.msrb.mxu0 %v16794_v50  ;;  %v9259_v50 = vpop.f32.mrf.mxu1  ;;  %v9572_v44 = vmax.f32 %v9232_v52, 0.0  ;;  %v19019_v52 = vld [vmem:[#allocation12 + $0x7c] sm:$0xf0] }
 0x830   :  { %10822 = vmatpush.bf16.msrb.mxu1 %v16986_v23  ;;  %v16863_v23 = vld [vmem:[#allocation12 + $0x198] sm:$0xf0]  ;;  %v9287_v15 = vpop.f32.mrf.mxu3  ;;  %v9260_v7 = vadd.f32 %v9259_v50, %v9246_v16  ;;  %v16725_v50 = vld [vmem:[#allocation12 + $0x68] sm:$0xf] }
 0x831   :  { %9561 = vmatpush.bf16.msrb.mxu3 %v16618_v5  ;;  %v21019_v42 = vpack.c.bf16 %v9576_v40, %v9572_v44  ;;  %v17221_v5 = vld [vmem:[#allocation12 + $0x450] sm:$0xf]  ;;  %v17126_v44 = vor.u32 %v19120_v30, %v17125_v21  ;;  %v19079_v21 = vld [vmem:[#allocation12 + $0x25c] sm:$0xf0]  ;;  %v19022_v30 = vld [vmem:[#allocation12 + $0x9c] sm:$0xf] }
 0x832   :  { %v17222_v12 = vor.u32 %v19144_v34, %v17221_v5  ;;  %v9274_v39 = vadd.f32 %v9273_v55, %v9260_v7  ;;  %v19013_v55 = vld [vmem:[#allocation12 + $0x4c] sm:$0xf0]  ;;  %v19046_v5 = vld [vmem:[#allocation12 + $0x15c] sm:$0xf]  ;;  %v16847_v34 = vld [vmem:[#allocation12 + $0x170] sm:$0xf0] }
 0x833   :  { %10809 = vmatpush.bf16.msrb.mxu0 %v16770_v57  ;;  %v19057_v57 = vld [vmem:[#allocation12 + $0x1b4] sm:$0xf]  ;;  %v16850_v1 = vor.u32 %v19046_v5, %v16847_v34  ;;  %v17127_v5 = vld [vmem:[#allocation12 + $0x3a8] sm:$0xf0]  ;;  %v19067_v34 = vld [vmem:[#allocation12 + $0x1fc] sm:$0xf0] }
 0x834   :  { %10823 = vmatpush.bf16.msrb.mxu1 %v16962_v49  ;;  %v9247_v29 = vpop.f32.mrf.mxu0  ;;  %v16890_v14 = vor.u32 %v19057_v57, %v16887_v47  ;;  %10758 = vmatmul.bf16.vlgmr.msra.gmra.mxu0 %v21019_v42  ;;  %v17197_v49 = vld [vmem:[#allocation12 + $0x420] sm:$0xf]  ;;  %v9275_v11 = vpop.f32.mrf.mxu2  ;;  %v16702_v57 = vor.u32 %v19013_v55, %v16701_v9  ;;  %v19141_v7 = vld [vmem:[#allocation12 + $0x454] sm:$0xf] }
 0x835   :  { %9562 = vmatpush.bf16.msrb.mxu3 %v16602_v3  ;;  %10778 = vmatpush.bf16.msra.mxu2 %v17222_v12  ;;  %v9248_v62 = vadd.f32 %v9247_v29, %v7837_v54  ;;  %v19138_v3 = vld [vmem:[#allocation12 + $0x434] sm:$0xf0]  ;;  %v17101_v29 = vld [vmem:[#allocation12 + $0x360] sm:$0xf]  ;;  %v17077_v12 = vld [vmem:[#allocation12 + $0x330] sm:$0xf] }
 0x836   :  { %v17198_v27 = vor.u32 %v19138_v3, %v17197_v49  ;;  %v19040_v49 = vld [vmem:[#allocation12 + $0x12c] sm:$0xf]  ;;  %v16823_v3 = vld [vmem:[#allocation12 + $0x140] sm:$0xf0] }
 0x837   :  { %10810 = vmatpush.bf16.msrb.mxu0 %v16746_v61  ;;  %v19051_v61 = vld [vmem:[#allocation12 + $0x184] sm:$0xf]  ;;  %v9261_v51 = vpop.f32.mrf.mxu1 }
 0x838   :  { %10824 = vmatpush.bf16.msrb.mxu1 %v16938_v53  ;;  %v16866_v31 = vor.u32 %v19051_v61, %v16863_v23  ;;  %v9262_v32 = vadd.f32 %v9261_v51, %v9248_v62  ;;  %v9289_v19 = vpop.f32.mrf.mxu3  ;;  %v9288_v53 = vadd.f32 %v9287_v15, %v9274_v39  ;;  %v19108_v51 = vld [vmem:[#allocation12 + $0x344] sm:$0xf0]  ;;  %v16826_v39 = vor.u32 %v19040_v49, %v16823_v3 }
 0x839   :  { %9563 = vmatpush.bf16.msrb.mxu3 %v16586_v63  ;;  %10779 = vmatpush.bf16.msra.mxu2 %v17198_v27  ;;  %v17078_v16 = vor.u32 %v19108_v51, %v17077_v12 }
 0x83b   :  { %10811 = vmatpush.bf16.msrb.mxu0 %v16722_v20 }
 0x83c   :  { %10825 = vmatpush.bf16.msrb.mxu1 %v16914_v43  ;;  %v9301_v20 = vpop.f32.mrf.mxu0  ;;  %v9329_v4 = vpop.f32.mrf.mxu2 }
 0x83d   :  { %9564 = vmatpush.bf16.msrb.mxu3 %v16570_v60  ;;  %v9302_v43 = vadd.f32 %v9301_v20, %v9288_v53  ;;  %v19102_v20 = vld [vmem:[#allocation12 + $0x314] sm:$0xf0] }
 0x83e   :  { %v16989_v53 = vld [vmem:[#allocation12 + $0x278] sm:$0xf] }
 0x83f   :  { %10812 = vmatpush.bf16.msrb.mxu0 %v16698_v48  ;;  %v9315_v63 = vpop.f32.mrf.mxu1  ;;  %v9276_v48 = vadd.f32 %v9275_v11, %v9262_v32  ;;  %v17053_v11 = vld [vmem:[#allocation12 + $0x300] sm:$0xf]  ;;  %v17013_v32 = vld [vmem:[#allocation12 + $0x2a8] sm:$0xf] }
 0x840   :  { %10826 = vmatpush.bf16.msrb.mxu1 %v16890_v14  ;;  %v9343_v56 = vpop.f32.mrf.mxu3  ;;  %v9316_v40 = vadd.f32 %v9315_v63, %v9302_v43  ;;  %v17054_v27 = vor.u32 %v19102_v20, %v17053_v11  ;;  %v19034_v63 = vld [vmem:[#allocation12 + $0xfc] sm:$0xf]  ;;  %v16853_v11 = vld [vmem:[#allocation12 + $0x160] sm:$0xf]  ;;  %v19050_v20 = vld [vmem:[#allocation12 + $0x174] sm:$0xf0] }
 0x841   :  { %9565 = vmatpush.bf16.msrb.mxu3 %v16554_v26  ;;  %v9290_v38 = vadd.f32 %v9289_v19, %v9276_v48  ;;  %v19114_v26 = vld [vmem:[#allocation12 + $0x374] sm:$0xf0]  ;;  %v16802_v48 = vor.u32 %v19034_v63, %v16799_v36  ;;  %v17039_v63 = vld [vmem:[#allocation12 + $0x2f0] sm:$0xf0]  ;;  %v16829_v36 = vld [vmem:[#allocation12 + $0x130] sm:$0xf] }
 0x842   :  { %v17102_v14 = vor.u32 %v19114_v26, %v17101_v29  ;;  %v9330_v54 = vadd.f32 %v9329_v4, %v9316_v40  ;;  %v16775_v4 = vld [vmem:[#allocation12 + $0xe0] sm:$0xf0] }
 0x843   :  { %10813 = vmatpush.bf16.msrb.mxu0 %v16674_v18  ;;  %v16726_v18 = vor.u32 %v19019_v52, %v16725_v50  ;;  %v19129_v52 = vld [vmem:[#allocation12 + $0x3f4] sm:$0xf]  ;;  %v19123_v40 = vld [vmem:[#allocation12 + $0x3c4] sm:$0xf] }
 0x844   :  { %9566 = vmatmul.bf16.vlgmr.msrb.gmra.mxu3 %v20985_v28  ;;  %10827 = vmatpush.bf16.msrb.mxu1 %v16866_v31  ;;  %v17174_v28 = vor.u32 %v19132_v6, %v17173_v24  ;;  %v9303_v22 = vpop.f32.mrf.mxu0  ;;  %v9331_v61 = vpop.f32.mrf.mxu2  ;;  %v9344_v23 = vadd.f32 %v9343_v56, %v9330_v54  ;;  %v17037_v31 = vld [vmem:[#allocation12 + $0x2d8] sm:$0xf]  ;;  %v17223_v24 = vld [vmem:[#allocation12 + $0x468] sm:$0xf0]  ;;  %v16751_v56 = vld [vmem:[#allocation12 + $0xb0] sm:$0xf0] }
 0x845   :  { %v9304_v60 = vadd.f32 %v9303_v22, %v9290_v38  ;;  %v17226_v19 = vor.u32 %v19141_v7, %v17223_v24  ;;  %v19135_v38 = vld [vmem:[#allocation12 + $0x424] sm:$0xf]  ;;  %v16990_v22 = vor.u32 %v19085_v0, %v16989_v53  ;;  %v16754_v55 = vor.u32 %v19022_v30, %v16751_v56  ;;  %v19117_v54 = vld [vmem:[#allocation12 + $0x394] sm:$0xf]  ;;  %v17079_v7 = vld [vmem:[#allocation12 + $0x348] sm:$0xf0] }
 0x846   :  { %10780 = vmatpush.bf16.msra.mxu2 %v17174_v28  ;;  %10814 = vmatmul.bf16.vlgmr.msrb.gmra.mxu0 %v21019_v42  ;;  %v9573_v25 = vmax.f32 %v9344_v23, 0.0  ;;  %v19091_v28 = vld [vmem:[#allocation12 + $0x2bc] sm:$0xf0]  ;;  %v16727_v29 = vld [vmem:[#allocation12 + $0x80] sm:$0xf0]  ;;  %v16854_v24 = vor.u32 %v19050_v20, %v16853_v11 }
 0x847   :  { %10862 = vmatpush.bf16.msra.mxu0 %v16846_v2  ;;  %v9317_v2 = vpop.f32.mrf.mxu1  ;;  %v17014_v8 = vor.u32 %v19091_v28, %v17013_v32  ;;  %v16703_v23 = vld [vmem:[#allocation12 + $0x50] sm:$0xf0]  ;;  %v19094_v32 = vld [vmem:[#allocation12 + $0x2dc] sm:$0xf]  ;;  %v19174_v11 = vld [vmem:[#allocation12 + $0x554] sm:$0xf0] }
 0x848   :  { %v9318_v47 = vadd.f32 %v9317_v2, %v9304_v60  ;;  %v9345_v41 = vpop.f32.mrf.mxu3  ;;  %v16778_v60 = vor.u32 %v19028_v35, %v16775_v4  ;;  %v17151_v2 = vld [vmem:[#allocation12 + $0x3d8] sm:$0xf0]  ;;  %v17042_v35 = vor.u32 %v19094_v32, %v17039_v63 }
 0x849   :  { %v17154_v26 = vor.u32 %v19123_v40, %v17151_v2  ;;  %v17055_v0 = vld [vmem:[#allocation12 + $0x318] sm:$0xf0] }
 0x84a   :  { %10781 = vmatpush.bf16.msra.mxu2 %v17150_v33  ;;  %v9332_v15 = vadd.f32 %v9331_v61, %v9318_v47  ;;  %v17175_v33 = vld [vmem:[#allocation12 + $0x408] sm:$0xf0]  ;;  %v19010_v61 = vld [vmem:[#allocation12 + $0x3c] sm:$0xf] }
 0x84b   :  { %10863 = vmatpush.bf16.msra.mxu0 %v16822_v59  ;;  %v16678_v59 = vor.u32 %v19007_v45, %v16677_v17  ;;  %v17178_v43 = vor.u32 %v19129_v52, %v17175_v33  ;;  %v19016_v47 = vld [vmem:[#allocation12 + $0x6c] sm:$0xf]  ;;  %v16706_v51 = vor.u32 %v19010_v61, %v16703_v23  ;;  %v17413_v33 = vld [vmem:[#allocation12 + $0x5d0] sm:$0xf]  ;;  %v19082_v2 = vld [vmem:[#allocation12 + $0x27c] sm:$0xf] }
 0x84c   :  { %v9346_v62 = vadd.f32 %v9345_v41, %v9332_v15  ;;  %v16730_v45 = vor.u32 %v19016_v47, %v16727_v29  ;;  %v17130_v15 = vor.u32 %v19117_v54, %v17127_v5  ;;  %v16893_v41 = vld [vmem:[#allocation12 + $0x1b8] sm:$0xf]  ;;  %v9385_v28 = vpop.f32.mrf.mxu2  ;;  %v16991_v29 = vld [vmem:[#allocation12 + $0x290] sm:$0xf0]  ;;  %v17365_v5 = vld [vmem:[#allocation12 + $0x570] sm:$0xf] }
 0x84d   :  { %v16994_v61 = vor.u32 %v19082_v2, %v16991_v29  ;;  %v17269_v29 = vld [vmem:[#allocation12 + $0x4b0] sm:$0xf] }
 0x84e   :  { %10782 = vmatpush.bf16.msra.mxu2 %v17126_v44  ;;  %v9577_v46 = vmax.f32 %v9346_v62, 0.0  ;;  %v16941_v44 = vld [vmem:[#allocation12 + $0x218] sm:$0xf]  ;;  %v19004_v62 = vld [vmem:[#allocation12 + $0xc] sm:$0xf] }
 0x84f   :  { %10864 = vmatpush.bf16.msra.mxu0 %v16798_v13  ;;  %v19097_v13 = vld [vmem:[#allocation12 + $0x2ec] sm:$0xf0]  ;;  %v9371_v3 = vpop.f32.mrf.mxu1 }
 0x850   :  { %v17038_v6 = vor.u32 %v19097_v13, %v17037_v31  ;;  %v17103_v31 = vld [vmem:[#allocation12 + $0x378] sm:$0xf0]  ;;  %v16679_v13 = vld [vmem:[#allocation12 + $0x20] sm:$0xf0] }
 0x852   :  { %10783 = vmatpush.bf16.msra.mxu2 %v17102_v14  ;;  %v16917_v14 = vld [vmem:[#allocation12 + $0x1e8] sm:$0xf] }
 0x853   :  { %10865 = vmatpush.bf16.msra.mxu0 %v16774_v37  ;;  %v21026_v37 = vpack.c.bf16 %v9577_v46, %v9573_v25  ;;  %v16918_v12 = vor.u32 %v19067_v34, %v16917_v14  ;;  %v16682_v46 = vor.u32 %v19004_v62, %v16679_v13  ;;  %v19180_v34 = vld [vmem:[#allocation12 + $0x584] sm:$0xf0] }
 0x854   :  { %v9387_v14 = vpop.f32.mrf.mxu2 }
 0x855   :  { %10772 = vmatmul.bf16.vlgmr.msra.gmra.mxu1 %v21026_v37 }
 0x856   :  { %10784 = vmatpush.bf16.msra.mxu2 %v17078_v16  ;;  %10876 = vmatpush.bf16.msra.mxu1 %v17038_v6  ;;  %v19061_v16 = vld [vmem:[#allocation12 + $0x1cc] sm:$0xf0]  ;;  %v16869_v6 = vld [vmem:[#allocation12 + $0x188] sm:$0xf] }
 0x857   :  { %10866 = vmatpush.bf16.msra.mxu0 %v16750_v58  ;;  %v17199_v58 = vld [vmem:[#allocation12 + $0x438] sm:$0xf0]  ;;  %v16894_v25 = vor.u32 %v19061_v16, %v16893_v41  ;;  %v9373_v56 = vpop.f32.mrf.mxu1  ;;  %v16757_v41 = vld [vmem:[#allocation12 + $0xa0] sm:$0xf] }
 0x858   :  { %v17202_v50 = vor.u32 %v19135_v38, %v17199_v58  ;;  %v19099_v58 = vld [vmem:[#allocation12 + $0x304] sm:$0xf] }
 0x859   :  { %v17058_v52 = vor.u32 %v19099_v58, %v17055_v0  ;;  %v16709_v58 = vld [vmem:[#allocation12 + $0x40] sm:$0xf]  ;;  %v19014_v0 = vld [vmem:[#allocation12 + $0x54] sm:$0xf0] }
 0x85a   :  { %10785 = vmatpush.bf16.msra.mxu2 %v17054_v27  ;;  %10877 = vmatpush.bf16.msra.mxu1 %v17014_v8  ;;  %v19105_v27 = vld [vmem:[#allocation12 + $0x334] sm:$0xf]  ;;  %v19044_v8 = vld [vmem:[#allocation12 + $0x144] sm:$0xf0] }
 0x85b   :  { %10867 = vmatpush.bf16.msra.mxu0 %v16726_v18  ;;  %v16965_v18 = vld [vmem:[#allocation12 + $0x248] sm:$0xf]  ;;  %v16830_v4 = vor.u32 %v19044_v8, %v16829_v36  ;;  %v16919_v8 = vld [vmem:[#allocation12 + $0x200] sm:$0xf0] }
 0x85c   :  { %v16966_v9 = vor.u32 %v19079_v21, %v16965_v18  ;;  %v16805_v18 = vld [vmem:[#allocation12 + $0x100] sm:$0xf]  ;;  %v19038_v21 = vld [vmem:[#allocation12 + $0x114] sm:$0xf0]  ;;  %v9441_v32 = vpop.f32.mrf.mxu2 }
 0x85d   :  { %v16806_v40 = vor.u32 %v19038_v21, %v16805_v18  ;;  %v19058_v18 = vld [vmem:[#allocation12 + $0x1bc] sm:$0xf] }
 0x85e   :  { %10834 = vmatpush.bf16.msrb.mxu2 %v17226_v19  ;;  %10878 = vmatpush.bf16.msra.mxu1 %v16990_v22  ;;  %v17082_v19 = vor.u32 %v19105_v27, %v17079_v7  ;;  %v16943_v7 = vld [vmem:[#allocation12 + $0x230] sm:$0xf0] }
 0x85f   :  { %10868 = vmatpush.bf16.msra.mxu0 %v16702_v57  ;;  %v19073_v57 = vld [vmem:[#allocation12 + $0x22c] sm:$0xf0]  ;;  %v9427_v62 = vpop.f32.mrf.mxu1 }
 0x860   :  { %v16942_v17 = vor.u32 %v19073_v57, %v16941_v44  ;;  %v9399_v22 = vpop.f32.mrf.mxu3 }
 0x862   :  { %10835 = vmatpush.bf16.msrb.mxu2 %v17202_v50  ;;  %10879 = vmatpush.bf16.msra.mxu1 %v16966_v9  ;;  %v19088_v50 = vld [vmem:[#allocation12 + $0x2ac] sm:$0xf]  ;;  %v17389_v9 = vld [vmem:[#allocation12 + $0x5a0] sm:$0xf] }
 0x863   :  { %10869 = vmatpush.bf16.msra.mxu0 %v16678_v59  ;;  %v9357_v59 = vpop.f32.mrf.mxu0 }
 0x865   :  { %10828 = vmatmul.bf16.vlgmr.msrb.gmra.mxu1 %v21026_v37 }
 0x866   :  { %10870 = vmatmul.bf16.vlgmr.msra.gmra.mxu0 %v21019_v42  ;;  %10836 = vmatpush.bf16.msrb.mxu2 %v17178_v43  ;;  %v19192_v43 = vld [vmem:[#allocation12 + $0x5e4] sm:$0xf0] }
 0x867   :  { %10918 = vmatpush.bf16.msrb.mxu0 %v16850_v1  ;;  %10880 = vmatpush.bf16.msra.mxu1 %v16942_v17  ;;  %v19111_v1 = vld [vmem:[#allocation12 + $0x364] sm:$0xf]  ;;  %v17414_v30 = vor.u32 %v19192_v43, %v17413_v33  ;;  %v19032_v17 = vld [vmem:[#allocation12 + $0xe4] sm:$0xf0]  ;;  %v17293_v33 = vld [vmem:[#allocation12 + $0x4e0] sm:$0xf] }
 0x868   :  { %v17106_v49 = vor.u32 %v19111_v1, %v17103_v31  ;;  %v19026_v1 = vld [vmem:[#allocation12 + $0xb4] sm:$0xf0]  ;;  %v9401_v13 = vpop.f32.mrf.mxu3 }
 0x869   :  { %10792 = vmatpush.bf16.msra.mxu3 %v17414_v30  ;;  %v19162_v43 = vld [vmem:[#allocation12 + $0x4f4] sm:$0xf0]  ;;  %v9429_v30 = vpop.f32.mrf.mxu1 }
 0x86a   :  { %10837 = vmatpush.bf16.msrb.mxu2 %v17154_v26  ;;  %v16781_v26 = vld [vmem:[#allocation12 + $0xd0] sm:$0xf]  ;;  %v17294_v21 = vor.u32 %v19162_v43, %v17293_v33  ;;  %v17181_v33 = vld [vmem:[#allocation12 + $0x3f8] sm:$0xf] }
 0x86b   :  { %10919 = vmatpush.bf16.msrb.mxu0 %v16826_v39  ;;  %10881 = vmatpush.bf16.msra.mxu1 %v16918_v12  ;;  %v19055_v39 = vld [vmem:[#allocation12 + $0x19c] sm:$0xf0]  ;;  %v9359_v53 = vpop.f32.mrf.mxu0  ;;  %v16782_v23 = vor.u32 %v19032_v17, %v16781_v26  ;;  %v17366_v12 = vor.u32 %v19180_v34, %v17365_v5  ;;  %v19156_v26 = vld [vmem:[#allocation12 + $0x4c4] sm:$0xf0]  ;;  %v9443_v17 = vpop.f32.mrf.mxu2  ;;  %v19133_v43 = vld [vmem:[#allocation12 + $0x40c] sm:$0xf0] }
 0x86c   :  { %v16870_v38 = vor.u32 %v19055_v39, %v16869_v6  ;;  %v19020_v6 = vld [vmem:[#allocation12 + $0x84] sm:$0xf0]  ;;  %v17045_v5 = vld [vmem:[#allocation12 + $0x2e0] sm:$0xf]  ;;  %v17270_v34 = vor.u32 %v19156_v26, %v17269_v29 }
 0x86e   :  { %10838 = vmatpush.bf16.msrb.mxu2 %v17130_v15  ;;  %v19076_v15 = vld [vmem:[#allocation12 + $0x24c] sm:$0xf] }
 0x86f   :  { %10920 = vmatpush.bf16.msrb.mxu0 %v16802_v48  ;;  %v7838_v48 = vperm.slane %v21010_v10, 2  ;;  %10882 = vmatpush.bf16.msra.mxu1 %v16894_v25  ;;  %v16758_v25 = vor.u32 %v19026_v1, %v16757_v41  ;;  %v17245_v41 = vld [vmem:[#allocation12 + $0x480] sm:$0xf]  ;;  %v19150_v1 = vld [vmem:[#allocation12 + $0x494] sm:$0xf0] }
 0x871   :  { %v9358_v10 = vadd.f32 %v9357_v59, %v7838_v48  ;;  %v9360_v47 = vadd.f32 %v9359_v53, %v7838_v48  ;;  %v16967_v59 = vld [vmem:[#allocation12 + $0x260] sm:$0xf0]  ;;  %v17317_v48 = vld [vmem:[#allocation12 + $0x510] sm:$0xf]  ;;  %v19168_v53 = vld [vmem:[#allocation12 + $0x524] sm:$0xf0] }
 0x872   :  { %10839 = vmatpush.bf16.msrb.mxu2 %v17106_v49  ;;  %v16970_v49 = vor.u32 %v19076_v15, %v16967_v59  ;;  %v19098_v15 = vld [vmem:[#allocation12 + $0x2f4] sm:$0xf0]  ;;  %v19041_v59 = vld [vmem:[#allocation12 + $0x134] sm:$0xf] }
 0x873   :  { %10921 = vmatpush.bf16.msrb.mxu0 %v16778_v60  ;;  %v17015_v60 = vld [vmem:[#allocation12 + $0x2c0] sm:$0xf0]  ;;  %10883 = vmatpush.bf16.msra.mxu1 %v16870_v38  ;;  %v9413_v54 = vpop.f32.mrf.mxu0 }
 0x874   :  { %v17018_v44 = vor.u32 %v19088_v50, %v17015_v60  ;;  %v16710_v60 = vor.u32 %v19014_v0, %v16709_v58  ;;  %v17391_v58 = vld [vmem:[#allocation12 + $0x5b8] sm:$0xf0]  ;;  %v19086_v0 = vld [vmem:[#allocation12 + $0x294] sm:$0xf0] }
 0x876   :  { %10840 = vmatpush.bf16.msrb.mxu2 %v17082_v19  ;;  %10884 = vmatmul.bf16.vlgmr.msra.gmra.mxu1 %v21026_v37  ;;  %v19064_v19 = vld [vmem:[#allocation12 + $0x1ec] sm:$0xf] }
 0x877   :  { %10922 = vmatpush.bf16.msrb.mxu0 %v16754_v55  ;;  %v19186_v55 = vld [vmem:[#allocation12 + $0x5b4] sm:$0xf0]  ;;  %10932 = vmatpush.bf16.msrb.mxu1 %v17042_v35  ;;  %v17318_v35 = vor.u32 %v19168_v53, %v17317_v48  ;;  %v16997_v53 = vld [vmem:[#allocation12 + $0x280] sm:$0xf] }
 0x878   :  { %v17390_v57 = vor.u32 %v19186_v55, %v17389_v9  ;;  %v19008_v9 = vld [vmem:[#allocation12 + $0x24] sm:$0xf0] }
 0x87a   :  { %10841 = vmatpush.bf16.msrb.mxu2 %v17058_v52  ;;  %10793 = vmatpush.bf16.msra.mxu3 %v17390_v57  ;;  %v16922_v52 = vor.u32 %v19064_v19, %v16919_v8 }
 0x87b   :  { %10923 = vmatpush.bf16.msrb.mxu0 %v16730_v45  ;;  %v9372_v45 = vadd.f32 %v9371_v3, %v9358_v10  ;;  %10933 = vmatpush.bf16.msrb.mxu1 %v17018_v44  ;;  %v17341_v3 = vld [vmem:[#allocation12 + $0x540] sm:$0xf]  ;;  %v9415_v38 = vpop.f32.mrf.mxu0  ;;  %v16895_v10 = vld [vmem:[#allocation12 + $0x1d0] sm:$0xf0]  ;;  %v19047_v44 = vld [vmem:[#allocation12 + $0x164] sm:$0xf] }
 0x87c   :  { %v17342_v27 = vor.u32 %v19174_v11, %v17341_v3  ;;  %v16898_v57 = vor.u32 %v19058_v18, %v16895_v10  ;;  %v17246_v3 = vor.u32 %v19150_v1, %v17245_v41  ;;  %v17046_v11 = vor.u32 %v19098_v15, %v17045_v5  ;;  %v16735_v5 = vld [vmem:[#allocation12 + $0x88] sm:$0xf0]  ;;  %v19068_v1 = vld [vmem:[#allocation12 + $0x204] sm:$0xf0] }
 0x87d   :  { %v9386_v31 = vadd.f32 %v9385_v28, %v9372_v45  ;;  %v16998_v18 = vor.u32 %v19086_v0, %v16997_v53  ;;  %v17319_v41 = vld [vmem:[#allocation12 + $0x528] sm:$0xf0]  ;;  %v16877_v0 = vld [vmem:[#allocation12 + $0x190] sm:$0xf] }
 0x87e   :  { %10794 = vmatpush.bf16.msra.mxu3 %v17366_v12  ;;  %v16831_v12 = vld [vmem:[#allocation12 + $0x148] sm:$0xf0] }
 0x87f   :  { %10924 = vmatpush.bf16.msrb.mxu0 %v16706_v51  ;;  %v9374_v51 = vadd.f32 %v9373_v56, %v9360_v47  ;;  %v9400_v20 = vadd.f32 %v9399_v22, %v9386_v31  ;;  %10934 = vmatpush.bf16.msrb.mxu1 %v16994_v61  ;;  %v16685_v56 = vld [vmem:[#allocation12 + $0x10] sm:$0xf] }
 0x880   :  { %v16686_v47 = vor.u32 %v19008_v9, %v16685_v56  ;;  %v19080_v56 = vld [vmem:[#allocation12 + $0x264] sm:$0xf0]  ;;  %v19023_v9 = vld [vmem:[#allocation12 + $0xa4] sm:$0xf] }
 0x881   :  { %v9388_v16 = vadd.f32 %v9387_v14, %v9374_v51  ;;  %v9414_v28 = vadd.f32 %v9413_v54, %v9400_v20  ;;  %v19052_v14 = vld [vmem:[#allocation12 + $0x18c] sm:$0xf]  ;;  %v16871_v54 = vld [vmem:[#allocation12 + $0x1a0] sm:$0xf0]  ;;  %v16834_v20 = vor.u32 %v19041_v59, %v16831_v12  ;;  %v16925_v12 = vld [vmem:[#allocation12 + $0x1f0] sm:$0xf] }
 0x882   :  { %10795 = vmatpush.bf16.msra.mxu3 %v17342_v27  ;;  %v17415_v27 = vld [vmem:[#allocation12 + $0x5e8] sm:$0xf0] }
 0x883   :  { %10925 = vmatpush.bf16.msrb.mxu0 %v16682_v46  ;;  %v19070_v46 = vld [vmem:[#allocation12 + $0x21c] sm:$0xf]  ;;  %v9402_v39 = vadd.f32 %v9401_v13, %v9388_v16  ;;  %10935 = vmatpush.bf16.msrb.mxu1 %v16970_v49  ;;  %v9428_v22 = vadd.f32 %v9427_v62, %v9414_v28  ;;  %v17229_v16 = vld [vmem:[#allocation12 + $0x458] sm:$0xf]  ;;  %v19145_v62 = vld [vmem:[#allocation12 + $0x46c] sm:$0xf0]  ;;  %v16874_v13 = vor.u32 %v19052_v14, %v16871_v54 }
 0x884   :  { %v16946_v63 = vor.u32 %v19070_v46, %v16943_v7  ;;  %v17021_v49 = vld [vmem:[#allocation12 + $0x2b0] sm:$0xf]  ;;  %v19189_v46 = vld [vmem:[#allocation12 + $0x5d4] sm:$0xf]  ;;  %v17230_v19 = vor.u32 %v19145_v62, %v17229_v16  ;;  %v19074_v14 = vld [vmem:[#allocation12 + $0x234] sm:$0xf0] }
 0x885   :  { %v9455_v50 = vpop.f32.mrf.mxu3  ;;  %v9442_v2 = vadd.f32 %v9441_v32, %v9428_v22  ;;  %v17418_v32 = vor.u32 %v19189_v46, %v17415_v27  ;;  %v19177_v22 = vld [vmem:[#allocation12 + $0x574] sm:$0xf]  ;;  %v16711_v16 = vld [vmem:[#allocation12 + $0x58] sm:$0xf0]  ;;  %v16926_v46 = vor.u32 %v19068_v1, %v16925_v12 }
 0x886   :  { %10926 = vmatmul.bf16.vlgmr.msrb.gmra.mxu0 %v21019_v42  ;;  %10796 = vmatpush.bf16.msra.mxu3 %v17318_v35  ;;  %v19029_v35 = vld [vmem:[#allocation12 + $0xd4] sm:$0xf] }
 0x887   :  { %10974 = vmatpush.bf16.msra.mxu0 %v16854_v24  ;;  %v16733_v24 = vld [vmem:[#allocation12 + $0x70] sm:$0xf]  ;;  %10936 = vmatpush.bf16.msrb.mxu1 %v16946_v63  ;;  %v9456_v61 = vadd.f32 %v9455_v50, %v9442_v2  ;;  %v17205_v63 = vld [vmem:[#allocation12 + $0x428] sm:$0xf]  ;;  %v19127_v2 = vld [vmem:[#allocation12 + $0x3dc] sm:$0xf0] }
 0x888   :  { %v16734_v36 = vor.u32 %v19020_v6, %v16733_v24  ;;  %v19035_v6 = vld [vmem:[#allocation12 + $0x104] sm:$0xf]  ;;  %v19017_v54 = vld [vmem:[#allocation12 + $0x74] sm:$0xf] }
 0x889   :  { %v9574_v7 = vmax.f32 %v9456_v61, 0.0  ;;  %v17133_v61 = vld [vmem:[#allocation12 + $0x398] sm:$0xf]  ;;  %v16738_v59 = vor.u32 %v19017_v54, %v16735_v5  ;;  %v17207_v54 = vld [vmem:[#allocation12 + $0x440] sm:$0xf0] }
 0x88a   :  { %10797 = vmatpush.bf16.msra.mxu3 %v17294_v21 }
 0x88b   :  { %10975 = vmatpush.bf16.msra.mxu0 %v16830_v4  ;;  %v9416_v4 = vadd.f32 %v9415_v38, %v9402_v39  ;;  %10937 = vmatpush.bf16.msrb.mxu1 %v16922_v52  ;;  %v16807_v39 = vld [vmem:[#allocation12 + $0x118] sm:$0xf0]  ;;  %v19183_v38 = vld [vmem:[#allocation12 + $0x5a4] sm:$0xf] }
 0x88c   :  { %v16810_v48 = vor.u32 %v19035_v6, %v16807_v39  ;;  %v17394_v50 = vor.u32 %v19183_v38, %v17391_v58  ;;  %v19062_v6 = vld [vmem:[#allocation12 + $0x1d4] sm:$0xf0]  ;;  %v19005_v39 = vld [vmem:[#allocation12 + $0x14] sm:$0xf]  ;;  %v17271_v58 = vld [vmem:[#allocation12 + $0x4c8] sm:$0xf0] }
 0x88d   :  { %v9430_v55 = vadd.f32 %v9429_v30, %v9416_v4  ;;  %v9457_v51 = vpop.f32.mrf.mxu3  ;;  %v16783_v4 = vld [vmem:[#allocation12 + $0xe8] sm:$0xf0]  ;;  %v16973_v30 = vld [vmem:[#allocation12 + $0x250] sm:$0xf]  ;;  %v19153_v38 = vld [vmem:[#allocation12 + $0x4b4] sm:$0xf] }
 0x88e   :  { %10798 = vmatpush.bf16.msra.mxu3 %v17270_v34  ;;  %v16786_v21 = vor.u32 %v19029_v35, %v16783_v4  ;;  %v16974_v29 = vor.u32 %v19080_v56, %v16973_v30  ;;  %v19056_v35 = vld [vmem:[#allocation12 + $0x1a4] sm:$0xf0]  ;;  %v17274_v4 = vor.u32 %v19153_v38, %v17271_v58  ;;  %v17231_v30 = vld [vmem:[#allocation12 + $0x470] sm:$0xf0]  ;;  %v19147_v56 = vld [vmem:[#allocation12 + $0x484] sm:$0xf] }
 0x88f   :  { %10976 = vmatpush.bf16.msra.mxu0 %v16806_v40  ;;  %v16855_v40 = vld [vmem:[#allocation12 + $0x178] sm:$0xf0]  ;;  %10938 = vmatpush.bf16.msrb.mxu1 %v16898_v57  ;;  %v19171_v57 = vld [vmem:[#allocation12 + $0x544] sm:$0xf]  ;;  %v19065_v58 = vld [vmem:[#allocation12 + $0x1f4] sm:$0xf] }
 0x890   :  { %v16858_v45 = vor.u32 %v19047_v44, %v16855_v40  ;;  %v17182_v44 = vor.u32 %v19133_v43, %v17181_v33  ;;  %v17157_v40 = vld [vmem:[#allocation12 + $0x3c8] sm:$0xf]  ;;  %v19095_v33 = vld [vmem:[#allocation12 + $0x2e4] sm:$0xf]  ;;  %v17047_v43 = vld [vmem:[#allocation12 + $0x2f8] sm:$0xf0] }
 0x891   :  { %v17158_v34 = vor.u32 %v19127_v2, %v17157_v40  ;;  %v17050_v40 = vor.u32 %v19095_v33, %v17047_v43  ;;  %v17111_v33 = vld [vmem:[#allocation12 + $0x380] sm:$0xf0] }
 0x892   :  { %10799 = vmatpush.bf16.msra.mxu3 %v17246_v3  ;;  %v17109_v3 = vld [vmem:[#allocation12 + $0x368] sm:$0xf] }
 0x893   :  { %10977 = vmatpush.bf16.msra.mxu0 %v16782_v23  ;;  %v9444_v23 = vadd.f32 %v9443_v17, %v9430_v55  ;;  %10939 = vmatpush.bf16.msrb.mxu1 %v16874_v13  ;;  %v16759_v55 = vld [vmem:[#allocation12 + $0xb8] sm:$0xf0]  ;;  %v16949_v17 = vld [vmem:[#allocation12 + $0x220] sm:$0xf]  ;;  %v21039_v13 = vpop.f32.mrf.mxu0 }
 0x894   :  { %v16762_v26 = vor.u32 %v19023_v9, %v16759_v55  ;;  %v16950_v15 = vor.u32 %v19074_v14, %v16949_v17  ;;  %v17247_v9 = vld [vmem:[#allocation12 + $0x498] sm:$0xf0]  ;;  %v19136_v14 = vld [vmem:[#allocation12 + $0x42c] sm:$0xf] }
 0x895   :  { %v9458_v31 = vadd.f32 %v9457_v51, %v9444_v23  ;;  %v19121_v23 = vld [vmem:[#allocation12 + $0x3ac] sm:$0xf0]  ;;  %v19165_v51 = vld [vmem:[#allocation12 + $0x514] sm:$0xf]  ;;  %v19334_v55 = vld [vmem:[#allocation10] sm:$0xf]  ;;  %v17250_v2 = vor.u32 %v19147_v56, %v17247_v9 }
 0x896   :  { %10848 = vmatpush.bf16.msrb.mxu3 %v17418_v32  ;;  %10940 = vmatmul.bf16.vlgmr.msrb.gmra.mxu1 %v21026_v37  ;;  %v17322_v62 = vor.u32 %v19165_v51, %v17319_v41  ;;  %v16687_v32 = vld [vmem:[#allocation12 + $0x28] sm:$0xf0]  ;;  %v17183_v41 = vld [vmem:[#allocation12 + $0x410] sm:$0xf0]  ;;  %v19106_v56 = vld [vmem:[#allocation12 + $0x33c] sm:$0xf] }
 0x897   :  { %10978 = vmatpush.bf16.msra.mxu0 %v16758_v25  ;;  %v19092_v25 = vld [vmem:[#allocation12 + $0x2c4] sm:$0xf0]  ;;  %v9578_v24 = vmax.f32 %v9458_v31, 0.0  ;;  %10988 = vmatpush.bf16.msra.mxu1 %v17046_v11  ;;  %v19011_v31 = vld [vmem:[#allocation12 + $0x44] sm:$0xf]  ;;  %v16690_v53 = vor.u32 %v19005_v39, %v16687_v32 }
 0x898   :  { %v17022_v8 = vor.u32 %v19092_v25, %v17021_v49  ;;  %v17134_v49 = vor.u32 %v19121_v23, %v17133_v61  ;;  %v19115_v11 = vld [vmem:[#allocation12 + $0x37c] sm:$0xf0]  ;;  %v17295_v25 = vld [vmem:[#allocation12 + $0x4f8] sm:$0xf0]  ;;  %v16714_v27 = vor.u32 %v19011_v31, %v16711_v16  ;;  %v19083_v61 = vld [vmem:[#allocation12 + $0x284] sm:$0xf] }
 0x899   :  { %v21035_v28 = vpack.c.bf16 %v9578_v24, %v9574_v7  ;;  %v16901_v7 = vld [vmem:[#allocation12 + $0x1c0] sm:$0xf]  ;;  %v16999_v23 = vld [vmem:[#allocation12 + $0x298] sm:$0xf0]  ;;  %v19077_v16 = vld [vmem:[#allocation12 + $0x254] sm:$0xf] }
 0x89a   :  { %10849 = vmatpush.bf16.msrb.mxu3 %v17394_v50  ;;  %v9497_v50 = vpop.f32.mrf.mxu2  ;;  %v17002_v31 = vor.u32 %v19083_v61, %v16999_v23  ;;  %v16951_v39 = vld [vmem:[#allocation12 + $0x238] sm:$0xf0]  ;;  %v17087_v9 = vld [vmem:[#allocation12 + $0x350] sm:$0xf0]  ;;  %v17237_v61 = vld [vmem:[#allocation12 + $0x460] sm:$0xf] }
 0x89b   :  { %10979 = vmatpush.bf16.msra.mxu0 %v16734_v36  ;;  %v19139_v36 = vld [vmem:[#allocation12 + $0x43c] sm:$0xf0]  ;;  %10786 = vmatmul.bf16.vlgmr.msra.gmra.mxu2 %v21035_v28  ;;  %v19146_v23 = vld [vmem:[#allocation12 + $0x474] sm:$0xf0] }
 0x89c   :  { %10890 = vmatpush.bf16.msra.mxu2 %v17230_v19  ;;  %v17206_v52 = vor.u32 %v19139_v36, %v17205_v63  ;;  %10989 = vmatpush.bf16.msra.mxu1 %v17022_v8  ;;  %v9483_v19 = vpop.f32.mrf.mxu1  ;;  %v17110_v63 = vor.u32 %v19115_v11, %v17109_v3  ;;  %v17085_v36 = vld [vmem:[#allocation12 + $0x338] sm:$0xf]  ;;  %v19109_v8 = vld [vmem:[#allocation12 + $0x34c] sm:$0xf0] }
 0x89f   :  { %10980 = vmatpush.bf16.msra.mxu0 %v16710_v60  ;;  %v17367_v60 = vld [vmem:[#allocation12 + $0x588] sm:$0xf0] }
 0x8a0   :  { %v17370_v10 = vor.u32 %v19177_v22, %v17367_v60  ;;  %10891 = vmatpush.bf16.msra.mxu2 %v17206_v52  ;;  %10990 = vmatpush.bf16.msra.mxu1 %v16998_v18  ;;  %v17086_v52 = vor.u32 %v19109_v8, %v17085_v36  ;;  %v17061_v22 = vld [vmem:[#allocation12 + $0x308] sm:$0xf]  ;;  %v19103_v60 = vld [vmem:[#allocation12 + $0x31c] sm:$0xf0]  ;;  %v19142_v18 = vld [vmem:[#allocation12 + $0x45c] sm:$0xf] }
 0x8a1   :  { %v17234_v17 = vor.u32 %v19142_v18, %v17231_v30  ;;  %v19118_v36 = vld [vmem:[#allocation12 + $0x39c] sm:$0xf]  ;;  %v17135_v8 = vld [vmem:[#allocation12 + $0x3b0] sm:$0xf0]  ;;  %v19059_v18 = vld [vmem:[#allocation12 + $0x1c4] sm:$0xf] }
 0x8a2   :  { %10850 = vmatpush.bf16.msrb.mxu3 %v17370_v10  ;;  %v16878_v10 = vor.u32 %v19056_v35, %v16877_v0  ;;  %v9499_v12 = vpop.f32.mrf.mxu2  ;;  %v16927_v0 = vld [vmem:[#allocation12 + $0x208] sm:$0xf0] }
 0x8a3   :  { %10981 = vmatpush.bf16.msra.mxu0 %v16686_v47  ;;  %v17343_v47 = vld [vmem:[#allocation12 + $0x558] sm:$0xf0] }
 0x8a4   :  { %10892 = vmatpush.bf16.msra.mxu2 %v17182_v44  ;;  %10991 = vmatpush.bf16.msra.mxu1 %v16974_v29  ;;  %v7839_v44 = vperm.slane %v19334_v55, 3  ;;  %v19089_v29 = vld [vmem:[#allocation12 + $0x2b4] sm:$0xf] }
 0x8a6   :  { %10982 = vmatmul.bf16.vlgmr.msra.gmra.mxu0 %v21019_v42  ;;  %v9470_v5 = vadd.f32 %v21039_v13, %v7839_v44 }
 0x8a7   :  { %11030 = vmatpush.bf16.msrb.mxu0 %v16858_v45  ;;  %v17346_v45 = vor.u32 %v19171_v57, %v17343_v47  ;;  %v9511_v57 = vpop.f32.mrf.mxu3  ;;  %v17062_v47 = vor.u32 %v19103_v60, %v17061_v22  ;;  %v16930_v22 = vor.u32 %v19065_v58, %v16927_v0  ;;  %v17301_v58 = vld [vmem:[#allocation12 + $0x4e8] sm:$0xf]  ;;  %v19163_v0 = vld [vmem:[#allocation12 + $0x4fc] sm:$0xf0] }
 0x8a8   :  { %10893 = vmatpush.bf16.msra.mxu2 %v17158_v34  ;;  %10992 = vmatpush.bf16.msra.mxu1 %v16950_v15  ;;  %v9484_v1 = vadd.f32 %v9483_v19, %v9470_v5 }
 0x8a9   :  { %10851 = vmatpush.bf16.msrb.mxu3 %v17346_v45  ;;  %v9485_v45 = vpop.f32.mrf.mxu1 }
 0x8aa   :  { %v9498_v13 = vadd.f32 %v9497_v50, %v9484_v1  ;;  %v17397_v1 = vld [vmem:[#allocation12 + $0x5a8] sm:$0xf] }
 0x8ab   :  { %11031 = vmatpush.bf16.msrb.mxu0 %v16834_v20  ;;  %v19159_v20 = vld [vmem:[#allocation12 + $0x4e4] sm:$0xf]  ;;  %10842 = vmatmul.bf16.vlgmr.msrb.gmra.mxu2 %v21035_v28 }
 0x8ac   :  { %v17298_v24 = vor.u32 %v19159_v20, %v17295_v25  ;;  %10894 = vmatpush.bf16.msra.mxu2 %v17134_v49  ;;  %10993 = vmatpush.bf16.msra.mxu1 %v16926_v46  ;;  %v19124_v25 = vld [vmem:[#allocation12 + $0x3cc] sm:$0xf]  ;;  %v17159_v46 = vld [vmem:[#allocation12 + $0x3e0] sm:$0xf0] }
 0x8ad   :  { %10852 = vmatpush.bf16.msrb.mxu3 %v17322_v62  ;;  %v16975_v62 = vld [vmem:[#allocation12 + $0x268] sm:$0xf0]  ;;  %v17162_v19 = vor.u32 %v19124_v25, %v17159_v46  ;;  %v17189_v25 = vld [vmem:[#allocation12 + $0x400] sm:$0xf]  ;;  %v19134_v46 = vld [vmem:[#allocation12 + $0x414] sm:$0xf0] }
 0x8af   :  { %11032 = vmatpush.bf16.msrb.mxu0 %v16810_v48  ;;  %v16902_v48 = vor.u32 %v19062_v6, %v16901_v7  ;;  %v9513_v20 = vpop.f32.mrf.mxu3  ;;  %v9512_v7 = vadd.f32 %v9511_v57, %v9498_v13  ;;  %v19071_v6 = vld [vmem:[#allocation12 + $0x224] sm:$0xf]  ;;  %v16879_v57 = vld [vmem:[#allocation12 + $0x1a8] sm:$0xf0]  ;;  %v19140_v13 = vld [vmem:[#allocation12 + $0x444] sm:$0xf0] }
 0x8b0   :  { %10895 = vmatpush.bf16.msra.mxu2 %v17110_v63  ;;  %v9553_v63 = vpop.f32.mrf.mxu2 }
 0x8b1   :  { %10853 = vmatpush.bf16.msrb.mxu3 %v17298_v24  ;;  %10994 = vmatpush.bf16.msra.mxu1 %v16902_v48  ;;  %v9539_v11 = vpop.f32.mrf.mxu1  ;;  %v16978_v24 = vor.u32 %v19077_v16, %v16975_v62  ;;  %v19187_v16 = vld [vmem:[#allocation12 + $0x5bc] sm:$0xf0]  ;;  %v17213_v62 = vld [vmem:[#allocation12 + $0x430] sm:$0xf] }
 0x8b3   :  { %11033 = vmatpush.bf16.msrb.mxu0 %v16786_v21  ;;  %v9471_v21 = vpop.f32.mrf.mxu0 }
 0x8b4   :  { %10896 = vmatpush.bf16.msra.mxu2 %v17086_v52  ;;  %v9472_v15 = vadd.f32 %v9471_v21, %v7839_v44  ;;  %v19112_v52 = vld [vmem:[#allocation12 + $0x36c] sm:$0xf]  ;;  %v16903_v21 = vld [vmem:[#allocation12 + $0x1d8] sm:$0xf0] }
 0x8b5   :  { %10854 = vmatpush.bf16.msrb.mxu3 %v17274_v4  ;;  %10995 = vmatpush.bf16.msra.mxu1 %v16878_v10  ;;  %v17138_v4 = vor.u32 %v19118_v36, %v17135_v8  ;;  %v17114_v30 = vor.u32 %v19112_v52, %v17111_v33  ;;  %v16906_v44 = vor.u32 %v19059_v18, %v16903_v21  ;;  %v17325_v36 = vld [vmem:[#allocation12 + $0x518] sm:$0xf]  ;;  %v19169_v8 = vld [vmem:[#allocation12 + $0x52c] sm:$0xf0] }
 0x8b6   :  { %v9486_v49 = vadd.f32 %v9485_v45, %v9472_v15  ;;  %v19100_v45 = vld [vmem:[#allocation12 + $0x30c] sm:$0xf]  ;;  %v17277_v33 = vld [vmem:[#allocation12 + $0x4b8] sm:$0xf] }
 0x8b7   :  { %11034 = vmatpush.bf16.msrb.mxu0 %v16762_v26  ;;  %v17023_v26 = vld [vmem:[#allocation12 + $0x2c8] sm:$0xf0] }
 0x8b8   :  { %v17026_v34 = vor.u32 %v19089_v29, %v17023_v26  ;;  %10897 = vmatpush.bf16.msra.mxu2 %v17062_v47  ;;  %10996 = vmatmul.bf16.vlgmr.msra.gmra.mxu1 %v21026_v37  ;;  %v17090_v26 = vor.u32 %v19106_v56, %v17087_v9  ;;  %v17069_v56 = vld [vmem:[#allocation12 + $0x310] sm:$0xf]  ;;  %v19104_v9 = vld [vmem:[#allocation12 + $0x324] sm:$0xf0] }
 0x8b9   :  { %10855 = vmatpush.bf16.msrb.mxu3 %v17250_v2  ;;  %11044 = vmatpush.bf16.msrb.mxu1 %v17050_v40  ;;  %v9541_v60 = vpop.f32.mrf.mxu1  ;;  %v9555_v40 = vpop.f32.mrf.mxu2  ;;  %v19053_v2 = vld [vmem:[#allocation12 + $0x194] sm:$0xf] }
 0x8ba   :  { %v16882_v15 = vor.u32 %v19053_v2, %v16879_v57  ;;  %v17239_v2 = vld [vmem:[#allocation12 + $0x478] sm:$0xf0] }
 0x8bb   :  { %11035 = vmatpush.bf16.msrb.mxu0 %v16738_v59  ;;  %v17210_v59 = vor.u32 %v19136_v14, %v17207_v54  ;;  %v9525_v51 = vpop.f32.mrf.mxu0  ;;  %10898 = vmatmul.bf16.vlgmr.msra.gmra.mxu2 %v21035_v28  ;;  %v17063_v14 = vld [vmem:[#allocation12 + $0x320] sm:$0xf0]  ;;  %v17421_v54 = vld [vmem:[#allocation12 + $0x5d8] sm:$0xf] }
 0x8bc   :  { %10946 = vmatpush.bf16.msrb.mxu2 %v17234_v17  ;;  %v9526_v48 = vadd.f32 %v9525_v51, %v9512_v7  ;;  %v17066_v51 = vor.u32 %v19100_v45, %v17063_v14  ;;  %v17190_v7 = vor.u32 %v19134_v46, %v17189_v25  ;;  %v17399_v45 = vld [vmem:[#allocation12 + $0x5c0] sm:$0xf0]  ;;  %v19137_v14 = vld [vmem:[#allocation12 + $0x434] sm:$0xf] }
 0x8bd   :  { %11045 = vmatpush.bf16.msrb.mxu1 %v17026_v34  ;;  %v19193_v34 = vld [vmem:[#allocation12 + $0x5ec] sm:$0xf0] }
 0x8be   :  { %v9540_v43 = vadd.f32 %v9539_v11, %v9526_v48  ;;  %v17373_v11 = vld [vmem:[#allocation12 + $0x578] sm:$0xf] }
 0x8bf   :  { %11036 = vmatpush.bf16.msrb.mxu0 %v16714_v27  ;;  %v9500_v27 = vadd.f32 %v9499_v12, %v9486_v49  ;;  %v17398_v49 = vor.u32 %v19187_v16, %v17397_v1  ;;  %v19122_v48 = vld [vmem:[#allocation12 + $0x3b4] sm:$0xf0]  ;;  %v19125_v1 = vld [vmem:[#allocation12 + $0x3d4] sm:$0xf]  ;;  %v17167_v16 = vld [vmem:[#allocation12 + $0x3e8] sm:$0xf0] }
 0x8c0   :  { %10947 = vmatpush.bf16.msrb.mxu2 %v17210_v59  ;;  %v9554_v55 = vadd.f32 %v9553_v63, %v9540_v43  ;;  %v19157_v43 = vld [vmem:[#allocation12 + $0x4cc] sm:$0xf0] }
 0x8c1   :  { %11046 = vmatpush.bf16.msrb.mxu1 %v17002_v31  ;;  %v9514_v32 = vadd.f32 %v9513_v20, %v9500_v27  ;;  %v19181_v20 = vld [vmem:[#allocation12 + $0x58c] sm:$0xf0]  ;;  %v17278_v18 = vor.u32 %v19157_v43, %v17277_v33 }
 0x8c2   :  { %v17374_v27 = vor.u32 %v19181_v20, %v17373_v11  ;;  %v19119_v11 = vld [vmem:[#allocation12 + $0x3a4] sm:$0xf]  ;;  %v17143_v20 = vld [vmem:[#allocation12 + $0x3b8] sm:$0xf0]  ;;  %v17405_v43 = vld [vmem:[#allocation12 + $0x5b0] sm:$0xf] }
 0x8c3   :  { %11037 = vmatpush.bf16.msrb.mxu0 %v16690_v53  ;;  %v16954_v53 = vor.u32 %v19071_v6, %v16951_v39  ;;  %v9527_v38 = vpop.f32.mrf.mxu0  ;;  %v19175_v6 = vld [vmem:[#allocation12 + $0x55c] sm:$0xf0]  ;;  %v17165_v39 = vld [vmem:[#allocation12 + $0x3d0] sm:$0xf]  ;;  %v17146_v46 = vor.u32 %v19119_v11, %v17143_v20 }
 0x8c4   :  { %v9528_v35 = vadd.f32 %v9527_v38, %v9514_v32  ;;  %v19128_v32 = vld [vmem:[#allocation12 + $0x3e4] sm:$0xf0]  ;;  %v19224_v11 = vld [vmem:[#allocation15 + $0xe4] sm:$0xf0] }
 0x8c5   :  { %11047 = vmatpush.bf16.msrb.mxu1 %v16978_v24  ;;  %v17349_v24 = vld [vmem:[#allocation12 + $0x548] sm:$0xf]  ;;  %v17166_v63 = vor.u32 %v19128_v32, %v17165_v39 }
 0x8c6   :  { %11038 = vmatmul.bf16.vlgmr.msrb.gmra.mxu0 %v21019_v42  ;;  %v19130_v42 = vld [vmem:[#allocation12 + $0x3fc] sm:$0xf]  ;;  %v9542_v10 = vadd.f32 %v9541_v60, %v9528_v35  ;;  %v17117_v35 = vld [vmem:[#allocation12 + $0x370] sm:$0xf]  ;;  %v19110_v60 = vld [vmem:[#allocation12 + $0x354] sm:$0xf0] }
 0x8c7   :  { %v17186_v3 = vor.u32 %v19130_v42, %v17183_v41  ;;  %v9567_v50 = vpop.f32.mrf.mxu3  ;;  %v17422_v42 = vor.u32 %v19193_v34, %v17421_v54  ;;  %v17238_v41 = vor.u32 %v19146_v23, %v17237_v61  ;;  %v17215_v54 = vld [vmem:[#allocation12 + $0x448] sm:$0xf0]  ;;  %v19178_v61 = vld [vmem:[#allocation12 + $0x57c] sm:$0xf]  ;;  %v17375_v23 = vld [vmem:[#allocation12 + $0x590] sm:$0xf0] }
 0x8c8   :  { %v9568_v47 = vadd.f32 %v9567_v50, %v9554_v55  ;;  %v9556_v29 = vadd.f32 %v9555_v40, %v9542_v10  ;;  %v17302_v50 = vor.u32 %v19163_v0, %v17301_v58  ;;  %v19151_v10 = vld [vmem:[#allocation12 + $0x49c] sm:$0xf0]  ;;  %v19190_v55 = vld [vmem:[#allocation12 + $0x5dc] sm:$0xf]  ;;  %v19143_v40 = vld [vmem:[#allocation12 + $0x464] sm:$0xf]  ;;  %v17218_v34 = vor.u32 %v19137_v14, %v17215_v54 }
 0x8c9   :  { %10948 = vmatpush.bf16.msrb.mxu2 %v17186_v3  ;;  %11048 = vmatpush.bf16.msrb.mxu1 %v16954_v53  ;;  %v17214_v3 = vor.u32 %v19140_v13, %v17213_v62  ;;  %v17326_v53 = vor.u32 %v19169_v8, %v17325_v36  ;;  %v17170_v13 = vor.u32 %v19125_v1, %v17167_v16  ;;  %v19107_v36 = vld [vmem:[#allocation12 + $0x344] sm:$0xf]  ;;  %v17095_v8 = vld [vmem:[#allocation12 + $0x358] sm:$0xf0]  ;;  %v19101_v58 = vld [vmem:[#allocation12 + $0x314] sm:$0xf] }
 0x8ca   :  { %v9575_v59 = vmax.f32 %v9568_v47, 0.0  ;;  %v17070_v47 = vor.u32 %v19104_v9, %v17069_v56  ;;  %v17071_v0 = vld [vmem:[#allocation12 + $0x328] sm:$0xf0]  ;;  %v19176_v56 = vld [vmem:[#allocation12 + $0x564] sm:$0xf0] }
 0x8cb   :  { %v19191_v14 = vld [vmem:[#allocation12 + $0x5e4] sm:$0xf]  ;;  %v17431_v54 = vld [vmem:[#allocation12 + $0x5f8] sm:$0xf0] }
 0x8cc   :  { %v19226_v1 = vld [vmem:[#allocation15 + $0xf4] sm:$0xf0]  ;;  %v17485_v16 = vld [vmem:[#allocation15 + $0x60] sm:$0xf] }
 0x8cd   :  { %10949 = vmatpush.bf16.msrb.mxu2 %v17162_v19  ;;  %11049 = vmatpush.bf16.msrb.mxu1 %v16930_v22  ;;  %v17350_v19 = vor.u32 %v19175_v6, %v17349_v24  ;;  %v17093_v22 = vld [vmem:[#allocation12 + $0x340] sm:$0xf]  ;;  %v19113_v24 = vld [vmem:[#allocation12 + $0x374] sm:$0xf]  ;;  %v17119_v6 = vld [vmem:[#allocation12 + $0x388] sm:$0xf0] }
 0x8ce   :  { %v17094_v21 = vor.u32 %v19110_v60, %v17093_v22  ;;  %v17122_v32 = vor.u32 %v19113_v24, %v17119_v6  ;;  %v19188_v22 = vld [vmem:[#allocation12 + $0x5c4] sm:$0xf0]  ;;  %v17477_v6 = vld [vmem:[#allocation15 + $0x50] sm:$0xf] }
 0x8cf   :  { %v9569_v17 = vpop.f32.mrf.mxu3  ;;  %v17406_v60 = vor.u32 %v19188_v22, %v17405_v43  ;;  %v17461_v43 = vld [vmem:[#allocation15 + $0x30] sm:$0xf]  ;;  %v19202_v22 = vld [vmem:[#allocation15 + $0x34] sm:$0xf0] }
 0x8d0   :  { %v9570_v5 = vadd.f32 %v9569_v17, %v9556_v29  ;;  %v19184_v17 = vld [vmem:[#allocation12 + $0x5ac] sm:$0xf] }
 0x8d1   :  { %10950 = vmatpush.bf16.msrb.mxu2 %v17138_v4  ;;  %11050 = vmatpush.bf16.msrb.mxu1 %v16906_v44  ;;  %v19116_v4 = vld [vmem:[#allocation12 + $0x384] sm:$0xf0]  ;;  %v17423_v44 = vld [vmem:[#allocation12 + $0x5f0] sm:$0xf0] }
 0x8d2   :  { %v9579_v12 = vmax.f32 %v9570_v5, 0.0  ;;  %v17118_v52 = vor.u32 %v19116_v4, %v17117_v35  ;;  %v17426_v29 = vor.u32 %v19190_v55, %v17423_v44  ;;  %v17402_v5 = vor.u32 %v19184_v17, %v17399_v45  ;;  %v17429_v35 = vld [vmem:[#allocation12 + $0x5e0] sm:$0xf]  ;;  %v19194_v4 = vld [vmem:[#allocation12 + $0x5f4] sm:$0xf0] }
 0x8d3   :  { %v17430_v33 = vor.u32 %v19194_v4, %v17429_v35  ;;  %v17333_v55 = vld [vmem:[#allocation12 + $0x520] sm:$0xf]  ;;  %v19170_v44 = vld [vmem:[#allocation12 + $0x534] sm:$0xf0]  ;;  %v17261_v45 = vld [vmem:[#allocation12 + $0x490] sm:$0xf] }
 0x8d4   :  { %v21046_v31 = vpack.c.bf16 %v9579_v12, %v9575_v59  ;;  %v17191_v59 = vld [vmem:[#allocation12 + $0x418] sm:$0xf0]  ;;  %v17378_v12 = vor.u32 %v19178_v61, %v17375_v23  ;;  %v19185_v61 = vld [vmem:[#allocation12 + $0x5b4] sm:$0xf]  ;;  %v17407_v23 = vld [vmem:[#allocation12 + $0x5c8] sm:$0xf0] }
 0x8d5   :  { %10951 = vmatpush.bf16.msrb.mxu2 %v17114_v30  ;;  %11051 = vmatpush.bf16.msrb.mxu1 %v16882_v15  ;;  %v17253_v30 = vld [vmem:[#allocation12 + $0x488] sm:$0xf]  ;;  %v19131_v15 = vld [vmem:[#allocation12 + $0x404] sm:$0xf]  ;;  %v17311_v35 = vld [vmem:[#allocation12 + $0x508] sm:$0xf0] }
 0x8d6   :  { %10800 = vmatmul.bf16.vlgmr.msra.gmra.mxu3 %v21046_v31  ;;  %v17254_v57 = vor.u32 %v19151_v10, %v17253_v30  ;;  %v17357_v10 = vld [vmem:[#allocation12 + $0x550] sm:$0xf] }
 0x8d7   :  { %10904 = vmatpush.bf16.msra.mxu3 %v17422_v42  ;;  %v19172_v42 = vld [vmem:[#allocation12 + $0x54c] sm:$0xf]  ;;  %v17358_v9 = vor.u32 %v19176_v56, %v17357_v10  ;;  %v19218_v10 = vld [vmem:[#allocation15 + $0xb4] sm:$0xf0] }
 0x8d8   :  { %11052 = vmatmul.bf16.vlgmr.msrb.gmra.mxu1 %v21026_v37  ;;  %v17141_v37 = vld [vmem:[#allocation12 + $0x3a0] sm:$0xf] }
 0x8d9   :  { %10952 = vmatpush.bf16.msrb.mxu2 %v17090_v26  ;;  %v17142_v38 = vor.u32 %v19122_v48, %v17141_v37  ;;  %v17242_v26 = vor.u32 %v19143_v40, %v17239_v2  ;;  %v17098_v48 = vor.u32 %v19107_v36, %v17095_v8  ;;  %v17334_v40 = vor.u32 %v19170_v44, %v17333_v55  ;;  %v17309_v2 = vld [vmem:[#allocation12 + $0x4f0] sm:$0xf]  ;;  %v19222_v8 = vld [vmem:[#allocation15 + $0xd4] sm:$0xf0]  ;;  %v17453_v55 = vld [vmem:[#allocation15 + $0x20] sm:$0xf] }
 0x8da   :  { %v19200_v44 = vld [vmem:[#allocation15 + $0x24] sm:$0xf0] }
 0x8db   :  { %10905 = vmatpush.bf16.msra.mxu3 %v17398_v49  ;;  %v19166_v49 = vld [vmem:[#allocation12 + $0x51c] sm:$0xf] }
 0x8dd   :  { %10953 = vmatpush.bf16.msrb.mxu2 %v17066_v51  ;;  %v17194_v51 = vor.u32 %v19131_v15, %v17191_v59  ;;  %v19179_v15 = vld [vmem:[#allocation12 + $0x584] sm:$0xf]  ;;  %v17493_v59 = vld [vmem:[#allocation15 + $0x70] sm:$0xf] }
 0x8df   :  { %10906 = vmatpush.bf16.msra.mxu3 %v17374_v27  ;;  %v19160_v27 = vld [vmem:[#allocation12 + $0x4ec] sm:$0xf] }
 0x8e0   :  { %10954 = vmatmul.bf16.vlgmr.msrb.gmra.mxu2 %v21035_v28 }
 0x8e1   :  { %11002 = vmatpush.bf16.msra.mxu2 %v17238_v41  ;;  %v17351_v41 = vld [vmem:[#allocation12 + $0x560] sm:$0xf0] }
 0x8e2   :  { %v17354_v62 = vor.u32 %v19172_v42, %v17351_v41  ;;  %v17410_v42 = vor.u32 %v19185_v61, %v17407_v23  ;;  %v17437_v61 = vld [vmem:[#allocation15] sm:$0xf]  ;;  %v19196_v23 = vld [vmem:[#allocation15 + $0x4] sm:$0xf0] }
 0x8e3   :  { %10907 = vmatpush.bf16.msra.mxu3 %v17350_v19  ;;  %v19154_v19 = vld [vmem:[#allocation12 + $0x4bc] sm:$0xf] }
 0x8e5   :  { %11003 = vmatpush.bf16.msra.mxu2 %v17214_v3  ;;  %v17327_v3 = vld [vmem:[#allocation12 + $0x530] sm:$0xf0] }
 0x8e6   :  { %10856 = vmatmul.bf16.vlgmr.msrb.gmra.mxu3 %v21046_v31  ;;  %v17330_v25 = vor.u32 %v19166_v49, %v17327_v3  ;;  %v17549_v3 = vld [vmem:[#allocation15 + $0xe0] sm:$0xf] }
 0x8e7   :  { %10908 = vmatpush.bf16.msra.mxu3 %v17326_v53  ;;  %v19148_v53 = vld [vmem:[#allocation12 + $0x48c] sm:$0xf] }
 0x8e9   :  { %11004 = vmatpush.bf16.msra.mxu2 %v17190_v7  ;;  %v17303_v7 = vld [vmem:[#allocation12 + $0x500] sm:$0xf0] }
 0x8ea   :  { %v17306_v39 = vor.u32 %v19160_v27, %v17303_v7  ;;  %v19173_v27 = vld [vmem:[#allocation12 + $0x554] sm:$0xf]  ;;  %v17359_v7 = vld [vmem:[#allocation12 + $0x568] sm:$0xf0] }
 0x8eb   :  { %10909 = vmatpush.bf16.msra.mxu3 %v17302_v50  ;;  %v17362_v24 = vor.u32 %v19173_v27, %v17359_v7  ;;  %v17551_v7 = vld [vmem:[#allocation15 + $0xe8] sm:$0xf0] }
 0x8ed   :  { %11005 = vmatpush.bf16.msra.mxu2 %v17166_v63  ;;  %v17279_v63 = vld [vmem:[#allocation12 + $0x4d0] sm:$0xf0] }
 0x8ee   :  { %v17282_v37 = vor.u32 %v19154_v19, %v17279_v63  ;;  %v19167_v19 = vld [vmem:[#allocation12 + $0x524] sm:$0xf]  ;;  %v17335_v63 = vld [vmem:[#allocation12 + $0x538] sm:$0xf0] }
 0x8ef   :  { %10910 = vmatpush.bf16.msra.mxu3 %v17278_v18  ;;  %v17381_v18 = vld [vmem:[#allocation12 + $0x580] sm:$0xf] }
 0x8f1   :  { %11006 = vmatpush.bf16.msra.mxu2 %v17142_v38  ;;  %v17255_v38 = vld [vmem:[#allocation12 + $0x4a0] sm:$0xf0] }
 0x8f2   :  { %v17258_v50 = vor.u32 %v19148_v53, %v17255_v38  ;;  %v17469_v53 = vld [vmem:[#allocation15 + $0x40] sm:$0xf]  ;;  %v19204_v38 = vld [vmem:[#allocation15 + $0x44] sm:$0xf0] }
 0x8f3   :  { %10911 = vmatpush.bf16.msra.mxu3 %v17254_v57  ;;  %v19164_v57 = vld [vmem:[#allocation12 + $0x504] sm:$0xf0]  ;;  %v17470_v4 = vor.u32 %v19204_v38, %v17469_v53 }
 0x8f4   :  { %v19219_v53 = vld [vmem:[#allocation15 + $0xc4] sm:$0xf] }
 0x8f5   :  { %11007 = vmatpush.bf16.msra.mxu2 %v17118_v52  ;;  %v17074_v52 = vor.u32 %v19101_v58, %v17071_v0  ;;  %v17533_v58 = vld [vmem:[#allocation15 + $0xc0] sm:$0xf]  ;;  %v19161_v0 = vld [vmem:[#allocation12 + $0x4f4] sm:$0xf] }
 0x8f6   :  { %10912 = vmatmul.bf16.vlgmr.msra.gmra.mxu3 %v21046_v31 }
 0x8f7   :  { %10960 = vmatpush.bf16.msrb.mxu3 %v17426_v29  ;;  %v17285_v29 = vld [vmem:[#allocation12 + $0x4c0] sm:$0xf] }
 0x8f9   :  { %11008 = vmatpush.bf16.msra.mxu2 %v17094_v21  ;;  %v19182_v21 = vld [vmem:[#allocation12 + $0x594] sm:$0xf0] }
 0x8fa   :  { %v17382_v30 = vor.u32 %v19182_v21, %v17381_v18  ;;  %v19155_v18 = vld [vmem:[#allocation12 + $0x4c4] sm:$0xf]  ;;  %v17287_v21 = vld [vmem:[#allocation12 + $0x4d8] sm:$0xf0] }
 0x8fb   :  { %10961 = vmatpush.bf16.msrb.mxu3 %v17402_v5 }
 0x8fd   :  { %11009 = vmatpush.bf16.msra.mxu2 %v17070_v47  ;;  %v17310_v47 = vor.u32 %v19164_v57, %v17309_v2  ;;  %v19149_v2 = vld [vmem:[#allocation12 + $0x494] sm:$0xf]  ;;  %v17263_v57 = vld [vmem:[#allocation12 + $0x4a8] sm:$0xf0] }
 0x8ff   :  { %10962 = vmatpush.bf16.msrb.mxu3 %v17378_v12  ;;  %v19210_v12 = vld [vmem:[#allocation15 + $0x74] sm:$0xf0] }
 0x900   :  { %11010 = vmatmul.bf16.vlgmr.msra.gmra.mxu2 %v21035_v28  ;;  %v17494_v41 = vor.u32 %v19210_v12, %v17493_v59  ;;  %v21057_v59 = vpop.f32.mrf.mxu0  ;;  %v17438_v12 = vor.u32 %v19196_v23, %v17437_v61 }
 0x901   :  { %11058 = vmatpush.bf16.msrb.mxu2 %v17242_v26  ;;  %v19158_v26 = vld [vmem:[#allocation12 + $0x4d4] sm:$0xf0] }
 0x902   :  { %v17286_v17 = vor.u32 %v19158_v26, %v17285_v29  ;;  %11514 = vmatpush.bf16.msra.mxu0 %v17494_v41  ;;  %v19216_v29 = vld [vmem:[#allocation15 + $0xa4] sm:$0xf0]  ;;  %v17495_v41 = vld [vmem:[#allocation15 + $0x78] sm:$0xf0] }
 0x903   :  { %10963 = vmatpush.bf16.msrb.mxu3 %v17354_v62  ;;  %v19208_v62 = vld [vmem:[#allocation15 + $0x64] sm:$0xf0] }
 0x904   :  { %v17486_v20 = vor.u32 %v19208_v62, %v17485_v16  ;;  %v19225_v62 = vld [vmem:[#allocation15 + $0xf4] sm:$0xf] }
 0x905   :  { %11059 = vmatpush.bf16.msrb.mxu2 %v17218_v34  ;;  %v17434_v34 = vor.u32 %v19191_v14, %v17431_v54  ;;  %v17266_v14 = vor.u32 %v19149_v2, %v17263_v57  ;;  %v17677_v2 = vld [vmem:[#allocation15 + $0x1e0] sm:$0xf] }
 0x906   :  { %11515 = vmatpush.bf16.msra.mxu0 %v17486_v20  ;;  %v19207_v20 = vld [vmem:[#allocation15 + $0x64] sm:$0xf] }
 0x907   :  { %10964 = vmatpush.bf16.msrb.mxu3 %v17330_v25  ;;  %v17550_v25 = vor.u32 %v19224_v11, %v17549_v3 }
 0x909   :  { %11060 = vmatpush.bf16.msrb.mxu2 %v17194_v51  ;;  %v17557_v51 = vld [vmem:[#allocation15 + $0xf0] sm:$0xf] }
 0x90a   :  { %v17558_v49 = vor.u32 %v19226_v1, %v17557_v51  ;;  %v19212_v51 = vld [vmem:[#allocation15 + $0x84] sm:$0xf0] }
 0x90b   :  { %10965 = vmatpush.bf16.msrb.mxu3 %v17306_v39  ;;  %v19206_v39 = vld [vmem:[#allocation15 + $0x54] sm:$0xf0] }
 0x90c   :  { %11528 = vmatpush.bf16.msra.mxu1 %v17558_v49  ;;  %v17478_v36 = vor.u32 %v19206_v39, %v17477_v6  ;;  %v21059_v49 = vpop.f32.mrf.mxu1  ;;  %v19205_v6 = vld [vmem:[#allocation15 + $0x54] sm:$0xf]  ;;  %v17479_v39 = vld [vmem:[#allocation15 + $0x58] sm:$0xf0] }
 0x90d   :  { %11061 = vmatpush.bf16.msrb.mxu2 %v17170_v13  ;;  %v17383_v13 = vld [vmem:[#allocation12 + $0x598] sm:$0xf0] }
 0x90e   :  { %11516 = vmatpush.bf16.msra.mxu0 %v17478_v36 }
 0x90f   :  { %10966 = vmatpush.bf16.msrb.mxu3 %v17282_v37 }
 0x910   :  { %11529 = vmatpush.bf16.msra.mxu1 %v17550_v25  ;;  %v17487_v25 = vld [vmem:[#allocation15 + $0x68] sm:$0xf0] }
 0x911   :  { %11062 = vmatpush.bf16.msrb.mxu2 %v17146_v46  ;;  %v17386_v46 = vor.u32 %v19179_v15, %v17383_v13  ;;  %v17501_v15 = vld [vmem:[#allocation15 + $0x80] sm:$0xf]  ;;  %v17559_v13 = vld [vmem:[#allocation15 + $0xf8] sm:$0xf0]  ;;  %v17490_v27 = vor.u32 %v19207_v20, %v17487_v25  ;;  %v19213_v25 = vld [vmem:[#allocation15 + $0x94] sm:$0xf] }
 0x912   :  { %11517 = vmatpush.bf16.msra.mxu0 %v17470_v4  ;;  %v17502_v1 = vor.u32 %v19212_v51, %v17501_v15  ;;  %v17562_v3 = vor.u32 %v19225_v62, %v17559_v13  ;;  %v19238_v51 = vld [vmem:[#allocation15 + $0x154] sm:$0xf0]  ;;  %v19197_v62 = vld [vmem:[#allocation15 + $0x14] sm:$0xf]  ;;  %v17447_v13 = vld [vmem:[#allocation15 + $0x18] sm:$0xf0] }
 0x913   :  { %10967 = vmatpush.bf16.msrb.mxu3 %v17258_v50  ;;  %v19220_v50 = vld [vmem:[#allocation15 + $0xc4] sm:$0xf0]  ;;  %v17450_v20 = vor.u32 %v19197_v62, %v17447_v13 }
 0x915   :  { %11063 = vmatpush.bf16.msrb.mxu2 %v17122_v32  ;;  %v17541_v32 = vld [vmem:[#allocation15 + $0xd0] sm:$0xf] }
 0x916   :  { %10968 = vmatmul.bf16.vlgmr.msrb.gmra.mxu3 %v21046_v31  ;;  %v17542_v37 = vor.u32 %v19222_v8, %v17541_v32  ;;  %v19221_v32 = vld [vmem:[#allocation15 + $0xd4] sm:$0xf]  ;;  %v21066_v8 = vpop.f32.mrf.mxu1 }
 0x917   :  { %11016 = vmatpush.bf16.msra.mxu3 %v17430_v33  ;;  %v17314_v33 = vor.u32 %v19161_v0, %v17311_v35 }
 0x918   :  { %11530 = vmatpush.bf16.msra.mxu1 %v17542_v37  ;;  %v19203_v37 = vld [vmem:[#allocation15 + $0x44] sm:$0xf] }
 0x919   :  { %11064 = vmatpush.bf16.msrb.mxu2 %v17098_v48  ;;  %v17338_v48 = vor.u32 %v19167_v19, %v17335_v63  ;;  %v17482_v19 = vor.u32 %v19205_v6, %v17479_v39  ;;  %v21064_v63 = vpop.f32.mrf.mxu0  ;;  %v19236_v6 = vld [vmem:[#allocation15 + $0x144] sm:$0xf0]  ;;  %v17661_v39 = vld [vmem:[#allocation15 + $0x1c0] sm:$0xf] }
 0x91b   :  { %11017 = vmatpush.bf16.msra.mxu3 %v17406_v60  ;;  %v17525_v60 = vld [vmem:[#allocation15 + $0xb0] sm:$0xf] }
 0x91c   :  { %v17526_v56 = vor.u32 %v19218_v10, %v17525_v60  ;;  %v19201_v60 = vld [vmem:[#allocation15 + $0x34] sm:$0xf] }
 0x91d   :  { %11065 = vmatpush.bf16.msrb.mxu2 %v17074_v52  ;;  %v17534_v52 = vor.u32 %v19220_v50, %v17533_v58  ;;  %v17535_v58 = vld [vmem:[#allocation15 + $0xc8] sm:$0xf0]  ;;  %v17621_v50 = vld [vmem:[#allocation15 + $0x170] sm:$0xf]  ;;  %v19217_v10 = vld [vmem:[#allocation15 + $0xb4] sm:$0xf] }
 0x91e   :  { %v21062_v11 = vpop.f32.mrf.mxu2  ;;  %v17538_v4 = vor.u32 %v19219_v53, %v17535_v58  ;;  %v10829_v61 = vpop.f32.mrf.mxu1  ;;  %v19211_v58 = vld [vmem:[#allocation15 + $0x84] sm:$0xf] }
 0x91f   :  { %11018 = vmatpush.bf16.msra.mxu3 %v17382_v30  ;;  %11531 = vmatpush.bf16.msra.mxu1 %v17534_v52  ;;  %v17462_v30 = vor.u32 %v19202_v22, %v17461_v43  ;;  %v19242_v52 = vld [vmem:[#allocation15 + $0x174] sm:$0xf0] }
 0x920   :  { %11066 = vmatmul.bf16.vlgmr.msrb.gmra.mxu2 %v21035_v28  ;;  %v19152_v28 = vld [vmem:[#allocation12 + $0x4a4] sm:$0xf0]  ;;  %v17622_v43 = vor.u32 %v19242_v52, %v17621_v50  ;;  %v19258_v22 = vld [vmem:[#allocation15 + $0x1f4] sm:$0xf0]  ;;  %v17589_v50 = vld [vmem:[#allocation15 + $0x130] sm:$0xf] }
 0x921   :  { %v17262_v5 = vor.u32 %v19152_v28, %v17261_v45  ;;  %11518 = vmatpush.bf16.msra.mxu0 %v17462_v30  ;;  %v19198_v45 = vld [vmem:[#allocation15 + $0x14] sm:$0xf0]  ;;  %v17509_v28 = vld [vmem:[#allocation15 + $0x90] sm:$0xf]  ;;  %v10815_v57 = vpop.f32.mrf.mxu0 }
 0x922   :  { %11542 = vmatpush.bf16.msra.mxu2 %v17622_v43  ;;  %v17653_v43 = vld [vmem:[#allocation15 + $0x1b0] sm:$0xf] }
 0x923   :  { %11019 = vmatpush.bf16.msra.mxu3 %v17358_v9  ;;  %v17290_v9 = vor.u32 %v19155_v18, %v17287_v21  ;;  %11532 = vmatpush.bf16.msra.mxu1 %v17526_v56  ;;  %v17463_v18 = vld [vmem:[#allocation15 + $0x38] sm:$0xf0] }
 0x924   :  { %v17466_v30 = vor.u32 %v19201_v60, %v17463_v18  ;;  %v17527_v56 = vld [vmem:[#allocation15 + $0xb8] sm:$0xf0] }
 0x926   :  { %v21068_v0 = vpop.f32.mrf.mxu2 }
 0x927   :  { %11020 = vmatpush.bf16.msra.mxu3 %v17334_v40  ;;  %v17517_v40 = vld [vmem:[#allocation15 + $0xa0] sm:$0xf] }
 0x928   :  { %v17518_v26 = vor.u32 %v19216_v29, %v17517_v40  ;;  %v19240_v40 = vld [vmem:[#allocation15 + $0x164] sm:$0xf0] }
 0x929   :  { %v19256_v29 = vld [vmem:[#allocation15 + $0x1e4] sm:$0xf0]  ;;  %v10817_v60 = vpop.f32.mrf.mxu0 }
 0x92a   :  { %11533 = vmatpush.bf16.msra.mxu1 %v17518_v26  ;;  %v19199_v26 = vld [vmem:[#allocation15 + $0x24] sm:$0xf] }
 0x92b   :  { %11021 = vmatpush.bf16.msra.mxu3 %v17310_v47  ;;  %v17454_v47 = vor.u32 %v19200_v44, %v17453_v55  ;;  %v17530_v55 = vor.u32 %v19217_v10, %v17527_v56  ;;  %v17613_v44 = vld [vmem:[#allocation15 + $0x160] sm:$0xf] }
 0x92d   :  { %11519 = vmatpush.bf16.msra.mxu0 %v17454_v47  ;;  %v17614_v47 = vor.u32 %v19240_v40, %v17613_v44 }
 0x92f   :  { %11022 = vmatpush.bf16.msra.mxu3 %v17286_v17  ;;  %v17445_v17 = vld [vmem:[#allocation15 + $0x10] sm:$0xf]  ;;  %11543 = vmatpush.bf16.msra.mxu2 %v17614_v47  ;;  %v17581_v47 = vld [vmem:[#allocation15 + $0x120] sm:$0xf] }
 0x930   :  { %v17446_v54 = vor.u32 %v19198_v45, %v17445_v17  ;;  %v17455_v17 = vld [vmem:[#allocation15 + $0x28] sm:$0xf0]  ;;  %v17678_v45 = vor.u32 %v19256_v29, %v17677_v2  ;;  %v19232_v29 = vld [vmem:[#allocation15 + $0x124] sm:$0xf0] }
 0x932   :  { %11520 = vmatpush.bf16.msra.mxu0 %v17446_v54  ;;  %v17519_v54 = vld [vmem:[#allocation15 + $0xa8] sm:$0xf0] }
 0x933   :  { %11023 = vmatpush.bf16.msra.mxu3 %v17262_v5  ;;  %v19214_v5 = vld [vmem:[#allocation15 + $0x94] sm:$0xf0] }
 0x936   :  { %11024 = vmatmul.bf16.vlgmr.msra.gmra.mxu3 %v21046_v31  ;;  %11521 = vmatpush.bf16.msra.mxu0 %v17438_v12  ;;  %v17605_v12 = vld [vmem:[#allocation15 + $0x150] sm:$0xf] }
 0x937   :  { %11072 = vmatpush.bf16.msrb.mxu3 %v17434_v34  ;;  %v17510_v34 = vor.u32 %v19214_v5, %v17509_v28  ;;  %v17458_v28 = vor.u32 %v19199_v26, %v17455_v17  ;;  %v17582_v17 = vor.u32 %v19232_v29, %v17581_v47 }
 0x939   :  { %11534 = vmatpush.bf16.msra.mxu1 %v17510_v34 }
 0x93b   :  { %11073 = vmatpush.bf16.msrb.mxu3 %v17410_v42  ;;  %v19209_v42 = vld [vmem:[#allocation15 + $0x74] sm:$0xf] }
 0x93c   :  { %v17498_v16 = vor.u32 %v19209_v42, %v17495_v41  ;;  %v17669_v42 = vld [vmem:[#allocation15 + $0x1d0] sm:$0xf]  ;;  %v10843_v41 = vpop.f32.mrf.mxu2 }
 0x93d   :  { %11535 = vmatpush.bf16.msra.mxu1 %v17502_v1  ;;  %v17606_v1 = vor.u32 %v19238_v51, %v17605_v12 }
 0x93e   :  { %11570 = vmatpush.bf16.msrb.mxu0 %v17498_v16  ;;  %v19254_v16 = vld [vmem:[#allocation15 + $0x1d4] sm:$0xf0] }
 0x93f   :  { %11074 = vmatpush.bf16.msrb.mxu3 %v17386_v46  ;;  %v19223_v46 = vld [vmem:[#allocation15 + $0xe4] sm:$0xf]  ;;  %11544 = vmatpush.bf16.msra.mxu2 %v17606_v1 }
 0x941   :  { %11584 = vmatpush.bf16.msrb.mxu1 %v17562_v3  ;;  %v17670_v3 = vor.u32 %v19254_v16, %v17669_v42 }
 0x942   :  { %11571 = vmatpush.bf16.msrb.mxu0 %v17490_v27 }
 0x943   :  { %11075 = vmatpush.bf16.msrb.mxu3 %v17362_v24  ;;  %v17554_v24 = vor.u32 %v19223_v46, %v17551_v7  ;;  %v17511_v46 = vld [vmem:[#allocation15 + $0x98] sm:$0xf0] }
 0x944   :  { %v17514_v7 = vor.u32 %v19213_v25, %v17511_v46  ;;  %v17629_v25 = vld [vmem:[#allocation15 + $0x180] sm:$0xf] }
 0x945   :  { %11585 = vmatpush.bf16.msrb.mxu1 %v17554_v24  ;;  %v17597_v24 = vld [vmem:[#allocation15 + $0x140] sm:$0xf] }
 0x946   :  { %11572 = vmatpush.bf16.msrb.mxu0 %v17482_v19  ;;  %v19252_v19 = vld [vmem:[#allocation15 + $0x1c4] sm:$0xf0] }
 0x947   :  { %11076 = vmatpush.bf16.msrb.mxu3 %v17338_v48  ;;  %v17471_v48 = vld [vmem:[#allocation15 + $0x48] sm:$0xf0]  ;;  %v17662_v53 = vor.u32 %v19252_v19, %v17661_v39 }
 0x948   :  { %v17474_v38 = vor.u32 %v19203_v37, %v17471_v48 }
 0x94a   :  { %11573 = vmatpush.bf16.msrb.mxu0 %v17474_v38 }
 0x94b   :  { %11077 = vmatpush.bf16.msrb.mxu3 %v17314_v33  ;;  %v17685_v33 = vld [vmem:[#allocation15 + $0x1f0] sm:$0xf] }
 0x94c   :  { %v17686_v21 = vor.u32 %v19258_v22, %v17685_v33  ;;  %v19234_v33 = vld [vmem:[#allocation15 + $0x134] sm:$0xf0] }
 0x94d   :  { %v19250_v22 = vld [vmem:[#allocation15 + $0x1b4] sm:$0xf0]  ;;  %v17590_v10 = vor.u32 %v19234_v33, %v17589_v50  ;;  %v17615_v50 = vld [vmem:[#allocation15 + $0x168] sm:$0xf0] }
 0x94e   :  { %11574 = vmatpush.bf16.msrb.mxu0 %v17466_v30  ;;  %v17654_v56 = vor.u32 %v19250_v22, %v17653_v43  ;;  %v17679_v22 = vld [vmem:[#allocation15 + $0x1e8] sm:$0xf0] }
 0x94f   :  { %11078 = vmatpush.bf16.msrb.mxu3 %v17290_v9  ;;  %v21072_v9 = vld [vmem:[#allocation13] sm:$0x3f] }
 0x950   :  { %v9778_v5 = vperm.slane %v21072_v9, 0  ;;  %v9779_v34 = vperm.slane %v21072_v9, 1 }
 0x952   :  { %11575 = vmatpush.bf16.msrb.mxu0 %v17458_v28  ;;  %v10816_v27 = vadd.f32 %v10815_v57, %v9779_v34  ;;  %v10760_v37 = vadd.f32 %v21057_v59, %v9778_v5  ;;  %v10762_v59 = vadd.f32 %v21064_v63, %v9778_v5  ;;  %v10818_v2 = vadd.f32 %v10817_v60, %v9779_v34  ;;  %v19248_v63 = vld [vmem:[#allocation15 + $0x1a4] sm:$0xf0]  ;;  %v19230_v5 = vld [vmem:[#allocation15 + $0x114] sm:$0xf0]  ;;  %v17637_v34 = vld [vmem:[#allocation15 + $0x190] sm:$0xf] }
 0x953   :  { %11079 = vmatpush.bf16.msrb.mxu3 %v17266_v14  ;;  %v19215_v14 = vld [vmem:[#allocation15 + $0xa4] sm:$0xf] }
 0x954   :  { %v17522_v15 = vor.u32 %v19215_v14, %v17519_v54  ;;  %v10830_v48 = vadd.f32 %v10829_v61, %v10816_v27  ;;  %v10774_v18 = vadd.f32 %v21059_v49, %v10760_v37  ;;  %v10776_v57 = vadd.f32 %v21066_v8, %v10762_v59  ;;  %v10845_v49 = vpop.f32.mrf.mxu2  ;;  %v17687_v37 = vld [vmem:[#allocation15 + $0x1f8] sm:$0xf0] }
 0x956   :  { %11080 = vmatmul.bf16.vlgmr.msrb.gmra.mxu3 %v21046_v31  ;;  %v17543_v31 = vld [vmem:[#allocation15 + $0xd8] sm:$0xf0]  ;;  %11576 = vmatpush.bf16.msrb.mxu0 %v17450_v20  ;;  %v10788_v44 = vadd.f32 %v21062_v11, %v10774_v18  ;;  %v10790_v14 = vadd.f32 %v21068_v0, %v10776_v57  ;;  %v17573_v11 = vld [vmem:[#allocation15 + $0x110] sm:$0xf]  ;;  %v19228_v20 = vld [vmem:[#allocation15 + $0x104] sm:$0xf0] }
 0x957   :  { %v17546_v36 = vor.u32 %v19221_v32, %v17543_v31  ;;  %11556 = vmatpush.bf16.msra.mxu3 %v17686_v21  ;;  %v17598_v32 = vor.u32 %v19236_v6, %v17597_v24  ;;  %v19195_v31 = vld [vmem:[#allocation15 + $0x4] sm:$0xf]  ;;  %v10844_v21 = vadd.f32 %v10843_v41, %v10830_v48  ;;  %v19241_v24 = vld [vmem:[#allocation15 + $0x174] sm:$0xf]  ;;  %v17623_v6 = vld [vmem:[#allocation15 + $0x178] sm:$0xf0] }
 0x959   :  { %11586 = vmatpush.bf16.msrb.mxu1 %v17546_v36  ;;  %v21070_v35 = vpop.f32.mrf.mxu3  ;;  %v17439_v36 = vld [vmem:[#allocation15 + $0x8] sm:$0xf0]  ;;  %11545 = vmatpush.bf16.msra.mxu2 %v17598_v32 }
 0x95a   :  { %v17442_v38 = vor.u32 %v19195_v31, %v17439_v36  ;;  %v10802_v26 = vadd.f32 %v21070_v35, %v10788_v44  ;;  %v17574_v35 = vor.u32 %v19230_v5, %v17573_v11  ;;  %v17626_v31 = vor.u32 %v19241_v24, %v17623_v6  ;;  %v19257_v36 = vld [vmem:[#allocation15 + $0x1f4] sm:$0xf]  ;;  %v19235_v44 = vld [vmem:[#allocation15 + $0x144] sm:$0xf]  ;;  %v17655_v11 = vld [vmem:[#allocation15 + $0x1b8] sm:$0xf0] }
 0x95b   :  { %11557 = vmatpush.bf16.msra.mxu3 %v17678_v45  ;;  %v17645_v45 = vld [vmem:[#allocation15 + $0x1a0] sm:$0xf]  ;;  %v17690_v48 = vor.u32 %v19257_v36, %v17687_v37  ;;  %v19243_v24 = vld [vmem:[#allocation15 + $0x184] sm:$0xf] }
 0x95c   :  { %11577 = vmatpush.bf16.msrb.mxu0 %v17442_v38  ;;  %v17646_v54 = vor.u32 %v19248_v63, %v17645_v45  ;;  %v11086_v51 = vmax.f32 %v10802_v26, 0.0  ;;  %v21090_v18 = vpop.f32.mrf.mxu2  ;;  %v19233_v45 = vld [vmem:[#allocation15 + $0x134] sm:$0xf]  ;;  %v17591_v63 = vld [vmem:[#allocation15 + $0x138] sm:$0xf0] }
 0x95d   :  { %11587 = vmatpush.bf16.msrb.mxu1 %v17538_v4  ;;  %v17503_v4 = vld [vmem:[#allocation15 + $0x88] sm:$0xf0]  ;;  %11546 = vmatpush.bf16.msra.mxu2 %v17590_v10  ;;  %v19253_v10 = vld [vmem:[#allocation15 + $0x1d4] sm:$0xf] }
 0x95e   :  { %v17506_v52 = vor.u32 %v19211_v58, %v17503_v4  ;;  %v19239_v4 = vld [vmem:[#allocation15 + $0x164] sm:$0xf] }
 0x95f   :  { %11558 = vmatpush.bf16.msra.mxu3 %v17670_v3  ;;  %v17565_v3 = vld [vmem:[#allocation15 + $0x100] sm:$0xf]  ;;  %v17618_v43 = vor.u32 %v19239_v4, %v17615_v50 }
 0x961   :  { %11588 = vmatpush.bf16.msrb.mxu1 %v17530_v55  ;;  %v21076_v23 = vpop.f32.mrf.mxu3  ;;  %v10831_v55 = vpop.f32.mrf.mxu1  ;;  %11547 = vmatpush.bf16.msra.mxu2 %v17582_v17 }
 0x962   :  { %v10832_v28 = vadd.f32 %v10831_v55, %v10818_v2  ;;  %v10804_v12 = vadd.f32 %v21076_v23, %v10790_v14  ;;  %v19244_v23 = vld [vmem:[#allocation15 + $0x184] sm:$0xf0]  ;;  %v19251_v2 = vld [vmem:[#allocation15 + $0x1c4] sm:$0xf] }
 0x963   :  { %11559 = vmatpush.bf16.msra.mxu3 %v17662_v53  ;;  %v17630_v19 = vor.u32 %v19244_v23, %v17629_v25  ;;  %v21086_v53 = vpop.f32.mrf.mxu0  ;;  %v17567_v23 = vld [vmem:[#allocation15 + $0x108] sm:$0xf0] }
 0x964   :  { %v10846_v8 = vadd.f32 %v10845_v49, %v10832_v28  ;;  %v11092_v62 = vmax.f32 %v10804_v12, 0.0  ;;  %v17663_v49 = vld [vmem:[#allocation15 + $0x1c8] sm:$0xf0]  ;;  %v19249_v28 = vld [vmem:[#allocation15 + $0x1b4] sm:$0xf]  ;;  %v10901_v14 = vpop.f32.mrf.mxu2 }
 0x965   :  { %11589 = vmatpush.bf16.msrb.mxu1 %v17522_v15  ;;  %v19246_v15 = vld [vmem:[#allocation15 + $0x194] sm:$0xf0]  ;;  %11548 = vmatpush.bf16.msra.mxu2 %v17574_v35  ;;  %v17666_v26 = vor.u32 %v19251_v2, %v17663_v49  ;;  %v17658_v5 = vor.u32 %v19249_v28, %v17655_v11  ;;  %v19281_v28 = vld [vmem:[%s21197_s14 + $0x30] sm:$0xff] }
 0x966   :  { %v17638_v1 = vor.u32 %v19246_v15, %v17637_v34  ;;  %v17583_v34 = vld [vmem:[#allocation15 + $0x128] sm:$0xf0]  ;;  %v19247_v15 = vld [vmem:[#allocation15 + $0x1a4] sm:$0xf] }
 0x967   :  { %11560 = vmatpush.bf16.msra.mxu3 %v17654_v56  ;;  %v17671_v56 = vld [vmem:[#allocation15 + $0x1d8] sm:$0xf0] }
 0x968   :  { %v17674_v55 = vor.u32 %v19253_v10, %v17671_v56 }
 0x969   :  { %11590 = vmatpush.bf16.msrb.mxu1 %v17514_v7  ;;  %v10857_v30 = vpop.f32.mrf.mxu3  ;;  %v17566_v7 = vor.u32 %v19228_v20, %v17565_v3  ;;  %v21088_v33 = vpop.f32.mrf.mxu1 }
 0x96a   :  { %v10858_v40 = vadd.f32 %v10857_v30, %v10844_v21  ;;  %v19237_v21 = vld [vmem:[#allocation15 + $0x154] sm:$0xf]  ;;  %v17607_v30 = vld [vmem:[#allocation15 + $0x158] sm:$0xf0] }
 0x96b   :  { %11561 = vmatpush.bf16.msra.mxu3 %v17646_v54  ;;  %11549 = vmatpush.bf16.msra.mxu2 %v17566_v7  ;;  %v17610_v59 = vor.u32 %v19237_v21, %v17607_v30  ;;  %v10873_v57 = vpop.f32.mrf.mxu0  ;;  %v17594_v54 = vor.u32 %v19233_v45, %v17591_v63  ;;  %v19227_v7 = vld [vmem:[#allocation15 + $0x104] sm:$0xf]  ;;  %v19282_v45 = vld [vmem:[%s21197_s14 + $0x38] sm:$0xff] }
 0x96c   :  { %v11087_v61 = vmax.f32 %v10858_v40, 0.0  ;;  %v17599_v40 = vld [vmem:[#allocation15 + $0x148] sm:$0xf0]  ;;  %v10955_v25 = vpop.f32.mrf.mxu2  ;;  %v17570_v6 = vor.u32 %v19227_v7, %v17567_v23 }
 0x96d   :  { %11591 = vmatpush.bf16.msrb.mxu1 %v17506_v52  ;;  %v19255_v52 = vld [vmem:[#allocation15 + $0x1e4] sm:$0xf]  ;;  %v17602_v29 = vor.u32 %v19235_v44, %v17599_v40 }
 0x96e   :  { %v11098_v16 = vpack.c.bf16 %v11087_v61, %v11086_v51  ;;  %v17682_v60 = vor.u32 %v19255_v52, %v17679_v22  ;;  %v19231_v61 = vld [vmem:[#allocation15 + $0x124] sm:$0xf] }
 0x96f   :  { %11562 = vmatpush.bf16.msra.mxu3 %v17638_v1  ;;  %11598 = vmatpush.bf16.msrb.mxu2 %v17626_v31  ;;  %v17586_v12 = vor.u32 %v19231_v61, %v17583_v34  ;;  %v19245_v1 = vld [vmem:[#allocation15 + $0x194] sm:$0xf]  ;;  %v19278_v61 = vld [vmem:[%s21197_s14 + $0x18] sm:$0xff] }
 0x970   :  { %v11178_v46 = vunpack.c.l.b16 %v11098_v16  ;;  %v11179_v27 = vunpack.c.h.b16 %v11098_v16  ;;  %v17639_v16 = vld [vmem:[#allocation15 + $0x198] sm:$0xf0] }
 0x971   :  { %v10859_v42 = vpop.f32.mrf.mxu3  ;;  %v10887_v17 = vpop.f32.mrf.mxu1  ;;  %v17642_v20 = vor.u32 %v19245_v1, %v17639_v16 }
 0x972   :  { %v10860_v41 = vadd.f32 %v10859_v42, %v10846_v8  ;;  %v17647_v8 = vld [vmem:[#allocation15 + $0x1a8] sm:$0xf0]  ;;  %v19229_v42 = vld [vmem:[#allocation15 + $0x114] sm:$0xf] }
 0x973   :  { %11563 = vmatpush.bf16.msra.mxu3 %v17630_v19  ;;  %11599 = vmatpush.bf16.msrb.mxu2 %v17618_v43  ;;  %v17650_v51 = vor.u32 %v19247_v15, %v17647_v8  ;;  %v10927_v35 = vpop.f32.mrf.mxu0  ;;  %v19277_v15 = vld [vmem:[%s21197_s14 + $0x10] sm:$0xff] }
 0x974   :  { %v11093_v0 = vmax.f32 %v10860_v41, 0.0  ;;  %v17575_v41 = vld [vmem:[#allocation15 + $0x118] sm:$0xf0] }
 0x975   :  { %v17578_v3 = vor.u32 %v19229_v42, %v17575_v41  ;;  %v19275_v41 = vld [vmem:[%s21197_s14] sm:$0xff] }
 0x976   :  { %v11101_v13 = vpack.c.bf16 %v11093_v0, %v11092_v62 }
 0x977   :  { %11612 = vmatpush.bf16.msrb.mxu3 %v17690_v48  ;;  %11600 = vmatpush.bf16.msrb.mxu2 %v17610_v59 }
 0x978   :  { %v11182_v39 = vunpack.c.l.b16 %v11101_v13  ;;  %v11183_v32 = vunpack.c.h.b16 %v11101_v13  ;;  %v9781_v13 = vperm.slane %v21072_v9, 3 }
 0x979   :  { %v21092_v47 = vpop.f32.mrf.mxu3  ;;  %v10941_v62 = vpop.f32.mrf.mxu1 }
 0x97a   :  { %v11186_v38 = vpack.c.b16 %v11182_v39, %v11178_v46  ;;  %v11187_v58 = vpack.c.b16 %v11183_v32, %v11179_v27  ;;  %v9780_v46 = vperm.slane %v21072_v9, 2  ;;  %v10928_v27 = vadd.f32 %v10927_v35, %v9781_v13  ;;  %v17631_v39 = vld [vmem:[#allocation15 + $0x188] sm:$0xf0] }
 0x97b   :  { %11613 = vmatpush.bf16.msrb.mxu3 %v17682_v60  ;;  %11601 = vmatpush.bf16.msrb.mxu2 %v17602_v29  ;;  %v17634_v31 = vor.u32 %v19243_v24, %v17631_v39  ;;  %v10929_v36 = vpop.f32.mrf.mxu0  ;;  %v10957_v60 = vpop.f32.mrf.mxu2 }
 0x97c   :  { %11522 = vmatmul.bf16.vlgmr.msra.gmra.mxu0 %v11186_v38  ;;  %11536 = vmatmul.bf16.vlgmr.msra.gmra.mxu1 %v11187_v58  ;;  %v10872_v32 = vadd.f32 %v21086_v53, %v9780_v46  ;;  %v10942_v19 = vadd.f32 %v10941_v62, %v10928_v27  ;;  %v10874_v48 = vadd.f32 %v10873_v57, %v9780_v46 }
 0x97d   :  { %v10930_v50 = vadd.f32 %v10929_v36, %v9781_v13 }
 0x97e   :  { %v10888_v52 = vadd.f32 %v10887_v17, %v10874_v48 }
 0x97f   :  { %11614 = vmatpush.bf16.msrb.mxu3 %v17674_v55  ;;  %11602 = vmatpush.bf16.msrb.mxu2 %v17594_v54  ;;  %v19279_v54 = vld [vmem:[%s21197_s14 + $0x20] sm:$0xff] }
 0x980   :  { %v10902_v30 = vadd.f32 %v10901_v14, %v10888_v52  ;;  %v19280_v14 = vld [vmem:[%s21197_s14 + $0x28] sm:$0xff] }
 0x981   :  { %v10915_v0 = vpop.f32.mrf.mxu3  ;;  %v10943_v4 = vpop.f32.mrf.mxu1 }
 0x982   :  { %v10944_v21 = vadd.f32 %v10943_v4, %v10930_v50  ;;  %v10916_v59 = vadd.f32 %v10915_v0, %v10902_v30  ;;  %v9783_v0 = vperm.slane %v21072_v9, 5 }
 0x983   :  { %11615 = vmatpush.bf16.msrb.mxu3 %v17666_v26  ;;  %11603 = vmatpush.bf16.msrb.mxu2 %v17586_v12  ;;  %v10983_v11 = vpop.f32.mrf.mxu0  ;;  %v11011_v34 = vpop.f32.mrf.mxu2 }
 0x984   :  { %v10958_v10 = vadd.f32 %v10957_v60, %v10944_v21  ;;  %v11094_v40 = vmax.f32 %v10916_v59, 0.0 }
 0x987   :  { %11616 = vmatpush.bf16.msrb.mxu3 %v17658_v5  ;;  %11604 = vmatpush.bf16.msrb.mxu2 %v17578_v3  ;;  %v9782_v3 = vperm.slane %v21072_v9, 4 }
 0x989   :  { %v10997_v5 = vpop.f32.mrf.mxu1 }
 0x98b   :  { %11617 = vmatpush.bf16.msrb.mxu3 %v17650_v51  ;;  %11605 = vmatpush.bf16.msrb.mxu2 %v17570_v6  ;;  %v10985_v8 = vpop.f32.mrf.mxu0  ;;  %v19276_v51 = vld [vmem:[%s21197_s14 + $0x8] sm:$0xff]  ;;  %v11013_v35 = vpop.f32.mrf.mxu2 }
 0x98c   :  { %11578 = vmatmul.bf16.vlgmr.msrb.gmra.mxu0 %v11186_v38  ;;  %11592 = vmatmul.bf16.vlgmr.msrb.gmra.mxu1 %v11187_v58  ;;  %v10886_v38 = vadd.f32 %v21088_v33, %v10872_v32  ;;  %v10956_v58 = vadd.f32 %v10955_v25, %v10942_v19  ;;  %v10984_v25 = vadd.f32 %v10983_v11, %v9782_v3  ;;  %v19271_v11 = vld [vmem:[#allocation18 + $0x60] sm:$0xff] }
 0x98d   :  { %v10986_v23 = vadd.f32 %v10985_v8, %v9782_v3  ;;  %v19269_v8 = vld [vmem:[#allocation18 + $0x50] sm:$0xff] }
 0x98e   :  { %v10900_v43 = vadd.f32 %v21090_v18, %v10886_v38  ;;  %v10998_v24 = vadd.f32 %v10997_v5, %v10984_v25  ;;  %v19287_v5 = vld [vmem:[%s21197_s14 + $0x60] sm:$0xff] }
 0x98f   :  { %11618 = vmatpush.bf16.msrb.mxu3 %v17642_v20 }
 0x990   :  { %v10914_v53 = vadd.f32 %v21092_v47, %v10900_v43 }
 0x991   :  { %v10999_v42 = vpop.f32.mrf.mxu1 }
 0x992   :  { %v11088_v44 = vmax.f32 %v10914_v53, 0.0  ;;  %v11000_v19 = vadd.f32 %v10999_v42, %v10986_v23 }
 0x993   :  { %11619 = vmatpush.bf16.msrb.mxu3 %v17634_v31  ;;  %v11039_v1 = vpop.f32.mrf.mxu0  ;;  %v11012_v31 = vadd.f32 %v11011_v34, %v10998_v24  ;;  %v19286_v34 = vld [vmem:[%s21197_s14 + $0x58] sm:$0xff] }
 0x994   :  { %v11040_v20 = vadd.f32 %v11039_v1, %v9783_v0  ;;  %v11014_v38 = vadd.f32 %v11013_v35, %v11000_v19  ;;  %v19268_v35 = vld [vmem:[#allocation18 + $0x48] sm:$0xff] }
 0x999   :  { %v10969_v37 = vpop.f32.mrf.mxu3  ;;  %v11053_v16 = vpop.f32.mrf.mxu1 }
 0x99a   :  { %v10970_v22 = vadd.f32 %v10969_v37, %v10956_v58  ;;  %v11054_v46 = vadd.f32 %v11053_v16, %v11040_v20 }
 0x99b   :  { %v11041_v27 = vpop.f32.mrf.mxu0 }
 0x99c   :  { %v11089_v56 = vmax.f32 %v10970_v22, 0.0  ;;  %v11042_v32 = vadd.f32 %v11041_v27, %v9783_v0  ;;  %v19283_v0 = vld [vmem:[%s21197_s14 + $0x40] sm:$0xff] }
 0x99e   :  { %v11099_v2 = vpack.c.bf16 %v11089_v56, %v11088_v44 }
 0x9a0   :  { %v11180_v49 = vunpack.c.l.b16 %v11099_v2  ;;  %v11181_v26 = vunpack.c.h.b16 %v11099_v2  ;;  %v19265_v2 = vld [vmem:[#allocation18 + $0x30] sm:$0xff] }
 0x9a1   :  { %v10971_v55 = vpop.f32.mrf.mxu3  ;;  %v11055_v39 = vpop.f32.mrf.mxu1 }
 0x9a2   :  { %v10972_v33 = vadd.f32 %v10971_v55, %v10958_v10  ;;  %v11056_v48 = vadd.f32 %v11055_v39, %v11042_v32 }
 0x9a3   :  { %v11067_v13 = vpop.f32.mrf.mxu2 }
 0x9a4   :  { %v11095_v57 = vmax.f32 %v10972_v33, 0.0  ;;  %v11068_v6 = vadd.f32 %v11067_v13, %v11054_v46 }
 0x9a6   :  { %v11102_v29 = vpack.c.bf16 %v11095_v57, %v11094_v40  ;;  %v19266_v40 = vld [vmem:[#allocation18 + $0x38] sm:$0xff]  ;;  %v19264_v57 = vld [vmem:[#allocation18 + $0x28] sm:$0xff] }
 0x9a7   :  { %11764 = vmatpush.bf16.msra.mxu0 %v19266_v40 }
 0x9a8   :  { %v11184_v17 = vunpack.c.l.b16 %v11102_v29  ;;  %v11185_v18 = vunpack.c.h.b16 %v11102_v29  ;;  %v19263_v29 = vld [vmem:[#allocation18 + $0x20] sm:$0xff] }
 0x9aa   :  { %v11188_v63 = vpack.c.b16 %v11184_v17, %v11180_v49  ;;  %v11189_v47 = vpack.c.b16 %v11185_v18, %v11181_v26  ;;  %v19262_v49 = vld [vmem:[#allocation18 + $0x18] sm:$0xff]  ;;  %v19261_v26 = vld [vmem:[#allocation18 + $0x10] sm:$0xff]  ;;  %v19260_v17 = vld [vmem:[#allocation18 + $0x8] sm:$0xff] }
 0x9ab   :  { %v11069_v37 = vpop.f32.mrf.mxu2  ;;  %11765 = vmatpush.bf16.msra.mxu0 %v19265_v2  ;;  %v19259_v18 = vld [vmem:[#allocation18] sm:$0xff] }
 0x9ac   :  { %11550 = vmatmul.bf16.vlgmr.msra.gmra.mxu2 %v11188_v63  ;;  %11564 = vmatmul.bf16.vlgmr.msra.gmra.mxu3 %v11189_v47  ;;  %v11070_v4 = vadd.f32 %v11069_v37, %v11056_v48 }
 0x9ad   :  { %12011 = vmatpush.bf16.msra.mxu3 %v19282_v45  ;;  %v19274_v45 = vld [vmem:[#allocation18 + $0x78] sm:$0xff] }
 0x9ae   :  { %11778 = vmatpush.bf16.msra.mxu1 %v19274_v45  ;;  %v19291_v45 = vld [vmem:[%s21196_s13] sm:$0xff] }
 0x9af   :  { %11766 = vmatpush.bf16.msra.mxu0 %v19264_v57  ;;  %v19298_v57 = vld [vmem:[%s21196_s13 + $0x38] sm:$0xff] }
 0x9b0   :  { %11891 = vmatpush.bf16.msra.mxu2 %v19298_v57 }
 0x9b1   :  { %12012 = vmatpush.bf16.msra.mxu3 %v19281_v28  ;;  %v19289_v28 = vld [vmem:[%s21197_s14 + $0x70] sm:$0xff] }
 0x9b3   :  { %11767 = vmatpush.bf16.msra.mxu0 %v19263_v29  ;;  %v19297_v29 = vld [vmem:[%s21196_s13 + $0x30] sm:$0xff] }
 0x9b4   :  { %11892 = vmatpush.bf16.msra.mxu2 %v19297_v29 }
 0x9b5   :  { %12013 = vmatpush.bf16.msra.mxu3 %v19280_v14  ;;  %v19272_v14 = vld [vmem:[#allocation18 + $0x68] sm:$0xff] }
 0x9b7   :  { %11768 = vmatpush.bf16.msra.mxu0 %v19262_v49  ;;  %v19296_v49 = vld [vmem:[%s21196_s13 + $0x28] sm:$0xff] }
 0x9b8   :  { %11893 = vmatpush.bf16.msra.mxu2 %v19296_v49 }
 0x9b9   :  { %12014 = vmatpush.bf16.msra.mxu3 %v19279_v54  ;;  %v11025_v12 = vpop.f32.mrf.mxu3  ;;  %v19288_v54 = vld [vmem:[%s21197_s14 + $0x68] sm:$0xff] }
 0x9ba   :  { %v11026_v58 = vadd.f32 %v11025_v12, %v11012_v31  ;;  %v19285_v12 = vld [vmem:[%s21197_s14 + $0x50] sm:$0xff] }
 0x9bb   :  { %11769 = vmatpush.bf16.msra.mxu0 %v19261_v26  ;;  %v19295_v26 = vld [vmem:[%s21196_s13 + $0x20] sm:$0xff] }
 0x9bc   :  { %11606 = vmatmul.bf16.vlgmr.msrb.gmra.mxu2 %v11188_v63  ;;  %11620 = vmatmul.bf16.vlgmr.msrb.gmra.mxu3 %v11189_v47  ;;  %v11090_v43 = vmax.f32 %v11026_v58, 0.0  ;;  %v19290_v63 = vld [vmem:[%s21197_s14 + $0x78] sm:$0xff]  ;;  %v19273_v47 = vld [vmem:[#allocation18 + $0x70] sm:$0xff] }
 0x9bd   :  { %12015 = vmatpush.bf16.msra.mxu3 %v19278_v61  ;;  %11779 = vmatpush.bf16.msra.mxu1 %v19273_v47  ;;  %v19270_v61 = vld [vmem:[#allocation18 + $0x58] sm:$0xff] }
 0x9be   :  { %11894 = vmatpush.bf16.msra.mxu2 %v19295_v26 }
 0x9bf   :  { %11770 = vmatpush.bf16.msra.mxu0 %v19260_v17  ;;  %v19293_v17 = vld [vmem:[%s21196_s13 + $0x10] sm:$0xff] }
 0x9c1   :  { %12016 = vmatpush.bf16.msra.mxu3 %v19277_v15  ;;  %v11027_v62 = vpop.f32.mrf.mxu3  ;;  %11780 = vmatpush.bf16.msra.mxu1 %v19272_v14 }
 0x9c2   :  { %v11028_v50 = vadd.f32 %v11027_v62, %v11014_v38  ;;  %v19267_v62 = vld [vmem:[#allocation18 + $0x40] sm:$0xff] }
 0x9c3   :  { %11771 = vmatpush.bf16.msra.mxu0 %v19259_v18  ;;  %v19292_v18 = vld [vmem:[%s21196_s13 + $0x8] sm:$0xff] }
 0x9c4   :  { %v11096_v60 = vmax.f32 %v11028_v50, 0.0 }
 0x9c5   :  { %12017 = vmatpush.bf16.msra.mxu3 %v19276_v51  ;;  %11781 = vmatpush.bf16.msra.mxu1 %v19271_v11  ;;  %v11168_v51 = vld [vmem:[#allocation16] sm:$0x3] }
 0x9c6   :  { %v11170_v1 = vperm.slane %v11168_v51, 0  ;;  %v11171_v31 = vperm.slane %v11168_v51, 1 }
 0x9c7   :  { %12025 = vmatpush.bf16.msrb.mxu0 %v19290_v63 }
 0x9c9   :  { %12018 = vmatpush.bf16.msra.mxu3 %v19275_v41  ;;  %11782 = vmatpush.bf16.msra.mxu1 %v19270_v61  ;;  %v19284_v41 = vld [vmem:[%s21197_s14 + $0x48] sm:$0xff] }
 0x9cb   :  { %12026 = vmatpush.bf16.msrb.mxu0 %v19289_v28  ;;  %v19323_v28 = vld [vmem:[#allocation19] ss:$0 sm:$0xff] }
 0x9cd   :  { %11783 = vmatpush.bf16.msra.mxu1 %v19269_v8 }
 0x9cf   :  { %12027 = vmatpush.bf16.msrb.mxu0 %v19288_v54 }
 0x9d1   :  { %11784 = vmatpush.bf16.msra.mxu1 %v19268_v35 }
 0x9d3   :  { %12028 = vmatpush.bf16.msrb.mxu0 %v19287_v5 }
 0x9d5   :  { %11785 = vmatpush.bf16.msra.mxu1 %v19267_v62 }
 0x9d7   :  { %12029 = vmatpush.bf16.msrb.mxu0 %v19286_v34 }
 0x9d9   :  { %v11081_v7 = vpop.f32.mrf.mxu3 }
 0x9da   :  { %v11082_v36 = vadd.f32 %v11081_v7, %v11068_v6 }
 0x9db   :  { %12030 = vmatpush.bf16.msrb.mxu0 %v19285_v12 }
 0x9dc   :  { %v11091_v9 = vmax.f32 %v11082_v36, 0.0 }
 0x9de   :  { %v11100_v21 = vpack.c.bf16 %v11091_v9, %v11090_v43 }
 0x9df   :  { %12031 = vmatpush.bf16.msrb.mxu0 %v19284_v41 }
 0x9e0   :  { %v11907_v10 = vunpack.c.l.b16 %v11100_v21  ;;  %v11908_v59 = vunpack.c.h.b16 %v11100_v21 }
 0x9e1   :  { %v11083_v52 = vpop.f32.mrf.mxu3 }
 0x9e2   :  { %v11084_v22 = vadd.f32 %v11083_v52, %v11070_v4 }
 0x9e3   :  { %12032 = vmatpush.bf16.msrb.mxu0 %v19283_v0 }
 0x9e4   :  { %v11097_v30 = vmax.f32 %v11084_v22, 0.0 }
 0x9e6   :  { %v11103_v53 = vpack.c.bf16 %v11097_v30, %v11096_v60 }
 0x9e8   :  { %v11909_v56 = vunpack.c.l.b16 %v11103_v53  ;;  %v11910_v55 = vunpack.c.h.b16 %v11103_v53 }
 0x9ea   :  { %v11911_v44 = vpack.c.b16 %v11909_v56, %v11907_v10  ;;  %v21126_v33 = vpack.c.b16 %v11910_v55, %v11908_v59 }
 0x9ec   :  { %12019 = vmatmul.bf16.vlgmr.msra.gmra.mxu3 %v11911_v44 }
 0x9f9   :  { %v11523_v15 = vpop.f32.mrf.mxu0  ;;  %v11537_v42 = vpop.f32.mrf.mxu1 }
 0x9fa   :  { %v11524_v13 = vadd.f32 %v11523_v15, %v11170_v1 }
 0x9fc   :  { %v11538_v46 = vadd.f32 %v11537_v42, %v11524_v13 }
 0xa01   :  { %v11525_v16 = vpop.f32.mrf.mxu0  ;;  %v11539_v25 = vpop.f32.mrf.mxu1 }
 0xa02   :  { %v11526_v27 = vadd.f32 %v11525_v16, %v11170_v1  ;;  %v19324_v1 = vld [vmem:[#allocation21] ss:$0 sm:$0xff] }
 0xa04   :  { %v11540_v24 = vadd.f32 %v11539_v25, %v11526_v27 }
 0xa09   :  { %v11579_v7 = vpop.f32.mrf.mxu0  ;;  %v11593_v37 = vpop.f32.mrf.mxu1 }
 0xa0a   :  { %v11580_v58 = vadd.f32 %v11579_v7, %v11171_v31 }
 0xa0c   :  { %v11594_v43 = vadd.f32 %v11593_v37, %v11580_v58 }
 0xa11   :  { %v11581_v4 = vpop.f32.mrf.mxu0  ;;  %v11595_v21 = vpop.f32.mrf.mxu1 }
 0xa12   :  { %v11582_v22 = vadd.f32 %v11581_v4, %v11171_v31 }
 0xa14   :  { %v11596_v30 = vadd.f32 %v11595_v21, %v11582_v22 }
 0xa2f   :  { %v11551_v3 = vpop.f32.mrf.mxu2  ;;  %v11565_v20 = vpop.f32.mrf.mxu3 }
 0xa30   :  { %v11552_v23 = vadd.f32 %v11551_v3, %v11538_v46 }
 0xa32   :  { %v11566_v32 = vadd.f32 %v11565_v20, %v11552_v23 }
 0xa34   :  { %v11626_v48 = vmax.f32 %v11566_v32, 0.0 }
 0xa37   :  { %v11553_v6 = vpop.f32.mrf.mxu2  ;;  %v11567_v39 = vpop.f32.mrf.mxu3 }
 0xa38   :  { %v11554_v19 = vadd.f32 %v11553_v6, %v11540_v24 }
 0xa3a   :  { %v11568_v36 = vadd.f32 %v11567_v39, %v11554_v19 }
 0xa3c   :  { %v11628_v38 = vmax.f32 %v11568_v36, 0.0 }
 0xa3e   :  { %v11630_v50 = vpack.c.bf16 %v11628_v38, %v11626_v48 }
 0xa3f   :  { %v11607_v9 = vpop.f32.mrf.mxu2  ;;  %v11621_v52 = vpop.f32.mrf.mxu3 }
 0xa40   :  { %11772 = vmatmul.bf16.vlgmr.msra.gmra.mxu0 %v11630_v50  ;;  %v11608_v60 = vadd.f32 %v11607_v9, %v11594_v43 }
 0xa42   :  { %v11622_v10 = vadd.f32 %v11621_v52, %v11608_v60 }
 0xa44   :  { %v11627_v44 = vmax.f32 %v11622_v10, 0.0 }
 0xa47   :  { %v11609_v53 = vpop.f32.mrf.mxu2  ;;  %v11623_v56 = vpop.f32.mrf.mxu3 }
 0xa48   :  { %v11610_v59 = vadd.f32 %v11609_v53, %v11596_v30 }
 0xa4a   :  { %v11624_v55 = vadd.f32 %v11623_v56, %v11610_v59 }
 0xa4c   :  { %v11629_v40 = vmax.f32 %v11624_v55, 0.0 }
 0xa4e   :  { %v11631_v2 = vpack.c.bf16 %v11629_v40, %v11627_v44 }
 0xa50   :  { %11786 = vmatmul.bf16.vlgmr.msra.gmra.mxu1 %v11631_v2  ;;  %12033 = vmatmul.bf16.vlgmr.msrb.gmra.mxu0 %v21126_v33  ;;  %v19294_v33 = vld [vmem:[%s21196_s13 + $0x18] sm:$0xff] }
 0xa51   :  { %11895 = vmatpush.bf16.msra.mxu2 %v19294_v33 }
 0xa55   :  { %11896 = vmatpush.bf16.msra.mxu2 %v19293_v17 }
 0xa59   :  { %11897 = vmatpush.bf16.msra.mxu2 %v19292_v18 }
 0xa5d   :  { %11898 = vmatpush.bf16.msra.mxu2 %v19291_v45 }
 0xa6f   :  { %v12020_v51 = vpop.f32.mrf.mxu3 }
 0xa77   :  { %v12022_v0 = vpop.f32.mrf.mxu3 }
 0xabd   :  { %v11773_v63 = vpop.f32.mrf.mxu0 }
 0xabe   :  { %v11774_v54 = vadd.f32 %v19323_v28, %v11773_v63 }
 0xac5   :  { %v11775_v14 = vpop.f32.mrf.mxu0 }
 0xac6   :  { %v11776_v11 = vadd.f32 %v19323_v28, %v11775_v14 }
 0xacd   :  { %v11787_v47 = vpop.f32.mrf.mxu1  ;;  %v12034_v42 = vpop.f32.mrf.mxu0 }
 0xace   :  { %v11788_v5 = vadd.f32 %v11787_v47, %v11774_v54 }
 0xad0   :  { %v11792_v15 = vmax.f32 %v11788_v5, 0.0 }
 0xad5   :  { %v11789_v61 = vpop.f32.mrf.mxu1  ;;  %v12036_v20 = vpop.f32.mrf.mxu0 }
 0xad6   :  { %v11790_v34 = vadd.f32 %v11789_v61, %v11776_v11 }
 0xad8   :  { %v11793_v8 = vmax.f32 %v11790_v34, 0.0 }
 0xada   :  { %v11794_v12 = vpack.c.bf16 %v11793_v8, %v11792_v15 }
 0xadc   :  { %11899 = vmatmul.bf16.vlgmr.msra.gmra.mxu2 %v11794_v12 }
 0xb5f   :  { %v11900_v35 = vpop.f32.mrf.mxu2 }
 0xb60   :  { %v12021_v41 = vadd.f32 %v12020_v51, %v11900_v35 }
 0xb62   :  { %v12035_v16 = vadd.f32 %v12034_v42, %v12021_v41 }
 0xb64   :  { %v12043_v62 = vadd.f32 %v19324_v1, %v12035_v16 }
 0xb66   :  { %12046 = vst.msk [vmem:[%s21199_s16] sm:$0xff] %vm12045_vm7, %v12043_v62 }
 0xb67   :  { %v11902_v13 = vpop.f32.mrf.mxu2 }
 0xb68   :  { %v12023_v3 = vadd.f32 %v12022_v0, %v11902_v13 }
 0xb6a   :  { %v12037_v25 = vadd.f32 %v12036_v20, %v12023_v3 }
 0xb6c   :  { %v12044_v46 = vadd.f32 %v19324_v1, %v12037_v25 }
 0xb6e   :  { %12047 = vst.msk [vmem:[%s21199_s16 + $0x8] sm:$0xff] %vm12045_vm7, %v12044_v46 }
 0xb6f   :  { %12052 = vsyncpa [#allocation3], 1 }
 0xb70   :  { %12053 = vsyncpa [#allocation5], 1 }
 0xb71   :  { %12054 = vsyncpa [#allocation8], 1 }
 0xb72   :  { %12055 = vsyncpa [#allocation11], 1 }
 0xb73   :  { %12056 = vsyncpa [#allocation14], 1 }
 0xb74   :  { %12057 = vsyncpa [#allocation17], 1 }
 0xb75   :  { %12058 = vsyncpa [#allocation20], 1 }

</bundles_post_ra>
